<compile_context>
chip_gen: v7x
topology: tpu7x:2x2x1
jax: 0.10.0
libtpu: 0.0.40
codegen_flags: <defaults>
</compile_context>

<pallas_src>
import math
from functools import partial

import jax
import jax.numpy as jnp
from jax import lax
from jax.experimental import pallas as pl
from jax.experimental.pallas import tpu as pltpu


def _dwconv3d_gelu_kernel(x_hbm, w_ref, b_ref, o_ref, xin_ref, xs_ref, dma_sem,
                          *, K, D, H, W, Ct, Qp):
    # x_hbm  : (B, Cg, D, H, L)   full input in HBM (memory_space=pl.ANY)
    # w_ref  : (1, K*K*K, L)      per-tap depthwise weights, W-tiled, f32
    # b_ref  : (1, 1, L)          bias, W-tiled, f32
    # o_ref  : (1, 1, D, H, L)    output block for (batch b, channel tile cg)
    # xin_ref: (D, H, L)          staging buffer for the manual HBM -> VMEM DMA
    # xs_ref : (Dp, Hp, Lp)       zero-padded slab; data interior at lane offset Qp
    # dma_sem: (1,)               DMA completion semaphore
    P = (K - 1) // 2
    L = W * Ct
    b = pl.program_id(0)
    cg = pl.program_id(1)

    # 1) Kick off the DMA of the unpadded (D, H, L) slab for this (b, cg) block.
    cp = pltpu.make_async_copy(x_hbm.at[b, cg], xin_ref, dma_sem.at[0])
    cp.start()

    # 2) Zero the padded slab while the DMA is in flight (different buffers -> no
    #    hazard).  Re-done every step so it stays correct under megacore grid
    #    splitting; the cost is ~1/K^3 of the MAC work and hides under the DMA.
    xs_ref[...] = jnp.zeros(xs_ref.shape, xs_ref.dtype)

    cp.wait()

    # 3) Fill the slab interior.  The lane window starts at Qp (multiple of 128),
    #    so these are aligned stores; one depth row at a time keeps peak VMEM
    #    temporaries bounded (no full-volume temporary).
    @pl.loop(0, D)
    def _fill(dd):
        xs_ref[P + dd, pl.ds(P, H), pl.ds(Qp, L)] = xin_ref[dd]

    base = Qp - P * Ct                   # lane offset of the kw = 0 tap window
    inv_sqrt2 = 1.0 / math.sqrt(2.0)

    # 4) Depth loop inside the kernel: a single (H, L) accumulator live at a time,
    #    all D slices produced per grid step (amortizes per-grid-step overhead).
    @pl.loop(0, D)
    def _depth(d):
        acc = jnp.zeros((H, L), jnp.float32)
        for kd in range(K):                          # K is small -> static unroll
            for kw in range(K):
                # One row-block load + one f32 cast per (kd, kw); the K kh taps
                # reuse it via value slices (sublane shifts), not VMEM reloads.
                rows = xs_ref[d + kd, :, pl.ds(base + kw * Ct, L)].astype(jnp.float32)
                for kh in range(K):
                    tap = (kd * K + kh) * K + kw
                    acc = acc + rows[kh:kh + H, :] * w_ref[0, tap]
        acc = acc + b_ref[0]                          # (1, L) broadcast over H
        # Exact (erf-based) GELU, matching torch.nn.GELU() default numerics.
        out = 0.5 * acc * (1.0 + lax.erf(acc * inv_sqrt2))
        o_ref[0, 0, d] = out.astype(o_ref.dtype)


def _channel_tile(C, max_tile=128):
    """Largest channel tile <= 128; prefers a full 128-lane tile when possible."""
    if C % max_tile == 0:
        return max_tile
    if C <= max_tile:
        return C
    for t in range(max_tile, 0, -1):
        if C % t == 0:
            return t
    return 1


@partial(jax.jit, static_argnames=("x_size", "kernel_size"))
def dwconv3d_forward(x, weight, bias, *, x_size, kernel_size=5):
    """Depthwise Conv3d(k, pad=(k-1)//2, groups=C) + GELU.

    x: (B, N, C) with N = D*H*W (row-major d, h, w); weight: (C, 1, K, K, K); bias: (C,).
    Returns (B, N, C), matching dwconv3d.forward in the PyTorch reference.
    """
    B, N, C = x.shape
    D, H, W = x_size
    K = kernel_size
    assert N == D * H * W
    assert K % 2 == 1
    P = (K - 1) // 2

    Ct = _channel_tile(C)                    # channel tile folded (with W) onto lanes
    Cg = C // Ct
    L = W * Ct                               # lane width of compute / output blocks
    # NOTE: best performance when L % 128 == 0 (unmasked output stores).

    Dp, Hp = D + 2 * P, H + 2 * P
    Qp = ((P * Ct + 127) // 128) * 128       # 128-aligned left pad -> aligned interior fill
    Lp = Qp + L + Qp                         # left pad | data | right pad (each >= P*Ct)

    # (B, N, C) -> (B, Cg, D, H, W*Ct).  For Cg == 1 (C <= 128) this is a pure reshape
    # (no HBM data movement); for Cg > 1 one relayout pass remains (see TODO above).
    x_f = (x.reshape(B, D, H, W, Cg, Ct)
            .transpose(0, 4, 1, 2, 3, 5)
            .reshape(B, Cg, D, H, L))

    # Weights (C, 1, K, K, K) -> (Cg, K^3, W*Ct) f32, tap index = (kd*K + kh)*K + kw.
    # Tiny tensor; W-tiling here keeps the in-kernel tap loop a pure VPU MAC.
    w_t = (weight[:, 0].astype(jnp.float32)
                 .reshape(Cg, Ct, K, K, K)
                 .transpose(0, 2, 3, 4, 1)           # (Cg, K, K, K, Ct)
                 .reshape(Cg, K * K * K, 1, Ct))
    w_f = jnp.broadcast_to(w_t, (Cg, K * K * K, W, Ct)).reshape(Cg, K * K * K, L)

    b_f = jnp.broadcast_to(bias.astype(jnp.float32).reshape(Cg, 1, 1, Ct),
                           (Cg, 1, W, Ct)).reshape(Cg, 1, L)

    # VMEM budget: padded slab + staging buffer + double-buffered weight/bias/output
    # blocks; 2x headroom, capped at v7x's 64 MiB physical VMEM.
    itm = x.dtype.itemsize
    vmem_need = (Dp * Hp * Lp * itm + D * H * L * itm
                 + 2 * (K ** 3) * L * 4 + 2 * L * 4
                 + 2 * D * H * L * itm)
    vmem_limit = int(min(64 * 2 ** 20, max(32 * 2 ** 20, 2 * vmem_need)))

    kernel = partial(_dwconv3d_gelu_kernel, K=K, D=D, H=H, W=W, Ct=Ct, Qp=Qp)
    out = pl.pallas_call(
        kernel,
        out_shape=jax.ShapeDtypeStruct((B, Cg, D, H, L), x.dtype),
        grid_spec=pltpu.PrefetchScalarGridSpec(
            num_scalar_prefetch=0,
            grid=(B, Cg),
            in_specs=[
                pl.BlockSpec(memory_space=pl.ANY),                       # x: raw HBM ref
                pl.BlockSpec((1, K * K * K, L), lambda b, cg: (cg, 0, 0)),
                pl.BlockSpec((1, 1, L), lambda b, cg: (cg, 0, 0)),
            ],
            out_specs=pl.BlockSpec((1, 1, D, H, L), lambda b, cg: (b, cg, 0, 0, 0)),
            scratch_shapes=[
                pltpu.VMEM((D, H, L), x.dtype),      # DMA staging buffer
                pltpu.VMEM((Dp, Hp, Lp), x.dtype),   # zero-padded slab (single copy)
                pltpu.SemaphoreType.DMA((1,)),
            ],
        ),
        compiler_params=pltpu.CompilerParams(
            # (b, cg) blocks are fully independent -> megacore sharding on v7x;
            # no-op on v5e/v6e (single TensorCore).
            dimension_semantics=("parallel", "parallel"),
            vmem_limit_bytes=vmem_limit,
        ),
    )(x_f, w_f, b_f)

    # (B, Cg, D, H, W*Ct) -> (B, N, C)  ==  PyTorch .flatten(2).transpose(1, 2).
    # Pure reshape for Cg == 1.
    return (out.reshape(B, Cg, D, H, W, Ct)
               .transpose(0, 2, 3, 4, 1, 5)
               .reshape(B, N, C))


@partial(jax.jit, static_argnames=("x_size", "K"))
def _reference_dwconv3d(x, weight, bias, *, x_size, K):
    # Pure-JAX reference of the PyTorch module (same math: f32 MACs, exact GELU).
    B, N, C = x.shape
    D, H, W = x_size
    P = (K - 1) // 2
    v = x.reshape(B, D, H, W, C).astype(jnp.float32)
    vp = jnp.pad(v, ((0, 0), (P, P), (P, P), (P, P), (0, 0)))
    acc = jnp.zeros((B, D, H, W, C), jnp.float32)
    for kd in range(K):
        for kh in range(K):
            for kw in range(K):
                acc = acc + (vp[:, kd:kd + D, kh:kh + H, kw:kw + W, :]
                             * weight[:, 0, kd, kh, kw].astype(jnp.float32))
    acc = acc + bias.astype(jnp.float32)
    out = 0.5 * acc * (1.0 + lax.erf(acc * (1.0 / math.sqrt(2.0))))
    return out.reshape(B, N, C).astype(x.dtype)


if __name__ == "__main__":
    # Small shapes consistent with the module: tokens arranged as a 3-D volume.
    B = 2
    C = 32                    # hidden_features
    D, H, W = 4, 8, 8
    N = D * H * W
    K = 5

    key = jax.random.PRNGKey(0)
    kx, kw_, kb = jax.random.split(key, 3)

    x = jax.random.normal(kx, (B, N, C), dtype=jnp.float32)

    # Deterministic PyTorch-style Conv3d init: U(-bound, bound), bound = 1/sqrt(fan_in),
    # fan_in = (in_channels / groups) * K^3 = K^3 for depthwise.
    bound = 1.0 / math.sqrt(K * K * K)
    weight = jax.random.uniform(kw_, (C, 1, K, K, K), jnp.float32, -bound, bound)
    bias = jax.random.uniform(kb, (C,), jnp.float32, -bound, bound)

    y = dwconv3d_forward(x, weight, bias, x_size=(D, H, W), kernel_size=K)
    y = jax.block_until_ready(y)
    assert y.shape == (B, N, C)

    y_ref = _reference_dwconv3d(x, weight, bias, x_size=(D, H, W), K=K)
    assert jnp.allclose(y, y_ref, atol=1e-3, rtol=1e-3), "mismatch vs reference"

    print("KERNEL_OK")
</pallas_src>

<mosaic_0001>
module attributes {stable_mosaic.version = 11 : i64} {
  func.func @_dwconv3d_gelu_kernel(%arg0: i32, %arg1: i32, %arg2: memref<2x1x4x8x256xf32, #tpu.memory_space<any>>, %arg3: memref<1x125x256xf32, #tpu.memory_space<vmem>>, %arg4: memref<1x1x256xf32, #tpu.memory_space<vmem>>, %arg5: memref<1x1x4x8x256xf32, #tpu.memory_space<vmem>>, %arg6: memref<4x8x256xf32, #tpu.memory_space<vmem>>, %arg7: memref<8x12x512xf32, #tpu.memory_space<vmem>>, %arg8: memref<1x!tpu.dma_semaphore, #tpu.memory_space<semaphore_mem>>) attributes {dimension_semantics = [#tpu.dimension_semantics<parallel>, #tpu.dimension_semantics<parallel>], iteration_bounds = array<i64: 2, 1>, scalar_prefetch = 0 : i64, scratch_operands = 3 : i64, tpu.core_type = #tpu.core_type<tc>, window_params = [{}, {transform_indices = @transform_1, window_bounds = array<i64: 1, 125, 256>}, {transform_indices = @transform_2, window_bounds = array<i64: 1, 1, 256>}, {transform_indices = @transform_3, window_bounds = array<i64: 1, 1, 4, 8, 256>}]} {
    %c0_i32 = arith.constant 0 : i32
    %c0_i32_0 = arith.constant 0 : i32
    %c0_i32_1 = arith.constant 0 : i32
    %c0_i32_2 = arith.constant 0 : i32
    %0 = tpu.memref_slice %arg2[%arg0, %arg1, %c0_i32_0, %c0_i32_1, %c0_i32_2] : memref<2x1x4x8x256xf32, #tpu.memory_space<any>> -> memref<1x1x4x8x256xf32, #tpu.memory_space<any>>
    %1 = tpu.memref_squeeze %0 : memref<1x1x4x8x256xf32, #tpu.memory_space<any>> -> memref<4x8x256xf32, #tpu.memory_space<any>>
    %2 = tpu.memref_slice %arg8[%c0_i32] : memref<1x!tpu.dma_semaphore, #tpu.memory_space<semaphore_mem>> -> memref<1x!tpu.dma_semaphore, #tpu.memory_space<semaphore_mem>>
    %3 = tpu.memref_squeeze %2 : memref<1x!tpu.dma_semaphore, #tpu.memory_space<semaphore_mem>> -> memref<!tpu.dma_semaphore, #tpu.memory_space<semaphore_mem>>
    tpu.enqueue_dma source(%1 : memref<4x8x256xf32, #tpu.memory_space<any>>) target(%arg6 : memref<4x8x256xf32, #tpu.memory_space<vmem>>) target_semaphore(%3 : memref<!tpu.dma_semaphore, #tpu.memory_space<semaphore_mem>>)
    %cst = arith.constant 0.000000e+00 : f32
    %4 = vector.broadcast %cst : f32 to vector<8x12x512xf32>
    %c0 = arith.constant 0 : index
    %c0_3 = arith.constant 0 : index
    %c0_4 = arith.constant 0 : index
    %5 = vector.load %arg7[%c0, %c0_3, %c0_4] : memref<8x12x512xf32, #tpu.memory_space<vmem>>, vector<8x12x512xf32>
    tpu.vector_store %arg7[%c0, %c0_3, %c0_4], %4 {strides = array<i32>} : memref<8x12x512xf32, #tpu.memory_space<vmem>>, vector<8x12x512xf32>,
    %c0_i32_5 = arith.constant 0 : i32
    %c0_i32_6 = arith.constant 0 : i32
    %c0_i32_7 = arith.constant 0 : i32
    %c0_i32_8 = arith.constant 0 : i32
    %6 = tpu.memref_slice %arg2[%arg0, %arg1, %c0_i32_6, %c0_i32_7, %c0_i32_8] : memref<2x1x4x8x256xf32, #tpu.memory_space<any>> -> memref<1x1x4x8x256xf32, #tpu.memory_space<any>>
    %7 = tpu.memref_squeeze %6 : memref<1x1x4x8x256xf32, #tpu.memory_space<any>> -> memref<4x8x256xf32, #tpu.memory_space<any>>
    %8 = tpu.memref_slice %arg8[%c0_i32_5] : memref<1x!tpu.dma_semaphore, #tpu.memory_space<semaphore_mem>> -> memref<1x!tpu.dma_semaphore, #tpu.memory_space<semaphore_mem>>
    %9 = tpu.memref_squeeze %8 : memref<1x!tpu.dma_semaphore, #tpu.memory_space<semaphore_mem>> -> memref<!tpu.dma_semaphore, #tpu.memory_space<semaphore_mem>>
    tpu.wait_dma2 semaphore(%9 : memref<!tpu.dma_semaphore, #tpu.memory_space<semaphore_mem>>) src(%7 : memref<4x8x256xf32, #tpu.memory_space<any>>) dst(%arg6 : memref<4x8x256xf32, #tpu.memory_space<vmem>>)
    %c0_i32_9 = arith.constant 0 : i32
    %c4_i32 = arith.constant 4 : i32
    %10 = arith.addi %c0_i32_9, %c4_i32 : i32
    %c1_i32 = arith.constant 1 : i32
    scf.for %arg9 = %c0_i32_9 to %10 step %c1_i32  : i32 {
      %c1_i32_15 = arith.constant 1 : i32
      %12 = arith.muli %arg9, %c1_i32_15 : i32
      %c0_i32_16 = arith.constant 0 : i32
      %13 = arith.addi %c0_i32_16, %12 : i32
      %14 = arith.index_cast %13 : i32 to index
      %c0_17 = arith.constant 0 : index
      %c0_18 = arith.constant 0 : index
      %15 = vector.load %arg6[%14, %c0_17, %c0_18] : memref<4x8x256xf32, #tpu.memory_space<vmem>>, vector<1x8x256xf32>
      %16 = vector.shape_cast %15 : vector<1x8x256xf32> to vector<8x256xf32>
      %c2_i32 = arith.constant 2 : i32
      %17 = arith.addi %c2_i32, %13 : i32
      %18 = arith.index_cast %17 : i32 to index
      %c2 = arith.constant 2 : index
      %c128 = arith.constant 128 : index
      %19 = vector.load %arg7[%18, %c2, %c128] : memref<8x12x512xf32, #tpu.memory_space<vmem>>, vector<1x8x256xf32>
      %20 = vector.shape_cast %19 : vector<1x8x256xf32> to vector<8x256xf32>
      %21 = vector.shape_cast %16 : vector<8x256xf32> to vector<1x8x256xf32>
      tpu.vector_store %arg7[%18, %c2, %c128], %21 {strides = array<i32>} : memref<8x12x512xf32, #tpu.memory_space<vmem>>, vector<1x8x256xf32>,
    }
    %c4_i32_10 = arith.constant 4 : i32
    %c0_i32_11 = arith.constant 0 : i32
    %c4_i32_12 = arith.constant 4 : i32
    %11 = arith.addi %c0_i32_11, %c4_i32_12 : i32
    %c1_i32_13 = arith.constant 1 : i32
    scf.for %arg9 = %c0_i32_11 to %11 step %c1_i32_13  : i32 {
      %c1_i32_15 = arith.constant 1 : i32
      %12 = arith.muli %arg9, %c1_i32_15 : i32
      %c0_i32_16 = arith.constant 0 : i32
      %13 = arith.addi %c0_i32_16, %12 : i32
      %cst_17 = arith.constant 0.000000e+00 : f32
      %14 = vector.broadcast %cst_17 : f32 to vector<8x256xf32>
      %c0_i32_18 = arith.constant 0 : i32
      %15 = arith.addi %13, %c0_i32_18 : i32
      %16 = arith.index_cast %15 : i32 to index
      %c0_19 = arith.constant 0 : index
      %c64 = arith.constant 64 : index
      %17 = vector.load %arg7[%16, %c0_19, %c64] : memref<8x12x512xf32, #tpu.memory_space<vmem>>, vector<1x12x256xf32>
      %18 = vector.shape_cast %17 : vector<1x12x256xf32> to vector<12x256xf32>
      %19 = vector.extract_strided_slice %18 {offsets = [0, 0], sizes = [8, 256], strides = [1, 1]} : vector<12x256xf32> to vector<8x256xf32>
      %c0_20 = arith.constant 0 : index
      %c0_21 = arith.constant 0 : index
      %c0_22 = arith.constant 0 : index
      %20 = vector.load %arg3[%c0_20, %c0_21, %c0_22] : memref<1x125x256xf32, #tpu.memory_space<vmem>>, vector<1x1x256xf32>
      %21 = vector.shape_cast %20 : vector<1x1x256xf32> to vector<256xf32>
      %22 = vector.shape_cast %21 : vector<256xf32> to vector<1x256xf32>
      %23 = vector.broadcast %22 : vector<1x256xf32> to vector<8x256xf32>
      %24 = arith.mulf %19, %23 : vector<8x256xf32>
      %25 = arith.addf %14, %24 : vector<8x256xf32>
      %26 = vector.extract_strided_slice %18 {offsets = [1, 0], sizes = [8, 256], strides = [1, 1]} : vector<12x256xf32> to vector<8x256xf32>
      %c0_23 = arith.constant 0 : index
      %c5 = arith.constant 5 : index
      %c0_24 = arith.constant 0 : index
      %27 = vector.load %arg3[%c0_23, %c5, %c0_24] : memref<1x125x256xf32, #tpu.memory_space<vmem>>, vector<1x1x256xf32>
      %28 = vector.shape_cast %27 : vector<1x1x256xf32> to vector<256xf32>
      %29 = vector.shape_cast %28 : vector<256xf32> to vector<1x256xf32>
      %30 = vector.broadcast %29 : vector<1x256xf32> to vector<8x256xf32>
      %31 = arith.mulf %26, %30 : vector<8x256xf32>
      %32 = arith.addf %25, %31 : vector<8x256xf32>
      %33 = vector.extract_strided_slice %18 {offsets = [2, 0], sizes = [8, 256], strides = [1, 1]} : vector<12x256xf32> to vector<8x256xf32>
      %c0_25 = arith.constant 0 : index
      %c10 = arith.constant 10 : index
      %c0_26 = arith.constant 0 : index
      %34 = vector.load %arg3[%c0_25, %c10, %c0_26] : memref<1x125x256xf32, #tpu.memory_space<vmem>>, vector<1x1x256xf32>
      %35 = vector.shape_cast %34 : vector<1x1x256xf32> to vector<256xf32>
      %36 = vector.shape_cast %35 : vector<256xf32> to vector<1x256xf32>
      %37 = vector.broadcast %36 : vector<1x256xf32> to vector<8x256xf32>
      %38 = arith.mulf %33, %37 : vector<8x256xf32>
      %39 = arith.addf %32, %38 : vector<8x256xf32>
      %40 = vector.extract_strided_slice %18 {offsets = [3, 0], sizes = [8, 256], strides = [1, 1]} : vector<12x256xf32> to vector<8x256xf32>
      %c0_27 = arith.constant 0 : index
      %c15 = arith.constant 15 : index
      %c0_28 = arith.constant 0 : index
      %41 = vector.load %arg3[%c0_27, %c15, %c0_28] : memref<1x125x256xf32, #tpu.memory_space<vmem>>, vector<1x1x256xf32>
      %42 = vector.shape_cast %41 : vector<1x1x256xf32> to vector<256xf32>
      %43 = vector.shape_cast %42 : vector<256xf32> to vector<1x256xf32>
      %44 = vector.broadcast %43 : vector<1x256xf32> to vector<8x256xf32>
      %45 = arith.mulf %40, %44 : vector<8x256xf32>
      %46 = arith.addf %39, %45 : vector<8x256xf32>
      %47 = vector.extract_strided_slice %18 {offsets = [4, 0], sizes = [8, 256], strides = [1, 1]} : vector<12x256xf32> to vector<8x256xf32>
      %c0_29 = arith.constant 0 : index
      %c20 = arith.constant 20 : index
      %c0_30 = arith.constant 0 : index
      %48 = vector.load %arg3[%c0_29, %c20, %c0_30] : memref<1x125x256xf32, #tpu.memory_space<vmem>>, vector<1x1x256xf32>
      %49 = vector.shape_cast %48 : vector<1x1x256xf32> to vector<256xf32>
      %50 = vector.shape_cast %49 : vector<256xf32> to vector<1x256xf32>
      %51 = vector.broadcast %50 : vector<1x256xf32> to vector<8x256xf32>
      %52 = arith.mulf %47, %51 : vector<8x256xf32>
      %53 = arith.addf %46, %52 : vector<8x256xf32>
      %c0_i32_31 = arith.constant 0 : i32
      %54 = arith.addi %13, %c0_i32_31 : i32
      %55 = arith.index_cast %54 : i32 to index
      %c0_32 = arith.constant 0 : index
      %c96 = arith.constant 96 : index
      %56 = vector.load %arg7[%55, %c0_32, %c96] : memref<8x12x512xf32, #tpu.memory_space<vmem>>, vector<1x12x256xf32>
      %57 = vector.shape_cast %56 : vector<1x12x256xf32> to vector<12x256xf32>
      %58 = vector.extract_strided_slice %57 {offsets = [0, 0], sizes = [8, 256], strides = [1, 1]} : vector<12x256xf32> to vector<8x256xf32>
      %c0_33 = arith.constant 0 : index
      %c1 = arith.constant 1 : index
      %c0_34 = arith.constant 0 : index
      %59 = vector.load %arg3[%c0_33, %c1, %c0_34] : memref<1x125x256xf32, #tpu.memory_space<vmem>>, vector<1x1x256xf32>
      %60 = vector.shape_cast %59 : vector<1x1x256xf32> to vector<256xf32>
      %61 = vector.shape_cast %60 : vector<256xf32> to vector<1x256xf32>
      %62 = vector.broadcast %61 : vector<1x256xf32> to vector<8x256xf32>
      %63 = arith.mulf %58, %62 : vector<8x256xf32>
      %64 = arith.addf %53, %63 : vector<8x256xf32>
      %65 = vector.extract_strided_slice %57 {offsets = [1, 0], sizes = [8, 256], strides = [1, 1]} : vector<12x256xf32> to vector<8x256xf32>
      %c0_35 = arith.constant 0 : index
      %c6 = arith.constant 6 : index
      %c0_36 = arith.constant 0 : index
      %66 = vector.load %arg3[%c0_35, %c6, %c0_36] : memref<1x125x256xf32, #tpu.memory_space<vmem>>, vector<1x1x256xf32>
      %67 = vector.shape_cast %66 : vector<1x1x256xf32> to vector<256xf32>
      %68 = vector.shape_cast %67 : vector<256xf32> to vector<1x256xf32>
      %69 = vector.broadcast %68 : vector<1x256xf32> to vector<8x256xf32>
      %70 = arith.mulf %65, %69 : vector<8x256xf32>
      %71 = arith.addf %64, %70 : vector<8x256xf32>
      %72 = vector.extract_strided_slice %57 {offsets = [2, 0], sizes = [8, 256], strides = [1, 1]} : vector<12x256xf32> to vector<8x256xf32>
      %c0_37 = arith.constant 0 : index
      %c11 = arith.constant 11 : index
      %c0_38 = arith.constant 0 : index
      %73 = vector.load %arg3[%c0_37, %c11, %c0_38] : memref<1x125x256xf32, #tpu.memory_space<vmem>>, vector<1x1x256xf32>
      %74 = vector.shape_cast %73 : vector<1x1x256xf32> to vector<256xf32>
      %75 = vector.shape_cast %74 : vector<256xf32> to vector<1x256xf32>
      %76 = vector.broadcast %75 : vector<1x256xf32> to vector<8x256xf32>
      %77 = arith.mulf %72, %76 : vector<8x256xf32>
      %78 = arith.addf %71, %77 : vector<8x256xf32>
      %79 = vector.extract_strided_slice %57 {offsets = [3, 0], sizes = [8, 256], strides = [1, 1]} : vector<12x256xf32> to vector<8x256xf32>
      %c0_39 = arith.constant 0 : index
      %c16 = arith.constant 16 : index
      %c0_40 = arith.constant 0 : index
      %80 = vector.load %arg3[%c0_39, %c16, %c0_40] : memref<1x125x256xf32, #tpu.memory_space<vmem>>, vector<1x1x256xf32>
      %81 = vector.shape_cast %80 : vector<1x1x256xf32> to vector<256xf32>
      %82 = vector.shape_cast %81 : vector<256xf32> to vector<1x256xf32>
      %83 = vector.broadcast %82 : vector<1x256xf32> to vector<8x256xf32>
      %84 = arith.mulf %79, %83 : vector<8x256xf32>
      %85 = arith.addf %78, %84 : vector<8x256xf32>
      %86 = vector.extract_strided_slice %57 {offsets = [4, 0], sizes = [8, 256], strides = [1, 1]} : vector<12x256xf32> to vector<8x256xf32>
      %c0_41 = arith.constant 0 : index
      %c21 = arith.constant 21 : index
      %c0_42 = arith.constant 0 : index
      %87 = vector.load %arg3[%c0_41, %c21, %c0_42] : memref<1x125x256xf32, #tpu.memory_space<vmem>>, vector<1x1x256xf32>
      %88 = vector.shape_cast %87 : vector<1x1x256xf32> to vector<256xf32>
      %89 = vector.shape_cast %88 : vector<256xf32> to vector<1x256xf32>
      %90 = vector.broadcast %89 : vector<1x256xf32> to vector<8x256xf32>
      %91 = arith.mulf %86, %90 : vector<8x256xf32>
      %92 = arith.addf %85, %91 : vector<8x256xf32>
      %c0_i32_43 = arith.constant 0 : i32
      %93 = arith.addi %13, %c0_i32_43 : i32
      %94 = arith.index_cast %93 : i32 to index
      %c0_44 = arith.constant 0 : index
      %c128 = arith.constant 128 : index
      %95 = vector.load %arg7[%94, %c0_44, %c128] : memref<8x12x512xf32, #tpu.memory_space<vmem>>, vector<1x12x256xf32>
      %96 = vector.shape_cast %95 : vector<1x12x256xf32> to vector<12x256xf32>
      %97 = vector.extract_strided_slice %96 {offsets = [0, 0], sizes = [8, 256], strides = [1, 1]} : vector<12x256xf32> to vector<8x256xf32>
      %c0_45 = arith.constant 0 : index
      %c2 = arith.constant 2 : index
      %c0_46 = arith.constant 0 : index
      %98 = vector.load %arg3[%c0_45, %c2, %c0_46] : memref<1x125x256xf32, #tpu.memory_space<vmem>>, vector<1x1x256xf32>
      %99 = vector.shape_cast %98 : vector<1x1x256xf32> to vector<256xf32>
      %100 = vector.shape_cast %99 : vector<256xf32> to vector<1x256xf32>
      %101 = vector.broadcast %100 : vector<1x256xf32> to vector<8x256xf32>
      %102 = arith.mulf %97, %101 : vector<8x256xf32>
      %103 = arith.addf %92, %102 : vector<8x256xf32>
      %104 = vector.extract_strided_slice %96 {offsets = [1, 0], sizes = [8, 256], strides = [1, 1]} : vector<12x256xf32> to vector<8x256xf32>
      %c0_47 = arith.constant 0 : index
      %c7 = arith.constant 7 : index
      %c0_48 = arith.constant 0 : index
      %105 = vector.load %arg3[%c0_47, %c7, %c0_48] : memref<1x125x256xf32, #tpu.memory_space<vmem>>, vector<1x1x256xf32>
      %106 = vector.shape_cast %105 : vector<1x1x256xf32> to vector<256xf32>
      %107 = vector.shape_cast %106 : vector<256xf32> to vector<1x256xf32>
      %108 = vector.broadcast %107 : vector<1x256xf32> to vector<8x256xf32>
      %109 = arith.mulf %104, %108 : vector<8x256xf32>
      %110 = arith.addf %103, %109 : vector<8x256xf32>
      %111 = vector.extract_strided_slice %96 {offsets = [2, 0], sizes = [8, 256], strides = [1, 1]} : vector<12x256xf32> to vector<8x256xf32>
      %c0_49 = arith.constant 0 : index
      %c12 = arith.constant 12 : index
      %c0_50 = arith.constant 0 : index
      %112 = vector.load %arg3[%c0_49, %c12, %c0_50] : memref<1x125x256xf32, #tpu.memory_space<vmem>>, vector<1x1x256xf32>
      %113 = vector.shape_cast %112 : vector<1x1x256xf32> to vector<256xf32>
      %114 = vector.shape_cast %113 : vector<256xf32> to vector<1x256xf32>
      %115 = vector.broadcast %114 : vector<1x256xf32> to vector<8x256xf32>
      %116 = arith.mulf %111, %115 : vector<8x256xf32>
      %117 = arith.addf %110, %116 : vector<8x256xf32>
      %118 = vector.extract_strided_slice %96 {offsets = [3, 0], sizes = [8, 256], strides = [1, 1]} : vector<12x256xf32> to vector<8x256xf32>
      %c0_51 = arith.constant 0 : index
      %c17 = arith.constant 17 : index
      %c0_52 = arith.constant 0 : index
      %119 = vector.load %arg3[%c0_51, %c17, %c0_52] : memref<1x125x256xf32, #tpu.memory_space<vmem>>, vector<1x1x256xf32>
      %120 = vector.shape_cast %119 : vector<1x1x256xf32> to vector<256xf32>
      %121 = vector.shape_cast %120 : vector<256xf32> to vector<1x256xf32>
      %122 = vector.broadcast %121 : vector<1x256xf32> to vector<8x256xf32>
      %123 = arith.mulf %118, %122 : vector<8x256xf32>
      %124 = arith.addf %117, %123 : vector<8x256xf32>
      %125 = vector.extract_strided_slice %96 {offsets = [4, 0], sizes = [8, 256], strides = [1, 1]} : vector<12x256xf32> to vector<8x256xf32>
      %c0_53 = arith.constant 0 : index
      %c22 = arith.constant 22 : index
      %c0_54 = arith.constant 0 : index
      %126 = vector.load %arg3[%c0_53, %c22, %c0_54] : memref<1x125x256xf32, #tpu.memory_space<vmem>>, vector<1x1x256xf32>
      %127 = vector.shape_cast %126 : vector<1x1x256xf32> to vector<256xf32>
      %128 = vector.shape_cast %127 : vector<256xf32> to vector<1x256xf32>
      %129 = vector.broadcast %128 : vector<1x256xf32> to vector<8x256xf32>
      %130 = arith.mulf %125, %129 : vector<8x256xf32>
      %131 = arith.addf %124, %130 : vector<8x256xf32>
      %c0_i32_55 = arith.constant 0 : i32
      %132 = arith.addi %13, %c0_i32_55 : i32
      %133 = arith.index_cast %132 : i32 to index
      %c0_56 = arith.constant 0 : index
      %c160 = arith.constant 160 : index
      %134 = vector.load %arg7[%133, %c0_56, %c160] : memref<8x12x512xf32, #tpu.memory_space<vmem>>, vector<1x12x256xf32>
      %135 = vector.shape_cast %134 : vector<1x12x256xf32> to vector<12x256xf32>
      %136 = vector.extract_strided_slice %135 {offsets = [0, 0], sizes = [8, 256], strides = [1, 1]} : vector<12x256xf32> to vector<8x256xf32>
      %c0_57 = arith.constant 0 : index
      %c3 = arith.constant 3 : index
      %c0_58 = arith.constant 0 : index
      %137 = vector.load %arg3[%c0_57, %c3, %c0_58] : memref<1x125x256xf32, #tpu.memory_space<vmem>>, vector<1x1x256xf32>
      %138 = vector.shape_cast %137 : vector<1x1x256xf32> to vector<256xf32>
      %139 = vector.shape_cast %138 : vector<256xf32> to vector<1x256xf32>
      %140 = vector.broadcast %139 : vector<1x256xf32> to vector<8x256xf32>
      %141 = arith.mulf %136, %140 : vector<8x256xf32>
      %142 = arith.addf %131, %141 : vector<8x256xf32>
      %143 = vector.extract_strided_slice %135 {offsets = [1, 0], sizes = [8, 256], strides = [1, 1]} : vector<12x256xf32> to vector<8x256xf32>
      %c0_59 = arith.constant 0 : index
      %c8 = arith.constant 8 : index
      %c0_60 = arith.constant 0 : index
      %144 = vector.load %arg3[%c0_59, %c8, %c0_60] : memref<1x125x256xf32, #tpu.memory_space<vmem>>, vector<1x1x256xf32>
      %145 = vector.shape_cast %144 : vector<1x1x256xf32> to vector<256xf32>
      %146 = vector.shape_cast %145 : vector<256xf32> to vector<1x256xf32>
      %147 = vector.broadcast %146 : vector<1x256xf32> to vector<8x256xf32>
      %148 = arith.mulf %143, %147 : vector<8x256xf32>
      %149 = arith.addf %142, %148 : vector<8x256xf32>
      %150 = vector.extract_strided_slice %135 {offsets = [2, 0], sizes = [8, 256], strides = [1, 1]} : vector<12x256xf32> to vector<8x256xf32>
      %c0_61 = arith.constant 0 : index
      %c13 = arith.constant 13 : index
      %c0_62 = arith.constant 0 : index
      %151 = vector.load %arg3[%c0_61, %c13, %c0_62] : memref<1x125x256xf32, #tpu.memory_space<vmem>>, vector<1x1x256xf32>
      %152 = vector.shape_cast %151 : vector<1x1x256xf32> to vector<256xf32>
      %153 = vector.shape_cast %152 : vector<256xf32> to vector<1x256xf32>
      %154 = vector.broadcast %153 : vector<1x256xf32> to vector<8x256xf32>
      %155 = arith.mulf %150, %154 : vector<8x256xf32>
      %156 = arith.addf %149, %155 : vector<8x256xf32>
      %157 = vector.extract_strided_slice %135 {offsets = [3, 0], sizes = [8, 256], strides = [1, 1]} : vector<12x256xf32> to vector<8x256xf32>
      %c0_63 = arith.constant 0 : index
      %c18 = arith.constant 18 : index
      %c0_64 = arith.constant 0 : index
      %158 = vector.load %arg3[%c0_63, %c18, %c0_64] : memref<1x125x256xf32, #tpu.memory_space<vmem>>, vector<1x1x256xf32>
      %159 = vector.shape_cast %158 : vector<1x1x256xf32> to vector<256xf32>
      %160 = vector.shape_cast %159 : vector<256xf32> to vector<1x256xf32>
      %161 = vector.broadcast %160 : vector<1x256xf32> to vector<8x256xf32>
      %162 = arith.mulf %157, %161 : vector<8x256xf32>
      %163 = arith.addf %156, %162 : vector<8x256xf32>
      %164 = vector.extract_strided_slice %135 {offsets = [4, 0], sizes = [8, 256], strides = [1, 1]} : vector<12x256xf32> to vector<8x256xf32>
      %c0_65 = arith.constant 0 : index
      %c23 = arith.constant 23 : index
      %c0_66 = arith.constant 0 : index
      %165 = vector.load %arg3[%c0_65, %c23, %c0_66] : memref<1x125x256xf32, #tpu.memory_space<vmem>>, vector<1x1x256xf32>
      %166 = vector.shape_cast %165 : vector<1x1x256xf32> to vector<256xf32>
      %167 = vector.shape_cast %166 : vector<256xf32> to vector<1x256xf32>
      %168 = vector.broadcast %167 : vector<1x256xf32> to vector<8x256xf32>
      %169 = arith.mulf %164, %168 : vector<8x256xf32>
      %170 = arith.addf %163, %169 : vector<8x256xf32>
      %c0_i32_67 = arith.constant 0 : i32
      %171 = arith.addi %13, %c0_i32_67 : i32
      %172 = arith.index_cast %171 : i32 to index
      %c0_68 = arith.constant 0 : index
      %c192 = arith.constant 192 : index
      %173 = vector.load %arg7[%172, %c0_68, %c192] : memref<8x12x512xf32, #tpu.memory_space<vmem>>, vector<1x12x256xf32>
      %174 = vector.shape_cast %173 : vector<1x12x256xf32> to vector<12x256xf32>
      %175 = vector.extract_strided_slice %174 {offsets = [0, 0], sizes = [8, 256], strides = [1, 1]} : vector<12x256xf32> to vector<8x256xf32>
      %c0_69 = arith.constant 0 : index
      %c4 = arith.constant 4 : index
      %c0_70 = arith.constant 0 : index
      %176 = vector.load %arg3[%c0_69, %c4, %c0_70] : memref<1x125x256xf32, #tpu.memory_space<vmem>>, vector<1x1x256xf32>
      %177 = vector.shape_cast %176 : vector<1x1x256xf32> to vector<256xf32>
      %178 = vector.shape_cast %177 : vector<256xf32> to vector<1x256xf32>
      %179 = vector.broadcast %178 : vector<1x256xf32> to vector<8x256xf32>
      %180 = arith.mulf %175, %179 : vector<8x256xf32>
      %181 = arith.addf %170, %180 : vector<8x256xf32>
      %182 = vector.extract_strided_slice %174 {offsets = [1, 0], sizes = [8, 256], strides = [1, 1]} : vector<12x256xf32> to vector<8x256xf32>
      %c0_71 = arith.constant 0 : index
      %c9 = arith.constant 9 : index
      %c0_72 = arith.constant 0 : index
      %183 = vector.load %arg3[%c0_71, %c9, %c0_72] : memref<1x125x256xf32, #tpu.memory_space<vmem>>, vector<1x1x256xf32>
      %184 = vector.shape_cast %183 : vector<1x1x256xf32> to vector<256xf32>
      %185 = vector.shape_cast %184 : vector<256xf32> to vector<1x256xf32>
      %186 = vector.broadcast %185 : vector<1x256xf32> to vector<8x256xf32>
      %187 = arith.mulf %182, %186 : vector<8x256xf32>
      %188 = arith.addf %181, %187 : vector<8x256xf32>
      %189 = vector.extract_strided_slice %174 {offsets = [2, 0], sizes = [8, 256], strides = [1, 1]} : vector<12x256xf32> to vector<8x256xf32>
      %c0_73 = arith.constant 0 : index
      %c14 = arith.constant 14 : index
      %c0_74 = arith.constant 0 : index
      %190 = vector.load %arg3[%c0_73, %c14, %c0_74] : memref<1x125x256xf32, #tpu.memory_space<vmem>>, vector<1x1x256xf32>
      %191 = vector.shape_cast %190 : vector<1x1x256xf32> to vector<256xf32>
      %192 = vector.shape_cast %191 : vector<256xf32> to vector<1x256xf32>
      %193 = vector.broadcast %192 : vector<1x256xf32> to vector<8x256xf32>
      %194 = arith.mulf %189, %193 : vector<8x256xf32>
      %195 = arith.addf %188, %194 : vector<8x256xf32>
      %196 = vector.extract_strided_slice %174 {offsets = [3, 0], sizes = [8, 256], strides = [1, 1]} : vector<12x256xf32> to vector<8x256xf32>
      %c0_75 = arith.constant 0 : index
      %c19 = arith.constant 19 : index
      %c0_76 = arith.constant 0 : index
      %197 = vector.load %arg3[%c0_75, %c19, %c0_76] : memref<1x125x256xf32, #tpu.memory_space<vmem>>, vector<1x1x256xf32>
      %198 = vector.shape_cast %197 : vector<1x1x256xf32> to vector<256xf32>
      %199 = vector.shape_cast %198 : vector<256xf32> to vector<1x256xf32>
      %200 = vector.broadcast %199 : vector<1x256xf32> to vector<8x256xf32>
      %201 = arith.mulf %196, %200 : vector<8x256xf32>
      %202 = arith.addf %195, %201 : vector<8x256xf32>
      %203 = vector.extract_strided_slice %174 {offsets = [4, 0], sizes = [8, 256], strides = [1, 1]} : vector<12x256xf32> to vector<8x256xf32>
      %c0_77 = arith.constant 0 : index
      %c24 = arith.constant 24 : index
      %c0_78 = arith.constant 0 : index
      %204 = vector.load %arg3[%c0_77, %c24, %c0_78] : memref<1x125x256xf32, #tpu.memory_space<vmem>>, vector<1x1x256xf32>
      %205 = vector.shape_cast %204 : vector<1x1x256xf32> to vector<256xf32>
      %206 = vector.shape_cast %205 : vector<256xf32> to vector<1x256xf32>
      %207 = vector.broadcast %206 : vector<1x256xf32> to vector<8x256xf32>
      %208 = arith.mulf %203, %207 : vector<8x256xf32>
      %209 = arith.addf %202, %208 : vector<8x256xf32>
      %c1_i32_79 = arith.constant 1 : i32
      %210 = arith.addi %13, %c1_i32_79 : i32
      %211 = arith.index_cast %210 : i32 to index
      %c0_80 = arith.constant 0 : index
      %c64_81 = arith.constant 64 : index
      %212 = vector.load %arg7[%211, %c0_80, %c64_81] : memref<8x12x512xf32, #tpu.memory_space<vmem>>, vector<1x12x256xf32>
      %213 = vector.shape_cast %212 : vector<1x12x256xf32> to vector<12x256xf32>
      %214 = vector.extract_strided_slice %213 {offsets = [0, 0], sizes = [8, 256], strides = [1, 1]} : vector<12x256xf32> to vector<8x256xf32>
      %c0_82 = arith.constant 0 : index
      %c25 = arith.constant 25 : index
      %c0_83 = arith.constant 0 : index
      %215 = vector.load %arg3[%c0_82, %c25, %c0_83] : memref<1x125x256xf32, #tpu.memory_space<vmem>>, vector<1x1x256xf32>
      %216 = vector.shape_cast %215 : vector<1x1x256xf32> to vector<256xf32>
      %217 = vector.shape_cast %216 : vector<256xf32> to vector<1x256xf32>
      %218 = vector.broadcast %217 : vector<1x256xf32> to vector<8x256xf32>
      %219 = arith.mulf %214, %218 : vector<8x256xf32>
      %220 = arith.addf %209, %219 : vector<8x256xf32>
      %221 = vector.extract_strided_slice %213 {offsets = [1, 0], sizes = [8, 256], strides = [1, 1]} : vector<12x256xf32> to vector<8x256xf32>
      %c0_84 = arith.constant 0 : index
      %c30 = arith.constant 30 : index
      %c0_85 = arith.constant 0 : index
      %222 = vector.load %arg3[%c0_84, %c30, %c0_85] : memref<1x125x256xf32, #tpu.memory_space<vmem>>, vector<1x1x256xf32>
      %223 = vector.shape_cast %222 : vector<1x1x256xf32> to vector<256xf32>
      %224 = vector.shape_cast %223 : vector<256xf32> to vector<1x256xf32>
      %225 = vector.broadcast %224 : vector<1x256xf32> to vector<8x256xf32>
      %226 = arith.mulf %221, %225 : vector<8x256xf32>
      %227 = arith.addf %220, %226 : vector<8x256xf32>
      %228 = vector.extract_strided_slice %213 {offsets = [2, 0], sizes = [8, 256], strides = [1, 1]} : vector<12x256xf32> to vector<8x256xf32>
      %c0_86 = arith.constant 0 : index
      %c35 = arith.constant 35 : index
      %c0_87 = arith.constant 0 : index
      %229 = vector.load %arg3[%c0_86, %c35, %c0_87] : memref<1x125x256xf32, #tpu.memory_space<vmem>>, vector<1x1x256xf32>
      %230 = vector.shape_cast %229 : vector<1x1x256xf32> to vector<256xf32>
      %231 = vector.shape_cast %230 : vector<256xf32> to vector<1x256xf32>
      %232 = vector.broadcast %231 : vector<1x256xf32> to vector<8x256xf32>
      %233 = arith.mulf %228, %232 : vector<8x256xf32>
      %234 = arith.addf %227, %233 : vector<8x256xf32>
      %235 = vector.extract_strided_slice %213 {offsets = [3, 0], sizes = [8, 256], strides = [1, 1]} : vector<12x256xf32> to vector<8x256xf32>
      %c0_88 = arith.constant 0 : index
      %c40 = arith.constant 40 : index
      %c0_89 = arith.constant 0 : index
      %236 = vector.load %arg3[%c0_88, %c40, %c0_89] : memref<1x125x256xf32, #tpu.memory_space<vmem>>, vector<1x1x256xf32>
      %237 = vector.shape_cast %236 : vector<1x1x256xf32> to vector<256xf32>
      %238 = vector.shape_cast %237 : vector<256xf32> to vector<1x256xf32>
      %239 = vector.broadcast %238 : vector<1x256xf32> to vector<8x256xf32>
      %240 = arith.mulf %235, %239 : vector<8x256xf32>
      %241 = arith.addf %234, %240 : vector<8x256xf32>
      %242 = vector.extract_strided_slice %213 {offsets = [4, 0], sizes = [8, 256], strides = [1, 1]} : vector<12x256xf32> to vector<8x256xf32>
      %c0_90 = arith.constant 0 : index
      %c45 = arith.constant 45 : index
      %c0_91 = arith.constant 0 : index
      %243 = vector.load %arg3[%c0_90, %c45, %c0_91] : memref<1x125x256xf32, #tpu.memory_space<vmem>>, vector<1x1x256xf32>
      %244 = vector.shape_cast %243 : vector<1x1x256xf32> to vector<256xf32>
      %245 = vector.shape_cast %244 : vector<256xf32> to vector<1x256xf32>
      %246 = vector.broadcast %245 : vector<1x256xf32> to vector<8x256xf32>
      %247 = arith.mulf %242, %246 : vector<8x256xf32>
      %248 = arith.addf %241, %247 : vector<8x256xf32>
      %c1_i32_92 = arith.constant 1 : i32
      %249 = arith.addi %13, %c1_i32_92 : i32
      %250 = arith.index_cast %249 : i32 to index
      %c0_93 = arith.constant 0 : index
      %c96_94 = arith.constant 96 : index
      %251 = vector.load %arg7[%250, %c0_93, %c96_94] : memref<8x12x512xf32, #tpu.memory_space<vmem>>, vector<1x12x256xf32>
      %252 = vector.shape_cast %251 : vector<1x12x256xf32> to vector<12x256xf32>
      %253 = vector.extract_strided_slice %252 {offsets = [0, 0], sizes = [8, 256], strides = [1, 1]} : vector<12x256xf32> to vector<8x256xf32>
      %c0_95 = arith.constant 0 : index
      %c26 = arith.constant 26 : index
      %c0_96 = arith.constant 0 : index
      %254 = vector.load %arg3[%c0_95, %c26, %c0_96] : memref<1x125x256xf32, #tpu.memory_space<vmem>>, vector<1x1x256xf32>
      %255 = vector.shape_cast %254 : vector<1x1x256xf32> to vector<256xf32>
      %256 = vector.shape_cast %255 : vector<256xf32> to vector<1x256xf32>
      %257 = vector.broadcast %256 : vector<1x256xf32> to vector<8x256xf32>
      %258 = arith.mulf %253, %257 : vector<8x256xf32>
      %259 = arith.addf %248, %258 : vector<8x256xf32>
      %260 = vector.extract_strided_slice %252 {offsets = [1, 0], sizes = [8, 256], strides = [1, 1]} : vector<12x256xf32> to vector<8x256xf32>
      %c0_97 = arith.constant 0 : index
      %c31 = arith.constant 31 : index
      %c0_98 = arith.constant 0 : index
      %261 = vector.load %arg3[%c0_97, %c31, %c0_98] : memref<1x125x256xf32, #tpu.memory_space<vmem>>, vector<1x1x256xf32>
      %262 = vector.shape_cast %261 : vector<1x1x256xf32> to vector<256xf32>
      %263 = vector.shape_cast %262 : vector<256xf32> to vector<1x256xf32>
      %264 = vector.broadcast %263 : vector<1x256xf32> to vector<8x256xf32>
      %265 = arith.mulf %260, %264 : vector<8x256xf32>
      %266 = arith.addf %259, %265 : vector<8x256xf32>
      %267 = vector.extract_strided_slice %252 {offsets = [2, 0], sizes = [8, 256], strides = [1, 1]} : vector<12x256xf32> to vector<8x256xf32>
      %c0_99 = arith.constant 0 : index
      %c36 = arith.constant 36 : index
      %c0_100 = arith.constant 0 : index
      %268 = vector.load %arg3[%c0_99, %c36, %c0_100] : memref<1x125x256xf32, #tpu.memory_space<vmem>>, vector<1x1x256xf32>
      %269 = vector.shape_cast %268 : vector<1x1x256xf32> to vector<256xf32>
      %270 = vector.shape_cast %269 : vector<256xf32> to vector<1x256xf32>
      %271 = vector.broadcast %270 : vector<1x256xf32> to vector<8x256xf32>
      %272 = arith.mulf %267, %271 : vector<8x256xf32>
      %273 = arith.addf %266, %272 : vector<8x256xf32>
      %274 = vector.extract_strided_slice %252 {offsets = [3, 0], sizes = [8, 256], strides = [1, 1]} : vector<12x256xf32> to vector<8x256xf32>
      %c0_101 = arith.constant 0 : index
      %c41 = arith.constant 41 : index
      %c0_102 = arith.constant 0 : index
      %275 = vector.load %arg3[%c0_101, %c41, %c0_102] : memref<1x125x256xf32, #tpu.memory_space<vmem>>, vector<1x1x256xf32>
      %276 = vector.shape_cast %275 : vector<1x1x256xf32> to vector<256xf32>
      %277 = vector.shape_cast %276 : vector<256xf32> to vector<1x256xf32>
      %278 = vector.broadcast %277 : vector<1x256xf32> to vector<8x256xf32>
      %279 = arith.mulf %274, %278 : vector<8x256xf32>
      %280 = arith.addf %273, %279 : vector<8x256xf32>
      %281 = vector.extract_strided_slice %252 {offsets = [4, 0], sizes = [8, 256], strides = [1, 1]} : vector<12x256xf32> to vector<8x256xf32>
      %c0_103 = arith.constant 0 : index
      %c46 = arith.constant 46 : index
      %c0_104 = arith.constant 0 : index
      %282 = vector.load %arg3[%c0_103, %c46, %c0_104] : memref<1x125x256xf32, #tpu.memory_space<vmem>>, vector<1x1x256xf32>
      %283 = vector.shape_cast %282 : vector<1x1x256xf32> to vector<256xf32>
      %284 = vector.shape_cast %283 : vector<256xf32> to vector<1x256xf32>
      %285 = vector.broadcast %284 : vector<1x256xf32> to vector<8x256xf32>
      %286 = arith.mulf %281, %285 : vector<8x256xf32>
      %287 = arith.addf %280, %286 : vector<8x256xf32>
      %c1_i32_105 = arith.constant 1 : i32
      %288 = arith.addi %13, %c1_i32_105 : i32
      %289 = arith.index_cast %288 : i32 to index
      %c0_106 = arith.constant 0 : index
      %c128_107 = arith.constant 128 : index
      %290 = vector.load %arg7[%289, %c0_106, %c128_107] : memref<8x12x512xf32, #tpu.memory_space<vmem>>, vector<1x12x256xf32>
      %291 = vector.shape_cast %290 : vector<1x12x256xf32> to vector<12x256xf32>
      %292 = vector.extract_strided_slice %291 {offsets = [0, 0], sizes = [8, 256], strides = [1, 1]} : vector<12x256xf32> to vector<8x256xf32>
      %c0_108 = arith.constant 0 : index
      %c27 = arith.constant 27 : index
      %c0_109 = arith.constant 0 : index
      %293 = vector.load %arg3[%c0_108, %c27, %c0_109] : memref<1x125x256xf32, #tpu.memory_space<vmem>>, vector<1x1x256xf32>
      %294 = vector.shape_cast %293 : vector<1x1x256xf32> to vector<256xf32>
      %295 = vector.shape_cast %294 : vector<256xf32> to vector<1x256xf32>
      %296 = vector.broadcast %295 : vector<1x256xf32> to vector<8x256xf32>
      %297 = arith.mulf %292, %296 : vector<8x256xf32>
      %298 = arith.addf %287, %297 : vector<8x256xf32>
      %299 = vector.extract_strided_slice %291 {offsets = [1, 0], sizes = [8, 256], strides = [1, 1]} : vector<12x256xf32> to vector<8x256xf32>
      %c0_110 = arith.constant 0 : index
      %c32 = arith.constant 32 : index
      %c0_111 = arith.constant 0 : index
      %300 = vector.load %arg3[%c0_110, %c32, %c0_111] : memref<1x125x256xf32, #tpu.memory_space<vmem>>, vector<1x1x256xf32>
      %301 = vector.shape_cast %300 : vector<1x1x256xf32> to vector<256xf32>
      %302 = vector.shape_cast %301 : vector<256xf32> to vector<1x256xf32>
      %303 = vector.broadcast %302 : vector<1x256xf32> to vector<8x256xf32>
      %304 = arith.mulf %299, %303 : vector<8x256xf32>
      %305 = arith.addf %298, %304 : vector<8x256xf32>
      %306 = vector.extract_strided_slice %291 {offsets = [2, 0], sizes = [8, 256], strides = [1, 1]} : vector<12x256xf32> to vector<8x256xf32>
      %c0_112 = arith.constant 0 : index
      %c37 = arith.constant 37 : index
      %c0_113 = arith.constant 0 : index
      %307 = vector.load %arg3[%c0_112, %c37, %c0_113] : memref<1x125x256xf32, #tpu.memory_space<vmem>>, vector<1x1x256xf32>
      %308 = vector.shape_cast %307 : vector<1x1x256xf32> to vector<256xf32>
      %309 = vector.shape_cast %308 : vector<256xf32> to vector<1x256xf32>
      %310 = vector.broadcast %309 : vector<1x256xf32> to vector<8x256xf32>
      %311 = arith.mulf %306, %310 : vector<8x256xf32>
      %312 = arith.addf %305, %311 : vector<8x256xf32>
      %313 = vector.extract_strided_slice %291 {offsets = [3, 0], sizes = [8, 256], strides = [1, 1]} : vector<12x256xf32> to vector<8x256xf32>
      %c0_114 = arith.constant 0 : index
      %c42 = arith.constant 42 : index
      %c0_115 = arith.constant 0 : index
      %314 = vector.load %arg3[%c0_114, %c42, %c0_115] : memref<1x125x256xf32, #tpu.memory_space<vmem>>, vector<1x1x256xf32>
      %315 = vector.shape_cast %314 : vector<1x1x256xf32> to vector<256xf32>
      %316 = vector.shape_cast %315 : vector<256xf32> to vector<1x256xf32>
      %317 = vector.broadcast %316 : vector<1x256xf32> to vector<8x256xf32>
      %318 = arith.mulf %313, %317 : vector<8x256xf32>
      %319 = arith.addf %312, %318 : vector<8x256xf32>
      %320 = vector.extract_strided_slice %291 {offsets = [4, 0], sizes = [8, 256], strides = [1, 1]} : vector<12x256xf32> to vector<8x256xf32>
      %c0_116 = arith.constant 0 : index
      %c47 = arith.constant 47 : index
      %c0_117 = arith.constant 0 : index
      %321 = vector.load %arg3[%c0_116, %c47, %c0_117] : memref<1x125x256xf32, #tpu.memory_space<vmem>>, vector<1x1x256xf32>
      %322 = vector.shape_cast %321 : vector<1x1x256xf32> to vector<256xf32>
      %323 = vector.shape_cast %322 : vector<256xf32> to vector<1x256xf32>
      %324 = vector.broadcast %323 : vector<1x256xf32> to vector<8x256xf32>
      %325 = arith.mulf %320, %324 : vector<8x256xf32>
      %326 = arith.addf %319, %325 : vector<8x256xf32>
      %c1_i32_118 = arith.constant 1 : i32
      %327 = arith.addi %13, %c1_i32_118 : i32
      %328 = arith.index_cast %327 : i32 to index
      %c0_119 = arith.constant 0 : index
      %c160_120 = arith.constant 160 : index
      %329 = vector.load %arg7[%328, %c0_119, %c160_120] : memref<8x12x512xf32, #tpu.memory_space<vmem>>, vector<1x12x256xf32>
      %330 = vector.shape_cast %329 : vector<1x12x256xf32> to vector<12x256xf32>
      %331 = vector.extract_strided_slice %330 {offsets = [0, 0], sizes = [8, 256], strides = [1, 1]} : vector<12x256xf32> to vector<8x256xf32>
      %c0_121 = arith.constant 0 : index
      %c28 = arith.constant 28 : index
      %c0_122 = arith.constant 0 : index
      %332 = vector.load %arg3[%c0_121, %c28, %c0_122] : memref<1x125x256xf32, #tpu.memory_space<vmem>>, vector<1x1x256xf32>
      %333 = vector.shape_cast %332 : vector<1x1x256xf32> to vector<256xf32>
      %334 = vector.shape_cast %333 : vector<256xf32> to vector<1x256xf32>
      %335 = vector.broadcast %334 : vector<1x256xf32> to vector<8x256xf32>
      %336 = arith.mulf %331, %335 : vector<8x256xf32>
      %337 = arith.addf %326, %336 : vector<8x256xf32>
      %338 = vector.extract_strided_slice %330 {offsets = [1, 0], sizes = [8, 256], strides = [1, 1]} : vector<12x256xf32> to vector<8x256xf32>
      %c0_123 = arith.constant 0 : index
      %c33 = arith.constant 33 : index
      %c0_124 = arith.constant 0 : index
      %339 = vector.load %arg3[%c0_123, %c33, %c0_124] : memref<1x125x256xf32, #tpu.memory_space<vmem>>, vector<1x1x256xf32>
      %340 = vector.shape_cast %339 : vector<1x1x256xf32> to vector<256xf32>
      %341 = vector.shape_cast %340 : vector<256xf32> to vector<1x256xf32>
      %342 = vector.broadcast %341 : vector<1x256xf32> to vector<8x256xf32>
      %343 = arith.mulf %338, %342 : vector<8x256xf32>
      %344 = arith.addf %337, %343 : vector<8x256xf32>
      %345 = vector.extract_strided_slice %330 {offsets = [2, 0], sizes = [8, 256], strides = [1, 1]} : vector<12x256xf32> to vector<8x256xf32>
      %c0_125 = arith.constant 0 : index
      %c38 = arith.constant 38 : index
      %c0_126 = arith.constant 0 : index
      %346 = vector.load %arg3[%c0_125, %c38, %c0_126] : memref<1x125x256xf32, #tpu.memory_space<vmem>>, vector<1x1x256xf32>
      %347 = vector.shape_cast %346 : vector<1x1x256xf32> to vector<256xf32>
      %348 = vector.shape_cast %347 : vector<256xf32> to vector<1x256xf32>
      %349 = vector.broadcast %348 : vector<1x256xf32> to vector<8x256xf32>
      %350 = arith.mulf %345, %349 : vector<8x256xf32>
      %351 = arith.addf %344, %350 : vector<8x256xf32>
      %352 = vector.extract_strided_slice %330 {offsets = [3, 0], sizes = [8, 256], strides = [1, 1]} : vector<12x256xf32> to vector<8x256xf32>
      %c0_127 = arith.constant 0 : index
      %c43 = arith.constant 43 : index
      %c0_128 = arith.constant 0 : index
      %353 = vector.load %arg3[%c0_127, %c43, %c0_128] : memref<1x125x256xf32, #tpu.memory_space<vmem>>, vector<1x1x256xf32>
      %354 = vector.shape_cast %353 : vector<1x1x256xf32> to vector<256xf32>
      %355 = vector.shape_cast %354 : vector<256xf32> to vector<1x256xf32>
      %356 = vector.broadcast %355 : vector<1x256xf32> to vector<8x256xf32>
      %357 = arith.mulf %352, %356 : vector<8x256xf32>
      %358 = arith.addf %351, %357 : vector<8x256xf32>
      %359 = vector.extract_strided_slice %330 {offsets = [4, 0], sizes = [8, 256], strides = [1, 1]} : vector<12x256xf32> to vector<8x256xf32>
      %c0_129 = arith.constant 0 : index
      %c48 = arith.constant 48 : index
      %c0_130 = arith.constant 0 : index
      %360 = vector.load %arg3[%c0_129, %c48, %c0_130] : memref<1x125x256xf32, #tpu.memory_space<vmem>>, vector<1x1x256xf32>
      %361 = vector.shape_cast %360 : vector<1x1x256xf32> to vector<256xf32>
      %362 = vector.shape_cast %361 : vector<256xf32> to vector<1x256xf32>
      %363 = vector.broadcast %362 : vector<1x256xf32> to vector<8x256xf32>
      %364 = arith.mulf %359, %363 : vector<8x256xf32>
      %365 = arith.addf %358, %364 : vector<8x256xf32>
      %c1_i32_131 = arith.constant 1 : i32
      %366 = arith.addi %13, %c1_i32_131 : i32
      %367 = arith.index_cast %366 : i32 to index
      %c0_132 = arith.constant 0 : index
      %c192_133 = arith.constant 192 : index
      %368 = vector.load %arg7[%367, %c0_132, %c192_133] : memref<8x12x512xf32, #tpu.memory_space<vmem>>, vector<1x12x256xf32>
      %369 = vector.shape_cast %368 : vector<1x12x256xf32> to vector<12x256xf32>
      %370 = vector.extract_strided_slice %369 {offsets = [0, 0], sizes = [8, 256], strides = [1, 1]} : vector<12x256xf32> to vector<8x256xf32>
      %c0_134 = arith.constant 0 : index
      %c29 = arith.constant 29 : index
      %c0_135 = arith.constant 0 : index
      %371 = vector.load %arg3[%c0_134, %c29, %c0_135] : memref<1x125x256xf32, #tpu.memory_space<vmem>>, vector<1x1x256xf32>
      %372 = vector.shape_cast %371 : vector<1x1x256xf32> to vector<256xf32>
      %373 = vector.shape_cast %372 : vector<256xf32> to vector<1x256xf32>
      %374 = vector.broadcast %373 : vector<1x256xf32> to vector<8x256xf32>
      %375 = arith.mulf %370, %374 : vector<8x256xf32>
      %376 = arith.addf %365, %375 : vector<8x256xf32>
      %377 = vector.extract_strided_slice %369 {offsets = [1, 0], sizes = [8, 256], strides = [1, 1]} : vector<12x256xf32> to vector<8x256xf32>
      %c0_136 = arith.constant 0 : index
      %c34 = arith.constant 34 : index
      %c0_137 = arith.constant 0 : index
      %378 = vector.load %arg3[%c0_136, %c34, %c0_137] : memref<1x125x256xf32, #tpu.memory_space<vmem>>, vector<1x1x256xf32>
      %379 = vector.shape_cast %378 : vector<1x1x256xf32> to vector<256xf32>
      %380 = vector.shape_cast %379 : vector<256xf32> to vector<1x256xf32>
      %381 = vector.broadcast %380 : vector<1x256xf32> to vector<8x256xf32>
      %382 = arith.mulf %377, %381 : vector<8x256xf32>
      %383 = arith.addf %376, %382 : vector<8x256xf32>
      %384 = vector.extract_strided_slice %369 {offsets = [2, 0], sizes = [8, 256], strides = [1, 1]} : vector<12x256xf32> to vector<8x256xf32>
      %c0_138 = arith.constant 0 : index
      %c39 = arith.constant 39 : index
      %c0_139 = arith.constant 0 : index
      %385 = vector.load %arg3[%c0_138, %c39, %c0_139] : memref<1x125x256xf32, #tpu.memory_space<vmem>>, vector<1x1x256xf32>
      %386 = vector.shape_cast %385 : vector<1x1x256xf32> to vector<256xf32>
      %387 = vector.shape_cast %386 : vector<256xf32> to vector<1x256xf32>
      %388 = vector.broadcast %387 : vector<1x256xf32> to vector<8x256xf32>
      %389 = arith.mulf %384, %388 : vector<8x256xf32>
      %390 = arith.addf %383, %389 : vector<8x256xf32>
      %391 = vector.extract_strided_slice %369 {offsets = [3, 0], sizes = [8, 256], strides = [1, 1]} : vector<12x256xf32> to vector<8x256xf32>
      %c0_140 = arith.constant 0 : index
      %c44 = arith.constant 44 : index
      %c0_141 = arith.constant 0 : index
      %392 = vector.load %arg3[%c0_140, %c44, %c0_141] : memref<1x125x256xf32, #tpu.memory_space<vmem>>, vector<1x1x256xf32>
      %393 = vector.shape_cast %392 : vector<1x1x256xf32> to vector<256xf32>
      %394 = vector.shape_cast %393 : vector<256xf32> to vector<1x256xf32>
      %395 = vector.broadcast %394 : vector<1x256xf32> to vector<8x256xf32>
      %396 = arith.mulf %391, %395 : vector<8x256xf32>
      %397 = arith.addf %390, %396 : vector<8x256xf32>
      %398 = vector.extract_strided_slice %369 {offsets = [4, 0], sizes = [8, 256], strides = [1, 1]} : vector<12x256xf32> to vector<8x256xf32>
      %c0_142 = arith.constant 0 : index
      %c49 = arith.constant 49 : index
      %c0_143 = arith.constant 0 : index
      %399 = vector.load %arg3[%c0_142, %c49, %c0_143] : memref<1x125x256xf32, #tpu.memory_space<vmem>>, vector<1x1x256xf32>
      %400 = vector.shape_cast %399 : vector<1x1x256xf32> to vector<256xf32>
      %401 = vector.shape_cast %400 : vector<256xf32> to vector<1x256xf32>
      %402 = vector.broadcast %401 : vector<1x256xf32> to vector<8x256xf32>
      %403 = arith.mulf %398, %402 : vector<8x256xf32>
      %404 = arith.addf %397, %403 : vector<8x256xf32>
      %c2_i32 = arith.constant 2 : i32
      %405 = arith.addi %13, %c2_i32 : i32
      %406 = arith.index_cast %405 : i32 to index
      %c0_144 = arith.constant 0 : index
      %c64_145 = arith.constant 64 : index
      %407 = vector.load %arg7[%406, %c0_144, %c64_145] : memref<8x12x512xf32, #tpu.memory_space<vmem>>, vector<1x12x256xf32>
      %408 = vector.shape_cast %407 : vector<1x12x256xf32> to vector<12x256xf32>
      %409 = vector.extract_strided_slice %408 {offsets = [0, 0], sizes = [8, 256], strides = [1, 1]} : vector<12x256xf32> to vector<8x256xf32>
      %c0_146 = arith.constant 0 : index
      %c50 = arith.constant 50 : index
      %c0_147 = arith.constant 0 : index
      %410 = vector.load %arg3[%c0_146, %c50, %c0_147] : memref<1x125x256xf32, #tpu.memory_space<vmem>>, vector<1x1x256xf32>
      %411 = vector.shape_cast %410 : vector<1x1x256xf32> to vector<256xf32>
      %412 = vector.shape_cast %411 : vector<256xf32> to vector<1x256xf32>
      %413 = vector.broadcast %412 : vector<1x256xf32> to vector<8x256xf32>
      %414 = arith.mulf %409, %413 : vector<8x256xf32>
      %415 = arith.addf %404, %414 : vector<8x256xf32>
      %416 = vector.extract_strided_slice %408 {offsets = [1, 0], sizes = [8, 256], strides = [1, 1]} : vector<12x256xf32> to vector<8x256xf32>
      %c0_148 = arith.constant 0 : index
      %c55 = arith.constant 55 : index
      %c0_149 = arith.constant 0 : index
      %417 = vector.load %arg3[%c0_148, %c55, %c0_149] : memref<1x125x256xf32, #tpu.memory_space<vmem>>, vector<1x1x256xf32>
      %418 = vector.shape_cast %417 : vector<1x1x256xf32> to vector<256xf32>
      %419 = vector.shape_cast %418 : vector<256xf32> to vector<1x256xf32>
      %420 = vector.broadcast %419 : vector<1x256xf32> to vector<8x256xf32>
      %421 = arith.mulf %416, %420 : vector<8x256xf32>
      %422 = arith.addf %415, %421 : vector<8x256xf32>
      %423 = vector.extract_strided_slice %408 {offsets = [2, 0], sizes = [8, 256], strides = [1, 1]} : vector<12x256xf32> to vector<8x256xf32>
      %c0_150 = arith.constant 0 : index
      %c60 = arith.constant 60 : index
      %c0_151 = arith.constant 0 : index
      %424 = vector.load %arg3[%c0_150, %c60, %c0_151] : memref<1x125x256xf32, #tpu.memory_space<vmem>>, vector<1x1x256xf32>
      %425 = vector.shape_cast %424 : vector<1x1x256xf32> to vector<256xf32>
      %426 = vector.shape_cast %425 : vector<256xf32> to vector<1x256xf32>
      %427 = vector.broadcast %426 : vector<1x256xf32> to vector<8x256xf32>
      %428 = arith.mulf %423, %427 : vector<8x256xf32>
      %429 = arith.addf %422, %428 : vector<8x256xf32>
      %430 = vector.extract_strided_slice %408 {offsets = [3, 0], sizes = [8, 256], strides = [1, 1]} : vector<12x256xf32> to vector<8x256xf32>
      %c0_152 = arith.constant 0 : index
      %c65 = arith.constant 65 : index
      %c0_153 = arith.constant 0 : index
      %431 = vector.load %arg3[%c0_152, %c65, %c0_153] : memref<1x125x256xf32, #tpu.memory_space<vmem>>, vector<1x1x256xf32>
      %432 = vector.shape_cast %431 : vector<1x1x256xf32> to vector<256xf32>
      %433 = vector.shape_cast %432 : vector<256xf32> to vector<1x256xf32>
      %434 = vector.broadcast %433 : vector<1x256xf32> to vector<8x256xf32>
      %435 = arith.mulf %430, %434 : vector<8x256xf32>
      %436 = arith.addf %429, %435 : vector<8x256xf32>
      %437 = vector.extract_strided_slice %408 {offsets = [4, 0], sizes = [8, 256], strides = [1, 1]} : vector<12x256xf32> to vector<8x256xf32>
      %c0_154 = arith.constant 0 : index
      %c70 = arith.constant 70 : index
      %c0_155 = arith.constant 0 : index
      %438 = vector.load %arg3[%c0_154, %c70, %c0_155] : memref<1x125x256xf32, #tpu.memory_space<vmem>>, vector<1x1x256xf32>
      %439 = vector.shape_cast %438 : vector<1x1x256xf32> to vector<256xf32>
      %440 = vector.shape_cast %439 : vector<256xf32> to vector<1x256xf32>
      %441 = vector.broadcast %440 : vector<1x256xf32> to vector<8x256xf32>
      %442 = arith.mulf %437, %441 : vector<8x256xf32>
      %443 = arith.addf %436, %442 : vector<8x256xf32>
      %c2_i32_156 = arith.constant 2 : i32
      %444 = arith.addi %13, %c2_i32_156 : i32
      %445 = arith.index_cast %444 : i32 to index
      %c0_157 = arith.constant 0 : index
      %c96_158 = arith.constant 96 : index
      %446 = vector.load %arg7[%445, %c0_157, %c96_158] : memref<8x12x512xf32, #tpu.memory_space<vmem>>, vector<1x12x256xf32>
      %447 = vector.shape_cast %446 : vector<1x12x256xf32> to vector<12x256xf32>
      %448 = vector.extract_strided_slice %447 {offsets = [0, 0], sizes = [8, 256], strides = [1, 1]} : vector<12x256xf32> to vector<8x256xf32>
      %c0_159 = arith.constant 0 : index
      %c51 = arith.constant 51 : index
      %c0_160 = arith.constant 0 : index
      %449 = vector.load %arg3[%c0_159, %c51, %c0_160] : memref<1x125x256xf32, #tpu.memory_space<vmem>>, vector<1x1x256xf32>
      %450 = vector.shape_cast %449 : vector<1x1x256xf32> to vector<256xf32>
      %451 = vector.shape_cast %450 : vector<256xf32> to vector<1x256xf32>
      %452 = vector.broadcast %451 : vector<1x256xf32> to vector<8x256xf32>
      %453 = arith.mulf %448, %452 : vector<8x256xf32>
      %454 = arith.addf %443, %453 : vector<8x256xf32>
      %455 = vector.extract_strided_slice %447 {offsets = [1, 0], sizes = [8, 256], strides = [1, 1]} : vector<12x256xf32> to vector<8x256xf32>
      %c0_161 = arith.constant 0 : index
      %c56 = arith.constant 56 : index
      %c0_162 = arith.constant 0 : index
      %456 = vector.load %arg3[%c0_161, %c56, %c0_162] : memref<1x125x256xf32, #tpu.memory_space<vmem>>, vector<1x1x256xf32>
      %457 = vector.shape_cast %456 : vector<1x1x256xf32> to vector<256xf32>
      %458 = vector.shape_cast %457 : vector<256xf32> to vector<1x256xf32>
      %459 = vector.broadcast %458 : vector<1x256xf32> to vector<8x256xf32>
      %460 = arith.mulf %455, %459 : vector<8x256xf32>
      %461 = arith.addf %454, %460 : vector<8x256xf32>
      %462 = vector.extract_strided_slice %447 {offsets = [2, 0], sizes = [8, 256], strides = [1, 1]} : vector<12x256xf32> to vector<8x256xf32>
      %c0_163 = arith.constant 0 : index
      %c61 = arith.constant 61 : index
      %c0_164 = arith.constant 0 : index
      %463 = vector.load %arg3[%c0_163, %c61, %c0_164] : memref<1x125x256xf32, #tpu.memory_space<vmem>>, vector<1x1x256xf32>
      %464 = vector.shape_cast %463 : vector<1x1x256xf32> to vector<256xf32>
      %465 = vector.shape_cast %464 : vector<256xf32> to vector<1x256xf32>
      %466 = vector.broadcast %465 : vector<1x256xf32> to vector<8x256xf32>
      %467 = arith.mulf %462, %466 : vector<8x256xf32>
      %468 = arith.addf %461, %467 : vector<8x256xf32>
      %469 = vector.extract_strided_slice %447 {offsets = [3, 0], sizes = [8, 256], strides = [1, 1]} : vector<12x256xf32> to vector<8x256xf32>
      %c0_165 = arith.constant 0 : index
      %c66 = arith.constant 66 : index
      %c0_166 = arith.constant 0 : index
      %470 = vector.load %arg3[%c0_165, %c66, %c0_166] : memref<1x125x256xf32, #tpu.memory_space<vmem>>, vector<1x1x256xf32>
      %471 = vector.shape_cast %470 : vector<1x1x256xf32> to vector<256xf32>
      %472 = vector.shape_cast %471 : vector<256xf32> to vector<1x256xf32>
      %473 = vector.broadcast %472 : vector<1x256xf32> to vector<8x256xf32>
      %474 = arith.mulf %469, %473 : vector<8x256xf32>
      %475 = arith.addf %468, %474 : vector<8x256xf32>
      %476 = vector.extract_strided_slice %447 {offsets = [4, 0], sizes = [8, 256], strides = [1, 1]} : vector<12x256xf32> to vector<8x256xf32>
      %c0_167 = arith.constant 0 : index
      %c71 = arith.constant 71 : index
      %c0_168 = arith.constant 0 : index
      %477 = vector.load %arg3[%c0_167, %c71, %c0_168] : memref<1x125x256xf32, #tpu.memory_space<vmem>>, vector<1x1x256xf32>
      %478 = vector.shape_cast %477 : vector<1x1x256xf32> to vector<256xf32>
      %479 = vector.shape_cast %478 : vector<256xf32> to vector<1x256xf32>
      %480 = vector.broadcast %479 : vector<1x256xf32> to vector<8x256xf32>
      %481 = arith.mulf %476, %480 : vector<8x256xf32>
      %482 = arith.addf %475, %481 : vector<8x256xf32>
      %c2_i32_169 = arith.constant 2 : i32
      %483 = arith.addi %13, %c2_i32_169 : i32
      %484 = arith.index_cast %483 : i32 to index
      %c0_170 = arith.constant 0 : index
      %c128_171 = arith.constant 128 : index
      %485 = vector.load %arg7[%484, %c0_170, %c128_171] : memref<8x12x512xf32, #tpu.memory_space<vmem>>, vector<1x12x256xf32>
      %486 = vector.shape_cast %485 : vector<1x12x256xf32> to vector<12x256xf32>
      %487 = vector.extract_strided_slice %486 {offsets = [0, 0], sizes = [8, 256], strides = [1, 1]} : vector<12x256xf32> to vector<8x256xf32>
      %c0_172 = arith.constant 0 : index
      %c52 = arith.constant 52 : index
      %c0_173 = arith.constant 0 : index
      %488 = vector.load %arg3[%c0_172, %c52, %c0_173] : memref<1x125x256xf32, #tpu.memory_space<vmem>>, vector<1x1x256xf32>
      %489 = vector.shape_cast %488 : vector<1x1x256xf32> to vector<256xf32>
      %490 = vector.shape_cast %489 : vector<256xf32> to vector<1x256xf32>
      %491 = vector.broadcast %490 : vector<1x256xf32> to vector<8x256xf32>
      %492 = arith.mulf %487, %491 : vector<8x256xf32>
      %493 = arith.addf %482, %492 : vector<8x256xf32>
      %494 = vector.extract_strided_slice %486 {offsets = [1, 0], sizes = [8, 256], strides = [1, 1]} : vector<12x256xf32> to vector<8x256xf32>
      %c0_174 = arith.constant 0 : index
      %c57 = arith.constant 57 : index
      %c0_175 = arith.constant 0 : index
      %495 = vector.load %arg3[%c0_174, %c57, %c0_175] : memref<1x125x256xf32, #tpu.memory_space<vmem>>, vector<1x1x256xf32>
      %496 = vector.shape_cast %495 : vector<1x1x256xf32> to vector<256xf32>
      %497 = vector.shape_cast %496 : vector<256xf32> to vector<1x256xf32>
      %498 = vector.broadcast %497 : vector<1x256xf32> to vector<8x256xf32>
      %499 = arith.mulf %494, %498 : vector<8x256xf32>
      %500 = arith.addf %493, %499 : vector<8x256xf32>
      %501 = vector.extract_strided_slice %486 {offsets = [2, 0], sizes = [8, 256], strides = [1, 1]} : vector<12x256xf32> to vector<8x256xf32>
      %c0_176 = arith.constant 0 : index
      %c62 = arith.constant 62 : index
      %c0_177 = arith.constant 0 : index
      %502 = vector.load %arg3[%c0_176, %c62, %c0_177] : memref<1x125x256xf32, #tpu.memory_space<vmem>>, vector<1x1x256xf32>
      %503 = vector.shape_cast %502 : vector<1x1x256xf32> to vector<256xf32>
      %504 = vector.shape_cast %503 : vector<256xf32> to vector<1x256xf32>
      %505 = vector.broadcast %504 : vector<1x256xf32> to vector<8x256xf32>
      %506 = arith.mulf %501, %505 : vector<8x256xf32>
      %507 = arith.addf %500, %506 : vector<8x256xf32>
      %508 = vector.extract_strided_slice %486 {offsets = [3, 0], sizes = [8, 256], strides = [1, 1]} : vector<12x256xf32> to vector<8x256xf32>
      %c0_178 = arith.constant 0 : index
      %c67 = arith.constant 67 : index
      %c0_179 = arith.constant 0 : index
      %509 = vector.load %arg3[%c0_178, %c67, %c0_179] : memref<1x125x256xf32, #tpu.memory_space<vmem>>, vector<1x1x256xf32>
      %510 = vector.shape_cast %509 : vector<1x1x256xf32> to vector<256xf32>
      %511 = vector.shape_cast %510 : vector<256xf32> to vector<1x256xf32>
      %512 = vector.broadcast %511 : vector<1x256xf32> to vector<8x256xf32>
      %513 = arith.mulf %508, %512 : vector<8x256xf32>
      %514 = arith.addf %507, %513 : vector<8x256xf32>
      %515 = vector.extract_strided_slice %486 {offsets = [4, 0], sizes = [8, 256], strides = [1, 1]} : vector<12x256xf32> to vector<8x256xf32>
      %c0_180 = arith.constant 0 : index
      %c72 = arith.constant 72 : index
      %c0_181 = arith.constant 0 : index
      %516 = vector.load %arg3[%c0_180, %c72, %c0_181] : memref<1x125x256xf32, #tpu.memory_space<vmem>>, vector<1x1x256xf32>
      %517 = vector.shape_cast %516 : vector<1x1x256xf32> to vector<256xf32>
      %518 = vector.shape_cast %517 : vector<256xf32> to vector<1x256xf32>
      %519 = vector.broadcast %518 : vector<1x256xf32> to vector<8x256xf32>
      %520 = arith.mulf %515, %519 : vector<8x256xf32>
      %521 = arith.addf %514, %520 : vector<8x256xf32>
      %c2_i32_182 = arith.constant 2 : i32
      %522 = arith.addi %13, %c2_i32_182 : i32
      %523 = arith.index_cast %522 : i32 to index
      %c0_183 = arith.constant 0 : index
      %c160_184 = arith.constant 160 : index
      %524 = vector.load %arg7[%523, %c0_183, %c160_184] : memref<8x12x512xf32, #tpu.memory_space<vmem>>, vector<1x12x256xf32>
      %525 = vector.shape_cast %524 : vector<1x12x256xf32> to vector<12x256xf32>
      %526 = vector.extract_strided_slice %525 {offsets = [0, 0], sizes = [8, 256], strides = [1, 1]} : vector<12x256xf32> to vector<8x256xf32>
      %c0_185 = arith.constant 0 : index
      %c53 = arith.constant 53 : index
      %c0_186 = arith.constant 0 : index
      %527 = vector.load %arg3[%c0_185, %c53, %c0_186] : memref<1x125x256xf32, #tpu.memory_space<vmem>>, vector<1x1x256xf32>
      %528 = vector.shape_cast %527 : vector<1x1x256xf32> to vector<256xf32>
      %529 = vector.shape_cast %528 : vector<256xf32> to vector<1x256xf32>
      %530 = vector.broadcast %529 : vector<1x256xf32> to vector<8x256xf32>
      %531 = arith.mulf %526, %530 : vector<8x256xf32>
      %532 = arith.addf %521, %531 : vector<8x256xf32>
      %533 = vector.extract_strided_slice %525 {offsets = [1, 0], sizes = [8, 256], strides = [1, 1]} : vector<12x256xf32> to vector<8x256xf32>
      %c0_187 = arith.constant 0 : index
      %c58 = arith.constant 58 : index
      %c0_188 = arith.constant 0 : index
      %534 = vector.load %arg3[%c0_187, %c58, %c0_188] : memref<1x125x256xf32, #tpu.memory_space<vmem>>, vector<1x1x256xf32>
      %535 = vector.shape_cast %534 : vector<1x1x256xf32> to vector<256xf32>
      %536 = vector.shape_cast %535 : vector<256xf32> to vector<1x256xf32>
      %537 = vector.broadcast %536 : vector<1x256xf32> to vector<8x256xf32>
      %538 = arith.mulf %533, %537 : vector<8x256xf32>
      %539 = arith.addf %532, %538 : vector<8x256xf32>
      %540 = vector.extract_strided_slice %525 {offsets = [2, 0], sizes = [8, 256], strides = [1, 1]} : vector<12x256xf32> to vector<8x256xf32>
      %c0_189 = arith.constant 0 : index
      %c63 = arith.constant 63 : index
      %c0_190 = arith.constant 0 : index
      %541 = vector.load %arg3[%c0_189, %c63, %c0_190] : memref<1x125x256xf32, #tpu.memory_space<vmem>>, vector<1x1x256xf32>
      %542 = vector.shape_cast %541 : vector<1x1x256xf32> to vector<256xf32>
      %543 = vector.shape_cast %542 : vector<256xf32> to vector<1x256xf32>
      %544 = vector.broadcast %543 : vector<1x256xf32> to vector<8x256xf32>
      %545 = arith.mulf %540, %544 : vector<8x256xf32>
      %546 = arith.addf %539, %545 : vector<8x256xf32>
      %547 = vector.extract_strided_slice %525 {offsets = [3, 0], sizes = [8, 256], strides = [1, 1]} : vector<12x256xf32> to vector<8x256xf32>
      %c0_191 = arith.constant 0 : index
      %c68 = arith.constant 68 : index
      %c0_192 = arith.constant 0 : index
      %548 = vector.load %arg3[%c0_191, %c68, %c0_192] : memref<1x125x256xf32, #tpu.memory_space<vmem>>, vector<1x1x256xf32>
      %549 = vector.shape_cast %548 : vector<1x1x256xf32> to vector<256xf32>
      %550 = vector.shape_cast %549 : vector<256xf32> to vector<1x256xf32>
      %551 = vector.broadcast %550 : vector<1x256xf32> to vector<8x256xf32>
      %552 = arith.mulf %547, %551 : vector<8x256xf32>
      %553 = arith.addf %546, %552 : vector<8x256xf32>
      %554 = vector.extract_strided_slice %525 {offsets = [4, 0], sizes = [8, 256], strides = [1, 1]} : vector<12x256xf32> to vector<8x256xf32>
      %c0_193 = arith.constant 0 : index
      %c73 = arith.constant 73 : index
      %c0_194 = arith.constant 0 : index
      %555 = vector.load %arg3[%c0_193, %c73, %c0_194] : memref<1x125x256xf32, #tpu.memory_space<vmem>>, vector<1x1x256xf32>
      %556 = vector.shape_cast %555 : vector<1x1x256xf32> to vector<256xf32>
      %557 = vector.shape_cast %556 : vector<256xf32> to vector<1x256xf32>
      %558 = vector.broadcast %557 : vector<1x256xf32> to vector<8x256xf32>
      %559 = arith.mulf %554, %558 : vector<8x256xf32>
      %560 = arith.addf %553, %559 : vector<8x256xf32>
      %c2_i32_195 = arith.constant 2 : i32
      %561 = arith.addi %13, %c2_i32_195 : i32
      %562 = arith.index_cast %561 : i32 to index
      %c0_196 = arith.constant 0 : index
      %c192_197 = arith.constant 192 : index
      %563 = vector.load %arg7[%562, %c0_196, %c192_197] : memref<8x12x512xf32, #tpu.memory_space<vmem>>, vector<1x12x256xf32>
      %564 = vector.shape_cast %563 : vector<1x12x256xf32> to vector<12x256xf32>
      %565 = vector.extract_strided_slice %564 {offsets = [0, 0], sizes = [8, 256], strides = [1, 1]} : vector<12x256xf32> to vector<8x256xf32>
      %c0_198 = arith.constant 0 : index
      %c54 = arith.constant 54 : index
      %c0_199 = arith.constant 0 : index
      %566 = vector.load %arg3[%c0_198, %c54, %c0_199] : memref<1x125x256xf32, #tpu.memory_space<vmem>>, vector<1x1x256xf32>
      %567 = vector.shape_cast %566 : vector<1x1x256xf32> to vector<256xf32>
      %568 = vector.shape_cast %567 : vector<256xf32> to vector<1x256xf32>
      %569 = vector.broadcast %568 : vector<1x256xf32> to vector<8x256xf32>
      %570 = arith.mulf %565, %569 : vector<8x256xf32>
      %571 = arith.addf %560, %570 : vector<8x256xf32>
      %572 = vector.extract_strided_slice %564 {offsets = [1, 0], sizes = [8, 256], strides = [1, 1]} : vector<12x256xf32> to vector<8x256xf32>
      %c0_200 = arith.constant 0 : index
      %c59 = arith.constant 59 : index
      %c0_201 = arith.constant 0 : index
      %573 = vector.load %arg3[%c0_200, %c59, %c0_201] : memref<1x125x256xf32, #tpu.memory_space<vmem>>, vector<1x1x256xf32>
      %574 = vector.shape_cast %573 : vector<1x1x256xf32> to vector<256xf32>
      %575 = vector.shape_cast %574 : vector<256xf32> to vector<1x256xf32>
      %576 = vector.broadcast %575 : vector<1x256xf32> to vector<8x256xf32>
      %577 = arith.mulf %572, %576 : vector<8x256xf32>
      %578 = arith.addf %571, %577 : vector<8x256xf32>
      %579 = vector.extract_strided_slice %564 {offsets = [2, 0], sizes = [8, 256], strides = [1, 1]} : vector<12x256xf32> to vector<8x256xf32>
      %c0_202 = arith.constant 0 : index
      %c64_203 = arith.constant 64 : index
      %c0_204 = arith.constant 0 : index
      %580 = vector.load %arg3[%c0_202, %c64_203, %c0_204] : memref<1x125x256xf32, #tpu.memory_space<vmem>>, vector<1x1x256xf32>
      %581 = vector.shape_cast %580 : vector<1x1x256xf32> to vector<256xf32>
      %582 = vector.shape_cast %581 : vector<256xf32> to vector<1x256xf32>
      %583 = vector.broadcast %582 : vector<1x256xf32> to vector<8x256xf32>
      %584 = arith.mulf %579, %583 : vector<8x256xf32>
      %585 = arith.addf %578, %584 : vector<8x256xf32>
      %586 = vector.extract_strided_slice %564 {offsets = [3, 0], sizes = [8, 256], strides = [1, 1]} : vector<12x256xf32> to vector<8x256xf32>
      %c0_205 = arith.constant 0 : index
      %c69 = arith.constant 69 : index
      %c0_206 = arith.constant 0 : index
      %587 = vector.load %arg3[%c0_205, %c69, %c0_206] : memref<1x125x256xf32, #tpu.memory_space<vmem>>, vector<1x1x256xf32>
      %588 = vector.shape_cast %587 : vector<1x1x256xf32> to vector<256xf32>
      %589 = vector.shape_cast %588 : vector<256xf32> to vector<1x256xf32>
      %590 = vector.broadcast %589 : vector<1x256xf32> to vector<8x256xf32>
      %591 = arith.mulf %586, %590 : vector<8x256xf32>
      %592 = arith.addf %585, %591 : vector<8x256xf32>
      %593 = vector.extract_strided_slice %564 {offsets = [4, 0], sizes = [8, 256], strides = [1, 1]} : vector<12x256xf32> to vector<8x256xf32>
      %c0_207 = arith.constant 0 : index
      %c74 = arith.constant 74 : index
      %c0_208 = arith.constant 0 : index
      %594 = vector.load %arg3[%c0_207, %c74, %c0_208] : memref<1x125x256xf32, #tpu.memory_space<vmem>>, vector<1x1x256xf32>
      %595 = vector.shape_cast %594 : vector<1x1x256xf32> to vector<256xf32>
      %596 = vector.shape_cast %595 : vector<256xf32> to vector<1x256xf32>
      %597 = vector.broadcast %596 : vector<1x256xf32> to vector<8x256xf32>
      %598 = arith.mulf %593, %597 : vector<8x256xf32>
      %599 = arith.addf %592, %598 : vector<8x256xf32>
      %c3_i32 = arith.constant 3 : i32
      %600 = arith.addi %13, %c3_i32 : i32
      %601 = arith.index_cast %600 : i32 to index
      %c0_209 = arith.constant 0 : index
      %c64_210 = arith.constant 64 : index
      %602 = vector.load %arg7[%601, %c0_209, %c64_210] : memref<8x12x512xf32, #tpu.memory_space<vmem>>, vector<1x12x256xf32>
      %603 = vector.shape_cast %602 : vector<1x12x256xf32> to vector<12x256xf32>
      %604 = vector.extract_strided_slice %603 {offsets = [0, 0], sizes = [8, 256], strides = [1, 1]} : vector<12x256xf32> to vector<8x256xf32>
      %c0_211 = arith.constant 0 : index
      %c75 = arith.constant 75 : index
      %c0_212 = arith.constant 0 : index
      %605 = vector.load %arg3[%c0_211, %c75, %c0_212] : memref<1x125x256xf32, #tpu.memory_space<vmem>>, vector<1x1x256xf32>
      %606 = vector.shape_cast %605 : vector<1x1x256xf32> to vector<256xf32>
      %607 = vector.shape_cast %606 : vector<256xf32> to vector<1x256xf32>
      %608 = vector.broadcast %607 : vector<1x256xf32> to vector<8x256xf32>
      %609 = arith.mulf %604, %608 : vector<8x256xf32>
      %610 = arith.addf %599, %609 : vector<8x256xf32>
      %611 = vector.extract_strided_slice %603 {offsets = [1, 0], sizes = [8, 256], strides = [1, 1]} : vector<12x256xf32> to vector<8x256xf32>
      %c0_213 = arith.constant 0 : index
      %c80 = arith.constant 80 : index
      %c0_214 = arith.constant 0 : index
      %612 = vector.load %arg3[%c0_213, %c80, %c0_214] : memref<1x125x256xf32, #tpu.memory_space<vmem>>, vector<1x1x256xf32>
      %613 = vector.shape_cast %612 : vector<1x1x256xf32> to vector<256xf32>
      %614 = vector.shape_cast %613 : vector<256xf32> to vector<1x256xf32>
      %615 = vector.broadcast %614 : vector<1x256xf32> to vector<8x256xf32>
      %616 = arith.mulf %611, %615 : vector<8x256xf32>
      %617 = arith.addf %610, %616 : vector<8x256xf32>
      %618 = vector.extract_strided_slice %603 {offsets = [2, 0], sizes = [8, 256], strides = [1, 1]} : vector<12x256xf32> to vector<8x256xf32>
      %c0_215 = arith.constant 0 : index
      %c85 = arith.constant 85 : index
      %c0_216 = arith.constant 0 : index
      %619 = vector.load %arg3[%c0_215, %c85, %c0_216] : memref<1x125x256xf32, #tpu.memory_space<vmem>>, vector<1x1x256xf32>
      %620 = vector.shape_cast %619 : vector<1x1x256xf32> to vector<256xf32>
      %621 = vector.shape_cast %620 : vector<256xf32> to vector<1x256xf32>
      %622 = vector.broadcast %621 : vector<1x256xf32> to vector<8x256xf32>
      %623 = arith.mulf %618, %622 : vector<8x256xf32>
      %624 = arith.addf %617, %623 : vector<8x256xf32>
      %625 = vector.extract_strided_slice %603 {offsets = [3, 0], sizes = [8, 256], strides = [1, 1]} : vector<12x256xf32> to vector<8x256xf32>
      %c0_217 = arith.constant 0 : index
      %c90 = arith.constant 90 : index
      %c0_218 = arith.constant 0 : index
      %626 = vector.load %arg3[%c0_217, %c90, %c0_218] : memref<1x125x256xf32, #tpu.memory_space<vmem>>, vector<1x1x256xf32>
      %627 = vector.shape_cast %626 : vector<1x1x256xf32> to vector<256xf32>
      %628 = vector.shape_cast %627 : vector<256xf32> to vector<1x256xf32>
      %629 = vector.broadcast %628 : vector<1x256xf32> to vector<8x256xf32>
      %630 = arith.mulf %625, %629 : vector<8x256xf32>
      %631 = arith.addf %624, %630 : vector<8x256xf32>
      %632 = vector.extract_strided_slice %603 {offsets = [4, 0], sizes = [8, 256], strides = [1, 1]} : vector<12x256xf32> to vector<8x256xf32>
      %c0_219 = arith.constant 0 : index
      %c95 = arith.constant 95 : index
      %c0_220 = arith.constant 0 : index
      %633 = vector.load %arg3[%c0_219, %c95, %c0_220] : memref<1x125x256xf32, #tpu.memory_space<vmem>>, vector<1x1x256xf32>
      %634 = vector.shape_cast %633 : vector<1x1x256xf32> to vector<256xf32>
      %635 = vector.shape_cast %634 : vector<256xf32> to vector<1x256xf32>
      %636 = vector.broadcast %635 : vector<1x256xf32> to vector<8x256xf32>
      %637 = arith.mulf %632, %636 : vector<8x256xf32>
      %638 = arith.addf %631, %637 : vector<8x256xf32>
      %c3_i32_221 = arith.constant 3 : i32
      %639 = arith.addi %13, %c3_i32_221 : i32
      %640 = arith.index_cast %639 : i32 to index
      %c0_222 = arith.constant 0 : index
      %c96_223 = arith.constant 96 : index
      %641 = vector.load %arg7[%640, %c0_222, %c96_223] : memref<8x12x512xf32, #tpu.memory_space<vmem>>, vector<1x12x256xf32>
      %642 = vector.shape_cast %641 : vector<1x12x256xf32> to vector<12x256xf32>
      %643 = vector.extract_strided_slice %642 {offsets = [0, 0], sizes = [8, 256], strides = [1, 1]} : vector<12x256xf32> to vector<8x256xf32>
      %c0_224 = arith.constant 0 : index
      %c76 = arith.constant 76 : index
      %c0_225 = arith.constant 0 : index
      %644 = vector.load %arg3[%c0_224, %c76, %c0_225] : memref<1x125x256xf32, #tpu.memory_space<vmem>>, vector<1x1x256xf32>
      %645 = vector.shape_cast %644 : vector<1x1x256xf32> to vector<256xf32>
      %646 = vector.shape_cast %645 : vector<256xf32> to vector<1x256xf32>
      %647 = vector.broadcast %646 : vector<1x256xf32> to vector<8x256xf32>
      %648 = arith.mulf %643, %647 : vector<8x256xf32>
      %649 = arith.addf %638, %648 : vector<8x256xf32>
      %650 = vector.extract_strided_slice %642 {offsets = [1, 0], sizes = [8, 256], strides = [1, 1]} : vector<12x256xf32> to vector<8x256xf32>
      %c0_226 = arith.constant 0 : index
      %c81 = arith.constant 81 : index
      %c0_227 = arith.constant 0 : index
      %651 = vector.load %arg3[%c0_226, %c81, %c0_227] : memref<1x125x256xf32, #tpu.memory_space<vmem>>, vector<1x1x256xf32>
      %652 = vector.shape_cast %651 : vector<1x1x256xf32> to vector<256xf32>
      %653 = vector.shape_cast %652 : vector<256xf32> to vector<1x256xf32>
      %654 = vector.broadcast %653 : vector<1x256xf32> to vector<8x256xf32>
      %655 = arith.mulf %650, %654 : vector<8x256xf32>
      %656 = arith.addf %649, %655 : vector<8x256xf32>
      %657 = vector.extract_strided_slice %642 {offsets = [2, 0], sizes = [8, 256], strides = [1, 1]} : vector<12x256xf32> to vector<8x256xf32>
      %c0_228 = arith.constant 0 : index
      %c86 = arith.constant 86 : index
      %c0_229 = arith.constant 0 : index
      %658 = vector.load %arg3[%c0_228, %c86, %c0_229] : memref<1x125x256xf32, #tpu.memory_space<vmem>>, vector<1x1x256xf32>
      %659 = vector.shape_cast %658 : vector<1x1x256xf32> to vector<256xf32>
      %660 = vector.shape_cast %659 : vector<256xf32> to vector<1x256xf32>
      %661 = vector.broadcast %660 : vector<1x256xf32> to vector<8x256xf32>
      %662 = arith.mulf %657, %661 : vector<8x256xf32>
      %663 = arith.addf %656, %662 : vector<8x256xf32>
      %664 = vector.extract_strided_slice %642 {offsets = [3, 0], sizes = [8, 256], strides = [1, 1]} : vector<12x256xf32> to vector<8x256xf32>
      %c0_230 = arith.constant 0 : index
      %c91 = arith.constant 91 : index
      %c0_231 = arith.constant 0 : index
      %665 = vector.load %arg3[%c0_230, %c91, %c0_231] : memref<1x125x256xf32, #tpu.memory_space<vmem>>, vector<1x1x256xf32>
      %666 = vector.shape_cast %665 : vector<1x1x256xf32> to vector<256xf32>
      %667 = vector.shape_cast %666 : vector<256xf32> to vector<1x256xf32>
      %668 = vector.broadcast %667 : vector<1x256xf32> to vector<8x256xf32>
      %669 = arith.mulf %664, %668 : vector<8x256xf32>
      %670 = arith.addf %663, %669 : vector<8x256xf32>
      %671 = vector.extract_strided_slice %642 {offsets = [4, 0], sizes = [8, 256], strides = [1, 1]} : vector<12x256xf32> to vector<8x256xf32>
      %c0_232 = arith.constant 0 : index
      %c96_233 = arith.constant 96 : index
      %c0_234 = arith.constant 0 : index
      %672 = vector.load %arg3[%c0_232, %c96_233, %c0_234] : memref<1x125x256xf32, #tpu.memory_space<vmem>>, vector<1x1x256xf32>
      %673 = vector.shape_cast %672 : vector<1x1x256xf32> to vector<256xf32>
      %674 = vector.shape_cast %673 : vector<256xf32> to vector<1x256xf32>
      %675 = vector.broadcast %674 : vector<1x256xf32> to vector<8x256xf32>
      %676 = arith.mulf %671, %675 : vector<8x256xf32>
      %677 = arith.addf %670, %676 : vector<8x256xf32>
      %c3_i32_235 = arith.constant 3 : i32
      %678 = arith.addi %13, %c3_i32_235 : i32
      %679 = arith.index_cast %678 : i32 to index
      %c0_236 = arith.constant 0 : index
      %c128_237 = arith.constant 128 : index
      %680 = vector.load %arg7[%679, %c0_236, %c128_237] : memref<8x12x512xf32, #tpu.memory_space<vmem>>, vector<1x12x256xf32>
      %681 = vector.shape_cast %680 : vector<1x12x256xf32> to vector<12x256xf32>
      %682 = vector.extract_strided_slice %681 {offsets = [0, 0], sizes = [8, 256], strides = [1, 1]} : vector<12x256xf32> to vector<8x256xf32>
      %c0_238 = arith.constant 0 : index
      %c77 = arith.constant 77 : index
      %c0_239 = arith.constant 0 : index
      %683 = vector.load %arg3[%c0_238, %c77, %c0_239] : memref<1x125x256xf32, #tpu.memory_space<vmem>>, vector<1x1x256xf32>
      %684 = vector.shape_cast %683 : vector<1x1x256xf32> to vector<256xf32>
      %685 = vector.shape_cast %684 : vector<256xf32> to vector<1x256xf32>
      %686 = vector.broadcast %685 : vector<1x256xf32> to vector<8x256xf32>
      %687 = arith.mulf %682, %686 : vector<8x256xf32>
      %688 = arith.addf %677, %687 : vector<8x256xf32>
      %689 = vector.extract_strided_slice %681 {offsets = [1, 0], sizes = [8, 256], strides = [1, 1]} : vector<12x256xf32> to vector<8x256xf32>
      %c0_240 = arith.constant 0 : index
      %c82 = arith.constant 82 : index
      %c0_241 = arith.constant 0 : index
      %690 = vector.load %arg3[%c0_240, %c82, %c0_241] : memref<1x125x256xf32, #tpu.memory_space<vmem>>, vector<1x1x256xf32>
      %691 = vector.shape_cast %690 : vector<1x1x256xf32> to vector<256xf32>
      %692 = vector.shape_cast %691 : vector<256xf32> to vector<1x256xf32>
      %693 = vector.broadcast %692 : vector<1x256xf32> to vector<8x256xf32>
      %694 = arith.mulf %689, %693 : vector<8x256xf32>
      %695 = arith.addf %688, %694 : vector<8x256xf32>
      %696 = vector.extract_strided_slice %681 {offsets = [2, 0], sizes = [8, 256], strides = [1, 1]} : vector<12x256xf32> to vector<8x256xf32>
      %c0_242 = arith.constant 0 : index
      %c87 = arith.constant 87 : index
      %c0_243 = arith.constant 0 : index
      %697 = vector.load %arg3[%c0_242, %c87, %c0_243] : memref<1x125x256xf32, #tpu.memory_space<vmem>>, vector<1x1x256xf32>
      %698 = vector.shape_cast %697 : vector<1x1x256xf32> to vector<256xf32>
      %699 = vector.shape_cast %698 : vector<256xf32> to vector<1x256xf32>
      %700 = vector.broadcast %699 : vector<1x256xf32> to vector<8x256xf32>
      %701 = arith.mulf %696, %700 : vector<8x256xf32>
      %702 = arith.addf %695, %701 : vector<8x256xf32>
      %703 = vector.extract_strided_slice %681 {offsets = [3, 0], sizes = [8, 256], strides = [1, 1]} : vector<12x256xf32> to vector<8x256xf32>
      %c0_244 = arith.constant 0 : index
      %c92 = arith.constant 92 : index
      %c0_245 = arith.constant 0 : index
      %704 = vector.load %arg3[%c0_244, %c92, %c0_245] : memref<1x125x256xf32, #tpu.memory_space<vmem>>, vector<1x1x256xf32>
      %705 = vector.shape_cast %704 : vector<1x1x256xf32> to vector<256xf32>
      %706 = vector.shape_cast %705 : vector<256xf32> to vector<1x256xf32>
      %707 = vector.broadcast %706 : vector<1x256xf32> to vector<8x256xf32>
      %708 = arith.mulf %703, %707 : vector<8x256xf32>
      %709 = arith.addf %702, %708 : vector<8x256xf32>
      %710 = vector.extract_strided_slice %681 {offsets = [4, 0], sizes = [8, 256], strides = [1, 1]} : vector<12x256xf32> to vector<8x256xf32>
      %c0_246 = arith.constant 0 : index
      %c97 = arith.constant 97 : index
      %c0_247 = arith.constant 0 : index
      %711 = vector.load %arg3[%c0_246, %c97, %c0_247] : memref<1x125x256xf32, #tpu.memory_space<vmem>>, vector<1x1x256xf32>
      %712 = vector.shape_cast %711 : vector<1x1x256xf32> to vector<256xf32>
      %713 = vector.shape_cast %712 : vector<256xf32> to vector<1x256xf32>
      %714 = vector.broadcast %713 : vector<1x256xf32> to vector<8x256xf32>
      %715 = arith.mulf %710, %714 : vector<8x256xf32>
      %716 = arith.addf %709, %715 : vector<8x256xf32>
      %c3_i32_248 = arith.constant 3 : i32
      %717 = arith.addi %13, %c3_i32_248 : i32
      %718 = arith.index_cast %717 : i32 to index
      %c0_249 = arith.constant 0 : index
      %c160_250 = arith.constant 160 : index
      %719 = vector.load %arg7[%718, %c0_249, %c160_250] : memref<8x12x512xf32, #tpu.memory_space<vmem>>, vector<1x12x256xf32>
      %720 = vector.shape_cast %719 : vector<1x12x256xf32> to vector<12x256xf32>
      %721 = vector.extract_strided_slice %720 {offsets = [0, 0], sizes = [8, 256], strides = [1, 1]} : vector<12x256xf32> to vector<8x256xf32>
      %c0_251 = arith.constant 0 : index
      %c78 = arith.constant 78 : index
      %c0_252 = arith.constant 0 : index
      %722 = vector.load %arg3[%c0_251, %c78, %c0_252] : memref<1x125x256xf32, #tpu.memory_space<vmem>>, vector<1x1x256xf32>
      %723 = vector.shape_cast %722 : vector<1x1x256xf32> to vector<256xf32>
      %724 = vector.shape_cast %723 : vector<256xf32> to vector<1x256xf32>
      %725 = vector.broadcast %724 : vector<1x256xf32> to vector<8x256xf32>
      %726 = arith.mulf %721, %725 : vector<8x256xf32>
      %727 = arith.addf %716, %726 : vector<8x256xf32>
      %728 = vector.extract_strided_slice %720 {offsets = [1, 0], sizes = [8, 256], strides = [1, 1]} : vector<12x256xf32> to vector<8x256xf32>
      %c0_253 = arith.constant 0 : index
      %c83 = arith.constant 83 : index
      %c0_254 = arith.constant 0 : index
      %729 = vector.load %arg3[%c0_253, %c83, %c0_254] : memref<1x125x256xf32, #tpu.memory_space<vmem>>, vector<1x1x256xf32>
      %730 = vector.shape_cast %729 : vector<1x1x256xf32> to vector<256xf32>
      %731 = vector.shape_cast %730 : vector<256xf32> to vector<1x256xf32>
      %732 = vector.broadcast %731 : vector<1x256xf32> to vector<8x256xf32>
      %733 = arith.mulf %728, %732 : vector<8x256xf32>
      %734 = arith.addf %727, %733 : vector<8x256xf32>
      %735 = vector.extract_strided_slice %720 {offsets = [2, 0], sizes = [8, 256], strides = [1, 1]} : vector<12x256xf32> to vector<8x256xf32>
      %c0_255 = arith.constant 0 : index
      %c88 = arith.constant 88 : index
      %c0_256 = arith.constant 0 : index
      %736 = vector.load %arg3[%c0_255, %c88, %c0_256] : memref<1x125x256xf32, #tpu.memory_space<vmem>>, vector<1x1x256xf32>
      %737 = vector.shape_cast %736 : vector<1x1x256xf32> to vector<256xf32>
      %738 = vector.shape_cast %737 : vector<256xf32> to vector<1x256xf32>
      %739 = vector.broadcast %738 : vector<1x256xf32> to vector<8x256xf32>
      %740 = arith.mulf %735, %739 : vector<8x256xf32>
      %741 = arith.addf %734, %740 : vector<8x256xf32>
      %742 = vector.extract_strided_slice %720 {offsets = [3, 0], sizes = [8, 256], strides = [1, 1]} : vector<12x256xf32> to vector<8x256xf32>
      %c0_257 = arith.constant 0 : index
      %c93 = arith.constant 93 : index
      %c0_258 = arith.constant 0 : index
      %743 = vector.load %arg3[%c0_257, %c93, %c0_258] : memref<1x125x256xf32, #tpu.memory_space<vmem>>, vector<1x1x256xf32>
      %744 = vector.shape_cast %743 : vector<1x1x256xf32> to vector<256xf32>
      %745 = vector.shape_cast %744 : vector<256xf32> to vector<1x256xf32>
      %746 = vector.broadcast %745 : vector<1x256xf32> to vector<8x256xf32>
      %747 = arith.mulf %742, %746 : vector<8x256xf32>
      %748 = arith.addf %741, %747 : vector<8x256xf32>
      %749 = vector.extract_strided_slice %720 {offsets = [4, 0], sizes = [8, 256], strides = [1, 1]} : vector<12x256xf32> to vector<8x256xf32>
      %c0_259 = arith.constant 0 : index
      %c98 = arith.constant 98 : index
      %c0_260 = arith.constant 0 : index
      %750 = vector.load %arg3[%c0_259, %c98, %c0_260] : memref<1x125x256xf32, #tpu.memory_space<vmem>>, vector<1x1x256xf32>
      %751 = vector.shape_cast %750 : vector<1x1x256xf32> to vector<256xf32>
      %752 = vector.shape_cast %751 : vector<256xf32> to vector<1x256xf32>
      %753 = vector.broadcast %752 : vector<1x256xf32> to vector<8x256xf32>
      %754 = arith.mulf %749, %753 : vector<8x256xf32>
      %755 = arith.addf %748, %754 : vector<8x256xf32>
      %c3_i32_261 = arith.constant 3 : i32
      %756 = arith.addi %13, %c3_i32_261 : i32
      %757 = arith.index_cast %756 : i32 to index
      %c0_262 = arith.constant 0 : index
      %c192_263 = arith.constant 192 : index
      %758 = vector.load %arg7[%757, %c0_262, %c192_263] : memref<8x12x512xf32, #tpu.memory_space<vmem>>, vector<1x12x256xf32>
      %759 = vector.shape_cast %758 : vector<1x12x256xf32> to vector<12x256xf32>
      %760 = vector.extract_strided_slice %759 {offsets = [0, 0], sizes = [8, 256], strides = [1, 1]} : vector<12x256xf32> to vector<8x256xf32>
      %c0_264 = arith.constant 0 : index
      %c79 = arith.constant 79 : index
      %c0_265 = arith.constant 0 : index
      %761 = vector.load %arg3[%c0_264, %c79, %c0_265] : memref<1x125x256xf32, #tpu.memory_space<vmem>>, vector<1x1x256xf32>
      %762 = vector.shape_cast %761 : vector<1x1x256xf32> to vector<256xf32>
      %763 = vector.shape_cast %762 : vector<256xf32> to vector<1x256xf32>
      %764 = vector.broadcast %763 : vector<1x256xf32> to vector<8x256xf32>
      %765 = arith.mulf %760, %764 : vector<8x256xf32>
      %766 = arith.addf %755, %765 : vector<8x256xf32>
      %767 = vector.extract_strided_slice %759 {offsets = [1, 0], sizes = [8, 256], strides = [1, 1]} : vector<12x256xf32> to vector<8x256xf32>
      %c0_266 = arith.constant 0 : index
      %c84 = arith.constant 84 : index
      %c0_267 = arith.constant 0 : index
      %768 = vector.load %arg3[%c0_266, %c84, %c0_267] : memref<1x125x256xf32, #tpu.memory_space<vmem>>, vector<1x1x256xf32>
      %769 = vector.shape_cast %768 : vector<1x1x256xf32> to vector<256xf32>
      %770 = vector.shape_cast %769 : vector<256xf32> to vector<1x256xf32>
      %771 = vector.broadcast %770 : vector<1x256xf32> to vector<8x256xf32>
      %772 = arith.mulf %767, %771 : vector<8x256xf32>
      %773 = arith.addf %766, %772 : vector<8x256xf32>
      %774 = vector.extract_strided_slice %759 {offsets = [2, 0], sizes = [8, 256], strides = [1, 1]} : vector<12x256xf32> to vector<8x256xf32>
      %c0_268 = arith.constant 0 : index
      %c89 = arith.constant 89 : index
      %c0_269 = arith.constant 0 : index
      %775 = vector.load %arg3[%c0_268, %c89, %c0_269] : memref<1x125x256xf32, #tpu.memory_space<vmem>>, vector<1x1x256xf32>
      %776 = vector.shape_cast %775 : vector<1x1x256xf32> to vector<256xf32>
      %777 = vector.shape_cast %776 : vector<256xf32> to vector<1x256xf32>
      %778 = vector.broadcast %777 : vector<1x256xf32> to vector<8x256xf32>
      %779 = arith.mulf %774, %778 : vector<8x256xf32>
      %780 = arith.addf %773, %779 : vector<8x256xf32>
      %781 = vector.extract_strided_slice %759 {offsets = [3, 0], sizes = [8, 256], strides = [1, 1]} : vector<12x256xf32> to vector<8x256xf32>
      %c0_270 = arith.constant 0 : index
      %c94 = arith.constant 94 : index
      %c0_271 = arith.constant 0 : index
      %782 = vector.load %arg3[%c0_270, %c94, %c0_271] : memref<1x125x256xf32, #tpu.memory_space<vmem>>, vector<1x1x256xf32>
      %783 = vector.shape_cast %782 : vector<1x1x256xf32> to vector<256xf32>
      %784 = vector.shape_cast %783 : vector<256xf32> to vector<1x256xf32>
      %785 = vector.broadcast %784 : vector<1x256xf32> to vector<8x256xf32>
      %786 = arith.mulf %781, %785 : vector<8x256xf32>
      %787 = arith.addf %780, %786 : vector<8x256xf32>
      %788 = vector.extract_strided_slice %759 {offsets = [4, 0], sizes = [8, 256], strides = [1, 1]} : vector<12x256xf32> to vector<8x256xf32>
      %c0_272 = arith.constant 0 : index
      %c99 = arith.constant 99 : index
      %c0_273 = arith.constant 0 : index
      %789 = vector.load %arg3[%c0_272, %c99, %c0_273] : memref<1x125x256xf32, #tpu.memory_space<vmem>>, vector<1x1x256xf32>
      %790 = vector.shape_cast %789 : vector<1x1x256xf32> to vector<256xf32>
      %791 = vector.shape_cast %790 : vector<256xf32> to vector<1x256xf32>
      %792 = vector.broadcast %791 : vector<1x256xf32> to vector<8x256xf32>
      %793 = arith.mulf %788, %792 : vector<8x256xf32>
      %794 = arith.addf %787, %793 : vector<8x256xf32>
      %c4_i32_274 = arith.constant 4 : i32
      %795 = arith.addi %13, %c4_i32_274 : i32
      %796 = arith.index_cast %795 : i32 to index
      %c0_275 = arith.constant 0 : index
      %c64_276 = arith.constant 64 : index
      %797 = vector.load %arg7[%796, %c0_275, %c64_276] : memref<8x12x512xf32, #tpu.memory_space<vmem>>, vector<1x12x256xf32>
      %798 = vector.shape_cast %797 : vector<1x12x256xf32> to vector<12x256xf32>
      %799 = vector.extract_strided_slice %798 {offsets = [0, 0], sizes = [8, 256], strides = [1, 1]} : vector<12x256xf32> to vector<8x256xf32>
      %c0_277 = arith.constant 0 : index
      %c100 = arith.constant 100 : index
      %c0_278 = arith.constant 0 : index
      %800 = vector.load %arg3[%c0_277, %c100, %c0_278] : memref<1x125x256xf32, #tpu.memory_space<vmem>>, vector<1x1x256xf32>
      %801 = vector.shape_cast %800 : vector<1x1x256xf32> to vector<256xf32>
      %802 = vector.shape_cast %801 : vector<256xf32> to vector<1x256xf32>
      %803 = vector.broadcast %802 : vector<1x256xf32> to vector<8x256xf32>
      %804 = arith.mulf %799, %803 : vector<8x256xf32>
      %805 = arith.addf %794, %804 : vector<8x256xf32>
      %806 = vector.extract_strided_slice %798 {offsets = [1, 0], sizes = [8, 256], strides = [1, 1]} : vector<12x256xf32> to vector<8x256xf32>
      %c0_279 = arith.constant 0 : index
      %c105 = arith.constant 105 : index
      %c0_280 = arith.constant 0 : index
      %807 = vector.load %arg3[%c0_279, %c105, %c0_280] : memref<1x125x256xf32, #tpu.memory_space<vmem>>, vector<1x1x256xf32>
      %808 = vector.shape_cast %807 : vector<1x1x256xf32> to vector<256xf32>
      %809 = vector.shape_cast %808 : vector<256xf32> to vector<1x256xf32>
      %810 = vector.broadcast %809 : vector<1x256xf32> to vector<8x256xf32>
      %811 = arith.mulf %806, %810 : vector<8x256xf32>
      %812 = arith.addf %805, %811 : vector<8x256xf32>
      %813 = vector.extract_strided_slice %798 {offsets = [2, 0], sizes = [8, 256], strides = [1, 1]} : vector<12x256xf32> to vector<8x256xf32>
      %c0_281 = arith.constant 0 : index
      %c110 = arith.constant 110 : index
      %c0_282 = arith.constant 0 : index
      %814 = vector.load %arg3[%c0_281, %c110, %c0_282] : memref<1x125x256xf32, #tpu.memory_space<vmem>>, vector<1x1x256xf32>
      %815 = vector.shape_cast %814 : vector<1x1x256xf32> to vector<256xf32>
      %816 = vector.shape_cast %815 : vector<256xf32> to vector<1x256xf32>
      %817 = vector.broadcast %816 : vector<1x256xf32> to vector<8x256xf32>
      %818 = arith.mulf %813, %817 : vector<8x256xf32>
      %819 = arith.addf %812, %818 : vector<8x256xf32>
      %820 = vector.extract_strided_slice %798 {offsets = [3, 0], sizes = [8, 256], strides = [1, 1]} : vector<12x256xf32> to vector<8x256xf32>
      %c0_283 = arith.constant 0 : index
      %c115 = arith.constant 115 : index
      %c0_284 = arith.constant 0 : index
      %821 = vector.load %arg3[%c0_283, %c115, %c0_284] : memref<1x125x256xf32, #tpu.memory_space<vmem>>, vector<1x1x256xf32>
      %822 = vector.shape_cast %821 : vector<1x1x256xf32> to vector<256xf32>
      %823 = vector.shape_cast %822 : vector<256xf32> to vector<1x256xf32>
      %824 = vector.broadcast %823 : vector<1x256xf32> to vector<8x256xf32>
      %825 = arith.mulf %820, %824 : vector<8x256xf32>
      %826 = arith.addf %819, %825 : vector<8x256xf32>
      %827 = vector.extract_strided_slice %798 {offsets = [4, 0], sizes = [8, 256], strides = [1, 1]} : vector<12x256xf32> to vector<8x256xf32>
      %c0_285 = arith.constant 0 : index
      %c120 = arith.constant 120 : index
      %c0_286 = arith.constant 0 : index
      %828 = vector.load %arg3[%c0_285, %c120, %c0_286] : memref<1x125x256xf32, #tpu.memory_space<vmem>>, vector<1x1x256xf32>
      %829 = vector.shape_cast %828 : vector<1x1x256xf32> to vector<256xf32>
      %830 = vector.shape_cast %829 : vector<256xf32> to vector<1x256xf32>
      %831 = vector.broadcast %830 : vector<1x256xf32> to vector<8x256xf32>
      %832 = arith.mulf %827, %831 : vector<8x256xf32>
      %833 = arith.addf %826, %832 : vector<8x256xf32>
      %c4_i32_287 = arith.constant 4 : i32
      %834 = arith.addi %13, %c4_i32_287 : i32
      %835 = arith.index_cast %834 : i32 to index
      %c0_288 = arith.constant 0 : index
      %c96_289 = arith.constant 96 : index
      %836 = vector.load %arg7[%835, %c0_288, %c96_289] : memref<8x12x512xf32, #tpu.memory_space<vmem>>, vector<1x12x256xf32>
      %837 = vector.shape_cast %836 : vector<1x12x256xf32> to vector<12x256xf32>
      %838 = vector.extract_strided_slice %837 {offsets = [0, 0], sizes = [8, 256], strides = [1, 1]} : vector<12x256xf32> to vector<8x256xf32>
      %c0_290 = arith.constant 0 : index
      %c101 = arith.constant 101 : index
      %c0_291 = arith.constant 0 : index
      %839 = vector.load %arg3[%c0_290, %c101, %c0_291] : memref<1x125x256xf32, #tpu.memory_space<vmem>>, vector<1x1x256xf32>
      %840 = vector.shape_cast %839 : vector<1x1x256xf32> to vector<256xf32>
      %841 = vector.shape_cast %840 : vector<256xf32> to vector<1x256xf32>
      %842 = vector.broadcast %841 : vector<1x256xf32> to vector<8x256xf32>
      %843 = arith.mulf %838, %842 : vector<8x256xf32>
      %844 = arith.addf %833, %843 : vector<8x256xf32>
      %845 = vector.extract_strided_slice %837 {offsets = [1, 0], sizes = [8, 256], strides = [1, 1]} : vector<12x256xf32> to vector<8x256xf32>
      %c0_292 = arith.constant 0 : index
      %c106 = arith.constant 106 : index
      %c0_293 = arith.constant 0 : index
      %846 = vector.load %arg3[%c0_292, %c106, %c0_293] : memref<1x125x256xf32, #tpu.memory_space<vmem>>, vector<1x1x256xf32>
      %847 = vector.shape_cast %846 : vector<1x1x256xf32> to vector<256xf32>
      %848 = vector.shape_cast %847 : vector<256xf32> to vector<1x256xf32>
      %849 = vector.broadcast %848 : vector<1x256xf32> to vector<8x256xf32>
      %850 = arith.mulf %845, %849 : vector<8x256xf32>
      %851 = arith.addf %844, %850 : vector<8x256xf32>
      %852 = vector.extract_strided_slice %837 {offsets = [2, 0], sizes = [8, 256], strides = [1, 1]} : vector<12x256xf32> to vector<8x256xf32>
      %c0_294 = arith.constant 0 : index
      %c111 = arith.constant 111 : index
      %c0_295 = arith.constant 0 : index
      %853 = vector.load %arg3[%c0_294, %c111, %c0_295] : memref<1x125x256xf32, #tpu.memory_space<vmem>>, vector<1x1x256xf32>
      %854 = vector.shape_cast %853 : vector<1x1x256xf32> to vector<256xf32>
      %855 = vector.shape_cast %854 : vector<256xf32> to vector<1x256xf32>
      %856 = vector.broadcast %855 : vector<1x256xf32> to vector<8x256xf32>
      %857 = arith.mulf %852, %856 : vector<8x256xf32>
      %858 = arith.addf %851, %857 : vector<8x256xf32>
      %859 = vector.extract_strided_slice %837 {offsets = [3, 0], sizes = [8, 256], strides = [1, 1]} : vector<12x256xf32> to vector<8x256xf32>
      %c0_296 = arith.constant 0 : index
      %c116 = arith.constant 116 : index
      %c0_297 = arith.constant 0 : index
      %860 = vector.load %arg3[%c0_296, %c116, %c0_297] : memref<1x125x256xf32, #tpu.memory_space<vmem>>, vector<1x1x256xf32>
      %861 = vector.shape_cast %860 : vector<1x1x256xf32> to vector<256xf32>
      %862 = vector.shape_cast %861 : vector<256xf32> to vector<1x256xf32>
      %863 = vector.broadcast %862 : vector<1x256xf32> to vector<8x256xf32>
      %864 = arith.mulf %859, %863 : vector<8x256xf32>
      %865 = arith.addf %858, %864 : vector<8x256xf32>
      %866 = vector.extract_strided_slice %837 {offsets = [4, 0], sizes = [8, 256], strides = [1, 1]} : vector<12x256xf32> to vector<8x256xf32>
      %c0_298 = arith.constant 0 : index
      %c121 = arith.constant 121 : index
      %c0_299 = arith.constant 0 : index
      %867 = vector.load %arg3[%c0_298, %c121, %c0_299] : memref<1x125x256xf32, #tpu.memory_space<vmem>>, vector<1x1x256xf32>
      %868 = vector.shape_cast %867 : vector<1x1x256xf32> to vector<256xf32>
      %869 = vector.shape_cast %868 : vector<256xf32> to vector<1x256xf32>
      %870 = vector.broadcast %869 : vector<1x256xf32> to vector<8x256xf32>
      %871 = arith.mulf %866, %870 : vector<8x256xf32>
      %872 = arith.addf %865, %871 : vector<8x256xf32>
      %c4_i32_300 = arith.constant 4 : i32
      %873 = arith.addi %13, %c4_i32_300 : i32
      %874 = arith.index_cast %873 : i32 to index
      %c0_301 = arith.constant 0 : index
      %c128_302 = arith.constant 128 : index
      %875 = vector.load %arg7[%874, %c0_301, %c128_302] : memref<8x12x512xf32, #tpu.memory_space<vmem>>, vector<1x12x256xf32>
      %876 = vector.shape_cast %875 : vector<1x12x256xf32> to vector<12x256xf32>
      %877 = vector.extract_strided_slice %876 {offsets = [0, 0], sizes = [8, 256], strides = [1, 1]} : vector<12x256xf32> to vector<8x256xf32>
      %c0_303 = arith.constant 0 : index
      %c102 = arith.constant 102 : index
      %c0_304 = arith.constant 0 : index
      %878 = vector.load %arg3[%c0_303, %c102, %c0_304] : memref<1x125x256xf32, #tpu.memory_space<vmem>>, vector<1x1x256xf32>
      %879 = vector.shape_cast %878 : vector<1x1x256xf32> to vector<256xf32>
      %880 = vector.shape_cast %879 : vector<256xf32> to vector<1x256xf32>
      %881 = vector.broadcast %880 : vector<1x256xf32> to vector<8x256xf32>
      %882 = arith.mulf %877, %881 : vector<8x256xf32>
      %883 = arith.addf %872, %882 : vector<8x256xf32>
      %884 = vector.extract_strided_slice %876 {offsets = [1, 0], sizes = [8, 256], strides = [1, 1]} : vector<12x256xf32> to vector<8x256xf32>
      %c0_305 = arith.constant 0 : index
      %c107 = arith.constant 107 : index
      %c0_306 = arith.constant 0 : index
      %885 = vector.load %arg3[%c0_305, %c107, %c0_306] : memref<1x125x256xf32, #tpu.memory_space<vmem>>, vector<1x1x256xf32>
      %886 = vector.shape_cast %885 : vector<1x1x256xf32> to vector<256xf32>
      %887 = vector.shape_cast %886 : vector<256xf32> to vector<1x256xf32>
      %888 = vector.broadcast %887 : vector<1x256xf32> to vector<8x256xf32>
      %889 = arith.mulf %884, %888 : vector<8x256xf32>
      %890 = arith.addf %883, %889 : vector<8x256xf32>
      %891 = vector.extract_strided_slice %876 {offsets = [2, 0], sizes = [8, 256], strides = [1, 1]} : vector<12x256xf32> to vector<8x256xf32>
      %c0_307 = arith.constant 0 : index
      %c112 = arith.constant 112 : index
      %c0_308 = arith.constant 0 : index
      %892 = vector.load %arg3[%c0_307, %c112, %c0_308] : memref<1x125x256xf32, #tpu.memory_space<vmem>>, vector<1x1x256xf32>
      %893 = vector.shape_cast %892 : vector<1x1x256xf32> to vector<256xf32>
      %894 = vector.shape_cast %893 : vector<256xf32> to vector<1x256xf32>
      %895 = vector.broadcast %894 : vector<1x256xf32> to vector<8x256xf32>
      %896 = arith.mulf %891, %895 : vector<8x256xf32>
      %897 = arith.addf %890, %896 : vector<8x256xf32>
      %898 = vector.extract_strided_slice %876 {offsets = [3, 0], sizes = [8, 256], strides = [1, 1]} : vector<12x256xf32> to vector<8x256xf32>
      %c0_309 = arith.constant 0 : index
      %c117 = arith.constant 117 : index
      %c0_310 = arith.constant 0 : index
      %899 = vector.load %arg3[%c0_309, %c117, %c0_310] : memref<1x125x256xf32, #tpu.memory_space<vmem>>, vector<1x1x256xf32>
      %900 = vector.shape_cast %899 : vector<1x1x256xf32> to vector<256xf32>
      %901 = vector.shape_cast %900 : vector<256xf32> to vector<1x256xf32>
      %902 = vector.broadcast %901 : vector<1x256xf32> to vector<8x256xf32>
      %903 = arith.mulf %898, %902 : vector<8x256xf32>
      %904 = arith.addf %897, %903 : vector<8x256xf32>
      %905 = vector.extract_strided_slice %876 {offsets = [4, 0], sizes = [8, 256], strides = [1, 1]} : vector<12x256xf32> to vector<8x256xf32>
      %c0_311 = arith.constant 0 : index
      %c122 = arith.constant 122 : index
      %c0_312 = arith.constant 0 : index
      %906 = vector.load %arg3[%c0_311, %c122, %c0_312] : memref<1x125x256xf32, #tpu.memory_space<vmem>>, vector<1x1x256xf32>
      %907 = vector.shape_cast %906 : vector<1x1x256xf32> to vector<256xf32>
      %908 = vector.shape_cast %907 : vector<256xf32> to vector<1x256xf32>
      %909 = vector.broadcast %908 : vector<1x256xf32> to vector<8x256xf32>
      %910 = arith.mulf %905, %909 : vector<8x256xf32>
      %911 = arith.addf %904, %910 : vector<8x256xf32>
      %c4_i32_313 = arith.constant 4 : i32
      %912 = arith.addi %13, %c4_i32_313 : i32
      %913 = arith.index_cast %912 : i32 to index
      %c0_314 = arith.constant 0 : index
      %c160_315 = arith.constant 160 : index
      %914 = vector.load %arg7[%913, %c0_314, %c160_315] : memref<8x12x512xf32, #tpu.memory_space<vmem>>, vector<1x12x256xf32>
      %915 = vector.shape_cast %914 : vector<1x12x256xf32> to vector<12x256xf32>
      %916 = vector.extract_strided_slice %915 {offsets = [0, 0], sizes = [8, 256], strides = [1, 1]} : vector<12x256xf32> to vector<8x256xf32>
      %c0_316 = arith.constant 0 : index
      %c103 = arith.constant 103 : index
      %c0_317 = arith.constant 0 : index
      %917 = vector.load %arg3[%c0_316, %c103, %c0_317] : memref<1x125x256xf32, #tpu.memory_space<vmem>>, vector<1x1x256xf32>
      %918 = vector.shape_cast %917 : vector<1x1x256xf32> to vector<256xf32>
      %919 = vector.shape_cast %918 : vector<256xf32> to vector<1x256xf32>
      %920 = vector.broadcast %919 : vector<1x256xf32> to vector<8x256xf32>
      %921 = arith.mulf %916, %920 : vector<8x256xf32>
      %922 = arith.addf %911, %921 : vector<8x256xf32>
      %923 = vector.extract_strided_slice %915 {offsets = [1, 0], sizes = [8, 256], strides = [1, 1]} : vector<12x256xf32> to vector<8x256xf32>
      %c0_318 = arith.constant 0 : index
      %c108 = arith.constant 108 : index
      %c0_319 = arith.constant 0 : index
      %924 = vector.load %arg3[%c0_318, %c108, %c0_319] : memref<1x125x256xf32, #tpu.memory_space<vmem>>, vector<1x1x256xf32>
      %925 = vector.shape_cast %924 : vector<1x1x256xf32> to vector<256xf32>
      %926 = vector.shape_cast %925 : vector<256xf32> to vector<1x256xf32>
      %927 = vector.broadcast %926 : vector<1x256xf32> to vector<8x256xf32>
      %928 = arith.mulf %923, %927 : vector<8x256xf32>
      %929 = arith.addf %922, %928 : vector<8x256xf32>
      %930 = vector.extract_strided_slice %915 {offsets = [2, 0], sizes = [8, 256], strides = [1, 1]} : vector<12x256xf32> to vector<8x256xf32>
      %c0_320 = arith.constant 0 : index
      %c113 = arith.constant 113 : index
      %c0_321 = arith.constant 0 : index
      %931 = vector.load %arg3[%c0_320, %c113, %c0_321] : memref<1x125x256xf32, #tpu.memory_space<vmem>>, vector<1x1x256xf32>
      %932 = vector.shape_cast %931 : vector<1x1x256xf32> to vector<256xf32>
      %933 = vector.shape_cast %932 : vector<256xf32> to vector<1x256xf32>
      %934 = vector.broadcast %933 : vector<1x256xf32> to vector<8x256xf32>
      %935 = arith.mulf %930, %934 : vector<8x256xf32>
      %936 = arith.addf %929, %935 : vector<8x256xf32>
      %937 = vector.extract_strided_slice %915 {offsets = [3, 0], sizes = [8, 256], strides = [1, 1]} : vector<12x256xf32> to vector<8x256xf32>
      %c0_322 = arith.constant 0 : index
      %c118 = arith.constant 118 : index
      %c0_323 = arith.constant 0 : index
      %938 = vector.load %arg3[%c0_322, %c118, %c0_323] : memref<1x125x256xf32, #tpu.memory_space<vmem>>, vector<1x1x256xf32>
      %939 = vector.shape_cast %938 : vector<1x1x256xf32> to vector<256xf32>
      %940 = vector.shape_cast %939 : vector<256xf32> to vector<1x256xf32>
      %941 = vector.broadcast %940 : vector<1x256xf32> to vector<8x256xf32>
      %942 = arith.mulf %937, %941 : vector<8x256xf32>
      %943 = arith.addf %936, %942 : vector<8x256xf32>
      %944 = vector.extract_strided_slice %915 {offsets = [4, 0], sizes = [8, 256], strides = [1, 1]} : vector<12x256xf32> to vector<8x256xf32>
      %c0_324 = arith.constant 0 : index
      %c123 = arith.constant 123 : index
      %c0_325 = arith.constant 0 : index
      %945 = vector.load %arg3[%c0_324, %c123, %c0_325] : memref<1x125x256xf32, #tpu.memory_space<vmem>>, vector<1x1x256xf32>
      %946 = vector.shape_cast %945 : vector<1x1x256xf32> to vector<256xf32>
      %947 = vector.shape_cast %946 : vector<256xf32> to vector<1x256xf32>
      %948 = vector.broadcast %947 : vector<1x256xf32> to vector<8x256xf32>
      %949 = arith.mulf %944, %948 : vector<8x256xf32>
      %950 = arith.addf %943, %949 : vector<8x256xf32>
      %c4_i32_326 = arith.constant 4 : i32
      %951 = arith.addi %13, %c4_i32_326 : i32
      %952 = arith.index_cast %951 : i32 to index
      %c0_327 = arith.constant 0 : index
      %c192_328 = arith.constant 192 : index
      %953 = vector.load %arg7[%952, %c0_327, %c192_328] : memref<8x12x512xf32, #tpu.memory_space<vmem>>, vector<1x12x256xf32>
      %954 = vector.shape_cast %953 : vector<1x12x256xf32> to vector<12x256xf32>
      %955 = vector.extract_strided_slice %954 {offsets = [0, 0], sizes = [8, 256], strides = [1, 1]} : vector<12x256xf32> to vector<8x256xf32>
      %c0_329 = arith.constant 0 : index
      %c104 = arith.constant 104 : index
      %c0_330 = arith.constant 0 : index
      %956 = vector.load %arg3[%c0_329, %c104, %c0_330] : memref<1x125x256xf32, #tpu.memory_space<vmem>>, vector<1x1x256xf32>
      %957 = vector.shape_cast %956 : vector<1x1x256xf32> to vector<256xf32>
      %958 = vector.shape_cast %957 : vector<256xf32> to vector<1x256xf32>
      %959 = vector.broadcast %958 : vector<1x256xf32> to vector<8x256xf32>
      %960 = arith.mulf %955, %959 : vector<8x256xf32>
      %961 = arith.addf %950, %960 : vector<8x256xf32>
      %962 = vector.extract_strided_slice %954 {offsets = [1, 0], sizes = [8, 256], strides = [1, 1]} : vector<12x256xf32> to vector<8x256xf32>
      %c0_331 = arith.constant 0 : index
      %c109 = arith.constant 109 : index
      %c0_332 = arith.constant 0 : index
      %963 = vector.load %arg3[%c0_331, %c109, %c0_332] : memref<1x125x256xf32, #tpu.memory_space<vmem>>, vector<1x1x256xf32>
      %964 = vector.shape_cast %963 : vector<1x1x256xf32> to vector<256xf32>
      %965 = vector.shape_cast %964 : vector<256xf32> to vector<1x256xf32>
      %966 = vector.broadcast %965 : vector<1x256xf32> to vector<8x256xf32>
      %967 = arith.mulf %962, %966 : vector<8x256xf32>
      %968 = arith.addf %961, %967 : vector<8x256xf32>
      %969 = vector.extract_strided_slice %954 {offsets = [2, 0], sizes = [8, 256], strides = [1, 1]} : vector<12x256xf32> to vector<8x256xf32>
      %c0_333 = arith.constant 0 : index
      %c114 = arith.constant 114 : index
      %c0_334 = arith.constant 0 : index
      %970 = vector.load %arg3[%c0_333, %c114, %c0_334] : memref<1x125x256xf32, #tpu.memory_space<vmem>>, vector<1x1x256xf32>
      %971 = vector.shape_cast %970 : vector<1x1x256xf32> to vector<256xf32>
      %972 = vector.shape_cast %971 : vector<256xf32> to vector<1x256xf32>
      %973 = vector.broadcast %972 : vector<1x256xf32> to vector<8x256xf32>
      %974 = arith.mulf %969, %973 : vector<8x256xf32>
      %975 = arith.addf %968, %974 : vector<8x256xf32>
      %976 = vector.extract_strided_slice %954 {offsets = [3, 0], sizes = [8, 256], strides = [1, 1]} : vector<12x256xf32> to vector<8x256xf32>
      %c0_335 = arith.constant 0 : index
      %c119 = arith.constant 119 : index
      %c0_336 = arith.constant 0 : index
      %977 = vector.load %arg3[%c0_335, %c119, %c0_336] : memref<1x125x256xf32, #tpu.memory_space<vmem>>, vector<1x1x256xf32>
      %978 = vector.shape_cast %977 : vector<1x1x256xf32> to vector<256xf32>
      %979 = vector.shape_cast %978 : vector<256xf32> to vector<1x256xf32>
      %980 = vector.broadcast %979 : vector<1x256xf32> to vector<8x256xf32>
      %981 = arith.mulf %976, %980 : vector<8x256xf32>
      %982 = arith.addf %975, %981 : vector<8x256xf32>
      %983 = vector.extract_strided_slice %954 {offsets = [4, 0], sizes = [8, 256], strides = [1, 1]} : vector<12x256xf32> to vector<8x256xf32>
      %c0_337 = arith.constant 0 : index
      %c124 = arith.constant 124 : index
      %c0_338 = arith.constant 0 : index
      %984 = vector.load %arg3[%c0_337, %c124, %c0_338] : memref<1x125x256xf32, #tpu.memory_space<vmem>>, vector<1x1x256xf32>
      %985 = vector.shape_cast %984 : vector<1x1x256xf32> to vector<256xf32>
      %986 = vector.shape_cast %985 : vector<256xf32> to vector<1x256xf32>
      %987 = vector.broadcast %986 : vector<1x256xf32> to vector<8x256xf32>
      %988 = arith.mulf %983, %987 : vector<8x256xf32>
      %989 = arith.addf %982, %988 : vector<8x256xf32>
      %c0_339 = arith.constant 0 : index
      %c0_340 = arith.constant 0 : index
      %c0_341 = arith.constant 0 : index
      %990 = vector.load %arg4[%c0_339, %c0_340, %c0_341] : memref<1x1x256xf32, #tpu.memory_space<vmem>>, vector<1x1x256xf32>
      %991 = vector.shape_cast %990 : vector<1x1x256xf32> to vector<1x256xf32>
      %992 = vector.broadcast %991 : vector<1x256xf32> to vector<8x256xf32>
      %993 = arith.addf %989, %992 : vector<8x256xf32>
      %cst_342 = arith.constant 5.000000e-01 : f32
      %994 = vector.broadcast %cst_342 : f32 to vector<8x256xf32>
      %995 = arith.mulf %994, %993 : vector<8x256xf32>
      %cst_343 = arith.constant 0.707106769 : f32
      %996 = vector.broadcast %cst_343 : f32 to vector<8x256xf32>
      %997 = arith.mulf %993, %996 : vector<8x256xf32>
      %998 = math.erf %997 : vector<8x256xf32>
      %cst_344 = arith.constant 1.000000e+00 : f32
      %999 = vector.broadcast %cst_344 : f32 to vector<8x256xf32>
      %1000 = arith.addf %999, %998 : vector<8x256xf32>
      %1001 = arith.mulf %995, %1000 : vector<8x256xf32>
      %c0_345 = arith.constant 0 : index
      %c0_346 = arith.constant 0 : index
      %1002 = arith.index_cast %13 : i32 to index
      %c0_347 = arith.constant 0 : index
      %c0_348 = arith.constant 0 : index
      %1003 = vector.load %arg5[%c0_345, %c0_346, %1002, %c0_347, %c0_348] : memref<1x1x4x8x256xf32, #tpu.memory_space<vmem>>, vector<1x1x1x8x256xf32>
      %1004 = vector.shape_cast %1003 : vector<1x1x1x8x256xf32> to vector<8x256xf32>
      %1005 = vector.shape_cast %1001 : vector<8x256xf32> to vector<1x1x1x8x256xf32>
      tpu.vector_store %arg5[%c0_345, %c0_346, %1002, %c0_347, %c0_348], %1005 {strides = array<i32>} : memref<1x1x4x8x256xf32, #tpu.memory_space<vmem>>, vector<1x1x1x8x256xf32>,
    }
    %c4_i32_14 = arith.constant 4 : i32
    return
  }
  func.func @transform_1(%arg0: i32, %arg1: i32) -> (i32, i32, i32) {
    %c0_i32 = arith.constant 0 : i32
    %c0_i32_0 = arith.constant 0 : i32
    %c0_i32_1 = arith.constant 0 : i32
    return %arg1, %c0_i32, %c0_i32_0 : i32, i32, i32
  }
  func.func @transform_2(%arg0: i32, %arg1: i32) -> (i32, i32, i32) {
    %c0_i32 = arith.constant 0 : i32
    %c0_i32_0 = arith.constant 0 : i32
    %c0_i32_1 = arith.constant 0 : i32
    return %arg1, %c0_i32, %c0_i32_0 : i32, i32, i32
  }
  func.func @transform_3(%arg0: i32, %arg1: i32) -> (i32, i32, i32, i32, i32) {
    %c0_i32 = arith.constant 0 : i32
    %c0_i32_0 = arith.constant 0 : i32
    %c0_i32_1 = arith.constant 0 : i32
    %c0_i32_2 = arith.constant 0 : i32
    return %arg0, %arg1, %c0_i32, %c0_i32_0, %c0_i32_1 : i32, i32, i32, i32, i32
  }
}

</mosaic_0001>

<bundles_post_ra>
// kernel: dwconv3d_forward.1
= control target key start
LH: loop header
LB: loop body
LE: loop exit
PB: predicated region body
PF: predicated region fallthrough
CT: control target
= control target key end

     0   :  { %s6503_s12 = smov 0   ;;  %s6505_s13 = smov 0   ;;  %s10347_s0 = inlined_call_operand.vmem [shape: f32[2,1,4,8,256], index: 0, kind: input, shape index: {}]   ;;  %s10348_s1 = inlined_call_operand.vmem [shape: f32[1,125,256], index: 1, kind: input, shape index: {}]   ;;  %s10349_s2 = inlined_call_operand.vmem [shape: f32[1,1,256], index: 2, kind: input, shape index: {}]   ;;  %s10350_s3 = inlined_call_operand.vmem [shape: f32[2,1,4,8,256], index: 3, kind: output, shape index: {}]  }
   0x1   :  { %s6507_s14 = smov 0  }
   0x2 LB: > { %s25_s15 = sadd.s32 1, %s6465_s13  ;;  %p6161_p0 = scmp.ge.s32.totalorder %s6469_s14, 1  ;;  %s6469_s14 = sphi %s6507_s14, %s13_s14   ;;  %s6465_s13 = sphi %s6505_s13, %s10853_s13   ;;  %s6461_s12 = sphi %s6503_s12, %s10852_s12  }
   0x3   : > { %p27_p1 = scmp.ge.s32.totalorder %s25_s15, 2  ;;  %p136_p2 = scmp.lt.s32.totalorder %s6469_s14, 3 }
   0x5   : > { %s10855_s15 = smov (%p27_p1, %s25_s15), 0  ;;  %p137_p3 = pnand %p6161_p0, %p136_p2 }
   0x6   : > { %p175_p4 = scmp.lt.s32.totalorder (!%p137_p3), %s6461_s12, 1  ;;  %s6341_s16 = sshll.u32 (!%p137_p3), %s6461_s12, 6 }
   0x7   : > { %140 = sbr.rel (%p137_p3) target bundleno = 4155 (0x103b), region = 28  ;;  %s188_s19 = scalar_lea.vmem (!%p137_p3), %s10347_s0, %s6341_s16 }
   0x8   : > { %v221_v0 = vld [vmem:[%s188_s19] sm:$0xff] (!%p137_p3)  ;;  %v223_v1 = vld [vmem:[%s188_s19 + $0x8] sm:$0xff] (!%p137_p3)  ;;  %v225_v2 = vld [vmem:[%s188_s19 + $0x10] sm:$0xff] (!%p137_p3) }
   0x9   : > { %222 = vst [vmem:[#allocation2] sm:$0xff] (!%p137_p3), %v221_v0  ;;  %224 = vst [vmem:[#allocation2 + $0x8] sm:$0xff] (!%p137_p3), %v223_v1  ;;  %v227_v3 = vld [vmem:[%s188_s19 + $0x18] sm:$0xff] (!%p137_p3)  ;;  %v229_v4 = vld [vmem:[%s188_s19 + $0x20] sm:$0xff] (!%p137_p3) }
   0xa   : > { %226 = vst [vmem:[#allocation2 + $0x10] sm:$0xff] (!%p137_p3), %v225_v2  ;;  %v231_v5 = vld [vmem:[%s188_s19 + $0x28] sm:$0xff] (!%p137_p3)  ;;  %228 = vst [vmem:[#allocation2 + $0x18] sm:$0xff] (!%p137_p3), %v227_v3  ;;  %v233_v6 = vld [vmem:[%s188_s19 + $0x30] sm:$0xff] (!%p137_p3) }
   0xb   : > { %230 = vst [vmem:[#allocation2 + $0x20] sm:$0xff] (!%p137_p3), %v229_v4  ;;  %232 = vst [vmem:[#allocation2 + $0x28] sm:$0xff] (!%p137_p3), %v231_v5  ;;  %v235_v7 = vld [vmem:[%s188_s19 + $0x38] sm:$0xff] (!%p137_p3) }
   0xc   : > { %234 = vst [vmem:[#allocation2 + $0x30] sm:$0xff] (!%p137_p3), %v233_v6  ;;  %236 = vst [vmem:[#allocation2 + $0x38] sm:$0xff] (!%p137_p3), %v235_v7 }
   0xe   : > { %s10857_s12 = smov (!%p175_p4, %s6461_s12), 1 }
   0xf   : > { %s6340_s20 = sshll.u32 %s10857_s12, 6 }
  0x10   : > { %s6527_s23 = scalar_lea.vmem %s10350_s3, %s6340_s20 }
  0x11   : > { %244 = vsyncadd [#allocation4], 1024  ;;  %v6479_v8 = vmov 0.0  }
  0x12   : > { %245 = vst [vmem:[#allocation3] sm:$0xff] %v6479_v8  ;;  %246 = vst [vmem:[#allocation3 + $0x8] sm:$0xff] %v6479_v8 }
  0x13   : > { %247 = vst [vmem:[#allocation3 + $0x10] sm:$0xff] %v6479_v8  ;;  %248 = vst [vmem:[#allocation3 + $0x18] sm:$0xff] %v6479_v8 }
  0x14   : > { %249 = vst [vmem:[#allocation3 + $0x20] sm:$0xf] %v6479_v8  ;;  %250 = vst [vmem:[#allocation3 + $0x28] sm:$0xf] %v6479_v8 }
  0x15   : > { %251 = vst [vmem:[#allocation3 + $0x30] sm:$0xf] %v6479_v8  ;;  %252 = vst [vmem:[#allocation3 + $0x38] sm:$0xf] %v6479_v8 }
  0x16   : > { %253 = vst [vmem:[#allocation3 + $0x40] sm:$0xff] %v6479_v8  ;;  %254 = vst [vmem:[#allocation3 + $0x48] sm:$0xff] %v6479_v8 }
  0x17   : > { %255 = vst [vmem:[#allocation3 + $0x50] sm:$0xff] %v6479_v8  ;;  %256 = vst [vmem:[#allocation3 + $0x58] sm:$0xff] %v6479_v8 }
  0x18   : > { %257 = vst [vmem:[#allocation3 + $0x60] sm:$0xf] %v6479_v8  ;;  %258 = vst [vmem:[#allocation3 + $0x68] sm:$0xf] %v6479_v8 }
  0x19   : > { %259 = vst [vmem:[#allocation3 + $0x70] sm:$0xf] %v6479_v8  ;;  %260 = vst [vmem:[#allocation3 + $0x78] sm:$0xf] %v6479_v8 }
  0x1a   : > { %261 = vst [vmem:[#allocation3 + $0x80] sm:$0xff] %v6479_v8  ;;  %262 = vst [vmem:[#allocation3 + $0x88] sm:$0xff] %v6479_v8 }
  0x1b   : > { %263 = vst [vmem:[#allocation3 + $0x90] sm:$0xff] %v6479_v8  ;;  %264 = vst [vmem:[#allocation3 + $0x98] sm:$0xff] %v6479_v8 }
  0x1c   : > { %265 = vst [vmem:[#allocation3 + $0xa0] sm:$0xf] %v6479_v8  ;;  %266 = vst [vmem:[#allocation3 + $0xa8] sm:$0xf] %v6479_v8 }
  0x1d   : > { %267 = vst [vmem:[#allocation3 + $0xb0] sm:$0xf] %v6479_v8  ;;  %268 = vst [vmem:[#allocation3 + $0xb8] sm:$0xf] %v6479_v8 }
  0x1e   : > { %269 = vst [vmem:[#allocation3 + $0xc0] sm:$0xff] %v6479_v8  ;;  %270 = vst [vmem:[#allocation3 + $0xc8] sm:$0xff] %v6479_v8 }
  0x1f   : > { %271 = vst [vmem:[#allocation3 + $0xd0] sm:$0xff] %v6479_v8  ;;  %272 = vst [vmem:[#allocation3 + $0xd8] sm:$0xff] %v6479_v8 }
  0x20   : > { %273 = vst [vmem:[#allocation3 + $0xe0] sm:$0xf] %v6479_v8  ;;  %274 = vst [vmem:[#allocation3 + $0xe8] sm:$0xf] %v6479_v8 }
  0x21   : > { %275 = vst [vmem:[#allocation3 + $0xf0] sm:$0xf] %v6479_v8  ;;  %276 = vst [vmem:[#allocation3 + $0xf8] sm:$0xf] %v6479_v8 }
  0x22   : > { %277 = vst [vmem:[#allocation3 + $0x100] sm:$0xff] %v6479_v8  ;;  %278 = vst [vmem:[#allocation3 + $0x108] sm:$0xff] %v6479_v8 }
  0x23   : > { %279 = vst [vmem:[#allocation3 + $0x110] sm:$0xff] %v6479_v8  ;;  %280 = vst [vmem:[#allocation3 + $0x118] sm:$0xff] %v6479_v8 }
  0x24   : > { %281 = vst [vmem:[#allocation3 + $0x120] sm:$0xf] %v6479_v8  ;;  %282 = vst [vmem:[#allocation3 + $0x128] sm:$0xf] %v6479_v8 }
  0x25   : > { %283 = vst [vmem:[#allocation3 + $0x130] sm:$0xf] %v6479_v8  ;;  %284 = vst [vmem:[#allocation3 + $0x138] sm:$0xf] %v6479_v8 }
  0x26   : > { %285 = vst [vmem:[#allocation3 + $0x140] sm:$0xff] %v6479_v8  ;;  %286 = vst [vmem:[#allocation3 + $0x148] sm:$0xff] %v6479_v8 }
  0x27   : > { %287 = vst [vmem:[#allocation3 + $0x150] sm:$0xff] %v6479_v8  ;;  %288 = vst [vmem:[#allocation3 + $0x158] sm:$0xff] %v6479_v8 }
  0x28   : > { %289 = vst [vmem:[#allocation3 + $0x160] sm:$0xf] %v6479_v8  ;;  %290 = vst [vmem:[#allocation3 + $0x168] sm:$0xf] %v6479_v8 }
  0x29   : > { %291 = vst [vmem:[#allocation3 + $0x170] sm:$0xf] %v6479_v8  ;;  %292 = vst [vmem:[#allocation3 + $0x178] sm:$0xf] %v6479_v8 }
  0x2a   : > { %293 = vst [vmem:[#allocation3 + $0x180] sm:$0xff] %v6479_v8  ;;  %294 = vst [vmem:[#allocation3 + $0x188] sm:$0xff] %v6479_v8 }
  0x2b   : > { %295 = vst [vmem:[#allocation3 + $0x190] sm:$0xff] %v6479_v8  ;;  %296 = vst [vmem:[#allocation3 + $0x198] sm:$0xff] %v6479_v8 }
  0x2c   : > { %297 = vst [vmem:[#allocation3 + $0x1a0] sm:$0xf] %v6479_v8  ;;  %298 = vst [vmem:[#allocation3 + $0x1a8] sm:$0xf] %v6479_v8 }
  0x2d   : > { %299 = vst [vmem:[#allocation3 + $0x1b0] sm:$0xf] %v6479_v8  ;;  %300 = vst [vmem:[#allocation3 + $0x1b8] sm:$0xf] %v6479_v8 }
  0x2e   : > { %301 = vst [vmem:[#allocation3 + $0x1c0] sm:$0xff] %v6479_v8  ;;  %302 = vst [vmem:[#allocation3 + $0x1c8] sm:$0xff] %v6479_v8 }
  0x2f   : > { %303 = vst [vmem:[#allocation3 + $0x1d0] sm:$0xff] %v6479_v8  ;;  %304 = vst [vmem:[#allocation3 + $0x1d8] sm:$0xff] %v6479_v8 }
  0x30   : > { %305 = vst [vmem:[#allocation3 + $0x1e0] sm:$0xf] %v6479_v8  ;;  %306 = vst [vmem:[#allocation3 + $0x1e8] sm:$0xf] %v6479_v8 }
  0x31   : > { %307 = vst [vmem:[#allocation3 + $0x1f0] sm:$0xf] %v6479_v8  ;;  %308 = vst [vmem:[#allocation3 + $0x1f8] sm:$0xf] %v6479_v8 }
  0x32   : > { %6457 = dma.done.wait [#allocation4], 1024 }
  0x33   : > { %6458 = vsyncadd [#allocation4], 4294966272  ;;  %s6471_s24 = smov 0  }
  0x34 LB: >> { %s6342_s25 = sshll.u32 %s6473_s24, 4  ;;  %s6168_s26 = sshll.u32 %s6473_s24, 6  ;;  %s6473_s24 = sphi %s6471_s24, %s319_s24  }
  0x35   : >> { %s322_s27 = scalar_lea.vmem [#allocation2], %s6342_s25  ;;  %s6069_s28 = scalar_lea.vmem [#allocation3], %s6168_s26 }
  0x36   : >> { %v323_v9 = vld [vmem:[%s322_s27] sm:$0xff]  ;;  %v324_v10 = vld [vmem:[%s322_s27 + $0x8] sm:$0xff]  ;;  %s319_s24 = sadd.s32 1, %s6473_s24  }
  0x37   : >> { %v328_v11 = vrot.slane %v323_v9, 6  ;;  %v329_v12 = vrot.slane %v324_v10, 6  ;;  %p316_p5 = scmp.ge.s32.totalorder %s319_s24, 4  }
  0x38   : > { %s6593_s29 = smov (%p316_p5), 0  }
  0x39   : >> { %6169 = vst [vmem:[%s6069_s28 + $0x88] sm:$0xfc] %v328_v11  ;;  %6171 = vst [vmem:[%s6069_s28 + $0xa8] sm:$0x3] %v328_v11  ;;  %318 = sbr.rel (!%p316_p5) target bundleno = 52 (0x34), region = 250 }
  0x3a   : >> { %6170 = vst [vmem:[%s6069_s28 + $0x90] sm:$0xfc] %v329_v12  ;;  %6172 = vst [vmem:[%s6069_s28 + $0xb0] sm:$0x3] %v329_v12 }
  0x40 LB: >> { %v356_v13 = vlaneseq  ;;  %v6175_v15 = vld [vmem:[%s10348_s1 + $0x5] ss:$8 sm:$0x3]  ;;  %v354_v16 = vld [vmem:[%s10348_s1] ss:$8 sm:$0x3]  ;;  %s6477_s29 = sphi %s6593_s29, %s344_s29  }
  0x41   : >> { %s6480_s7 = smov 64   ;;  %v6176_v23 = vld [vmem:[%s10348_s1 + $0x12] ss:$8 sm:$0x3]  ;;  %s6481_s21 = smov 96   ;;  %vm410_vm0 = vcmask 1046528  }
  0x42   : >> { %v357_v14 = vshrl.u32 %v356_v13, 7  ;;  %v6177_v26 = vld [vmem:[%s10348_s1 + $0x17] ss:$8 sm:$0x3]  ;;  %s6343_s25 = sshll.u32 %s6477_s29, 6  ;;  %vm457_vm1 = vcmask 1045504  }
  0x43   : >> { %v6178_v29 = vld [vmem:[%s10348_s1 + $0x24] ss:$8 sm:$0x3]  ;;  %v6179_v32 = vld [vmem:[%s10348_s1 + $0x1] ss:$8 sm:$0x3] }
  0x44   : >> { %v6604_v17 = vsub.s32 0, %v357_v14  ;;  %v6606_v18 = vsub.s32 1, %v357_v14  ;;  %v6180_v35 = vld [vmem:[%s10348_s1 + $0x6] ss:$8 sm:$0x3]  ;;  %s6674_s9 = scalar_lea.vmem [#allocation3], %s6343_s25 }
  0x45   : >> { %v6181_v38 = vld [vmem:[%s10348_s1 + $0x13] ss:$8 sm:$0x3]  ;;  %v6185_v41 = vld [vmem:[%s10348_s1 + $0x7] ss:$8 sm:$0x3] }
  0x46   : >> { %v385_v19 = vrot.slane %v6175_v15, %v6604_v17  ;;  %v359_v20 = vrot.slane %v354_v16, %v6604_v17  ;;  %v389_v21 = vrot.slane %v6175_v15, %v6606_v18  ;;  %v363_v22 = vrot.slane %v354_v16, %v6606_v18  ;;  %v6182_v42 = vld [vmem:[%s10348_s1 + $0x20] ss:$8 sm:$0x3]  ;;  %v6183_v43 = vld [vmem:[%s10348_s1 + $0x25] ss:$8 sm:$0x3] }
  0x47   : >> { %v436_v24 = vrot.slane %v6176_v23, %v6606_v18  ;;  %v432_v25 = vrot.slane %v6176_v23, %v6604_v17  ;;  %v483_v27 = vrot.slane %v6177_v26, %v6606_v18  ;;  %v479_v28 = vrot.slane %v6177_v26, %v6604_v17  ;;  %v6186_v45 = vld [vmem:[%s10348_s1 + $0x14] ss:$8 sm:$0x3]  ;;  %v6680_v49 = vld [vmem:[%s6674_s9 + $0x30] sm:$0xf]  ;;  %v6687_v52 = vld [vmem:[%s6674_s9 + $0x8] sm:$0xff] }
  0x48   : >> { %390 = vrot.lane.b32.xlu1 %v385_v19, %s6480_s7  ;;  %364 = vrot.lane.b32.xlu0 %v359_v20, %s6480_s7  ;;  %v530_v30 = vrot.slane %v6178_v29, %v6606_v18  ;;  %v526_v31 = vrot.slane %v6178_v29, %v6604_v17  ;;  %v577_v33 = vrot.slane %v6179_v32, %v6606_v18  ;;  %v6677_v48 = vld [vmem:[%s6674_s9 + $0x10] sm:$0xff]  ;;  %v6184_v50 = vld [vmem:[%s10348_s1 + $0x2] ss:$8 sm:$0x3]  ;;  %vm504_vm2 = vcmask 1044480   ;;  %s6482_s25 = smov 32  }
  0x49   : >> { %v573_v34 = vrot.slane %v6179_v32, %v6604_v17  ;;  %v613_v36 = vrot.slane %v6180_v35, %v6604_v17  ;;  %v617_v37 = vrot.slane %v6180_v35, %v6606_v18  ;;  %v671_v39 = vrot.slane %v6181_v38, %v6606_v18  ;;  %v6690_v53 = vld [vmem:[%s6674_s9 + $0x28] sm:$0xf]  ;;  %v6188_v13 = vld [vmem:[%s10348_s1 + $0x26] ss:$8 sm:$0x3] }
  0x4a   : >> { %v667_v40 = vrot.slane %v6181_v38, %v6604_v17  ;;  %v861_v44 = vrot.slane %v6185_v41, %v6606_v18  ;;  %v721_v46 = vrot.slane %v6182_v42, %v6604_v17  ;;  %v725_v47 = vrot.slane %v6182_v42, %v6606_v18  ;;  %v6187_v0 = vld [vmem:[%s10348_s1 + $0x21] ss:$8 sm:$0x3] }
  0x4b   : >> { %v857_v51 = vrot.slane %v6185_v41, %v6604_v17  ;;  %v899_v54 = vrot.slane %v6186_v45, %v6606_v18  ;;  %v779_v55 = vrot.slane %v6183_v43, %v6606_v18  ;;  %v895_v58 = vrot.slane %v6186_v45, %v6604_v17 }
  0x4c   : >> { %392 = vrot.lane.b32.xlu1 %v389_v21, %s6480_s7  ;;  %366 = vrot.lane.b32.xlu0 %v363_v22, %s6480_s7  ;;  %v865_v56 = vmul.f32 %v861_v44, %v6677_v48  ;;  %v867_v57 = vmul.f32 %v861_v44, %v6680_v49  ;;  %v775_v59 = vrot.slane %v6183_v43, %v6604_v17  ;;  %vm551_vm3 = vcmask 1043456  }
  0x4d   : >> { %v833_v60 = vrot.slane %v6184_v50, %v6606_v18  ;;  %v829_v61 = vrot.slane %v6184_v50, %v6604_v17  ;;  %v864_v62 = vmul.f32 %v857_v51, %v6687_v52  ;;  %v866_v63 = vmul.f32 %v857_v51, %v6690_v53  ;;  %v6190_v51 = vld [vmem:[%s10348_s1 + $0x10] ss:$8 sm:$0x3] }
  0x4e   : >> { %v903_v1 = vmul.f32 %v899_v54, %v6677_v48  ;;  %v905_v2 = vmul.f32 %v899_v54, %v6680_v49  ;;  %v875_v3 = vrot.slane %v865_v56, 1  ;;  %v876_v4 = vrot.slane %v867_v57, 1  ;;  %v6191_v56 = vld [vmem:[%s10348_s1 + $0x15] ss:$8 sm:$0x3] }
  0x4f   : >> { %v902_v5 = vmul.f32 %v895_v58, %v6687_v52  ;;  %v904_v6 = vmul.f32 %v895_v58, %v6690_v53  ;;  %v837_v7 = vmul.f32 %v833_v60, %v6677_v48  ;;  %v836_v8 = vmul.f32 %v829_v61, %v6687_v52 }
  0x50   : >> { %439 = vrot.lane.b32.xlu1 %v436_v24, %s6480_s7  ;;  %437 = vrot.lane.b32.xlu0 %v432_v25, %s6480_s7  ;;  %v937_v9 = vrot.slane %v6187_v0, %v6606_v18  ;;  %v872_v10 = vrot.slane %v864_v62, 1  ;;  %v873_v11 = vrot.slane %v866_v63, 1  ;;  %v933_v12 = vrot.slane %v6187_v0, %v6604_v17  ;;  %v6777_v62 = vld [vmem:[%s10348_s1 + $0x27] ss:$8 sm:$0x3] }
  0x51   : >> { %v913_v14 = vrot.slane %v903_v1, 2  ;;  %v877_v15 = vsel %vm410_vm0, %v875_v3, %v876_v4  ;;  %v914_v16 = vrot.slane %v905_v2, 2  ;;  %v910_v19 = vrot.slane %v902_v5, 2  ;;  %v6785_v0 = vld [vmem:[%s6674_s9] sm:$0xff] }
  0x52   : >> { %v911_v20 = vrot.slane %v904_v6, 2  ;;  %v941_v21 = vmul.f32 %v937_v9, %v6677_v48  ;;  %v943_v22 = vmul.f32 %v937_v9, %v6680_v49  ;;  %v975_v23 = vrot.slane %v6188_v13, %v6606_v18  ;;  %v6788_v1 = vld [vmem:[%s6674_s9 + $0x20] sm:$0xf] }
  0x53   : >> { %v874_v24 = vsel %vm410_vm0, %v872_v10, %v873_v11  ;;  %v940_v25 = vmul.f32 %v933_v12, %v6687_v52  ;;  %v942_v26 = vmul.f32 %v933_v12, %v6690_v53  ;;  %v1051_v54 = vrot.slane %v6190_v51, %v6604_v17 }
  0x54   : >> { %486 = vrot.lane.b32.xlu1 %v483_v27, %s6480_s7  ;;  %484 = vrot.lane.b32.xlu0 %v479_v28, %s6480_s7  ;;  %v971_v27 = vrot.slane %v6188_v13, %v6604_v17  ;;  %v915_v28 = vsel %vm457_vm1, %v913_v14, %v914_v16  ;;  %v912_v29 = vsel %vm457_vm1, %v910_v19, %v911_v20  ;;  %vm1020_vm4 = vcmask 261120  }
  0x55   : >> { %v979_v32 = vmul.f32 %v975_v23, %v6677_v48  ;;  %v949_v35 = vrot.slane %v942_v26, 3  ;;  %v1109_v57 = vrot.slane %v6191_v56, %v6606_v18  ;;  %v1105_v58 = vrot.slane %v6191_v56, %v6604_v17 }
  0x56   : >> { %v1213_v63 = vrot.slane %v6777_v62, %v6604_v17  ;;  %vm582_vm5 = vcmask 785408   ;;  %vm368_vm6 = vcmask 523264  }
  0x58   : >> { %533 = vrot.lane.b32.xlu1 %v530_v30, %s6480_s7  ;;  %531 = vrot.lane.b32.xlu0 %v526_v31, %s6480_s7  ;;  %v951_v30 = vrot.slane %v941_v21, 3  ;;  %v952_v31 = vrot.slane %v943_v22, 3 }
  0x5a   : >> { %v953_v38 = vsel %vm504_vm2, %v951_v30, %v952_v31 }
  0x5c   : >> { %580 = vrot.lane.b32.xlu1 %v577_v33, %s6481_s21  ;;  %578 = vrot.lane.b32.xlu0 %v573_v34, %s6481_s21  ;;  %v981_v33 = vmul.f32 %v975_v23, %v6680_v49  ;;  %v948_v34 = vrot.slane %v940_v25, 3 }
  0x5e   : >> { %v990_v41 = vrot.slane %v981_v33, 4 }
  0x60   : >> { %618 = vrot.lane.b32.xlu1 %v613_v36, %s6481_s21  ;;  %620 = vrot.lane.b32.xlu0 %v617_v37, %s6481_s21  ;;  %v978_v36 = vmul.f32 %v971_v27, %v6687_v52  ;;  %v980_v37 = vmul.f32 %v971_v27, %v6690_v53 }
  0x62   : >> { %v986_v42 = vrot.slane %v978_v36, 4  ;;  %v987_v43 = vrot.slane %v980_v37, 4 }
  0x64   : >> { %674 = vrot.lane.b32.xlu1 %v671_v39, %s6481_s21  ;;  %672 = vrot.lane.b32.xlu0 %v667_v40, %s6481_s21  ;;  %v989_v39 = vrot.slane %v979_v32, 4  ;;  %v950_v40 = vsel %vm504_vm2, %v948_v34, %v949_v35  ;;  %v988_v45 = vsel %vm551_vm3, %v986_v42, %v987_v43 }
  0x66   : >> { %v991_v44 = vsel %vm551_vm3, %v989_v39, %v990_v41 }
  0x68   : >> { %726 = vrot.lane.b32.xlu1 %v721_v46, %s6481_s21  ;;  %728 = vrot.lane.b32.xlu0 %v725_v47, %s6481_s21  ;;  %v6189_v46 = vld [vmem:[%s10348_s1 + $0x3] ss:$8 sm:$0x3] }
  0x69   : >> { %v1015_v47 = vrot.slane %v6189_v46, %v6606_v18  ;;  %v1011_v50 = vrot.slane %v6189_v46, %v6604_v17 }
  0x6c   : >> { %782 = vrot.lane.b32.xlu1 %v779_v55, %s6481_s21  ;;  %780 = vrot.lane.b32.xlu0 %v775_v59, %s6481_s21  ;;  %v1055_v55 = vrot.slane %v6190_v51, %v6606_v18  ;;  %v6192_v59 = vld [vmem:[%s10348_s1 + $0x22] ss:$8 sm:$0x3] }
  0x6d   : >> { %v1159_v60 = vrot.slane %v6192_v59, %v6604_v17  ;;  %v1163_v61 = vrot.slane %v6192_v59, %v6606_v18 }
  0x70   : >> { %842 = vrot.lane.b32.xlu0 %v837_v7, %s6480_s7  ;;  %840 = vrot.lane.b32.xlu1 %v836_v8, %s6480_s7 }
  0x74   : >> { %880 = vrot.lane.b32.xlu0 %v877_v15, %s6480_s7  ;;  %878 = vrot.lane.b32.xlu1 %v874_v24, %s6480_s7 }
  0x78   : >> { %918 = vrot.lane.b32.xlu0 %v915_v28, %s6480_s7  ;;  %916 = vrot.lane.b32.xlu1 %v912_v29, %s6480_s7 }
  0x7c   : >> { %956 = vrot.lane.b32.xlu0 %v953_v38, %s6480_s7  ;;  %954 = vrot.lane.b32.xlu1 %v950_v40, %s6480_s7 }
  0x80   : >> { %994 = vrot.lane.b32.xlu0 %v991_v44, %s6480_s7  ;;  %992 = vrot.lane.b32.xlu1 %v988_v45, %s6480_s7 }
  0x84   : >> { %1018 = vrot.lane.b32.xlu0 %v1015_v47, %s6482_s25  ;;  %1016 = vrot.lane.b32.xlu1 %v1011_v50, %s6482_s25 }
  0x88   : >> { %1056 = vrot.lane.b32.xlu0 %v1051_v54, %s6482_s25  ;;  %1058 = vrot.lane.b32.xlu1 %v1055_v55, %s6482_s25 }
  0x8c   : >> { %1112 = vrot.lane.b32.xlu0 %v1109_v57, %s6482_s25  ;;  %1110 = vrot.lane.b32.xlu1 %v1105_v58, %s6482_s25 }
  0x90   : >> { %1164 = vrot.lane.b32.xlu0 %v1159_v60, %s6482_s25  ;;  %1166 = vrot.lane.b32.xlu1 %v1163_v61, %s6482_s25 }
  0x94   : >> { %1218 = vrot.lane.b32.xlu1 %v1213_v63, %s6482_s25 }
  0xba   : >> { %v6790_v2 = vpop.permute.xlu1 %390  ;;  %v6792_v3 = vpop.permute.xlu0 %364 }
  0xbb   : >> { %v398_v4 = vmul.f32 %v6790_v2, %v6785_v0  ;;  %v401_v5 = vmul.f32 %v6790_v2, %v6788_v1  ;;  %v373_v8 = vmul.f32 %v6792_v3, %v6785_v0 }
  0xbd   : >> { %v411_v6 = vrot.slane %v398_v4, 1  ;;  %v412_v7 = vrot.slane %v401_v5, 1 }
  0xbe   : >> { %v6800_v9 = vpop.permute.xlu1 %392  ;;  %v6802_v10 = vpop.permute.xlu0 %366 }
  0xbf   : >> { %v413_v11 = vsel %vm410_vm0, %v411_v6, %v412_v7 }
  0xc0   : >> { %v423_v12 = vadd.f32 %v413_v11, %v373_v8 }
  0xc2   : >> { %v6805_v13 = vpop.permute.xlu1 %439  ;;  %v6807_v14 = vpop.permute.xlu0 %437 }
  0xc3   : >> { %v445_v15 = vmul.f32 %v6807_v14, %v6785_v0  ;;  %v448_v16 = vmul.f32 %v6807_v14, %v6788_v1 }
  0xc5   : >> { %v458_v19 = vrot.slane %v445_v15, 2  ;;  %v459_v22 = vrot.slane %v448_v16, 2 }
  0xc6   : >> { %v6813_v20 = vpop.permute.xlu1 %486  ;;  %v6815_v21 = vpop.permute.xlu0 %484 }
  0xc7   : >> { %v492_v23 = vmul.f32 %v6815_v21, %v6785_v0  ;;  %v460_v24 = vsel %vm457_vm1, %v458_v19, %v459_v22  ;;  %v495_v26 = vmul.f32 %v6815_v21, %v6788_v1  ;;  %v6885_v22 = vld [vmem:[%s6674_s9 + $0x18] sm:$0xff] }
  0xc8   : >> { %v470_v25 = vadd.f32 %v460_v24, %v423_v12 }
  0xc9   : >> { %v505_v29 = vrot.slane %v492_v23, 3  ;;  %v506_v30 = vrot.slane %v495_v26, 3 }
  0xca   : >> { %v6822_v27 = vpop.permute.xlu1 %533  ;;  %v6824_v28 = vpop.permute.xlu0 %531 }
  0xcb   : >> { %v539_v31 = vmul.f32 %v6824_v28, %v6785_v0  ;;  %v542_v32 = vmul.f32 %v6824_v28, %v6788_v1  ;;  %v507_v33 = vsel %vm504_vm2, %v505_v29, %v506_v30 }
  0xcc   : >> { %v517_v36 = vadd.f32 %v507_v33, %v470_v25 }
  0xcd   : >> { %v552_v37 = vrot.slane %v539_v31, 4  ;;  %v553_v38 = vrot.slane %v542_v32, 4 }
  0xce   : >> { %v581_v34 = vpop.permute.xlu1 %580  ;;  %v579_v35 = vpop.permute.xlu0 %578 }
  0xcf   : >> { %v587_v39 = vmul.f32 %v579_v35, %v6785_v0  ;;  %v554_v40 = vsel %vm551_vm3, %v552_v37, %v553_v38  ;;  %v589_v44 = vmul.f32 %v581_v34, %v6677_v48  ;;  %v583_v26 = vsel %vm582_vm5, %v579_v35, %v581_v34 }
  0xd0   : >> { %v6837_v43 = vadd.f32 %v554_v40, %v517_v36  ;;  %v588_v40 = vmul.f32 %v583_v26, %v6687_v52 }
  0xd1   : >> { %593 = vrot.lane.b32.xlu0 %v587_v39, %s6481_s21 }
  0xd2   : >> { %v6833_v41 = vpop.permute.xlu1 %618  ;;  %v6835_v42 = vpop.permute.xlu0 %620 }
  0xd3   : >> { %v626_v30 = vmul.f32 %v6833_v41, %v6785_v0  ;;  %v629_v31 = vmul.f32 %v6833_v41, %v6788_v1  ;;  %v628_v35 = vmul.f32 %v6835_v42, %v6677_v48  ;;  %v631_v39 = vmul.f32 %v6835_v42, %v6680_v49 }
  0xd5   : >> { %597 = vrot.lane.b32.xlu0 %v589_v44, %s6481_s21  ;;  %v644_v26 = vrot.slane %v628_v35, 1 }
  0xd6   : >> { %v6841_v45 = vpop.permute.xlu1 %674  ;;  %v6843_v46 = vpop.permute.xlu0 %672 }
  0xd7   : >> { %v680_v6 = vmul.f32 %v6843_v46, %v6785_v0  ;;  %v683_v7 = vmul.f32 %v6843_v46, %v6788_v1  ;;  %v682_v16 = vmul.f32 %v6841_v45, %v6677_v48  ;;  %v685_v19 = vmul.f32 %v6841_v45, %v6680_v49 }
  0xd9   : >> { %v692_v24 = vrot.slane %v680_v6, 2  ;;  %v693_v25 = vrot.slane %v683_v7, 2  ;;  %v698_v32 = vrot.slane %v682_v16, 2  ;;  %v699_v33 = vrot.slane %v685_v19, 2 }
  0xda   : >> { %v6846_v47 = vpop.permute.xlu1 %726  ;;  %v6848_v50 = vpop.permute.xlu0 %728  ;;  %v638_v6 = vrot.slane %v626_v30, 1  ;;  %v639_v7 = vrot.slane %v629_v31, 1 }
  0xdb   : >> { %v694_v34 = vsel %vm457_vm1, %v692_v24, %v693_v25  ;;  %v700_v44 = vsel %vm457_vm1, %v698_v32, %v699_v33  ;;  %v6926_v25 = vld [vmem:[%s6674_s9 + $0x38] sm:$0xf]  ;;  %v734_v30 = vmul.f32 %v6846_v47, %v6785_v0  ;;  %v737_v31 = vmul.f32 %v6846_v47, %v6788_v1 }
  0xdc   : >> { %v640_v32 = vsel %vm410_vm0, %v638_v6, %v639_v7 }
  0xdd   : >> { %v746_v7 = vrot.slane %v734_v30, 3 }
  0xde   : >> { %v6850_v51 = vpop.permute.xlu1 %782  ;;  %v6852_v54 = vpop.permute.xlu0 %780 }
  0xdf   : >> { %v788_v37 = vmul.f32 %v6852_v54, %v6785_v0  ;;  %v791_v38 = vmul.f32 %v6852_v54, %v6788_v1 }
  0xe2   : >> { %v6854_v55 = vpop.permute.xlu0 %842  ;;  %v6856_v56 = vpop.permute.xlu1 %840 }
  0xe6   : >> { %v6858_v57 = vpop.permute.xlu0 %880  ;;  %v6860_v58 = vpop.permute.xlu1 %878 }
  0xea   : >> { %v6862_v59 = vpop.permute.xlu0 %918  ;;  %v6864_v60 = vpop.permute.xlu1 %916 }
  0xeb   : >> { %10499 = vst [vmem:[#allocation7_spill] sm:$0xff] %v6862_v59  ;;  %10500 = vst [vmem:[#allocation8_spill] sm:$0xff] %v6864_v60 }
  0xee   : >> { %v6866_v61 = vpop.permute.xlu0 %956  ;;  %v6868_v63 = vpop.permute.xlu1 %954 }
  0xef   : >> { %10501 = vst [vmem:[#allocation9_spill] sm:$0xff] %v6866_v61  ;;  %10502 = vst [vmem:[#allocation10_spill] sm:$0xff] %v6868_v63 }
  0xf2   : >> { %v6870_v4 = vpop.permute.xlu0 %994  ;;  %v6872_v5 = vpop.permute.xlu1 %992 }
  0xf3   : >> { %10503 = vst [vmem:[#allocation11_spill] sm:$0xff] %v6870_v4  ;;  %10504 = vst [vmem:[#allocation12_spill] sm:$0xff] %v6872_v5 }
  0xf6   : >> { %v1019_v8 = vpop.permute.xlu0 %1018  ;;  %v1017_v11 = vpop.permute.xlu1 %1016 }
  0xf7   : >> { %v1021_v12 = vsel %vm1020_vm4, %v1017_v11, %v1019_v8  ;;  %v1025_v15 = vmul.f32 %v1017_v11, %v6687_v52  ;;  %v1027_v29 = vmul.f32 %v1019_v8, %v6885_v22  ;;  %v790_v8 = vmul.f32 %v6850_v51, %v6677_v48 }
  0xf8   : >> { %v1026_v23 = vmul.f32 %v1021_v12, %v6677_v48  ;;  %v793_v11 = vmul.f32 %v6850_v51, %v6680_v49  ;;  %v800_v12 = vrot.slane %v788_v37, 4 }
  0xf9   : >> { %1031 = vrot.lane.b32.xlu1 %v1025_v15, %s6482_s25  ;;  %v801_v15 = vrot.slane %v791_v38, 4  ;;  %v806_v37 = vrot.slane %v790_v8, 4  ;;  %v747_v8 = vrot.slane %v737_v31, 3 }
  0xfa   : >> { %1033 = vrot.lane.b32.xlu0 %v1026_v23, %s6482_s25  ;;  %v6896_v36 = vpop.permute.xlu0 %1056  ;;  %v6917_v16 = vpop.permute.xlu1 %1058  ;;  %v807_v38 = vrot.slane %v793_v11, 4 }
  0xfb   : >> { %v1064_v23 = vmul.f32 %v6896_v36, %v6687_v52  ;;  %v1067_v24 = vmul.f32 %v6896_v36, %v6690_v53  ;;  %v802_v33 = vsel %vm551_vm3, %v800_v12, %v801_v15  ;;  %v1069_v35 = vmul.f32 %v6917_v16, %v6926_v25 }
  0xfc   : >> { %v808_v12 = vsel %vm551_vm3, %v806_v37, %v807_v38  ;;  %v622_v38 = vsel %vm582_vm5, %v6833_v41, %v6835_v42 }
  0xfd   : >> { %1035 = vrot.lane.b32.xlu1 %v1027_v29, %s6482_s25  ;;  %v645_v29 = vrot.slane %v631_v39, 1  ;;  %v1076_v39 = vrot.slane %v1064_v23, 1  ;;  %v1077_v1 = vrot.slane %v1067_v24, 1 }
  0xfe   : >> { %701 = vrot.lane.b32.xlu0 %v694_v34, %s6481_s21  ;;  %v6919_v19 = vpop.permute.xlu0 %1112  ;;  %v1066_v34 = vmul.f32 %v6917_v16, %v6885_v22  ;;  %v1111_v6 = vpop.permute.xlu1 %1110 }
  0xff   : >> { %v646_v0 = vsel %vm410_vm0, %v644_v26, %v645_v29  ;;  %v1118_v15 = vmul.f32 %v1111_v6, %v6687_v52  ;;  %v1121_v23 = vmul.f32 %v1111_v6, %v6690_v53  ;;  %v1083_v26 = vrot.slane %v1069_v35, 1 }
 0x100   : >> { %v1082_v24 = vrot.slane %v1066_v34, 1  ;;  %v1078_v29 = vsel %vm410_vm0, %v1076_v39, %v1077_v1  ;;  %v1120_v41 = vmul.f32 %v6919_v19, %v6885_v22  ;;  %v1123_v42 = vmul.f32 %v6919_v19, %v6926_v25 }
 0x101   : >> { %595 = vrot.lane.b32.xlu1 %v588_v40, %s6481_s21  ;;  %v736_v40 = vmul.f32 %v6848_v50, %v6677_v48  ;;  %v1131_v39 = vrot.slane %v1121_v23, 2  ;;  %v627_v23 = vmul.f32 %v622_v38, %v6687_v52 }
 0x102   : >> { %705 = vrot.lane.b32.xlu0 %v700_v44, %s6481_s21  ;;  %v739_v44 = vmul.f32 %v6848_v50, %v6680_v49  ;;  %v6945_v11 = vpop.permute.xlu0 %1164  ;;  %v1167_v34 = vpop.permute.xlu1 %1166  ;;  %v1084_v35 = vsel %vm410_vm0, %v1082_v24, %v1083_v26  ;;  %v630_v24 = vmul.f32 %v622_v38, %v6690_v53 }
 0x103   : >> { %v1172_v30 = vmul.f32 %v6945_v11, %v6687_v52  ;;  %v1175_v31 = vmul.f32 %v6945_v11, %v6690_v53  ;;  %v1174_v1 = vmul.f32 %v1167_v34, %v6885_v22  ;;  %v641_v38 = vrot.slane %v627_v23, 1 }
 0x104   : >> { %v753_v37 = vrot.slane %v739_v44, 3  ;;  %v676_v44 = vsel %vm582_vm5, %v6843_v46, %v6841_v45 }
 0x105   : >> { %647 = vrot.lane.b32.xlu1 %v640_v32, %s6481_s21  ;;  %v748_v32 = vsel %vm504_vm2, %v746_v7, %v747_v8  ;;  %v1184_v7 = vrot.slane %v1172_v30, 3  ;;  %v1190_v46 = vrot.slane %v1174_v1, 3  ;;  %v784_v30 = vsel %vm582_vm5, %v6852_v54, %v6850_v51 }
 0x106   : >> { %809 = vrot.lane.b32.xlu0 %v802_v33, %s6481_s21  ;;  %v752_v33 = vrot.slane %v736_v40, 3  ;;  %v1185_v40 = vrot.slane %v1175_v31, 3  ;;  %v1136_v31 = vrot.slane %v1120_v41, 2  ;;  %v792_v51 = vmul.f32 %v784_v30, %v6690_v53 }
 0x108   : >> { %v754_v8 = vsel %vm504_vm2, %v752_v33, %v753_v37  ;;  %v1186_v45 = vsel %vm504_vm2, %v1184_v7, %v1185_v40  ;;  %v684_v33 = vmul.f32 %v676_v44, %v6690_v53  ;;  %v730_v37 = vsel %vm582_vm5, %v6846_v47, %v6848_v50 }
 0x109   : >> { %651 = vrot.lane.b32.xlu1 %v646_v0, %s6481_s21  ;;  %v1130_v0 = vrot.slane %v1118_v15, 2  ;;  %v735_v7 = vmul.f32 %v730_v37, %v6687_v52  ;;  %v1060_v47 = vsel %vm1020_vm4, %v6896_v36, %v6917_v16  ;;  %v738_v50 = vmul.f32 %v730_v37, %v6690_v53 }
 0x10a   : >> { %813 = vrot.lane.b32.xlu0 %v808_v12, %s6481_s21  ;;  %v1177_v12 = vmul.f32 %v1167_v34, %v6926_v25  ;;  %v1114_v40 = vsel %vm1020_vm4, %v1111_v6, %v6919_v19  ;;  %v1065_v23 = vmul.f32 %v1060_v47, %v6677_v48  ;;  %v1068_v36 = vmul.f32 %v1060_v47, %v6680_v49 }
 0x10b   : >> { %v1132_v15 = vsel %vm457_vm1, %v1130_v0, %v1131_v39  ;;  %v642_v0 = vrot.slane %v630_v24, 1  ;;  %v789_v39 = vmul.f32 %v784_v30, %v6687_v52  ;;  %v1168_v16 = vsel %vm1020_vm4, %v6945_v11, %v1167_v34 }
 0x10c   : >> { %v1191_v26 = vrot.slane %v1177_v12, 3  ;;  %v696_v12 = vrot.slane %v684_v33, 2  ;;  %v750_v24 = vrot.slane %v738_v50, 3  ;;  %v1119_v19 = vmul.f32 %v1114_v40, %v6677_v48 }
 0x10d   : >> { %755 = vrot.lane.b32.xlu1 %v748_v32, %s6481_s21  ;;  %v1137_v32 = vrot.slane %v1123_v42, 2  ;;  %v803_v41 = vrot.slane %v789_v39, 4  ;;  %v804_v42 = vrot.slane %v792_v51, 4  ;;  %v1122_v6 = vmul.f32 %v1114_v40, %v6680_v49 }
 0x10e   : >> { %1085 = vrot.lane.b32.xlu0 %v1078_v29, %s6482_s25  ;;  %v681_v29 = vmul.f32 %v676_v44, %v6687_v52  ;;  %v643_v44 = vsel %vm410_vm0, %v641_v38, %v642_v0  ;;  %v1173_v30 = vmul.f32 %v1168_v16, %v6677_v48  ;;  %v1133_v34 = vrot.slane %v1119_v19, 2 }
 0x10f   : >> { %v1138_v54 = vsel %vm457_vm1, %v1136_v31, %v1137_v32  ;;  %v1176_v31 = vmul.f32 %v1168_v16, %v6680_v49  ;;  %v1134_v32 = vrot.slane %v1122_v6, 2  ;;  %v1217_v51 = vrot.slane %v6777_v62, %v6606_v18 }
 0x110   : >> { %v695_v1 = vrot.slane %v681_v29, 2  ;;  %v1080_v29 = vrot.slane %v1068_v36, 1 }
 0x111   : >> { %759 = vrot.lane.b32.xlu1 %v754_v8, %s6481_s21  ;;  %v1188_v0 = vrot.slane %v1176_v31, 3  ;;  %v1135_v39 = vsel %vm457_vm1, %v1133_v34, %v1134_v32 }
 0x112   : >> { %1089 = vrot.lane.b32.xlu0 %v1084_v35, %s6482_s25  ;;  %v1192_v35 = vsel %vm504_vm2, %v1190_v46, %v1191_v26  ;;  %v697_v8 = vsel %vm457_vm1, %v695_v1, %v696_v12  ;;  %v1219_v46 = vpop.permute.xlu1 %1218  ;;  %v1079_v26 = vrot.slane %v1065_v23, 1 }
 0x113   : >> { %v1226_v33 = vmul.f32 %v1219_v46, %v6687_v52  ;;  %v1229_v37 = vmul.f32 %v1219_v46, %v6690_v53 }
 0x114   : >> { %v1081_v38 = vsel %vm410_vm0, %v1079_v26, %v1080_v29 }
 0x115   : >> { %1139 = vrot.lane.b32.xlu1 %v1132_v15, %s6482_s25  ;;  %v749_v15 = vrot.slane %v735_v7, 3  ;;  %v1239_v1 = vrot.slane %v1229_v37, 4 }
 0x116   : >> { %1193 = vrot.lane.b32.xlu0 %v1186_v45, %s6482_s25  ;;  %v805_v45 = vsel %vm551_vm3, %v803_v41, %v804_v42 }
 0x117   : >> { %v751_v11 = vsel %vm504_vm2, %v749_v15, %v750_v24 }
 0x119   : >> { %1143 = vrot.lane.b32.xlu1 %v1138_v54, %s6482_s25  ;;  %v1238_v54 = vrot.slane %v1226_v33, 4 }
 0x11a   : >> { %1197 = vrot.lane.b32.xlu0 %v1192_v35, %s6482_s25  ;;  %v1187_v35 = vrot.slane %v1173_v30, 3 }
 0x11b   : >> { %v1240_v52 = vsel %vm551_vm3, %v1238_v54, %v1239_v1  ;;  %v6198_v1 = vld [vmem:[%s10348_s1 + $0x30] ss:$8 sm:$0x3] }
 0x11c   : >> { %v1189_v12 = vsel %vm504_vm2, %v1187_v35, %v1188_v0 }
 0x11d   : >> { %703 = vrot.lane.b32.xlu1 %v697_v8, %s6481_s21 }
 0x11e   : >> { %649 = vrot.lane.b32.xlu0 %v643_v44, %s6481_s21 }
 0x121   : >> { %811 = vrot.lane.b32.xlu1 %v805_v45, %s6481_s21 }
 0x122   : >> { %757 = vrot.lane.b32.xlu0 %v751_v11, %s6481_s21  ;;  %v6194_v11 = vld [vmem:[%s10348_s1 + $0x4] ss:$8 sm:$0x3] }
 0x125   : >> { %1087 = vrot.lane.b32.xlu1 %v1081_v38, %s6482_s25  ;;  %v6196_v38 = vld [vmem:[%s10348_s1 + $0x16] ss:$8 sm:$0x3] }
 0x126   : >> { %1141 = vrot.lane.b32.xlu0 %v1135_v39, %s6482_s25  ;;  %v1342_v35 = vrot.slane %v6196_v38, %v6606_v18  ;;  %v1338_v0 = vrot.slane %v6196_v38, %v6604_v17  ;;  %v6197_v39 = vld [vmem:[%s10348_s1 + $0x23] ss:$8 sm:$0x3] }
 0x127   : >> { %v1384_v54 = vrot.slane %v6197_v39, %v6604_v17 }
 0x129   : >> { %1195 = vrot.lane.b32.xlu1 %v1189_v12, %s6482_s25  ;;  %v1434_v12 = vrot.slane %v6198_v1, %v6606_v18 }
 0x12a   : >> { %1220 = vrot.lane.b32.xlu0 %v1217_v51, %s6482_s25  ;;  %v1388_v51 = vrot.slane %v6197_v39, %v6606_v18 }
 0x12d   : >> { %1247 = vrot.lane.b32.xlu1 %v1240_v52, %s6482_s25  ;;  %v1430_v52 = vrot.slane %v6198_v1, %v6604_v17 }
 0x143   : >> { %v7032_v53 = vpop.permute.xlu0 %593 }
 0x147   : >> { %v7034_v7 = vpop.permute.xlu0 %597 }
 0x16c   : >> { %v7036_v47 = vpop.permute.xlu0 %1033 }
 0x16d   : >> { %10505 = vst [vmem:[#allocation13_spill] sm:$0xff] %v7036_v47 }
 0x170   : >> { %v7038_v50 = vpop.permute.xlu0 %701 }
 0x174   : >> { %v7040_v62 = vpop.permute.xlu0 %705 }
 0x178   : >> { %v7042_v40 = vpop.permute.xlu0 %809 }
 0x17c   : >> { %v7044_v44 = vpop.permute.xlu0 %813 }
 0x180   : >> { %v7046_v41 = vpop.permute.xlu0 %1085 }
 0x181   : >> { %10506 = vst [vmem:[#allocation14_spill] sm:$0xff] %v7046_v41 }
 0x184   : >> { %v7048_v42 = vpop.permute.xlu0 %1089 }
 0x185   : >> { %10507 = vst [vmem:[#allocation15_spill] sm:$0xff] %v7048_v42 }
 0x188   : >> { %v7050_v8 = vpop.permute.xlu0 %1193 }
 0x189   : >> { %10508 = vst [vmem:[#allocation16_spill] sm:$0xff] %v7050_v8 }
 0x18c   : >> { %v7052_v15 = vpop.permute.xlu0 %1197 }
 0x18d   : >> { %10509 = vst [vmem:[#allocation17_spill] sm:$0xff] %v7052_v15 }
 0x190   : >> { %v7054_v23 = vpop.permute.xlu0 %649 }
 0x194   : >> { %v7056_v36 = vpop.permute.xlu0 %757 }
 0x198   : >> { %v7058_v16 = vpop.permute.xlu0 %1141 }
 0x199   : >> { %10510 = vst [vmem:[#allocation18_spill] sm:$0xff] %v7058_v16 }
 0x19c   : >> { %v1221_v24 = vpop.permute.xlu0 %1220 }
 0x19d   : >> { %v1222_v19 = vsel %vm1020_vm4, %v1219_v46, %v1221_v24  ;;  %v1228_v6 = vmul.f32 %v1221_v24, %v6885_v22  ;;  %v1231_v45 = vmul.f32 %v1221_v24, %v6926_v25  ;;  %v1271_v25 = vrot.slane %v6194_v11, %v6606_v18  ;;  %v6206_v24 = vld [vmem:[%s10348_s1 + $0x31] ss:$8 sm:$0x3] }
 0x19e   : >> { %v1227_v26 = vmul.f32 %v1222_v19, %v6677_v48  ;;  %v1230_v29 = vmul.f32 %v1222_v19, %v6680_v49  ;;  %v1267_v48 = vrot.slane %v6194_v11, %v6604_v17  ;;  %v6195_v49 = vld [vmem:[%s10348_s1 + $0x11] ss:$8 sm:$0x3]  ;;  %v1490_v19 = vrot.slane %v6206_v24, %v6606_v18 }
 0x19f   : >> { %v1244_v30 = vrot.slane %v1228_v6, 4  ;;  %v1245_v31 = vrot.slane %v1231_v45, 4  ;;  %v1296_v46 = vrot.slane %v6195_v49, %v6606_v18  ;;  %v1292_v37 = vrot.slane %v6195_v49, %v6604_v17  ;;  %v6207_v45 = vld [vmem:[%s10348_s1 + $0x36] ss:$8 sm:$0x3] }
 0x1a0   : >> { %v1241_v34 = vrot.slane %v1227_v26, 4  ;;  %v1242_v32 = vrot.slane %v1230_v29, 4  ;;  %v1486_v6 = vrot.slane %v6206_v24, %v6604_v17  ;;  %v1515_v26 = vrot.slane %v6207_v45, %v6606_v18 }
 0x1a1   : >> { %v1246_v33 = vsel %vm551_vm3, %v1244_v30, %v1245_v31  ;;  %v1511_v29 = vrot.slane %v6207_v45, %v6604_v17  ;;  %v6208_v30 = vld [vmem:[%s10348_s1 + $0x43] ss:$8 sm:$0x3] }
 0x1a2   : >> { %1251 = vrot.lane.b32.xlu1 %v1246_v33, %s6482_s25  ;;  %v1243_v22 = vsel %vm551_vm3, %v1241_v34, %v1242_v32  ;;  %v1561_v31 = vrot.slane %v6208_v30, %v6606_v18  ;;  %v1557_v11 = vrot.slane %v6208_v30, %v6604_v17  ;;  %v6209_v34 = vld [vmem:[%s10348_s1 + $0x50] ss:$8 sm:$0x3] }
 0x1a3   : >> { %1249 = vrot.lane.b32.xlu0 %v1243_v22, %s6482_s25  ;;  %v1607_v32 = vrot.slane %v6209_v34, %v6606_v18  ;;  %v1603_v33 = vrot.slane %v6209_v34, %v6604_v17  ;;  %v6210_v22 = vld [vmem:[%s10348_s1 + $0x55] ss:$8 sm:$0x3] }
 0x1a4   : >> { %v1649_v49 = vrot.slane %v6210_v22, %v6604_v17 }
 0x1a6   : >> { %1274 = vrot.lane.b32.xlu1 %v1271_v25, %s6480_s7  ;;  %v7133_v25 = vpop.permute.xlu1 %1031 }
 0x1a7   : >> { %1272 = vrot.lane.b32.xlu0 %v1267_v48, %s6480_s7  ;;  %10511 = vst [vmem:[#allocation19_spill] sm:$0xff] %v7133_v25  ;;  %v1653_v48 = vrot.slane %v6210_v22, %v6606_v18 }
 0x1aa   : >> { %1299 = vrot.lane.b32.xlu1 %v1296_v46, %s6480_s7  ;;  %v6211_v46 = vld [vmem:[%s10348_s1 + $0x32] ss:$8 sm:$0x3] }
 0x1ab   : >> { %1297 = vrot.lane.b32.xlu0 %v1292_v37, %s6480_s7  ;;  %v7142_v37 = vpop.permute.xlu1 %1035  ;;  %v1699_v38 = vrot.slane %v6211_v46, %v6606_v18 }
 0x1ac   : >> { %10512 = vst [vmem:[#allocation20_spill] sm:$0xff] %v7142_v37 }
 0x1ae   : >> { %1345 = vrot.lane.b32.xlu1 %v1342_v35, %s6480_s7  ;;  %v1695_v35 = vrot.slane %v6211_v46, %v6604_v17 }
 0x1af   : >> { %1343 = vrot.lane.b32.xlu0 %v1338_v0, %s6480_s7  ;;  %v7150_v0 = vpop.permute.xlu1 %595 }
 0x1b2   : >> { %1391 = vrot.lane.b32.xlu1 %v1388_v51, %s6480_s7 }
 0x1b3   : >> { %1389 = vrot.lane.b32.xlu0 %v1384_v54, %s6480_s7  ;;  %v7152_v39 = vpop.permute.xlu1 %647 }
 0x1b6   : >> { %1437 = vrot.lane.b32.xlu1 %v1434_v12, %s6480_s7 }
 0x1b7   : >> { %1435 = vrot.lane.b32.xlu0 %v1430_v52, %s6480_s7  ;;  %v7154_v51 = vpop.permute.xlu1 %651 }
 0x1ba   : >> { %1493 = vrot.lane.b32.xlu1 %v1490_v19, %s6480_s7 }
 0x1bb   : >> { %1491 = vrot.lane.b32.xlu0 %v1486_v6, %s6480_s7  ;;  %v7156_v54 = vpop.permute.xlu1 %755 }
 0x1be   : >> { %1518 = vrot.lane.b32.xlu1 %v1515_v26, %s6480_s7 }
 0x1bf   : >> { %1516 = vrot.lane.b32.xlu0 %v1511_v29, %s6480_s7  ;;  %v7158_v1 = vpop.permute.xlu1 %759 }
 0x1c2   : >> { %1564 = vrot.lane.b32.xlu1 %v1561_v31, %s6480_s7 }
 0x1c3   : >> { %1562 = vrot.lane.b32.xlu0 %v1557_v11, %s6480_s7  ;;  %v7160_v12 = vpop.permute.xlu1 %1139 }
 0x1c4   : >> { %10513 = vst [vmem:[#allocation21_spill] sm:$0xff] %v7160_v12 }
 0x1c6   : >> { %1610 = vrot.lane.b32.xlu1 %v1607_v32, %s6480_s7 }
 0x1c7   : >> { %1608 = vrot.lane.b32.xlu0 %v1603_v33, %s6480_s7  ;;  %v7162_v52 = vpop.permute.xlu1 %1143 }
 0x1c8   : >> { %10514 = vst [vmem:[#allocation22_spill] sm:$0xff] %v7162_v52 }
 0x1ca   : >> { %1656 = vrot.lane.b32.xlu1 %v1653_v48, %s6480_s7 }
 0x1cb   : >> { %1654 = vrot.lane.b32.xlu0 %v1649_v49, %s6480_s7  ;;  %v7164_v24 = vpop.permute.xlu1 %703 }
 0x1ce   : >> { %1702 = vrot.lane.b32.xlu1 %v1699_v38, %s6481_s21 }
 0x1cf   : >> { %1700 = vrot.lane.b32.xlu0 %v1695_v35, %s6481_s21  ;;  %v7166_v19 = vpop.permute.xlu1 %811 }
 0x1d3   : >> { %v7168_v6 = vpop.permute.xlu1 %1087 }
 0x1d4   : >> { %10515 = vst [vmem:[#allocation23_spill] sm:$0xff] %v7168_v6 }
 0x1d7   : >> { %v7170_v45 = vpop.permute.xlu1 %1195 }
 0x1d8   : >> { %10516 = vst [vmem:[#allocation24_spill] sm:$0xff] %v7170_v45  ;;  %v7256_v45 = vld [vmem:[%s6674_s9 + $0x68] sm:$0xf] }
 0x1db   : >> { %v7172_v26 = vpop.permute.xlu1 %1247 }
 0x1dc   : >> { %10517 = vst [vmem:[#allocation25_spill] sm:$0xff] %v7172_v26 }
 0x214   : >> { %v7174_v29 = vpop.permute.xlu1 %1251 }
 0x215   : >> { %10518 = vst [vmem:[#allocation26_spill] sm:$0xff] %v7174_v29  ;;  %v7176_v30 = vpop.permute.xlu0 %1249 }
 0x216   : >> { %10519 = vst [vmem:[#allocation27_spill] sm:$0xff] %v7176_v30  ;;  %v7222_v30 = vld [vmem:[%s6674_s9 + $0x48] sm:$0xff] }
 0x218   : >> { %v7178_v31 = vpop.permute.xlu1 %1274 }
 0x219   : >> { %10520 = vst [vmem:[#allocation28_spill] sm:$0xff] %v7178_v31  ;;  %v7180_v11 = vpop.permute.xlu0 %1272 }
 0x21a   : >> { %10521 = vst [vmem:[#allocation29_spill] sm:$0xff] %v7180_v11 }
 0x21c   : >> { %v7182_v34 = vpop.permute.xlu1 %1299 }
 0x21d   : >> { %10522 = vst [vmem:[#allocation30_spill] sm:$0xff] %v7182_v34  ;;  %v7184_v32 = vpop.permute.xlu0 %1297 }
 0x21e   : >> { %10523 = vst [vmem:[#allocation31_spill] sm:$0xff] %v7184_v32 }
 0x220   : >> { %v7186_v33 = vpop.permute.xlu1 %1345 }
 0x221   : >> { %10524 = vst [vmem:[#allocation32_spill] sm:$0xff] %v7186_v33  ;;  %v7188_v22 = vpop.permute.xlu0 %1343 }
 0x222   : >> { %10525 = vst [vmem:[#allocation33_spill] sm:$0xff] %v7188_v22 }
 0x224   : >> { %v7190_v48 = vpop.permute.xlu1 %1391 }
 0x225   : >> { %10526 = vst [vmem:[#allocation34_spill] sm:$0xff] %v7190_v48  ;;  %v7192_v49 = vpop.permute.xlu0 %1389 }
 0x226   : >> { %10527 = vst [vmem:[#allocation35_spill] sm:$0xff] %v7192_v49 }
 0x228   : >> { %v7194_v46 = vpop.permute.xlu1 %1437 }
 0x229   : >> { %10528 = vst [vmem:[#allocation36_spill] sm:$0xff] %v7194_v46  ;;  %v7196_v38 = vpop.permute.xlu0 %1435 }
 0x22a   : >> { %10529 = vst [vmem:[#allocation37_spill] sm:$0xff] %v7196_v38 }
 0x22c   : >> { %v7198_v35 = vpop.permute.xlu1 %1493 }
 0x22d   : >> { %10530 = vst [vmem:[#allocation38_spill] sm:$0xff] %v7198_v35  ;;  %v7200_v11 = vpop.permute.xlu0 %1491 }
 0x22e   : >> { %10531 = vst [vmem:[#allocation39_spill] sm:$0xff] %v7200_v11  ;;  %v7219_v11 = vld [vmem:[%s6674_s9 + $0x40] sm:$0xff] }
 0x230   : >> { %v7202_v31 = vpop.permute.xlu1 %1518 }
 0x231   : >> { %10532 = vst [vmem:[#allocation40_spill] sm:$0xff] %v7202_v31  ;;  %v7204_v33 = vpop.permute.xlu0 %1516 }
 0x232   : >> { %10533 = vst [vmem:[#allocation41_spill] sm:$0xff] %v7204_v33 }
 0x234   : >> { %v7206_v22 = vpop.permute.xlu1 %1564 }
 0x235   : >> { %10534 = vst [vmem:[#allocation42_spill] sm:$0xff] %v7206_v22  ;;  %v7208_v48 = vpop.permute.xlu0 %1562 }
 0x236   : >> { %10535 = vst [vmem:[#allocation43_spill] sm:$0xff] %v7208_v48 }
 0x238   : >> { %v7210_v29 = vpop.permute.xlu1 %1610 }
 0x239   : >> { %10536 = vst [vmem:[#allocation44_spill] sm:$0xff] %v7210_v29  ;;  %v7212_v49 = vpop.permute.xlu0 %1608  ;;  %v6212_v29 = vld [vmem:[%s10348_s1 + $0x37] ss:$8 sm:$0x3] }
 0x23a   : >> { %10537 = vst [vmem:[#allocation45_spill] sm:$0xff] %v7212_v49  ;;  %v7230_v49 = vld [vmem:[%s6674_s9 + $0x50] sm:$0xff]  ;;  %v1734_v48 = vrot.slane %v6212_v29, %v6604_v17 }
 0x23c   : >> { %v7214_v46 = vpop.permute.xlu1 %1656 }
 0x23d   : >> { %10538 = vst [vmem:[#allocation46_spill] sm:$0xff] %v7214_v46  ;;  %v7216_v38 = vpop.permute.xlu0 %1654 }
 0x23e   : >> { %10539 = vst [vmem:[#allocation47_spill] sm:$0xff] %v7216_v38 }
 0x240   : >> { %v1703_v35 = vpop.permute.xlu1 %1702 }
 0x241   : >> { %v1701_v26 = vpop.permute.xlu0 %1700  ;;  %v1710_v38 = vmul.f32 %v7230_v49, %v1703_v35 }
 0x242   : >> { %v1704_v33 = vsel %vm582_vm5, %v1701_v26, %v1703_v35  ;;  %v1708_v22 = vmul.f32 %v7219_v11, %v1701_v26  ;;  %v1738_v26 = vrot.slane %v6212_v29, %v6606_v18 }
 0x243   : >> { %v1709_v46 = vmul.f32 %v7222_v30, %v1704_v33 }
 0x244   : >> { %1714 = vrot.lane.b32.xlu0 %v1708_v22, %s6481_s21  ;;  %v7248_v22 = vld [vmem:[%s6674_s9 + $0x60] sm:$0xf] }
 0x245   : >> { %1716 = vrot.lane.b32.xlu1 %v1709_v46, %s6481_s21 }
 0x248   : >> { %1718 = vrot.lane.b32.xlu0 %v1710_v38, %s6481_s21  ;;  %v7253_v38 = vld [vmem:[%s6674_s9 + $0x70] sm:$0xf] }
 0x249   : >> { %1739 = vrot.lane.b32.xlu1 %v1734_v48, %s6481_s21 }
 0x24c   : >> { %1741 = vrot.lane.b32.xlu0 %v1738_v26, %s6481_s21 }
 0x2b6   : >> { %v7241_v31 = vpop.permute.xlu0 %1714 }
 0x2b7   : >> { %10540 = vst [vmem:[#allocation48_spill] sm:$0xff] %v7241_v31  ;;  %v7243_v33 = vpop.permute.xlu1 %1716 }
 0x2b8   : >> { %10541 = vst [vmem:[#allocation49_spill] sm:$0xff] %v7243_v33 }
 0x2ba   : >> { %v7245_v35 = vpop.permute.xlu0 %1718 }
 0x2bb   : >> { %10542 = vst [vmem:[#allocation50_spill] sm:$0xff] %v7245_v35  ;;  %v1740_v46 = vpop.permute.xlu1 %1739 }
 0x2bc   : >> { %v1747_v32 = vmul.f32 %v7219_v11, %v1740_v46  ;;  %v1750_v34 = vmul.f32 %v7248_v22, %v1740_v46 }
 0x2be   : >> { %v1742_v29 = vpop.permute.xlu0 %1741  ;;  %v1759_v15 = vrot.slane %v1747_v32, 1  ;;  %v1760_v48 = vrot.slane %v1750_v34, 1 }
 0x2bf   : >> { %v1743_v26 = vsel %vm582_vm5, %v1740_v46, %v1742_v29  ;;  %v1749_v31 = vmul.f32 %v7230_v49, %v1742_v29  ;;  %v1752_v35 = vmul.f32 %v7253_v38, %v1742_v29  ;;  %v6213_v46 = vld [vmem:[%s10348_s1 + $0x44] ss:$8 sm:$0x3] }
 0x2c0   : >> { %v1748_v33 = vmul.f32 %v7222_v30, %v1743_v26  ;;  %v1751_v8 = vmul.f32 %v7256_v45, %v1743_v26  ;;  %v1761_v52 = vsel %vm410_vm0, %v1759_v15, %v1760_v48  ;;  %v1792_v15 = vrot.slane %v6213_v46, %v6606_v18 }
 0x2c1   : >> { %v1765_v16 = vrot.slane %v1749_v31, 1  ;;  %v1766_v12 = vrot.slane %v1752_v35, 1  ;;  %1768 = vrot.lane.b32.xlu1 %v1761_v52, %s6481_s21  ;;  %v1788_v31 = vrot.slane %v6213_v46, %v6604_v17 }
 0x2c2   : >> { %v1762_v32 = vrot.slane %v1748_v33, 1  ;;  %v1763_v34 = vrot.slane %v1751_v8, 1 }
 0x2c3   : >> { %v1767_v42 = vsel %vm410_vm0, %v1765_v16, %v1766_v12 }
 0x2c4   : >> { %v1764_v29 = vsel %vm410_vm0, %v1762_v32, %v1763_v34 }
 0x2c5   : >> { %1772 = vrot.lane.b32.xlu1 %v1767_v42, %s6481_s21  ;;  %1770 = vrot.lane.b32.xlu0 %v1764_v29, %s6481_s21 }
 0x2c9   : >> { %1795 = vrot.lane.b32.xlu1 %v1792_v15, %s6481_s21  ;;  %1793 = vrot.lane.b32.xlu0 %v1788_v31, %s6481_s21  ;;  %v6214_v31 = vld [vmem:[%s10348_s1 + $0x51] ss:$8 sm:$0x3] }
 0x333   : >> { %v7276_v8 = vpop.permute.xlu1 %1768 }
 0x334   : >> { %10543 = vst [vmem:[#allocation51_spill] sm:$0xff] %v7276_v8 }
 0x337   : >> { %v7278_v52 = vpop.permute.xlu1 %1772  ;;  %v7280_v33 = vpop.permute.xlu0 %1770 }
 0x338   : >> { %10544 = vst [vmem:[#allocation52_spill] sm:$0xff] %v7278_v52  ;;  %10545 = vst [vmem:[#allocation53_spill] sm:$0xff] %v7280_v33 }
 0x33b   : >> { %v1796_v16 = vpop.permute.xlu1 %1795  ;;  %v1794_v12 = vpop.permute.xlu0 %1793 }
 0x33c   : >> { %v1803_v42 = vmul.f32 %v7230_v49, %v1796_v16  ;;  %v1806_v35 = vmul.f32 %v7253_v38, %v1796_v16  ;;  %v1797_v48 = vsel %vm582_vm5, %v1794_v12, %v1796_v16  ;;  %v1801_v26 = vmul.f32 %v7219_v11, %v1794_v12 }
 0x33d   : >> { %v1802_v32 = vmul.f32 %v7222_v30, %v1797_v48  ;;  %v1804_v34 = vmul.f32 %v7248_v22, %v1794_v12  ;;  %v1805_v46 = vmul.f32 %v7256_v45, %v1797_v48  ;;  %v1842_v12 = vrot.slane %v6214_v31, %v6604_v17 }
 0x33e   : >> { %v1819_v29 = vrot.slane %v1803_v42, 2  ;;  %v1813_v15 = vrot.slane %v1801_v26, 2  ;;  %v1820_v52 = vrot.slane %v1806_v35, 2  ;;  %v1846_v35 = vrot.slane %v6214_v31, %v6606_v18 }
 0x33f   : >> { %v1814_v8 = vrot.slane %v1804_v34, 2  ;;  %v1816_v33 = vrot.slane %v1802_v32, 2  ;;  %v1817_v6 = vrot.slane %v1805_v46, 2 }
 0x340   : >> { %v1821_v42 = vsel %vm457_vm1, %v1819_v29, %v1820_v52 }
 0x341   : >> { %v1815_v16 = vsel %vm457_vm1, %v1813_v15, %v1814_v8  ;;  %v1818_v41 = vsel %vm457_vm1, %v1816_v33, %v1817_v6 }
 0x342   : >> { %1822 = vrot.lane.b32.xlu0 %v1815_v16, %s6481_s21  ;;  %1824 = vrot.lane.b32.xlu1 %v1818_v41, %s6481_s21 }
 0x346   : >> { %1826 = vrot.lane.b32.xlu0 %v1821_v42, %s6481_s21  ;;  %1847 = vrot.lane.b32.xlu1 %v1842_v12, %s6481_s21 }
 0x34a   : >> { %1849 = vrot.lane.b32.xlu0 %v1846_v35, %s6481_s21 }
 0x3b4   : >> { %v7302_v48 = vpop.permute.xlu0 %1822  ;;  %v7304_v8 = vpop.permute.xlu1 %1824 }
 0x3b5   : >> { %10546 = vst [vmem:[#allocation54_spill] sm:$0xff] %v7302_v48  ;;  %10547 = vst [vmem:[#allocation55_spill] sm:$0xff] %v7304_v8 }
 0x3b8   : >> { %v7306_v6 = vpop.permute.xlu0 %1826  ;;  %v1848_v33 = vpop.permute.xlu1 %1847 }
 0x3b9   : >> { %10548 = vst [vmem:[#allocation56_spill] sm:$0xff] %v7306_v6  ;;  %v1855_v41 = vmul.f32 %v7219_v11, %v1848_v33  ;;  %v1858_v26 = vmul.f32 %v7248_v22, %v1848_v33 }
 0x3bb   : >> { %v1867_v52 = vrot.slane %v1855_v41, 3  ;;  %v1868_v32 = vrot.slane %v1858_v26, 3  ;;  %v6215_v41 = vld [vmem:[%s10348_s1 + $0x56] ss:$8 sm:$0x3] }
 0x3bc   : >> { %v1850_v34 = vpop.permute.xlu0 %1849 }
 0x3bd   : >> { %v1851_v46 = vsel %vm582_vm5, %v1848_v33, %v1850_v34  ;;  %v1857_v29 = vmul.f32 %v7230_v49, %v1850_v34  ;;  %v1860_v15 = vmul.f32 %v7253_v38, %v1850_v34  ;;  %v1869_v31 = vsel %vm504_vm2, %v1867_v52, %v1868_v32 }
 0x3be   : >> { %v1856_v16 = vmul.f32 %v7222_v30, %v1851_v46  ;;  %v1859_v12 = vmul.f32 %v7256_v45, %v1851_v46  ;;  %1876 = vrot.lane.b32.xlu1 %v1869_v31, %s6481_s21  ;;  %v1900_v32 = vrot.slane %v6215_v41, %v6606_v18  ;;  %v1896_v34 = vrot.slane %v6215_v41, %v6604_v17  ;;  %v6216_v31 = vld [vmem:[%s10348_s1 + $0x33] ss:$8 sm:$0x3] }
 0x3bf   : >> { %v1873_v42 = vrot.slane %v1857_v29, 3  ;;  %v1874_v35 = vrot.slane %v1860_v15, 3  ;;  %v1954_v4 = vrot.slane %v6216_v31, %v6606_v18 }
 0x3c0   : >> { %v1870_v26 = vrot.slane %v1856_v16, 3  ;;  %v1871_v33 = vrot.slane %v1859_v12, 3  ;;  %v6218_v12 = vld [vmem:[%s10348_s1 + $0x45] ss:$8 sm:$0x3] }
 0x3c1   : >> { %v1875_v6 = vsel %vm504_vm2, %v1873_v42, %v1874_v35  ;;  %v2016_v48 = vrot.slane %v6218_v12, %v6604_v17 }
 0x3c2   : >> { %1880 = vrot.lane.b32.xlu1 %v1875_v6, %s6481_s21  ;;  %v1872_v52 = vsel %vm504_vm2, %v1870_v26, %v1871_v33  ;;  %v6217_v6 = vld [vmem:[%s10348_s1 + $0x40] ss:$8 sm:$0x3] }
 0x3c3   : >> { %1878 = vrot.lane.b32.xlu0 %v1872_v52, %s6481_s21  ;;  %v1978_v26 = vrot.slane %v6217_v6, %v6604_v17 }
 0x3c6   : >> { %1903 = vrot.lane.b32.xlu1 %v1900_v32, %s6481_s21 }
 0x3c7   : >> { %1901 = vrot.lane.b32.xlu0 %v1896_v34, %s6481_s21  ;;  %v1950_v34 = vrot.slane %v6216_v31, %v6604_v17  ;;  %v2023_v31 = vmul.f32 %v7222_v30, %v2016_v48 }
 0x430   : >> { %v7328_v46 = vpop.permute.xlu1 %1876 }
 0x431   : >> { %10549 = vst [vmem:[#allocation57_spill] sm:$0xff] %v7328_v46 }
 0x434   : >> { %v7330_v29 = vpop.permute.xlu1 %1880 }
 0x435   : >> { %10550 = vst [vmem:[#allocation58_spill] sm:$0xff] %v7330_v29  ;;  %v7332_v15 = vpop.permute.xlu0 %1878 }
 0x436   : >> { %10551 = vst [vmem:[#allocation59_spill] sm:$0xff] %v7332_v15  ;;  %v1982_v15 = vrot.slane %v6217_v6, %v6606_v18  ;;  %v6219_v6 = vld [vmem:[%s10348_s1 + $0x52] ss:$8 sm:$0x3] }
 0x438   : >> { %v1904_v16 = vpop.permute.xlu1 %1903 }
 0x439   : >> { %v1911_v42 = vmul.f32 %v7230_v49, %v1904_v16  ;;  %v1914_v35 = vmul.f32 %v7253_v38, %v1904_v16  ;;  %v1902_v41 = vpop.permute.xlu0 %1901 }
 0x43a   : >> { %v1905_v33 = vsel %vm582_vm5, %v1902_v41, %v1904_v16  ;;  %v1909_v52 = vmul.f32 %v7219_v11, %v1902_v41  ;;  %v1912_v32 = vmul.f32 %v7248_v22, %v1902_v41  ;;  %v1985_v11 = vmul.f32 %v7222_v30, %v1978_v26 }
 0x43b   : >> { %v1910_v29 = vmul.f32 %v7222_v30, %v1905_v33  ;;  %v1913_v46 = vmul.f32 %v7256_v45, %v1905_v33  ;;  %v1927_v8 = vrot.slane %v1911_v42, 4  ;;  %v1928_v37 = vrot.slane %v1914_v35, 4 }
 0x43c   : >> { %v1921_v25 = vrot.slane %v1909_v52, 4  ;;  %v1922_v47 = vrot.slane %v1912_v32, 4  ;;  %v1987_v22 = vmul.f32 %v7256_v45, %v1978_v26  ;;  %v1986_v35 = vmul.f32 %v7230_v49, %v1982_v15 }
 0x43d   : >> { %v1924_v5 = vrot.slane %v1910_v29, 4  ;;  %v1925_v16 = vrot.slane %v1913_v46, 4  ;;  %v1988_v46 = vmul.f32 %v7253_v38, %v1982_v15  ;;  %v2020_v29 = vrot.slane %v6218_v12, %v6606_v18  ;;  %v6220_v15 = vld [vmem:[%s10348_s1 + $0x57] ss:$8 sm:$0x3] }
 0x43e   : >> { %v1923_v41 = vsel %vm551_vm3, %v1921_v25, %v1922_v47  ;;  %v1929_v47 = vsel %vm551_vm3, %v1927_v8, %v1928_v37  ;;  %v1957_v25 = vmul.f32 %v7222_v30, %v1950_v34  ;;  %v2025_v26 = vmul.f32 %v7256_v45, %v2016_v48 }
 0x43f   : >> { %1930 = vrot.lane.b32.xlu0 %v1923_v41, %s6481_s21  ;;  %v1926_v42 = vsel %vm551_vm3, %v1924_v5, %v1925_v16  ;;  %v1993_v33 = vrot.slane %v1985_v11, 1  ;;  %v1994_v52 = vrot.slane %v1987_v22, 1  ;;  %v2054_v5 = vrot.slane %v6219_v6, %v6604_v17 }
 0x440   : >> { %1932 = vrot.lane.b32.xlu1 %v1926_v42, %s6481_s21  ;;  %v1958_v32 = vmul.f32 %v7230_v49, %v1954_v4  ;;  %v1996_v12 = vrot.slane %v1986_v35, 1  ;;  %v1997_v37 = vrot.slane %v1988_v46, 1  ;;  %v2024_v8 = vmul.f32 %v7230_v49, %v2020_v29 }
 0x441   : >> { %v2026_v34 = vmul.f32 %v7253_v38, %v2020_v29  ;;  %v2031_v48 = vrot.slane %v2023_v31, 2  ;;  %v2032_v16 = vrot.slane %v2025_v26, 2  ;;  %v2058_v11 = vrot.slane %v6219_v6, %v6606_v18 }
 0x442   : >> { %v1995_v4 = vsel %vm410_vm0, %v1993_v33, %v1994_v52  ;;  %v2061_v22 = vmul.f32 %v7222_v30, %v2054_v5  ;;  %v2063_v41 = vmul.f32 %v7256_v45, %v2054_v5  ;;  %v2092_v42 = vrot.slane %v6220_v15, %v6604_v17 }
 0x443   : >> { %1934 = vrot.lane.b32.xlu0 %v1929_v47, %s6481_s21  ;;  %v1998_v35 = vsel %vm410_vm0, %v1996_v12, %v1997_v37  ;;  %v2034_v46 = vrot.slane %v2024_v8, 2  ;;  %v2035_v29 = vrot.slane %v2026_v34, 2  ;;  %v2033_v47 = vsel %vm457_vm1, %v2031_v48, %v2032_v16 }
 0x444   : >> { %1961 = vrot.lane.b32.xlu1 %v1957_v25, %s6480_s7  ;;  %v2062_v6 = vmul.f32 %v7230_v49, %v2058_v11  ;;  %v2064_v25 = vmul.f32 %v7253_v38, %v2058_v11  ;;  %v2096_v31 = vrot.slane %v6220_v15, %v6606_v18  ;;  %v2069_v26 = vrot.slane %v2061_v22, 3 }
 0x445   : >> { %v2070_v33 = vrot.slane %v2063_v41, 3  ;;  %v2099_v52 = vmul.f32 %v7222_v30, %v2092_v42  ;;  %v2101_v5 = vmul.f32 %v7256_v45, %v2092_v42  ;;  %v6223_v42 = vld [vmem:[%s10348_s1 + $0x34] ss:$8 sm:$0x3] }
 0x446   : >> { %v2072_v12 = vrot.slane %v2062_v6, 3  ;;  %v2073_v37 = vrot.slane %v2064_v25, 3  ;;  %v2100_v8 = vmul.f32 %v7230_v49, %v2096_v31  ;;  %v2102_v34 = vmul.f32 %v7253_v38, %v2096_v31 }
 0x447   : >> { %1963 = vrot.lane.b32.xlu0 %v1958_v32, %s6480_s7  ;;  %v2036_v32 = vsel %vm457_vm1, %v2034_v46, %v2035_v29  ;;  %v2071_v15 = vsel %vm504_vm2, %v2069_v26, %v2070_v33  ;;  %v2107_v48 = vrot.slane %v2099_v52, 4  ;;  %v2108_v16 = vrot.slane %v2101_v5, 4 }
 0x448   : >> { %1999 = vrot.lane.b32.xlu1 %v1995_v4, %s6480_s7  ;;  %v2074_v11 = vsel %vm504_vm2, %v2072_v12, %v2073_v37  ;;  %v2110_v4 = vrot.slane %v2100_v8, 4  ;;  %v2111_v22 = vrot.slane %v2102_v34, 4  ;;  %v2132_v46 = vrot.slane %v6223_v42, %v6604_v17 }
 0x449   : >> { %v2109_v41 = vsel %vm551_vm3, %v2107_v48, %v2108_v16  ;;  %v2136_v29 = vrot.slane %v6223_v42, %v6606_v18  ;;  %v7443_v16 = vld [vmem:[%s6674_s9 + $0x58] sm:$0xff] }
 0x44b   : >> { %2001 = vrot.lane.b32.xlu0 %v1998_v35, %s6480_s7  ;;  %v2112_v35 = vsel %vm551_vm3, %v2110_v4, %v2111_v22 }
 0x44c   : >> { %2037 = vrot.lane.b32.xlu1 %v2033_v47, %s6480_s7 }
 0x44f   : >> { %2039 = vrot.lane.b32.xlu0 %v2036_v32, %s6480_s7 }
 0x450   : >> { %2075 = vrot.lane.b32.xlu1 %v2071_v15, %s6480_s7 }
 0x453   : >> { %2077 = vrot.lane.b32.xlu0 %v2074_v11, %s6480_s7 }
 0x454   : >> { %2113 = vrot.lane.b32.xlu1 %v2109_v41, %s6480_s7  ;;  %v6224_v41 = vld [vmem:[%s10348_s1 + $0x41] ss:$8 sm:$0x3] }
 0x457   : >> { %2115 = vrot.lane.b32.xlu0 %v2112_v35, %s6480_s7  ;;  %v2175_v35 = vrot.slane %v6224_v41, %v6606_v18 }
 0x458   : >> { %2137 = vrot.lane.b32.xlu1 %v2132_v46, %s6482_s25  ;;  %v2171_v46 = vrot.slane %v6224_v41, %v6604_v17 }
 0x45b   : >> { %2139 = vrot.lane.b32.xlu0 %v2136_v29, %s6482_s25 }
 0x4b1   : >> { %v7415_v47 = vpop.permute.xlu0 %1930 }
 0x4b2   : >> { %10552 = vst [vmem:[#allocation60_spill] sm:$0xff] %v7415_v47  ;;  %v7417_v6 = vpop.permute.xlu1 %1932 }
 0x4b3   : >> { %10553 = vst [vmem:[#allocation61_spill] sm:$0xff] %v7417_v6 }
 0x4b5   : >> { %v7419_v25 = vpop.permute.xlu0 %1934 }
 0x4b6   : >> { %10554 = vst [vmem:[#allocation62_spill] sm:$0xff] %v7419_v25  ;;  %v7421_v31 = vpop.permute.xlu1 %1961 }
 0x4b7   : >> { %10555 = vst [vmem:[#allocation63_spill] sm:$0xff] %v7421_v31 }
 0x4b9   : >> { %v7423_v26 = vpop.permute.xlu0 %1963 }
 0x4ba   : >> { %10556 = vst [vmem:[#allocation64_spill] sm:$0xff] %v7423_v26  ;;  %v7425_v33 = vpop.permute.xlu1 %1999 }
 0x4bb   : >> { %10557 = vst [vmem:[#allocation65_spill] sm:$0xff] %v7425_v33 }
 0x4bd   : >> { %v7427_v52 = vpop.permute.xlu0 %2001 }
 0x4be   : >> { %10558 = vst [vmem:[#allocation66_spill] sm:$0xff] %v7427_v52  ;;  %v7429_v5 = vpop.permute.xlu1 %2037 }
 0x4bf   : >> { %10559 = vst [vmem:[#allocation67_spill] sm:$0xff] %v7429_v5 }
 0x4c1   : >> { %v7431_v32 = vpop.permute.xlu0 %2039 }
 0x4c2   : >> { %10560 = vst [vmem:[#allocation68_spill] sm:$0xff] %v7431_v32  ;;  %v7433_v12 = vpop.permute.xlu1 %2075 }
 0x4c3   : >> { %10561 = vst [vmem:[#allocation69_spill] sm:$0xff] %v7433_v12  ;;  %v6225_v12 = vld [vmem:[%s10348_s1 + $0x46] ss:$8 sm:$0x3] }
 0x4c5   : >> { %v7435_v37 = vpop.permute.xlu0 %2077 }
 0x4c6   : >> { %10562 = vst [vmem:[#allocation70_spill] sm:$0xff] %v7435_v37  ;;  %v7437_v8 = vpop.permute.xlu1 %2113 }
 0x4c7   : >> { %10563 = vst [vmem:[#allocation71_spill] sm:$0xff] %v7437_v8 }
 0x4c9   : >> { %v7439_v34 = vpop.permute.xlu0 %2115 }
 0x4ca   : >> { %10564 = vst [vmem:[#allocation72_spill] sm:$0xff] %v7439_v34  ;;  %v2138_v15 = vpop.permute.xlu1 %2137 }
 0x4cb   : >> { %v2145_v48 = vmul.f32 %v7222_v30, %v2138_v15 }
 0x4cd   : >> { %v2140_v11 = vpop.permute.xlu0 %2139  ;;  %2151 = vrot.lane.b32.xlu1 %v2145_v48, %s6482_s25 }
 0x4ce   : >> { %v2141_v4 = vsel %vm1020_vm4, %v2138_v15, %v2140_v11  ;;  %v2147_v22 = vmul.f32 %v7443_v16, %v2140_v11  ;;  %v7465_v11 = vld [vmem:[%s6674_s9 + $0x78] sm:$0xf] }
 0x4cf   : >> { %v2146_v42 = vmul.f32 %v7230_v49, %v2141_v4 }
 0x4d1   : >> { %2155 = vrot.lane.b32.xlu1 %v2147_v22, %s6482_s25  ;;  %2153 = vrot.lane.b32.xlu0 %v2146_v42, %s6482_s25 }
 0x4d5   : >> { %2178 = vrot.lane.b32.xlu1 %v2175_v35, %s6482_s25  ;;  %2176 = vrot.lane.b32.xlu0 %v2171_v46, %s6482_s25 }
 0x53f   : >> { %v7458_v29 = vpop.permute.xlu1 %2151 }
 0x540   : >> { %10565 = vst [vmem:[#allocation73_spill] sm:$0xff] %v7458_v29 }
 0x543   : >> { %v7460_v15 = vpop.permute.xlu1 %2155  ;;  %v7462_v48 = vpop.permute.xlu0 %2153 }
 0x544   : >> { %10566 = vst [vmem:[#allocation74_spill] sm:$0xff] %v7460_v15  ;;  %10567 = vst [vmem:[#allocation75_spill] sm:$0xff] %v7462_v48 }
 0x547   : >> { %v2179_v4 = vpop.permute.xlu1 %2178  ;;  %v2177_v22 = vpop.permute.xlu0 %2176 }
 0x548   : >> { %v2186_v42 = vmul.f32 %v7443_v16, %v2179_v4  ;;  %v2189_v8 = vmul.f32 %v7465_v11, %v2179_v4  ;;  %v2180_v41 = vsel %vm1020_vm4, %v2177_v22, %v2179_v4  ;;  %v2184_v35 = vmul.f32 %v7222_v30, %v2177_v22 }
 0x549   : >> { %v2185_v46 = vmul.f32 %v7230_v49, %v2180_v41  ;;  %v2187_v29 = vmul.f32 %v7256_v45, %v2177_v22  ;;  %v2188_v15 = vmul.f32 %v7253_v38, %v2180_v41  ;;  %v2225_v22 = vrot.slane %v6225_v12, %v6604_v17 }
 0x54a   : >> { %v2202_v34 = vrot.slane %v2186_v42, 1  ;;  %v2196_v48 = vrot.slane %v2184_v35, 1  ;;  %v2203_v37 = vrot.slane %v2189_v8, 1  ;;  %v2229_v8 = vrot.slane %v6225_v12, %v6606_v18 }
 0x54b   : >> { %v2197_v5 = vrot.slane %v2187_v29, 1  ;;  %v2199_v32 = vrot.slane %v2185_v46, 1  ;;  %v2200_v33 = vrot.slane %v2188_v15, 1 }
 0x54c   : >> { %v2204_v42 = vsel %vm410_vm0, %v2202_v34, %v2203_v37 }
 0x54d   : >> { %v2198_v4 = vsel %vm410_vm0, %v2196_v48, %v2197_v5  ;;  %v2201_v52 = vsel %vm410_vm0, %v2199_v32, %v2200_v33 }
 0x54e   : >> { %2205 = vrot.lane.b32.xlu0 %v2198_v4, %s6482_s25  ;;  %2207 = vrot.lane.b32.xlu1 %v2201_v52, %s6482_s25 }
 0x552   : >> { %2209 = vrot.lane.b32.xlu0 %v2204_v42, %s6482_s25  ;;  %2230 = vrot.lane.b32.xlu1 %v2225_v22, %s6482_s25 }
 0x556   : >> { %2232 = vrot.lane.b32.xlu0 %v2229_v8, %s6482_s25 }
 0x5c0   : >> { %v7487_v29 = vpop.permute.xlu0 %2205  ;;  %v7489_v5 = vpop.permute.xlu1 %2207 }
 0x5c1   : >> { %10568 = vst [vmem:[#allocation76_spill] sm:$0xff] %v7487_v29  ;;  %10569 = vst [vmem:[#allocation77_spill] sm:$0xff] %v7489_v5  ;;  %v6227_v29 = vld [vmem:[%s10348_s1 + $0x60] ss:$8 sm:$0x3] }
 0x5c4   : >> { %v7491_v33 = vpop.permute.xlu0 %2209  ;;  %v2231_v32 = vpop.permute.xlu1 %2230 }
 0x5c5   : >> { %10570 = vst [vmem:[#allocation78_spill] sm:$0xff] %v7491_v33  ;;  %v2238_v52 = vmul.f32 %v7222_v30, %v2231_v32  ;;  %v2241_v15 = vmul.f32 %v7256_v45, %v2231_v32 }
 0x5c7   : >> { %v2250_v37 = vrot.slane %v2238_v52, 2  ;;  %v2251_v34 = vrot.slane %v2241_v15, 2  ;;  %v6226_v52 = vld [vmem:[%s10348_s1 + $0x53] ss:$8 sm:$0x3] }
 0x5c8   : >> { %v2233_v48 = vpop.permute.xlu0 %2232 }
 0x5c9   : >> { %v2234_v41 = vsel %vm1020_vm4, %v2231_v32, %v2233_v48  ;;  %v2240_v12 = vmul.f32 %v7443_v16, %v2233_v48  ;;  %v2243_v35 = vmul.f32 %v7465_v11, %v2233_v48  ;;  %v2252_v46 = vsel %vm457_vm1, %v2250_v37, %v2251_v34 }
 0x5ca   : >> { %v2239_v4 = vmul.f32 %v7230_v49, %v2234_v41  ;;  %v2242_v22 = vmul.f32 %v7253_v38, %v2234_v41  ;;  %2259 = vrot.lane.b32.xlu1 %v2252_v46, %s6482_s25  ;;  %v2283_v34 = vrot.slane %v6226_v52, %v6606_v18  ;;  %v2279_v48 = vrot.slane %v6226_v52, %v6604_v17 }
 0x5cb   : >> { %v2256_v42 = vrot.slane %v2240_v12, 2  ;;  %v2257_v8 = vrot.slane %v2243_v35, 2 }
 0x5cc   : >> { %v2253_v15 = vrot.slane %v2239_v4, 2  ;;  %v2254_v32 = vrot.slane %v2242_v22, 2 }
 0x5cd   : >> { %v2258_v33 = vsel %vm457_vm1, %v2256_v42, %v2257_v8 }
 0x5ce   : >> { %2263 = vrot.lane.b32.xlu1 %v2258_v33, %s6482_s25  ;;  %v2255_v37 = vsel %vm457_vm1, %v2253_v15, %v2254_v32 }
 0x5cf   : >> { %2261 = vrot.lane.b32.xlu0 %v2255_v37, %s6482_s25 }
 0x5d2   : >> { %2286 = vrot.lane.b32.xlu1 %v2283_v34, %s6482_s25 }
 0x5d3   : >> { %2284 = vrot.lane.b32.xlu0 %v2279_v48, %s6482_s25 }
 0x63c   : >> { %v7513_v41 = vpop.permute.xlu1 %2259 }
 0x63d   : >> { %10571 = vst [vmem:[#allocation79_spill] sm:$0xff] %v7513_v41 }
 0x640   : >> { %v7515_v12 = vpop.permute.xlu1 %2263 }
 0x641   : >> { %10572 = vst [vmem:[#allocation80_spill] sm:$0xff] %v7515_v12  ;;  %v7517_v35 = vpop.permute.xlu0 %2261 }
 0x642   : >> { %10573 = vst [vmem:[#allocation81_spill] sm:$0xff] %v7517_v35 }
 0x644   : >> { %v2287_v46 = vpop.permute.xlu1 %2286 }
 0x645   : >> { %v2294_v33 = vmul.f32 %v7443_v16, %v2287_v46  ;;  %v2297_v4 = vmul.f32 %v7465_v11, %v2287_v46  ;;  %v2285_v22 = vpop.permute.xlu0 %2284 }
 0x646   : >> { %v2288_v42 = vsel %vm1020_vm4, %v2285_v22, %v2287_v46  ;;  %v2292_v8 = vmul.f32 %v7222_v30, %v2285_v22  ;;  %v2295_v52 = vmul.f32 %v7256_v45, %v2285_v22 }
 0x647   : >> { %v2293_v15 = vmul.f32 %v7230_v49, %v2288_v42  ;;  %v2296_v32 = vmul.f32 %v7253_v38, %v2288_v42  ;;  %v2310_v37 = vrot.slane %v2294_v33, 3  ;;  %v2311_v34 = vrot.slane %v2297_v4, 3 }
 0x648   : >> { %v2304_v48 = vrot.slane %v2292_v8, 3  ;;  %v2305_v12 = vrot.slane %v2295_v52, 3  ;;  %v2333_v33 = vrot.slane %v6227_v29, %v6604_v17  ;;  %v2337_v4 = vrot.slane %v6227_v29, %v6606_v18 }
 0x649   : >> { %v2307_v41 = vrot.slane %v2293_v15, 3  ;;  %v2308_v35 = vrot.slane %v2296_v32, 3  ;;  %v2312_v42 = vsel %vm504_vm2, %v2310_v37, %v2311_v34 }
 0x64a   : >> { %v2306_v46 = vsel %vm504_vm2, %v2304_v48, %v2305_v12 }
 0x64b   : >> { %2313 = vrot.lane.b32.xlu0 %v2306_v46, %s6482_s25  ;;  %v2309_v22 = vsel %vm504_vm2, %v2307_v41, %v2308_v35 }
 0x64c   : >> { %2315 = vrot.lane.b32.xlu1 %v2309_v22, %s6482_s25 }
 0x64f   : >> { %2317 = vrot.lane.b32.xlu0 %v2312_v42, %s6482_s25 }
 0x650   : >> { %2338 = vrot.lane.b32.xlu1 %v2333_v33, %s6482_s25 }
 0x653   : >> { %2340 = vrot.lane.b32.xlu0 %v2337_v4, %s6482_s25 }
 0x6bd   : >> { %v7539_v8 = vpop.permute.xlu0 %2313 }
 0x6be   : >> { %10574 = vst [vmem:[#allocation82_spill] sm:$0xff] %v7539_v8  ;;  %v7541_v12 = vpop.permute.xlu1 %2315 }
 0x6bf   : >> { %10575 = vst [vmem:[#allocation83_spill] sm:$0xff] %v7541_v12  ;;  %v6248_v12 = vld [vmem:[%s10348_s1 + $0x82] ss:$8 sm:$0x3] }
 0x6c1   : >> { %v7543_v52 = vpop.permute.xlu0 %2317 }
 0x6c2   : >> { %10576 = vst [vmem:[#allocation84_spill] sm:$0xff] %v7543_v52  ;;  %v2339_v41 = vpop.permute.xlu1 %2338 }
 0x6c3   : >> { %v2346_v35 = vmul.f32 %v7222_v30, %v2339_v41  ;;  %v2349_v15 = vmul.f32 %v7256_v45, %v2339_v41 }
 0x6c5   : >> { %v2358_v32 = vrot.slane %v2346_v35, 4  ;;  %v2359_v37 = vrot.slane %v2349_v15, 4  ;;  %v2341_v34 = vpop.permute.xlu0 %2340  ;;  %v6229_v35 = vld [vmem:[%s10348_s1 + $0x42] ss:$8 sm:$0x3] }
 0x6c6   : >> { %v2342_v29 = vsel %vm1020_vm4, %v2339_v41, %v2341_v34  ;;  %v2348_v48 = vmul.f32 %v7443_v16, %v2341_v34  ;;  %v2351_v46 = vmul.f32 %v7465_v11, %v2341_v34  ;;  %v6228_v41 = vld [vmem:[%s10348_s1 + $0x35] ss:$8 sm:$0x3]  ;;  %v2412_v15 = vrot.slane %v6229_v35, %v6604_v17 }
 0x6c7   : >> { %v2347_v22 = vmul.f32 %v7230_v49, %v2342_v29  ;;  %v2350_v42 = vmul.f32 %v7253_v38, %v2342_v29  ;;  %v2360_v33 = vsel %vm551_vm3, %v2358_v32, %v2359_v37  ;;  %v2391_v49 = vrot.slane %v6228_v41, %v6606_v18  ;;  %v6230_v32 = vld [vmem:[%s10348_s1 + $0x47] ss:$8 sm:$0x3]  ;;  %v6231_v29 = vld [vmem:[%s10348_s1 + $0x54] ss:$8 sm:$0x3] }
 0x6c8   : >> { %v2364_v4 = vrot.slane %v2348_v48, 4  ;;  %v2365_v52 = vrot.slane %v2351_v46, 4  ;;  %2367 = vrot.lane.b32.xlu1 %v2360_v33, %s6482_s25  ;;  %v2387_v38 = vrot.slane %v6228_v41, %v6604_v17  ;;  %v2462_v37 = vrot.slane %v6230_v32, %v6606_v18  ;;  %v6241_v41 = vld [vmem:[%s10348_s1 + $0x67] ss:$8 sm:$0x3] }
 0x6c9   : >> { %v2361_v45 = vrot.slane %v2347_v22, 4  ;;  %v2362_v30 = vrot.slane %v2350_v42, 4  ;;  %v2458_v34 = vrot.slane %v6230_v32, %v6604_v17  ;;  %v2508_v48 = vrot.slane %v6231_v29, %v6606_v18  ;;  %v6232_v22 = vld [vmem:[%s10348_s1 + $0x61] ss:$8 sm:$0x3] }
 0x6ca   : >> { %v2366_v16 = vsel %vm551_vm3, %v2364_v4, %v2365_v52  ;;  %v2416_v52 = vrot.slane %v6229_v35, %v6606_v18  ;;  %v2504_v46 = vrot.slane %v6231_v29, %v6604_v17  ;;  %v2554_v42 = vrot.slane %v6232_v22, %v6606_v18  ;;  %v6240_v4 = vld [vmem:[%s10348_s1 + $0x62] ss:$8 sm:$0x3] }
 0x6cb   : >> { %v2363_v11 = vsel %vm551_vm3, %v2361_v45, %v2362_v30  ;;  %v2550_v33 = vrot.slane %v6232_v22, %v6604_v17  ;;  %v2610_v45 = vrot.slane %v6240_v4, %v6606_v18  ;;  %v2606_v30 = vrot.slane %v6240_v4, %v6604_v17 }
 0x6cc   : >> { %2371 = vrot.lane.b32.xlu1 %v2366_v16, %s6482_s25  ;;  %2369 = vrot.lane.b32.xlu0 %v2363_v11, %s6482_s25  ;;  %v2635_v16 = vrot.slane %v6241_v41, %v6606_v18  ;;  %v2631_v11 = vrot.slane %v6241_v41, %v6604_v17 }
 0x6d0   : >> { %2394 = vrot.lane.b32.xlu1 %v2391_v49, %s6480_s7  ;;  %2392 = vrot.lane.b32.xlu0 %v2387_v38, %s6480_s7  ;;  %v6242_v49 = vld [vmem:[%s10348_s1 + $0x74] ss:$8 sm:$0x3] }
 0x6d1   : >> { %v2681_v38 = vrot.slane %v6242_v49, %v6606_v18  ;;  %v2677_v35 = vrot.slane %v6242_v49, %v6604_v17 }
 0x6d4   : >> { %2419 = vrot.lane.b32.xlu1 %v2416_v52, %s6480_s7  ;;  %2417 = vrot.lane.b32.xlu0 %v2412_v15, %s6480_s7  ;;  %v6243_v52 = vld [vmem:[%s10348_s1 + $0x81] ss:$8 sm:$0x3] }
 0x6d5   : >> { %v2727_v15 = vrot.slane %v6243_v52, %v6606_v18  ;;  %v2723_v32 = vrot.slane %v6243_v52, %v6604_v17 }
 0x6d8   : >> { %2465 = vrot.lane.b32.xlu1 %v2462_v37, %s6480_s7  ;;  %2463 = vrot.lane.b32.xlu0 %v2458_v34, %s6480_s7  ;;  %v6244_v37 = vld [vmem:[%s10348_s1 + $0x86] ss:$8 sm:$0x3] }
 0x6d9   : >> { %v2773_v34 = vrot.slane %v6244_v37, %v6606_v18  ;;  %v2769_v29 = vrot.slane %v6244_v37, %v6604_v17 }
 0x6dc   : >> { %2511 = vrot.lane.b32.xlu1 %v2508_v48, %s6480_s7  ;;  %2509 = vrot.lane.b32.xlu0 %v2504_v46, %s6480_s7  ;;  %v6245_v48 = vld [vmem:[%s10348_s1 + $0x63] ss:$8 sm:$0x3] }
 0x6dd   : >> { %v2819_v46 = vrot.slane %v6245_v48, %v6606_v18  ;;  %v2815_v22 = vrot.slane %v6245_v48, %v6604_v17 }
 0x6e0   : >> { %2557 = vrot.lane.b32.xlu1 %v2554_v42, %s6480_s7  ;;  %2555 = vrot.lane.b32.xlu0 %v2550_v33, %s6480_s7 }
 0x6e4   : >> { %2613 = vrot.lane.b32.xlu1 %v2610_v45, %s6480_s7  ;;  %2611 = vrot.lane.b32.xlu0 %v2606_v30, %s6480_s7 }
 0x6e8   : >> { %2638 = vrot.lane.b32.xlu1 %v2635_v16, %s6480_s7  ;;  %2636 = vrot.lane.b32.xlu0 %v2631_v11, %s6480_s7 }
 0x6ec   : >> { %2684 = vrot.lane.b32.xlu1 %v2681_v38, %s6480_s7  ;;  %2682 = vrot.lane.b32.xlu0 %v2677_v35, %s6480_s7 }
 0x6f0   : >> { %2730 = vrot.lane.b32.xlu1 %v2727_v15, %s6480_s7  ;;  %2728 = vrot.lane.b32.xlu0 %v2723_v32, %s6480_s7 }
 0x6f4   : >> { %2776 = vrot.lane.b32.xlu1 %v2773_v34, %s6480_s7  ;;  %2774 = vrot.lane.b32.xlu0 %v2769_v29, %s6480_s7 }
 0x6f8   : >> { %2822 = vrot.lane.b32.xlu1 %v2819_v46, %s6481_s21  ;;  %2820 = vrot.lane.b32.xlu0 %v2815_v22, %s6481_s21 }
 0x73a   : >> { %v7635_v42 = vpop.permute.xlu1 %2367 }
 0x73b   : >> { %10577 = vst [vmem:[#allocation85_spill] sm:$0xff] %v7635_v42 }
 0x73e   : >> { %v7637_v33 = vpop.permute.xlu1 %2371  ;;  %v7639_v4 = vpop.permute.xlu0 %2369 }
 0x73f   : >> { %10578 = vst [vmem:[#allocation86_spill] sm:$0xff] %v7637_v33  ;;  %10579 = vst [vmem:[#allocation87_spill] sm:$0xff] %v7639_v4  ;;  %v6247_v4 = vld [vmem:[%s10348_s1 + $0x75] ss:$8 sm:$0x3] }
 0x742   : >> { %v7641_v45 = vpop.permute.xlu1 %2394  ;;  %v7643_v30 = vpop.permute.xlu0 %2392 }
 0x743   : >> { %10580 = vst [vmem:[#allocation88_spill] sm:$0xff] %v7641_v45  ;;  %10581 = vst [vmem:[#allocation89_spill] sm:$0xff] %v7643_v30 }
 0x746   : >> { %v7645_v41 = vpop.permute.xlu1 %2419  ;;  %v7647_v16 = vpop.permute.xlu0 %2417 }
 0x747   : >> { %10582 = vst [vmem:[#allocation90_spill] sm:$0xff] %v7645_v41  ;;  %10583 = vst [vmem:[#allocation91_spill] sm:$0xff] %v7647_v16  ;;  %v7719_v41 = vld [vmem:[%s6674_s9 + $0xa8] sm:$0xf] }
 0x74a   : >> { %v7649_v11 = vpop.permute.xlu1 %2465  ;;  %v7651_v49 = vpop.permute.xlu0 %2463 }
 0x74b   : >> { %10584 = vst [vmem:[#allocation92_spill] sm:$0xff] %v7649_v11  ;;  %10585 = vst [vmem:[#allocation93_spill] sm:$0xff] %v7651_v49 }
 0x74e   : >> { %v7653_v38 = vpop.permute.xlu1 %2511  ;;  %v7655_v35 = vpop.permute.xlu0 %2509 }
 0x74f   : >> { %10586 = vst [vmem:[#allocation94_spill] sm:$0xff] %v7653_v38  ;;  %10587 = vst [vmem:[#allocation95_spill] sm:$0xff] %v7655_v35 }
 0x752   : >> { %v7657_v52 = vpop.permute.xlu1 %2557  ;;  %v7659_v15 = vpop.permute.xlu0 %2555 }
 0x753   : >> { %10588 = vst [vmem:[#allocation96_spill] sm:$0xff] %v7657_v52  ;;  %10589 = vst [vmem:[#allocation97_spill] sm:$0xff] %v7659_v15 }
 0x756   : >> { %v7661_v32 = vpop.permute.xlu1 %2613  ;;  %v7663_v37 = vpop.permute.xlu0 %2611 }
 0x757   : >> { %10590 = vst [vmem:[#allocation98_spill] sm:$0xff] %v7661_v32  ;;  %10591 = vst [vmem:[#allocation99_spill] sm:$0xff] %v7663_v37  ;;  %v7682_v37 = vld [vmem:[%s6674_s9 + $0x80] sm:$0xff] }
 0x75a   : >> { %v7665_v34 = vpop.permute.xlu1 %2638  ;;  %v7667_v29 = vpop.permute.xlu0 %2636 }
 0x75b   : >> { %10592 = vst [vmem:[#allocation100_spill] sm:$0xff] %v7665_v34  ;;  %10593 = vst [vmem:[#allocation101_spill] sm:$0xff] %v7667_v29  ;;  %v7685_v34 = vld [vmem:[%s6674_s9 + $0x88] sm:$0xff] }
 0x75e   : >> { %v7669_v48 = vpop.permute.xlu1 %2684  ;;  %v7671_v46 = vpop.permute.xlu0 %2682 }
 0x75f   : >> { %10594 = vst [vmem:[#allocation102_spill] sm:$0xff] %v7669_v48  ;;  %10595 = vst [vmem:[#allocation103_spill] sm:$0xff] %v7671_v46  ;;  %v6246_v46 = vld [vmem:[%s10348_s1 + $0x70] ss:$8 sm:$0x3] }
 0x760   : >> { %v2854_v48 = vrot.slane %v6246_v46, %v6604_v17 }
 0x762   : >> { %v7673_v22 = vpop.permute.xlu1 %2730  ;;  %v7675_v35 = vpop.permute.xlu0 %2728 }
 0x763   : >> { %10596 = vst [vmem:[#allocation104_spill] sm:$0xff] %v7673_v22  ;;  %10597 = vst [vmem:[#allocation105_spill] sm:$0xff] %v7675_v35 }
 0x766   : >> { %v7677_v52 = vpop.permute.xlu1 %2776  ;;  %v7679_v15 = vpop.permute.xlu0 %2774 }
 0x767   : >> { %10598 = vst [vmem:[#allocation106_spill] sm:$0xff] %v7677_v52  ;;  %10599 = vst [vmem:[#allocation107_spill] sm:$0xff] %v7679_v15  ;;  %v7694_v52 = vld [vmem:[%s6674_s9 + $0x90] sm:$0xff] }
 0x76a   : >> { %v2823_v32 = vpop.permute.xlu1 %2822  ;;  %v2821_v38 = vpop.permute.xlu0 %2820 }
 0x76b   : >> { %v2824_v29 = vsel %vm582_vm5, %v2821_v38, %v2823_v32  ;;  %v2828_v22 = vmul.f32 %v7682_v37, %v2821_v38  ;;  %v2830_v15 = vmul.f32 %v7694_v52, %v2823_v32  ;;  %v2858_v38 = vrot.slane %v6246_v46, %v6606_v18  ;;  %v7709_v32 = vld [vmem:[%s6674_s9 + $0xa0] sm:$0xf] }
 0x76c   : >> { %v2829_v35 = vmul.f32 %v7685_v34, %v2824_v29 }
 0x76d   : >> { %2834 = vrot.lane.b32.xlu0 %v2828_v22, %s6481_s21 }
 0x76e   : >> { %2836 = vrot.lane.b32.xlu1 %v2829_v35, %s6481_s21 }
 0x771   : >> { %2838 = vrot.lane.b32.xlu0 %v2830_v15, %s6481_s21 }
 0x772   : >> { %2859 = vrot.lane.b32.xlu1 %v2854_v48, %s6481_s21  ;;  %v7716_v48 = vld [vmem:[%s6674_s9 + $0xb0] sm:$0xf] }
 0x775   : >> { %2861 = vrot.lane.b32.xlu0 %v2858_v38, %s6481_s21 }
 0x7df   : >> { %v7704_v29 = vpop.permute.xlu0 %2834 }
 0x7e0   : >> { %10600 = vst [vmem:[#allocation108_spill] sm:$0xff] %v7704_v29  ;;  %v7706_v49 = vpop.permute.xlu1 %2836 }
 0x7e1   : >> { %10601 = vst [vmem:[#allocation109_spill] sm:$0xff] %v7706_v49 }
 0x7e3   : >> { %v7711_v22 = vpop.permute.xlu0 %2838 }
 0x7e4   : >> { %10602 = vst [vmem:[#allocation110_spill] sm:$0xff] %v7711_v22  ;;  %v2860_v35 = vpop.permute.xlu1 %2859 }
 0x7e5   : >> { %v2867_v11 = vmul.f32 %v7682_v37, %v2860_v35  ;;  %v2870_v42 = vmul.f32 %v7709_v32, %v2860_v35 }
 0x7e7   : >> { %v2879_v15 = vrot.slane %v2867_v11, 1  ;;  %v2880_v16 = vrot.slane %v2870_v42, 1  ;;  %v2862_v46 = vpop.permute.xlu0 %2861 }
 0x7e8   : >> { %v2863_v38 = vsel %vm582_vm5, %v2860_v35, %v2862_v46  ;;  %v2869_v29 = vmul.f32 %v7694_v52, %v2862_v46  ;;  %v2872_v49 = vmul.f32 %v7716_v48, %v2862_v46 }
 0x7e9   : >> { %v2881_v22 = vsel %vm410_vm0, %v2879_v15, %v2880_v16  ;;  %v2868_v30 = vmul.f32 %v7685_v34, %v2863_v38  ;;  %v2871_v45 = vmul.f32 %v7719_v41, %v2863_v38  ;;  %v2912_v15 = vrot.slane %v6247_v4, %v6606_v18 }
 0x7ea   : >> { %2888 = vrot.lane.b32.xlu1 %v2881_v22, %s6481_s21  ;;  %v2885_v42 = vrot.slane %v2869_v29, 1  ;;  %v2886_v11 = vrot.slane %v2872_v49, 1  ;;  %v2908_v22 = vrot.slane %v6247_v4, %v6604_v17 }
 0x7eb   : >> { %v2882_v33 = vrot.slane %v2868_v30, 1  ;;  %v2883_v35 = vrot.slane %v2871_v45, 1 }
 0x7ec   : >> { %v2887_v8 = vsel %vm410_vm0, %v2885_v42, %v2886_v11 }
 0x7ed   : >> { %v2884_v16 = vsel %vm410_vm0, %v2882_v33, %v2883_v35 }
 0x7ee   : >> { %2892 = vrot.lane.b32.xlu1 %v2887_v8, %s6481_s21  ;;  %2890 = vrot.lane.b32.xlu0 %v2884_v16, %s6481_s21 }
 0x7f2   : >> { %2915 = vrot.lane.b32.xlu1 %v2912_v15, %s6481_s21  ;;  %2913 = vrot.lane.b32.xlu0 %v2908_v22, %s6481_s21 }
 0x85c   : >> { %v7739_v49 = vpop.permute.xlu1 %2888 }
 0x85d   : >> { %10603 = vst [vmem:[#allocation111_spill] sm:$0xff] %v7739_v49 }
 0x860   : >> { %v7741_v30 = vpop.permute.xlu1 %2892  ;;  %v7743_v45 = vpop.permute.xlu0 %2890 }
 0x861   : >> { %10604 = vst [vmem:[#allocation112_spill] sm:$0xff] %v7741_v30  ;;  %10605 = vst [vmem:[#allocation113_spill] sm:$0xff] %v7743_v45 }
 0x864   : >> { %v2916_v29 = vpop.permute.xlu1 %2915  ;;  %v2914_v46 = vpop.permute.xlu0 %2913 }
 0x865   : >> { %v2923_v8 = vmul.f32 %v7694_v52, %v2916_v29  ;;  %v2926_v33 = vmul.f32 %v7716_v48, %v2916_v29  ;;  %v2917_v38 = vsel %vm582_vm5, %v2914_v46, %v2916_v29  ;;  %v2921_v4 = vmul.f32 %v7682_v37, %v2914_v46 }
 0x866   : >> { %v2924_v42 = vmul.f32 %v7709_v32, %v2914_v46  ;;  %v2922_v11 = vmul.f32 %v7685_v34, %v2917_v38  ;;  %v2925_v35 = vmul.f32 %v7719_v41, %v2917_v38 }
 0x867   : >> { %v2939_v16 = vrot.slane %v2923_v8, 2  ;;  %v2940_v15 = vrot.slane %v2926_v33, 2  ;;  %v2933_v22 = vrot.slane %v2921_v4, 2  ;;  %v2962_v8 = vrot.slane %v6248_v12, %v6604_v17 }
 0x868   : >> { %v2934_v30 = vrot.slane %v2924_v42, 2  ;;  %v2936_v49 = vrot.slane %v2922_v11, 2  ;;  %v2937_v45 = vrot.slane %v2925_v35, 2  ;;  %v2966_v33 = vrot.slane %v6248_v12, %v6606_v18 }
 0x869   : >> { %v2941_v38 = vsel %vm457_vm1, %v2939_v16, %v2940_v15 }
 0x86a   : >> { %v2935_v29 = vsel %vm457_vm1, %v2933_v22, %v2934_v30  ;;  %v2938_v46 = vsel %vm457_vm1, %v2936_v49, %v2937_v45 }
 0x86b   : >> { %2942 = vrot.lane.b32.xlu0 %v2935_v29, %s6481_s21  ;;  %2944 = vrot.lane.b32.xlu1 %v2938_v46, %s6481_s21 }
 0x86f   : >> { %2946 = vrot.lane.b32.xlu0 %v2941_v38, %s6481_s21  ;;  %2967 = vrot.lane.b32.xlu1 %v2962_v8, %s6481_s21 }
 0x873   : >> { %2969 = vrot.lane.b32.xlu0 %v2966_v33, %s6481_s21 }
 0x8dd   : >> { %v7765_v4 = vpop.permute.xlu0 %2942  ;;  %v7767_v30 = vpop.permute.xlu1 %2944 }
 0x8de   : >> { %10606 = vst [vmem:[#allocation114_spill] sm:$0xff] %v7765_v4  ;;  %10607 = vst [vmem:[#allocation115_spill] sm:$0xff] %v7767_v30 }
 0x8e1   : >> { %v7769_v42 = vpop.permute.xlu0 %2946  ;;  %v2968_v49 = vpop.permute.xlu1 %2967 }
 0x8e2   : >> { %10608 = vst [vmem:[#allocation116_spill] sm:$0xff] %v7769_v42  ;;  %v2975_v45 = vmul.f32 %v7682_v37, %v2968_v49  ;;  %v2978_v11 = vmul.f32 %v7709_v32, %v2968_v49 }
 0x8e4   : >> { %v2987_v35 = vrot.slane %v2975_v45, 3  ;;  %v2988_v16 = vrot.slane %v2978_v11, 3 }
 0x8e5   : >> { %v2970_v15 = vpop.permute.xlu0 %2969 }
 0x8e6   : >> { %v2971_v12 = vsel %vm582_vm5, %v2968_v49, %v2970_v15  ;;  %v2977_v22 = vmul.f32 %v7694_v52, %v2970_v15  ;;  %v2980_v29 = vmul.f32 %v7716_v48, %v2970_v15  ;;  %v2989_v8 = vsel %vm504_vm2, %v2987_v35, %v2988_v16  ;;  %v6249_v49 = vld [vmem:[%s10348_s1 + $0x87] ss:$8 sm:$0x3] }
 0x8e7   : >> { %v2976_v46 = vmul.f32 %v7685_v34, %v2971_v12  ;;  %v2979_v38 = vmul.f32 %v7719_v41, %v2971_v12  ;;  %2996 = vrot.lane.b32.xlu1 %v2989_v8, %s6481_s21  ;;  %v3020_v35 = vrot.slane %v6249_v49, %v6606_v18  ;;  %v3016_v16 = vrot.slane %v6249_v49, %v6604_v17  ;;  %v6252_v49 = vld [vmem:[%s10348_s1 + $0x76] ss:$8 sm:$0x3] }
 0x8e8   : >> { %v2993_v33 = vrot.slane %v2977_v22, 3  ;;  %v2994_v42 = vrot.slane %v2980_v29, 3  ;;  %v6250_v29 = vld [vmem:[%s10348_s1 + $0x64] ss:$8 sm:$0x3]  ;;  %v3136_v26 = vrot.slane %v6252_v49, %v6604_v17 }
 0x8e9   : >> { %v2990_v4 = vrot.slane %v2976_v46, 3  ;;  %v2991_v45 = vrot.slane %v2979_v38, 3 }
 0x8ea   : >> { %v2995_v11 = vsel %vm504_vm2, %v2993_v33, %v2994_v42  ;;  %v6251_v42 = vld [vmem:[%s10348_s1 + $0x71] ss:$8 sm:$0x3]  ;;  %v3070_v33 = vrot.slane %v6250_v29, %v6604_v17 }
 0x8eb   : >> { %v2992_v15 = vsel %vm504_vm2, %v2990_v4, %v2991_v45  ;;  %3000 = vrot.lane.b32.xlu1 %v2995_v11, %s6481_s21  ;;  %v3098_v46 = vrot.slane %v6251_v42, %v6604_v17  ;;  %v3102_v45 = vrot.slane %v6251_v42, %v6606_v18 }
 0x8ec   : >> { %2998 = vrot.lane.b32.xlu0 %v2992_v15, %s6481_s21 }
 0x8ed   : >> { %v3105_v42 = vmul.f32 %v7685_v34, %v3098_v46  ;;  %v3107_v31 = vmul.f32 %v7719_v41, %v3098_v46  ;;  %v3108_v46 = vmul.f32 %v7716_v48, %v3102_v45 }
 0x8ef   : >> { %3023 = vrot.lane.b32.xlu1 %v3020_v35, %s6481_s21 }
 0x8f0   : >> { %3021 = vrot.lane.b32.xlu0 %v3016_v16, %s6481_s21 }
 0x959   : >> { %v7791_v12 = vpop.permute.xlu1 %2996 }
 0x95a   : >> { %10609 = vst [vmem:[#allocation117_spill] sm:$0xff] %v7791_v12 }
 0x95d   : >> { %v7796_v22 = vpop.permute.xlu1 %3000 }
 0x95e   : >> { %10610 = vst [vmem:[#allocation118_spill] sm:$0xff] %v7796_v22  ;;  %v7798_v4 = vpop.permute.xlu0 %2998 }
 0x95f   : >> { %10611 = vst [vmem:[#allocation119_spill] sm:$0xff] %v7798_v4 }
 0x961   : >> { %v3024_v38 = vpop.permute.xlu1 %3023 }
 0x962   : >> { %v3022_v8 = vpop.permute.xlu0 %3021  ;;  %v3031_v11 = vmul.f32 %v7694_v52, %v3024_v38  ;;  %v3034_v15 = vmul.f32 %v7716_v48, %v3024_v38 }
 0x963   : >> { %v3025_v35 = vsel %vm582_vm5, %v3022_v8, %v3024_v38  ;;  %v3029_v16 = vmul.f32 %v7682_v37, %v3022_v8  ;;  %v3032_v12 = vmul.f32 %v7709_v32, %v3022_v8  ;;  %v6253_v38 = vld [vmem:[%s10348_s1 + $0x83] ss:$8 sm:$0x3]  ;;  %v3074_v32 = vrot.slane %v6250_v29, %v6606_v18 }
 0x964   : >> { %v3030_v22 = vmul.f32 %v7685_v34, %v3025_v35  ;;  %v3033_v4 = vmul.f32 %v7719_v41, %v3025_v35  ;;  %v3047_v30 = vrot.slane %v3031_v11, 4  ;;  %v3048_v25 = vrot.slane %v3034_v15, 4 }
 0x965   : >> { %v3041_v5 = vrot.slane %v3029_v16, 4  ;;  %v3042_v37 = vrot.slane %v3032_v12, 4  ;;  %v3106_v8 = vmul.f32 %v7694_v52, %v3102_v45  ;;  %v3140_v16 = vrot.slane %v6252_v49, %v6606_v18  ;;  %v6254_v45 = vld [vmem:[%s10348_s1 + $0x90] ss:$8 sm:$0x3] }
 0x966   : >> { %v3044_v47 = vrot.slane %v3030_v22, 4  ;;  %v3045_v6 = vrot.slane %v3033_v4, 4  ;;  %v3077_v12 = vmul.f32 %v7685_v34, %v3070_v33  ;;  %v3113_v22 = vrot.slane %v3105_v42, 1 }
 0x967   : >> { %v3043_v35 = vsel %vm551_vm3, %v3041_v5, %v3042_v37  ;;  %v3174_v4 = vrot.slane %v6253_v38, %v6604_v17  ;;  %v3049_v29 = vsel %vm551_vm3, %v3047_v30, %v3048_v25  ;;  %v3114_v15 = vrot.slane %v3107_v31, 1 }
 0x968   : >> { %v3046_v11 = vsel %vm551_vm3, %v3044_v47, %v3045_v6  ;;  %3050 = vrot.lane.b32.xlu0 %v3043_v35, %s6481_s21  ;;  %v3143_v5 = vmul.f32 %v7685_v34, %v3136_v26  ;;  %v3145_v47 = vmul.f32 %v7719_v41, %v3136_v26  ;;  %v3078_v6 = vmul.f32 %v7694_v52, %v3074_v32 }
 0x969   : >> { %3052 = vrot.lane.b32.xlu1 %v3046_v11, %s6481_s21  ;;  %v3116_v49 = vrot.slane %v3106_v8, 1  ;;  %v3117_v37 = vrot.slane %v3108_v46, 1  ;;  %v3144_v33 = vmul.f32 %v7694_v52, %v3140_v16  ;;  %v3146_v42 = vmul.f32 %v7716_v48, %v3140_v16 }
 0x96a   : >> { %v3181_v25 = vmul.f32 %v7685_v34, %v3174_v4  ;;  %v3183_v31 = vmul.f32 %v7719_v41, %v3174_v4  ;;  %v3178_v26 = vrot.slane %v6253_v38, %v6606_v18  ;;  %v3115_v30 = vsel %vm410_vm0, %v3113_v22, %v3114_v15 }
 0x96b   : >> { %v3151_v32 = vrot.slane %v3143_v5, 2  ;;  %v3152_v35 = vrot.slane %v3145_v47, 2  ;;  %v3212_v8 = vrot.slane %v6254_v45, %v6604_v17  ;;  %v3118_v11 = vsel %vm410_vm0, %v3116_v49, %v3117_v37 }
 0x96c   : >> { %3054 = vrot.lane.b32.xlu0 %v3049_v29, %s6481_s21  ;;  %v3154_v46 = vrot.slane %v3144_v33, 2  ;;  %v3155_v16 = vrot.slane %v3146_v42, 2  ;;  %v3190_v29 = vrot.slane %v3183_v31, 3  ;;  %v3182_v4 = vmul.f32 %v7694_v52, %v3178_v26 }
 0x96d   : >> { %3081 = vrot.lane.b32.xlu1 %v3077_v12, %s6480_s7  ;;  %v3189_v12 = vrot.slane %v3181_v25, 3  ;;  %v3184_v38 = vmul.f32 %v7716_v48, %v3178_v26  ;;  %v3153_v22 = vsel %vm457_vm1, %v3151_v32, %v3152_v35  ;;  %v3219_v15 = vmul.f32 %v7685_v34, %v3212_v8 }
 0x96e   : >> { %v3221_v5 = vmul.f32 %v7719_v41, %v3212_v8  ;;  %v3216_v47 = vrot.slane %v6254_v45, %v6606_v18  ;;  %v3192_v37 = vrot.slane %v3182_v4, 3  ;;  %v6257_v8 = vld [vmem:[%s10348_s1 + $0x65] ss:$8 sm:$0x3] }
 0x96f   : >> { %v3191_v49 = vsel %vm504_vm2, %v3189_v12, %v3190_v29  ;;  %v3193_v33 = vrot.slane %v3184_v38, 3  ;;  %v3227_v42 = vrot.slane %v3219_v15, 4 }
 0x970   : >> { %3083 = vrot.lane.b32.xlu0 %v3078_v6, %s6480_s7  ;;  %v3156_v6 = vsel %vm457_vm1, %v3154_v46, %v3155_v16  ;;  %v3228_v25 = vrot.slane %v3221_v5, 4  ;;  %v3220_v31 = vmul.f32 %v7694_v52, %v3216_v47  ;;  %v3222_v26 = vmul.f32 %v7716_v48, %v3216_v47 }
 0x971   : >> { %3119 = vrot.lane.b32.xlu1 %v3115_v30, %s6480_s7  ;;  %v3194_v45 = vsel %vm504_vm2, %v3192_v37, %v3193_v33  ;;  %v3256_v16 = vrot.slane %v6257_v8, %v6606_v18 }
 0x972   : >> { %v3229_v30 = vsel %vm551_vm3, %v3227_v42, %v3228_v25  ;;  %v3230_v32 = vrot.slane %v3220_v31, 4  ;;  %v3231_v35 = vrot.slane %v3222_v26, 4  ;;  %v7906_v26 = vld [vmem:[%s6674_s9 + $0x98] sm:$0xff] }
 0x974   : >> { %3121 = vrot.lane.b32.xlu0 %v3118_v11, %s6480_s7  ;;  %v3252_v11 = vrot.slane %v6257_v8, %v6604_v17  ;;  %v3232_v46 = vsel %vm551_vm3, %v3230_v32, %v3231_v35 }
 0x975   : >> { %3157 = vrot.lane.b32.xlu1 %v3153_v22, %s6480_s7 }
 0x978   : >> { %3159 = vrot.lane.b32.xlu0 %v3156_v6, %s6480_s7 }
 0x979   : >> { %3195 = vrot.lane.b32.xlu1 %v3191_v49, %s6480_s7 }
 0x97c   : >> { %3197 = vrot.lane.b32.xlu0 %v3194_v45, %s6480_s7 }
 0x97d   : >> { %3233 = vrot.lane.b32.xlu1 %v3229_v30, %s6480_s7  ;;  %v6258_v30 = vld [vmem:[%s10348_s1 + $0x72] ss:$8 sm:$0x3] }
 0x980   : >> { %3235 = vrot.lane.b32.xlu0 %v3232_v46, %s6480_s7  ;;  %v3291_v46 = vrot.slane %v6258_v30, %v6604_v17 }
 0x981   : >> { %3257 = vrot.lane.b32.xlu1 %v3252_v11, %s6482_s25  ;;  %v3295_v11 = vrot.slane %v6258_v30, %v6606_v18 }
 0x984   : >> { %3259 = vrot.lane.b32.xlu0 %v3256_v16, %s6482_s25 }
 0x9da   : >> { %v7878_v12 = vpop.permute.xlu0 %3050 }
 0x9db   : >> { %10612 = vst [vmem:[#allocation120_spill] sm:$0xff] %v7878_v12  ;;  %v7880_v29 = vpop.permute.xlu1 %3052 }
 0x9dc   : >> { %10613 = vst [vmem:[#allocation121_spill] sm:$0xff] %v7880_v29 }
 0x9de   : >> { %v7882_v4 = vpop.permute.xlu0 %3054 }
 0x9df   : >> { %10614 = vst [vmem:[#allocation122_spill] sm:$0xff] %v7882_v4  ;;  %v7884_v38 = vpop.permute.xlu1 %3081 }
 0x9e0   : >> { %10615 = vst [vmem:[#allocation123_spill] sm:$0xff] %v7884_v38 }
 0x9e2   : >> { %v7886_v22 = vpop.permute.xlu0 %3083 }
 0x9e3   : >> { %10616 = vst [vmem:[#allocation124_spill] sm:$0xff] %v7886_v22  ;;  %v7888_v15 = vpop.permute.xlu1 %3119 }
 0x9e4   : >> { %10617 = vst [vmem:[#allocation125_spill] sm:$0xff] %v7888_v15  ;;  %v6259_v15 = vld [vmem:[%s10348_s1 + $0x77] ss:$8 sm:$0x3] }
 0x9e6   : >> { %v7890_v5 = vpop.permute.xlu0 %3121 }
 0x9e7   : >> { %10618 = vst [vmem:[#allocation126_spill] sm:$0xff] %v7890_v5  ;;  %v7892_v47 = vpop.permute.xlu1 %3157 }
 0x9e8   : >> { %10619 = vst [vmem:[#allocation127_spill] sm:$0xff] %v7892_v47 }
 0x9ea   : >> { %v7894_v6 = vpop.permute.xlu0 %3159 }
 0x9eb   : >> { %10620 = vst [vmem:[#allocation128_spill] sm:$0xff] %v7894_v6  ;;  %v7896_v49 = vpop.permute.xlu1 %3195 }
 0x9ec   : >> { %10621 = vst [vmem:[#allocation129_spill] sm:$0xff] %v7896_v49 }
 0x9ee   : >> { %v7898_v37 = vpop.permute.xlu0 %3197 }
 0x9ef   : >> { %10622 = vst [vmem:[#allocation130_spill] sm:$0xff] %v7898_v37  ;;  %v7900_v33 = vpop.permute.xlu1 %3233 }
 0x9f0   : >> { %10623 = vst [vmem:[#allocation131_spill] sm:$0xff] %v7900_v33 }
 0x9f2   : >> { %v7902_v42 = vpop.permute.xlu0 %3235 }
 0x9f3   : >> { %10624 = vst [vmem:[#allocation132_spill] sm:$0xff] %v7902_v42  ;;  %v3258_v25 = vpop.permute.xlu1 %3257 }
 0x9f4   : >> { %v3265_v31 = vmul.f32 %v7685_v34, %v3258_v25 }
 0x9f6   : >> { %3271 = vrot.lane.b32.xlu1 %v3265_v31, %s6482_s25  ;;  %v3260_v45 = vpop.permute.xlu0 %3259 }
 0x9f7   : >> { %v3261_v32 = vsel %vm1020_vm4, %v3258_v25, %v3260_v45  ;;  %v3267_v35 = vmul.f32 %v7906_v26, %v3260_v45  ;;  %v7928_v45 = vld [vmem:[%s6674_s9 + $0xb8] sm:$0xf] }
 0x9f8   : >> { %v3266_v8 = vmul.f32 %v7694_v52, %v3261_v32 }
 0x9fa   : >> { %3275 = vrot.lane.b32.xlu1 %v3267_v35, %s6482_s25  ;;  %3273 = vrot.lane.b32.xlu0 %v3266_v8, %s6482_s25 }
 0x9fe   : >> { %3298 = vrot.lane.b32.xlu1 %v3295_v11, %s6482_s25  ;;  %3296 = vrot.lane.b32.xlu0 %v3291_v46, %s6482_s25 }
 0xa68   : >> { %v7921_v16 = vpop.permute.xlu1 %3271 }
 0xa69   : >> { %10625 = vst [vmem:[#allocation133_spill] sm:$0xff] %v7921_v16 }
 0xa6c   : >> { %v7923_v31 = vpop.permute.xlu1 %3275  ;;  %v7925_v25 = vpop.permute.xlu0 %3273 }
 0xa6d   : >> { %10626 = vst [vmem:[#allocation134_spill] sm:$0xff] %v7923_v31  ;;  %10627 = vst [vmem:[#allocation135_spill] sm:$0xff] %v7925_v25 }
 0xa70   : >> { %v3299_v32 = vpop.permute.xlu1 %3298  ;;  %v3297_v8 = vpop.permute.xlu0 %3296 }
 0xa71   : >> { %v3306_v35 = vmul.f32 %v7906_v26, %v3299_v32  ;;  %v3309_v33 = vmul.f32 %v7928_v45, %v3299_v32  ;;  %v3300_v30 = vsel %vm1020_vm4, %v3297_v8, %v3299_v32  ;;  %v3304_v11 = vmul.f32 %v7685_v34, %v3297_v8 }
 0xa72   : >> { %v3307_v46 = vmul.f32 %v7719_v41, %v3297_v8  ;;  %v3305_v16 = vmul.f32 %v7694_v52, %v3300_v30  ;;  %v3308_v31 = vmul.f32 %v7716_v48, %v3300_v30 }
 0xa73   : >> { %v3322_v42 = vrot.slane %v3306_v35, 1  ;;  %v3323_v25 = vrot.slane %v3309_v33, 1  ;;  %v3316_v49 = vrot.slane %v3304_v11, 1  ;;  %v3345_v33 = vrot.slane %v6259_v15, %v6604_v17 }
 0xa74   : >> { %v3317_v37 = vrot.slane %v3307_v46, 1  ;;  %v3319_v47 = vrot.slane %v3305_v16, 1  ;;  %v3320_v6 = vrot.slane %v3308_v31, 1  ;;  %v3349_v16 = vrot.slane %v6259_v15, %v6606_v18 }
 0xa75   : >> { %v3324_v30 = vsel %vm410_vm0, %v3322_v42, %v3323_v25 }
 0xa76   : >> { %v3318_v32 = vsel %vm410_vm0, %v3316_v49, %v3317_v37  ;;  %v3321_v8 = vsel %vm410_vm0, %v3319_v47, %v3320_v6 }
 0xa77   : >> { %3325 = vrot.lane.b32.xlu0 %v3318_v32, %s6482_s25  ;;  %3327 = vrot.lane.b32.xlu1 %v3321_v8, %s6482_s25 }
 0xa7b   : >> { %3329 = vrot.lane.b32.xlu0 %v3324_v30, %s6482_s25  ;;  %3350 = vrot.lane.b32.xlu1 %v3345_v33, %s6482_s25 }
 0xa7f   : >> { %3352 = vrot.lane.b32.xlu0 %v3349_v16, %s6482_s25 }
 0xae9   : >> { %v7950_v31 = vpop.permute.xlu0 %3325  ;;  %v7952_v49 = vpop.permute.xlu1 %3327 }
 0xaea   : >> { %10628 = vst [vmem:[#allocation136_spill] sm:$0xff] %v7950_v31  ;;  %10629 = vst [vmem:[#allocation137_spill] sm:$0xff] %v7952_v49 }
 0xaed   : >> { %v7954_v37 = vpop.permute.xlu0 %3329  ;;  %v3351_v47 = vpop.permute.xlu1 %3350 }
 0xaee   : >> { %10630 = vst [vmem:[#allocation138_spill] sm:$0xff] %v7954_v37  ;;  %v3358_v6 = vmul.f32 %v7685_v34, %v3351_v47  ;;  %v3361_v42 = vmul.f32 %v7719_v41, %v3351_v47 }
 0xaf0   : >> { %v3370_v25 = vrot.slane %v3358_v6, 2  ;;  %v3371_v35 = vrot.slane %v3361_v42, 2 }
 0xaf1   : >> { %v3353_v11 = vpop.permute.xlu0 %3352 }
 0xaf2   : >> { %v3354_v15 = vsel %vm1020_vm4, %v3351_v47, %v3353_v11  ;;  %v3360_v46 = vmul.f32 %v7906_v26, %v3353_v11  ;;  %v3363_v32 = vmul.f32 %v7928_v45, %v3353_v11  ;;  %v3372_v33 = vsel %vm457_vm1, %v3370_v25, %v3371_v35  ;;  %v6260_v47 = vld [vmem:[%s10348_s1 + $0x84] ss:$8 sm:$0x3] }
 0xaf3   : >> { %v3359_v8 = vmul.f32 %v7694_v52, %v3354_v15  ;;  %v3362_v30 = vmul.f32 %v7716_v48, %v3354_v15  ;;  %3379 = vrot.lane.b32.xlu1 %v3372_v33, %s6482_s25  ;;  %v3403_v25 = vrot.slane %v6260_v47, %v6606_v18  ;;  %v3399_v35 = vrot.slane %v6260_v47, %v6604_v17 }
 0xaf4   : >> { %v3376_v16 = vrot.slane %v3360_v46, 2  ;;  %v3377_v37 = vrot.slane %v3363_v32, 2 }
 0xaf5   : >> { %v3373_v31 = vrot.slane %v3359_v8, 2  ;;  %v3374_v6 = vrot.slane %v3362_v30, 2 }
 0xaf6   : >> { %v3378_v42 = vsel %vm457_vm1, %v3376_v16, %v3377_v37 }
 0xaf7   : >> { %v3375_v11 = vsel %vm457_vm1, %v3373_v31, %v3374_v6  ;;  %3383 = vrot.lane.b32.xlu1 %v3378_v42, %s6482_s25 }
 0xaf8   : >> { %3381 = vrot.lane.b32.xlu0 %v3375_v11, %s6482_s25 }
 0xafb   : >> { %3406 = vrot.lane.b32.xlu1 %v3403_v25, %s6482_s25 }
 0xafc   : >> { %3404 = vrot.lane.b32.xlu0 %v3399_v35, %s6482_s25  ;;  %v6261_v35 = vld [vmem:[%s10348_s1 + $0x91] ss:$8 sm:$0x3] }
 0xb65   : >> { %v7976_v15 = vpop.permute.xlu1 %3379 }
 0xb66   : >> { %10631 = vst [vmem:[#allocation139_spill] sm:$0xff] %v7976_v15 }
 0xb69   : >> { %v7978_v46 = vpop.permute.xlu1 %3383 }
 0xb6a   : >> { %10632 = vst [vmem:[#allocation140_spill] sm:$0xff] %v7978_v46  ;;  %v7980_v32 = vpop.permute.xlu0 %3381 }
 0xb6b   : >> { %10633 = vst [vmem:[#allocation141_spill] sm:$0xff] %v7980_v32 }
 0xb6d   : >> { %v3407_v37 = vpop.permute.xlu1 %3406 }
 0xb6e   : >> { %v3405_v31 = vpop.permute.xlu0 %3404  ;;  %v3414_v8 = vmul.f32 %v7906_v26, %v3407_v37  ;;  %v3417_v30 = vmul.f32 %v7928_v45, %v3407_v37 }
 0xb6f   : >> { %v3408_v33 = vsel %vm1020_vm4, %v3405_v31, %v3407_v37  ;;  %v3412_v16 = vmul.f32 %v7685_v34, %v3405_v31  ;;  %v3415_v47 = vmul.f32 %v7719_v41, %v3405_v31  ;;  %v3453_v31 = vrot.slane %v6261_v35, %v6604_v17 }
 0xb70   : >> { %v3413_v6 = vmul.f32 %v7694_v52, %v3408_v33  ;;  %v3416_v42 = vmul.f32 %v7716_v48, %v3408_v33  ;;  %v3430_v11 = vrot.slane %v3414_v8, 3  ;;  %v3431_v46 = vrot.slane %v3417_v30, 3 }
 0xb71   : >> { %v3424_v25 = vrot.slane %v3412_v16, 3  ;;  %v3425_v15 = vrot.slane %v3415_v47, 3  ;;  %v3457_v30 = vrot.slane %v6261_v35, %v6606_v18 }
 0xb72   : >> { %v3427_v32 = vrot.slane %v3413_v6, 3  ;;  %v3428_v49 = vrot.slane %v3416_v42, 3  ;;  %v3432_v8 = vsel %vm504_vm2, %v3430_v11, %v3431_v46 }
 0xb73   : >> { %v3426_v37 = vsel %vm504_vm2, %v3424_v25, %v3425_v15 }
 0xb74   : >> { %v3429_v5 = vsel %vm504_vm2, %v3427_v32, %v3428_v49  ;;  %3433 = vrot.lane.b32.xlu0 %v3426_v37, %s6482_s25 }
 0xb75   : >> { %3435 = vrot.lane.b32.xlu1 %v3429_v5, %s6482_s25 }
 0xb78   : >> { %3437 = vrot.lane.b32.xlu0 %v3432_v8, %s6482_s25 }
 0xb79   : >> { %3458 = vrot.lane.b32.xlu1 %v3453_v31, %s6482_s25 }
 0xb7c   : >> { %3460 = vrot.lane.b32.xlu0 %v3457_v30, %s6482_s25 }
 0xbe6   : >> { %v8002_v33 = vpop.permute.xlu0 %3433 }
 0xbe7   : >> { %10634 = vst [vmem:[#allocation142_spill] sm:$0xff] %v8002_v33  ;;  %v8004_v15 = vpop.permute.xlu1 %3435 }
 0xbe8   : >> { %10635 = vst [vmem:[#allocation143_spill] sm:$0xff] %v8004_v15 }
 0xbea   : >> { %v8006_v49 = vpop.permute.xlu0 %3437 }
 0xbeb   : >> { %10636 = vst [vmem:[#allocation144_spill] sm:$0xff] %v8006_v49  ;;  %v3459_v32 = vpop.permute.xlu1 %3458 }
 0xbec   : >> { %v3466_v5 = vmul.f32 %v7685_v34, %v3459_v32  ;;  %v3469_v16 = vmul.f32 %v7719_v41, %v3459_v32  ;;  %v6262_v41 = vld [vmem:[%s10348_s1 + $0x66] ss:$8 sm:$0x3] }
 0xbee   : >> { %v3478_v46 = vrot.slane %v3466_v5, 4  ;;  %v3479_v6 = vrot.slane %v3469_v16, 4  ;;  %v3461_v47 = vpop.permute.xlu0 %3460  ;;  %v6263_v5 = vld [vmem:[%s10348_s1 + $0x73] ss:$8 sm:$0x3] }
 0xbef   : >> { %v3462_v42 = vsel %vm1020_vm4, %v3459_v32, %v3461_v47  ;;  %v3468_v11 = vmul.f32 %v7906_v26, %v3461_v47  ;;  %v3471_v25 = vmul.f32 %v7928_v45, %v3461_v47  ;;  %v3536_v16 = vrot.slane %v6263_v5, %v6606_v18 }
 0xbf0   : >> { %v3480_v35 = vsel %vm551_vm3, %v3478_v46, %v3479_v6  ;;  %v3467_v37 = vmul.f32 %v7694_v52, %v3462_v42  ;;  %v3470_v31 = vmul.f32 %v7716_v48, %v3462_v42  ;;  %v3511_v52 = vrot.slane %v6262_v41, %v6606_v18  ;;  %v6264_v6 = vld [vmem:[%s10348_s1 + $0x80] ss:$8 sm:$0x3] }
 0xbf1   : >> { %3487 = vrot.lane.b32.xlu1 %v3480_v35, %s6482_s25  ;;  %v3484_v34 = vrot.slane %v3468_v11, 4  ;;  %v3485_v8 = vrot.slane %v3471_v25, 4  ;;  %v3507_v48 = vrot.slane %v6262_v41, %v6604_v17  ;;  %v3532_v46 = vrot.slane %v6263_v5, %v6604_v17  ;;  %v6265_v11 = vld [vmem:[%s10348_s1 + $0x85] ss:$8 sm:$0x3] }
 0xbf2   : >> { %v3481_v30 = vrot.slane %v3467_v37, 4  ;;  %v3482_v32 = vrot.slane %v3470_v31, 4  ;;  %v3582_v47 = vrot.slane %v6264_v6, %v6606_v18  ;;  %v3578_v42 = vrot.slane %v6264_v6, %v6604_v17  ;;  %v6266_v37 = vld [vmem:[%s10348_s1 + $0x92] ss:$8 sm:$0x3] }
 0xbf3   : >> { %v3486_v26 = vsel %vm551_vm3, %v3484_v34, %v3485_v8  ;;  %v3628_v25 = vrot.slane %v6265_v11, %v6606_v18  ;;  %v3624_v35 = vrot.slane %v6265_v11, %v6604_v17  ;;  %v3674_v31 = vrot.slane %v6266_v37, %v6606_v18  ;;  %v6274_v8 = vld [vmem:[%s10348_s1 + $0x93] ss:$8 sm:$0x3] }
 0xbf4   : >> { %v3483_v45 = vsel %vm551_vm3, %v3481_v30, %v3482_v32  ;;  %v3670_v34 = vrot.slane %v6266_v37, %v6604_v17  ;;  %v3730_v41 = vrot.slane %v6274_v8, %v6606_v18  ;;  %v3726_v30 = vrot.slane %v6274_v8, %v6604_v17  ;;  %v6275_v32 = vld [vmem:[%s10348_s1 + $0xa0] ss:$8 sm:$0x3] }
 0xbf5   : >> { %3491 = vrot.lane.b32.xlu1 %v3486_v26, %s6482_s25  ;;  %3489 = vrot.lane.b32.xlu0 %v3483_v45, %s6482_s25  ;;  %v3755_v26 = vrot.slane %v6275_v32, %v6606_v18  ;;  %v3751_v45 = vrot.slane %v6275_v32, %v6604_v17 }
 0xbf9   : >> { %3514 = vrot.lane.b32.xlu1 %v3511_v52, %s6480_s7  ;;  %3512 = vrot.lane.b32.xlu0 %v3507_v48, %s6480_s7  ;;  %v6276_v52 = vld [vmem:[%s10348_s1 + $0xa5] ss:$8 sm:$0x3] }
 0xbfa   : >> { %v3801_v48 = vrot.slane %v6276_v52, %v6606_v18  ;;  %v3797_v5 = vrot.slane %v6276_v52, %v6604_v17 }
 0xbfd   : >> { %3539 = vrot.lane.b32.xlu1 %v3536_v16, %s6480_s7  ;;  %3537 = vrot.lane.b32.xlu0 %v3532_v46, %s6480_s7  ;;  %v6277_v16 = vld [vmem:[%s10348_s1 + $0xb2] ss:$8 sm:$0x3] }
 0xbfe   : >> { %v3847_v46 = vrot.slane %v6277_v16, %v6606_v18  ;;  %v3843_v6 = vrot.slane %v6277_v16, %v6604_v17 }
 0xc01   : >> { %3585 = vrot.lane.b32.xlu1 %v3582_v47, %s6480_s7  ;;  %3583 = vrot.lane.b32.xlu0 %v3578_v42, %s6480_s7  ;;  %v6278_v47 = vld [vmem:[%s10348_s1 + $0xb7] ss:$8 sm:$0x3] }
 0xc02   : >> { %v3893_v42 = vrot.slane %v6278_v47, %v6606_v18  ;;  %v3889_v11 = vrot.slane %v6278_v47, %v6604_v17 }
 0xc05   : >> { %3631 = vrot.lane.b32.xlu1 %v3628_v25, %s6480_s7  ;;  %3629 = vrot.lane.b32.xlu0 %v3624_v35, %s6480_s7  ;;  %v6279_v25 = vld [vmem:[%s10348_s1 + $0x94] ss:$8 sm:$0x3] }
 0xc06   : >> { %v3939_v35 = vrot.slane %v6279_v25, %v6606_v18  ;;  %v3935_v37 = vrot.slane %v6279_v25, %v6604_v17 }
 0xc09   : >> { %3677 = vrot.lane.b32.xlu1 %v3674_v31, %s6480_s7  ;;  %3675 = vrot.lane.b32.xlu0 %v3670_v34, %s6480_s7 }
 0xc0d   : >> { %3733 = vrot.lane.b32.xlu1 %v3730_v41, %s6480_s7  ;;  %3731 = vrot.lane.b32.xlu0 %v3726_v30, %s6480_s7 }
 0xc11   : >> { %3758 = vrot.lane.b32.xlu1 %v3755_v26, %s6480_s7  ;;  %3756 = vrot.lane.b32.xlu0 %v3751_v45, %s6480_s7 }
 0xc15   : >> { %3804 = vrot.lane.b32.xlu1 %v3801_v48, %s6480_s7  ;;  %3802 = vrot.lane.b32.xlu0 %v3797_v5, %s6480_s7 }
 0xc19   : >> { %3850 = vrot.lane.b32.xlu1 %v3847_v46, %s6480_s7  ;;  %3848 = vrot.lane.b32.xlu0 %v3843_v6, %s6480_s7 }
 0xc1d   : >> { %3896 = vrot.lane.b32.xlu1 %v3893_v42, %s6480_s7  ;;  %3894 = vrot.lane.b32.xlu0 %v3889_v11, %s6480_s7 }
 0xc21   : >> { %3942 = vrot.lane.b32.xlu1 %v3939_v35, %s6481_s21  ;;  %3940 = vrot.lane.b32.xlu0 %v3935_v37, %s6481_s21 }
 0xc63   : >> { %v8098_v31 = vpop.permute.xlu1 %3487 }
 0xc64   : >> { %10637 = vst [vmem:[#allocation145_spill] sm:$0xff] %v8098_v31 }
 0xc67   : >> { %v8100_v34 = vpop.permute.xlu1 %3491  ;;  %v8102_v8 = vpop.permute.xlu0 %3489 }
 0xc68   : >> { %10638 = vst [vmem:[#allocation146_spill] sm:$0xff] %v8100_v34  ;;  %10639 = vst [vmem:[#allocation147_spill] sm:$0xff] %v8102_v8 }
 0xc6b   : >> { %v8104_v41 = vpop.permute.xlu1 %3514  ;;  %v8106_v30 = vpop.permute.xlu0 %3512 }
 0xc6c   : >> { %10640 = vst [vmem:[#allocation148_spill] sm:$0xff] %v8104_v41  ;;  %10641 = vst [vmem:[#allocation149_spill] sm:$0xff] %v8106_v30  ;;  %v8182_v41 = vld [vmem:[%s6674_s9 + $0xe8] sm:$0xf] }
 0xc6f   : >> { %v8108_v32 = vpop.permute.xlu1 %3539  ;;  %v8110_v26 = vpop.permute.xlu0 %3537 }
 0xc70   : >> { %10642 = vst [vmem:[#allocation150_spill] sm:$0xff] %v8108_v32  ;;  %10643 = vst [vmem:[#allocation151_spill] sm:$0xff] %v8110_v26 }
 0xc73   : >> { %v8112_v45 = vpop.permute.xlu1 %3585  ;;  %v8114_v52 = vpop.permute.xlu0 %3583 }
 0xc74   : >> { %10644 = vst [vmem:[#allocation152_spill] sm:$0xff] %v8112_v45  ;;  %10645 = vst [vmem:[#allocation153_spill] sm:$0xff] %v8114_v52 }
 0xc77   : >> { %v8116_v48 = vpop.permute.xlu1 %3631  ;;  %v8118_v5 = vpop.permute.xlu0 %3629 }
 0xc78   : >> { %10646 = vst [vmem:[#allocation154_spill] sm:$0xff] %v8116_v48  ;;  %10647 = vst [vmem:[#allocation155_spill] sm:$0xff] %v8118_v5  ;;  %v8148_v5 = vld [vmem:[%s6674_s9 + $0xc8] sm:$0xff] }
 0xc79   : >> { %10660 = vst [vmem:[#allocation168_spill] sm:$0xff] %v8148_v5 }
 0xc7b   : >> { %v8120_v16 = vpop.permute.xlu1 %3677  ;;  %v8122_v46 = vpop.permute.xlu0 %3675 }
 0xc7c   : >> { %10648 = vst [vmem:[#allocation156_spill] sm:$0xff] %v8120_v16  ;;  %10649 = vst [vmem:[#allocation157_spill] sm:$0xff] %v8122_v46  ;;  %v8145_v46 = vld [vmem:[%s6674_s9 + $0xc0] sm:$0xff] }
 0xc7f   : >> { %v8124_v6 = vpop.permute.xlu1 %3733  ;;  %v8126_v47 = vpop.permute.xlu0 %3731 }
 0xc80   : >> { %10650 = vst [vmem:[#allocation158_spill] sm:$0xff] %v8124_v6  ;;  %10651 = vst [vmem:[#allocation159_spill] sm:$0xff] %v8126_v47 }
 0xc83   : >> { %v8128_v42 = vpop.permute.xlu1 %3758  ;;  %v8130_v11 = vpop.permute.xlu0 %3756 }
 0xc84   : >> { %10652 = vst [vmem:[#allocation160_spill] sm:$0xff] %v8128_v42  ;;  %10653 = vst [vmem:[#allocation161_spill] sm:$0xff] %v8130_v11 }
 0xc87   : >> { %v8132_v25 = vpop.permute.xlu1 %3804  ;;  %v8134_v35 = vpop.permute.xlu0 %3802 }
 0xc88   : >> { %10654 = vst [vmem:[#allocation162_spill] sm:$0xff] %v8132_v25  ;;  %10655 = vst [vmem:[#allocation163_spill] sm:$0xff] %v8134_v35 }
 0xc8b   : >> { %v8136_v37 = vpop.permute.xlu1 %3850  ;;  %v8138_v48 = vpop.permute.xlu0 %3848 }
 0xc8c   : >> { %10656 = vst [vmem:[#allocation164_spill] sm:$0xff] %v8136_v37  ;;  %10657 = vst [vmem:[#allocation165_spill] sm:$0xff] %v8138_v48  ;;  %v6280_v37 = vld [vmem:[%s10348_s1 + $0xa1] ss:$8 sm:$0x3]  ;;  %v8156_v48 = vld [vmem:[%s6674_s9 + $0xd0] sm:$0xff] }
 0xc8d   : >> { %v3974_v35 = vrot.slane %v6280_v37, %v6604_v17 }
 0xc8f   : >> { %v8140_v16 = vpop.permute.xlu1 %3896  ;;  %v8142_v45 = vpop.permute.xlu0 %3894 }
 0xc90   : >> { %10658 = vst [vmem:[#allocation166_spill] sm:$0xff] %v8140_v16  ;;  %10659 = vst [vmem:[#allocation167_spill] sm:$0xff] %v8142_v45 }
 0xc93   : >> { %v3943_v6 = vpop.permute.xlu1 %3942  ;;  %v3941_v47 = vpop.permute.xlu0 %3940 }
 0xc94   : >> { %v3944_v42 = vsel %vm582_vm5, %v3941_v47, %v3943_v6  ;;  %v3948_v25 = vmul.f32 %v8145_v46, %v3941_v47  ;;  %v3950_v45 = vmul.f32 %v8156_v48, %v3943_v6  ;;  %v3978_v47 = vrot.slane %v6280_v37, %v6606_v18 }
 0xc95   : >> { %v3949_v16 = vmul.f32 %v8148_v5, %v3944_v42 }
 0xc96   : >> { %3954 = vrot.lane.b32.xlu0 %v3948_v25, %s6481_s21  ;;  %v8174_v25 = vld [vmem:[%s6674_s9 + $0xe0] sm:$0xf] }
 0xc97   : >> { %3956 = vrot.lane.b32.xlu1 %v3949_v16, %s6481_s21  ;;  %10664 = vst [vmem:[#allocation172_spill] sm:$0xff] %v8174_v25 }
 0xc9a   : >> { %3958 = vrot.lane.b32.xlu0 %v3950_v45, %s6481_s21  ;;  %v8179_v45 = vld [vmem:[%s6674_s9 + $0xf0] sm:$0xf] }
 0xc9b   : >> { %3979 = vrot.lane.b32.xlu1 %v3974_v35, %s6481_s21 }
 0xc9e   : >> { %3981 = vrot.lane.b32.xlu0 %v3978_v47, %s6481_s21 }
 0xd08   : >> { %v8167_v11 = vpop.permute.xlu0 %3954 }
 0xd09   : >> { %10661 = vst [vmem:[#allocation169_spill] sm:$0xff] %v8167_v11  ;;  %v8169_v42 = vpop.permute.xlu1 %3956 }
 0xd0a   : >> { %10662 = vst [vmem:[#allocation170_spill] sm:$0xff] %v8169_v42 }
 0xd0c   : >> { %v8171_v6 = vpop.permute.xlu0 %3958 }
 0xd0d   : >> { %10663 = vst [vmem:[#allocation171_spill] sm:$0xff] %v8171_v6  ;;  %v3980_v16 = vpop.permute.xlu1 %3979 }
 0xd0e   : >> { %v3987_v52 = vmul.f32 %v8145_v46, %v3980_v16  ;;  %v3990_v26 = vmul.f32 %v8174_v25, %v3980_v16 }
 0xd10   : >> { %v3999_v37 = vrot.slane %v3987_v52, 1  ;;  %v4000_v30 = vrot.slane %v3990_v26, 1  ;;  %v3982_v35 = vpop.permute.xlu0 %3981 }
 0xd11   : >> { %v3983_v47 = vsel %vm582_vm5, %v3980_v16, %v3982_v35  ;;  %v3989_v11 = vmul.f32 %v8156_v48, %v3982_v35  ;;  %v3992_v6 = vmul.f32 %v8179_v45, %v3982_v35  ;;  %v6281_v16 = vld [vmem:[%s10348_s1 + $0xa6] ss:$8 sm:$0x3] }
 0xd12   : >> { %v3988_v42 = vmul.f32 %v8148_v5, %v3983_v47  ;;  %v3991_v32 = vmul.f32 %v8182_v41, %v3983_v47  ;;  %v4001_v34 = vsel %vm410_vm0, %v3999_v37, %v4000_v30  ;;  %v4032_v30 = vrot.slane %v6281_v16, %v6606_v18 }
 0xd13   : >> { %v4005_v31 = vrot.slane %v3989_v11, 1  ;;  %v4006_v8 = vrot.slane %v3992_v6, 1  ;;  %4008 = vrot.lane.b32.xlu1 %v4001_v34, %s6481_s21  ;;  %v4028_v11 = vrot.slane %v6281_v16, %v6604_v17  ;;  %v8203_v34 = vld [vmem:[%s10348_s1 + $0xb3] ss:$8 sm:$0x3] }
 0xd14   : >> { %v4002_v26 = vrot.slane %v3988_v42, 1  ;;  %v4003_v52 = vrot.slane %v3991_v32, 1  ;;  %v394_v42 = vsel %vm368_vm6, %v6790_v2, %v6800_v9  ;;  %v8224_v6 = vld [vmem:[%s6674_s9 + $0x10] sm:$0xff]  ;;  %v441_v2 = vsel %vm368_vm6, %v6807_v14, %v6805_v13 }
 0xd15   : >> { %v4007_v49 = vsel %vm410_vm0, %v4005_v31, %v4006_v8  ;;  %v8212_v31 = vld [vmem:[%s10348_s1 + $0xc0] ss:$8 sm:$0x3]  ;;  %v8228_v37 = vmul.f32 %v8224_v6, %v6800_v9 }
 0xd16   : >> { %v4004_v35 = vsel %vm410_vm0, %v4002_v26, %v4003_v52  ;;  %v4136_v8 = vrot.slane %v8212_v31, %v6604_v17  ;;  %v8235_v52 = vld [vmem:[%s6674_s9 + $0x30] sm:$0xf] }
 0xd17   : >> { %4012 = vrot.lane.b32.xlu1 %v4007_v49, %s6481_s21  ;;  %4010 = vrot.lane.b32.xlu0 %v4004_v35, %s6481_s21  ;;  %v4082_v49 = vrot.slane %v8203_v34, %v6604_v17  ;;  %v8239_v16 = vmul.f32 %v8235_v52, %v6800_v9  ;;  %v8245_v35 = vld [vmem:[%s6674_s9 + $0x8] sm:$0xff] }
 0xd18   : >> { %v446_v9 = vmul.f32 %v8245_v35, %v441_v2 }
 0xd1a   : >> { %v461_v29 = vrot.slane %v446_v9, 2 }
 0xd1b   : >> { %4035 = vrot.lane.b32.xlu1 %v4032_v30, %s6481_s21  ;;  %4033 = vrot.lane.b32.xlu0 %v4028_v11, %s6481_s21  ;;  %v399_v30 = vmul.f32 %v8245_v35, %v394_v42  ;;  %v8249_v11 = vld [vmem:[%s6674_s9 + $0x28] sm:$0xf] }
 0xd1c   : >> { %v449_v33 = vmul.f32 %v8249_v11, %v441_v2  ;;  %v535_v2 = vsel %vm368_vm6, %v6824_v28, %v6822_v27 }
 0xd1d   : >> { %v414_v4 = vrot.slane %v399_v30, 1  ;;  %v540_v28 = vmul.f32 %v8245_v35, %v535_v2 }
 0xd1e   : >> { %v462_v30 = vrot.slane %v449_v33, 2  ;;  %v447_v33 = vmul.f32 %v8224_v6, %v6805_v13 }
 0xd1f   : >> { %4087 = vrot.lane.b32.xlu1 %v4082_v49, %s6481_s21  ;;  %v402_v49 = vmul.f32 %v8249_v11, %v394_v42  ;;  %v488_v42 = vsel %vm368_vm6, %v6815_v21, %v6813_v20 }
 0xd20   : >> { %v493_v21 = vmul.f32 %v8245_v35, %v488_v42 }
 0xd21   : >> { %v415_v12 = vrot.slane %v402_v49, 1 }
 0xd23   : >> { %4141 = vrot.lane.b32.xlu1 %v4136_v8, %s6481_s21 }
 0xd85   : >> { %v8218_v32 = vpop.permute.xlu1 %4008 }
 0xd86   : >> { %10665 = vst [vmem:[#allocation173_spill] sm:$0xff] %v8218_v32 }
 0xd89   : >> { %v8230_v47 = vpop.permute.xlu1 %4012  ;;  %v8232_v26 = vpop.permute.xlu0 %4010 }
 0xd8a   : >> { %10666 = vst [vmem:[#allocation174_spill] sm:$0xff] %v8230_v47  ;;  %10667 = vst [vmem:[#allocation175_spill] sm:$0xff] %v8232_v26  ;;  %v369_v47 = vsel %vm368_vm6, %v6792_v3, %v6802_v10 }
 0xd8d   : >> { %v4036_v32 = vpop.permute.xlu1 %4035  ;;  %v4034_v26 = vpop.permute.xlu0 %4033 }
 0xd8e   : >> { %v4037_v15 = vsel %vm582_vm5, %v4034_v26, %v4036_v32  ;;  %v4041_v38 = vmul.f32 %v8145_v46, %v4034_v26  ;;  %v4044_v3 = vmul.f32 %v8174_v25, %v4034_v26 }
 0xd8f   : >> { %v4042_v8 = vmul.f32 %v8148_v5, %v4037_v15  ;;  %v4045_v22 = vmul.f32 %v8182_v41, %v4037_v15  ;;  %v496_v5 = vmul.f32 %v8249_v11, %v488_v42 }
 0xd90   : >> { %v4053_v14 = vrot.slane %v4041_v38, 2  ;;  %v4054_v63 = vrot.slane %v4044_v3, 2  ;;  %v450_v3 = vmul.f32 %v8235_v52, %v6805_v13  ;;  %v494_v13 = vmul.f32 %v8224_v6, %v6813_v20 }
 0xd91   : >> { %v4056_v61 = vrot.slane %v4042_v8, 2  ;;  %v4057_v60 = vrot.slane %v4045_v22, 2  ;;  %v8270_v59 = vpop.permute.xlu1 %4087  ;;  %v543_v22 = vmul.f32 %v8249_v11, %v535_v2  ;;  %v4086_v8 = vrot.slane %v8203_v34, %v6606_v18 }
 0xd92   : >> { %v4095_v15 = vmul.f32 %v8145_v46, %v8270_v59  ;;  %v4098_v26 = vmul.f32 %v8174_v25, %v8270_v59  ;;  %v4055_v38 = vsel %vm457_vm1, %v4053_v14, %v4054_v63  ;;  %v4043_v63 = vmul.f32 %v8156_v48, %v4036_v32 }
 0xd93   : >> { %v4058_v49 = vsel %vm457_vm1, %v4056_v61, %v4057_v60  ;;  %4062 = vrot.lane.b32.xlu0 %v4055_v38, %s6481_s21  ;;  %v4046_v60 = vmul.f32 %v8179_v45, %v4036_v32  ;;  %v8295_v61 = vld [vmem:[%s10348_s1 + $0xa3] ss:$8 sm:$0x3]  ;;  %v416_v14 = vsel %vm410_vm0, %v414_v4, %v415_v12  ;;  %v508_v34 = vrot.slane %v493_v21, 3 }
 0xd94   : >> { %4064 = vrot.lane.b32.xlu1 %v4058_v49, %s6481_s21  ;;  %v4107_v9 = vrot.slane %v4095_v15, 3  ;;  %v4108_v42 = vrot.slane %v4098_v26, 3  ;;  %v509_v2 = vrot.slane %v496_v5, 3  ;;  %v374_v26 = vmul.f32 %v8245_v35, %v369_v47 }
 0xd95   : >> { %v463_v38 = vsel %vm457_vm1, %v461_v29, %v462_v30  ;;  %v497_v32 = vmul.f32 %v8235_v52, %v6813_v20  ;;  %v555_v49 = vrot.slane %v540_v28, 4  ;;  %v556_v25 = vrot.slane %v543_v22, 4  ;;  %v8314_v20 = vld [vmem:[%s10348_s1 + $0x96] ss:$8 sm:$0x3] }
 0xd96   : >> { %v4109_v15 = vsel %vm504_vm2, %v4107_v9, %v4108_v42  ;;  %v4140_v12 = vrot.slane %v8212_v31, %v6606_v18  ;;  %v4411_v4 = vrot.slane %v8295_v61, %v6604_v17  ;;  %v424_v5 = vadd.f32 %v416_v14, %v374_v26 }
 0xd97   : >> { %4089 = vrot.lane.b32.xlu0 %v4086_v8, %s6481_s21  ;;  %v464_v29 = vrot.slane %v447_v33, 2  ;;  %v4059_v47 = vrot.slane %v4043_v63, 2  ;;  %v4060_v21 = vrot.slane %v4046_v60, 2  ;;  %v465_v30 = vrot.slane %v450_v3, 2 }
 0xd98   : >> { %4116 = vrot.lane.b32.xlu1 %v4109_v15, %s6481_s21  ;;  %v510_v28 = vsel %vm504_vm2, %v508_v34, %v509_v2  ;;  %v541_v31 = vmul.f32 %v8224_v6, %v6822_v27  ;;  %v544_v22 = vmul.f32 %v8235_v52, %v6822_v27  ;;  %v471_v8 = vadd.f32 %v463_v38, %v424_v5 }
 0xd99   : >> { %v511_v9 = vrot.slane %v494_v13, 3  ;;  %v512_v42 = vrot.slane %v497_v32, 3  ;;  %v10668_v33 = vrot.slane %v8239_v16, 1  ;;  %v10669_v63 = vrot.slane %v8228_v37, 1 }
 0xd9a   : >> { %v557_v14 = vsel %vm551_vm3, %v555_v49, %v556_v25  ;;  %v4372_v3 = vrot.slane %v8314_v20, %v6604_v17  ;;  %v375_v27 = vmul.f32 %v8224_v6, %v6802_v10  ;;  %v518_v34 = vadd.f32 %v510_v28, %v471_v8  ;;  %v8340_v25 = vld [vmem:[%s10348_s1 + $0xb0] ss:$8 sm:$0x3] }
 0xd9b   : >> { %v419_v60 = vsel %vm410_vm0, %v10669_v63, %v10668_v33  ;;  %4143 = vrot.lane.b32.xlu0 %v4140_v12, %s6481_s21  ;;  %v599_v16 = vsel %vm582_vm5, %v7032_v53, %v7150_v0  ;;  %v4061_v37 = vsel %vm457_vm1, %v4059_v47, %v4060_v21  ;;  %v466_v2 = vsel %vm457_vm1, %v464_v29, %v465_v30  ;;  %v8361_v29 = vld [vmem:[%s10348_s1 + $0xb5] ss:$8 sm:$0x3] }
 0xd9c   : >> { %4416 = vrot.lane.b32.xlu1 %v4411_v4, %s6482_s25  ;;  %v558_v15 = vrot.slane %v541_v31, 4  ;;  %v559_v26 = vrot.slane %v544_v22, 4  ;;  %v600_v10 = vsel %vm582_vm5, %v7150_v0, %v7034_v7  ;;  %v425_v38 = vadd.f32 %v419_v60, %v375_v27  ;;  %v8373_v31 = vld [vmem:[%s10348_s1 + $0xc2] ss:$8 sm:$0x3] }
 0xd9d   : >> { %v513_v13 = vsel %vm504_vm2, %v511_v9, %v512_v42  ;;  %v565_v32 = vadd.f32 %v557_v14, %v518_v34  ;;  %v653_v53 = vsel %vm582_vm5, %v7152_v39, %v7054_v23  ;;  %v604_v49 = vadd.f32 %v599_v16, %v6837_v43 }
 0xd9e   : >> { %v654_v12 = vsel %vm582_vm5, %v7054_v23, %v7154_v51  ;;  %v4465_v0 = vrot.slane %v8340_v25, %v6604_v17  ;;  %v472_v4 = vadd.f32 %v466_v2, %v425_v38  ;;  %v560_v43 = vsel %vm551_vm3, %v558_v15, %v559_v26  ;;  %v10671_v26 = vld [vmem:[#allocation8_spill] sm:$0xff] }
 0xd9f   : >> { %4066 = vrot.lane.b32.xlu0 %v4061_v37, %s6481_s21  ;;  %v605_v5 = vadd.f32 %v600_v10, %v565_v32  ;;  %v658_v39 = vadd.f32 %v653_v53, %v604_v49  ;;  %v4519_v23 = vrot.slane %v8361_v29, %v6604_v17  ;;  %v707_v28 = vsel %vm582_vm5, %v7038_v50, %v7164_v24  ;;  %v10673_v32 = vld [vmem:[#allocation10_spill] sm:$0xff] }
 0xda0   : >> { %4377 = vrot.lane.b32.xlu1 %v4372_v3, %s6482_s25  ;;  %v519_v47 = vadd.f32 %v513_v13, %v472_v4  ;;  %v708_v22 = vsel %vm582_vm5, %v7164_v24, %v7040_v62  ;;  %v761_v33 = vsel %vm582_vm5, %v7156_v54, %v7056_v36  ;;  %v762_v50 = vsel %vm582_vm5, %v7056_v36, %v7158_v1 }
 0xda1   : >> { %v659_v21 = vadd.f32 %v654_v12, %v605_v5  ;;  %v712_v8 = vadd.f32 %v707_v28, %v658_v39  ;;  %v4573_v63 = vrot.slane %v8373_v31, %v6604_v17  ;;  %v815_v54 = vsel %vm582_vm5, %v7042_v40, %v7166_v19 }
 0xda2   : >> { %v566_v30 = vadd.f32 %v560_v43, %v519_v47  ;;  %v816_v36 = vsel %vm582_vm5, %v7166_v19, %v7044_v44  ;;  %v882_v40 = vsel %vm368_vm6, %v6860_v58, %v6858_v57  ;;  %v10677_v47 = vld [vmem:[#allocation19_spill] sm:$0xff] }
 0xda3   : >> { %v713_v42 = vadd.f32 %v708_v22, %v659_v21  ;;  %v766_v24 = vadd.f32 %v761_v33, %v712_v8  ;;  %v10678_v22 = vld [vmem:[#allocation20_spill] sm:$0xff]  ;;  %v10680_v33 = vld [vmem:[#allocation23_spill] sm:$0xff] }
 0xda4   : >> { %4470 = vrot.lane.b32.xlu1 %v4465_v0, %s6482_s25  ;;  %v606_v9 = vadd.f32 %v7034_v7, %v566_v30  ;;  %v10675_v0 = vld [vmem:[#allocation12_spill] sm:$0xff] }
 0xda5   : >> { %v767_v14 = vadd.f32 %v762_v50, %v713_v42  ;;  %v820_v3 = vadd.f32 %v815_v54, %v766_v24  ;;  %v10682_v54 = vld [vmem:[#allocation21_spill] sm:$0xff] }
 0xda6   : >> { %v660_v60 = vadd.f32 %v7154_v51, %v606_v9  ;;  %v844_v51 = vsel %vm368_vm6, %v6856_v56, %v6854_v55  ;;  %v10679_v9 = vld [vmem:[#allocation14_spill] sm:$0xff] }
 0xda7   : >> { %v821_v34 = vadd.f32 %v816_v36, %v767_v14  ;;  %v848_v16 = vadd.f32 %v6856_v56, %v820_v3  ;;  %v1091_v50 = vsel %vm1020_vm4, %v10679_v9, %v10680_v33  ;;  %v10683_v3 = vld [vmem:[#allocation18_spill] sm:$0xff] }
 0xda8   : >> { %4524 = vrot.lane.b32.xlu1 %v4519_v23, %s6482_s25  ;;  %v714_v7 = vadd.f32 %v7040_v62, %v660_v60 }
 0xda9   : >> { %v849_v37 = vadd.f32 %v844_v51, %v821_v34  ;;  %v886_v2 = vadd.f32 %v6860_v58, %v848_v16  ;;  %v10684_v34 = vld [vmem:[#allocation22_spill] sm:$0xff] }
 0xdaa   : >> { %v768_v27 = vadd.f32 %v7158_v1, %v714_v7  ;;  %v10670_v1 = vld [vmem:[#allocation7_spill] sm:$0xff]  ;;  %v1146_v51 = vsel %vm1020_vm4, %v10683_v3, %v10684_v34 }
 0xdab   : >> { %v887_v15 = vadd.f32 %v882_v40, %v849_v37  ;;  %v920_v10 = vsel %vm368_vm6, %v10671_v26, %v10670_v1  ;;  %v924_v38 = vadd.f32 %v10671_v26, %v886_v2  ;;  %v10685_v37 = vld [vmem:[#allocation16_spill] sm:$0xff]  ;;  %v10688_v26 = vld [vmem:[#allocation30_spill] sm:$0xff] }
 0xdac   : >> { %4578 = vrot.lane.b32.xlu1 %v4573_v63, %s6482_s25  ;;  %v822_v62 = vadd.f32 %v7044_v44, %v768_v27  ;;  %v10672_v44 = vld [vmem:[#allocation9_spill] sm:$0xff]  ;;  %v10681_v63 = vld [vmem:[#allocation15_spill] sm:$0xff]  ;;  %v1145_v27 = vsel %vm1020_vm4, %v10682_v54, %v10683_v3  ;;  %v10686_v2 = vld [vmem:[#allocation24_spill] sm:$0xff] }
 0xdad   : >> { %v925_v13 = vadd.f32 %v920_v10, %v887_v15  ;;  %v958_v53 = vsel %vm368_vm6, %v10673_v32, %v10672_v44  ;;  %v962_v49 = vadd.f32 %v10673_v32, %v924_v38  ;;  %v1092_v60 = vsel %vm1020_vm4, %v10680_v33, %v10681_v63  ;;  %v10687_v15 = vld [vmem:[#allocation17_spill] sm:$0xff]  ;;  %v10689_v10 = vld [vmem:[#allocation31_spill] sm:$0xff] }
 0xdae   : >> { %v850_v19 = vadd.f32 %v6854_v55, %v822_v62  ;;  %v10674_v55 = vld [vmem:[#allocation11_spill] sm:$0xff]  ;;  %v1301_v38 = vsel %vm368_vm6, %v10689_v10, %v10688_v26 }
 0xdaf   : >> { %v963_v12 = vadd.f32 %v958_v53, %v925_v13  ;;  %v996_v4 = vsel %vm368_vm6, %v10675_v0, %v10674_v55  ;;  %v1000_v5 = vadd.f32 %v10675_v0, %v962_v49  ;;  %v10690_v13 = vld [vmem:[#allocation27_spill] sm:$0xff]  ;;  %v10692_v53 = vld [vmem:[#allocation26_spill] sm:$0xff]  ;;  %v10694_v0 = vld [vmem:[#allocation29_spill] sm:$0xff] }
 0xdb0   : >> { %v888_v56 = vadd.f32 %v6858_v57, %v850_v19  ;;  %v10676_v57 = vld [vmem:[#allocation13_spill] sm:$0xff]  ;;  %v1199_v19 = vsel %vm1020_vm4, %v10685_v37, %v10686_v2  ;;  %v1254_v49 = vsel %vm1020_vm4, %v10690_v13, %v10692_v53 }
 0xdb1   : >> { %v1001_v39 = vadd.f32 %v996_v4, %v963_v12  ;;  %v1037_v21 = vsel %vm1020_vm4, %v10677_v47, %v10676_v57  ;;  %v1042_v23 = vadd.f32 %v10677_v47, %v1000_v5  ;;  %v1038_v8 = vsel %vm1020_vm4, %v10676_v57, %v10678_v22  ;;  %v6400_v5 = vld [vmem:[%s6674_s9 + $0x38] sm:$0xf] }
 0xdb2   : >> { %v926_v58 = vadd.f32 %v10670_v1, %v888_v56  ;;  %v1200_v1 = vsel %vm1020_vm4, %v10686_v2, %v10687_v15  ;;  %v1308_v57 = vmul.f32 %v8249_v11, %v10689_v10 }
 0xdb3   : >> { %v1043_v30 = vadd.f32 %v1037_v21, %v1001_v39  ;;  %v1096_v42 = vadd.f32 %v10679_v9, %v1042_v23  ;;  %v1305_v39 = vmul.f32 %v8245_v35, %v10689_v10  ;;  %v1306_v23 = vmul.f32 %v8224_v6, %v1301_v38 }
 0xdb4   : >> { %v964_v43 = vadd.f32 %v10672_v44, %v926_v58  ;;  %v10691_v44 = vld [vmem:[#allocation25_spill] sm:$0xff]  ;;  %v6399_v58 = vld [vmem:[%s6674_s9 + $0x18] sm:$0xff]  ;;  %v1280_v9 = vmul.f32 %v8245_v35, %v10694_v0 }
 0xdb5   : >> { %v1097_v14 = vadd.f32 %v1091_v50, %v1043_v30  ;;  %v1150_v36 = vadd.f32 %v10682_v54, %v1096_v42  ;;  %v1253_v32 = vsel %vm1020_vm4, %v10691_v44, %v10690_v13  ;;  %v1307_v12 = vmul.f32 %v6399_v58, %v10688_v26 }
 0xdb6   : >> { %v1002_v28 = vadd.f32 %v10674_v55, %v964_v43  ;;  %v10693_v55 = vld [vmem:[#allocation28_spill] sm:$0xff]  ;;  %v1310_v43 = vmul.f32 %v6400_v5, %v10688_v26  ;;  %v1309_v30 = vmul.f32 %v8235_v52, %v1301_v38  ;;  %v1317_v63 = vrot.slane %v1305_v39, 1 }
 0xdb7   : >> { %v1151_v16 = vadd.f32 %v1145_v27, %v1097_v14  ;;  %v1204_v40 = vadd.f32 %v10685_v37, %v1150_v36  ;;  %v1276_v4 = vsel %vm368_vm6, %v10694_v0, %v10693_v55  ;;  %v1282_v21 = vmul.f32 %v6399_v58, %v10693_v55  ;;  %v10696_v14 = vld [vmem:[#allocation33_spill] sm:$0xff]  ;;  %v10698_v37 = vld [vmem:[#allocation35_spill] sm:$0xff]  ;;  %v10699_v0 = vld [vmem:[#allocation36_spill] sm:$0xff] }
 0xdb8   : >> { %v1044_v24 = vadd.f32 %v1038_v8, %v1002_v28  ;;  %v1281_v42 = vmul.f32 %v8224_v6, %v1276_v4  ;;  %v1323_v33 = vrot.slane %v1307_v12, 1  ;;  %v1324_v50 = vrot.slane %v1310_v43, 1  ;;  %v10700_v4 = vld [vmem:[#allocation37_spill] sm:$0xff] }
 0xdb9   : >> { %v1205_v56 = vadd.f32 %v1199_v19, %v1151_v16  ;;  %v1258_v28 = vadd.f32 %v10691_v44, %v1204_v40  ;;  %v1320_v36 = vrot.slane %v1306_v23, 1  ;;  %v1321_v3 = vrot.slane %v1309_v30, 1 }
 0xdba   : >> { %v1098_v7 = vadd.f32 %v1092_v60, %v1044_v24  ;;  %v1318_v60 = vrot.slane %v1308_v57, 1  ;;  %v10695_v24 = vld [vmem:[#allocation32_spill] sm:$0xff]  ;;  %v1354_v16 = vmul.f32 %v8249_v11, %v10696_v14  ;;  %v1325_v26 = vsel %vm410_vm0, %v1323_v33, %v1324_v50 }
 0xdbb   : >> { %v1259_v22 = vadd.f32 %v1253_v32, %v1205_v56  ;;  %v1353_v27 = vmul.f32 %v6399_v58, %v10695_v24  ;;  %v1356_v34 = vmul.f32 %v6400_v5, %v10695_v24  ;;  %v1283_v2 = vadd.f32 %v1280_v9, %v1258_v28 }
 0xdbc   : >> { %v1152_v62 = vadd.f32 %v1146_v51, %v1098_v7  ;;  %v1347_v7 = vsel %vm368_vm6, %v10696_v14, %v10695_v24  ;;  %v1351_v51 = vmul.f32 %v8245_v35, %v10696_v14  ;;  %v1319_v10 = vsel %vm410_vm0, %v1317_v63, %v1318_v60 }
 0xdbd   : >> { %v1284_v19 = vadd.f32 %v1281_v42, %v1259_v22  ;;  %v1352_v15 = vmul.f32 %v8224_v6, %v1347_v7  ;;  %v1397_v38 = vmul.f32 %v8245_v35, %v10698_v37  ;;  %v1400_v56 = vmul.f32 %v8249_v11, %v10698_v37 }
 0xdbe   : >> { %v1206_v47 = vadd.f32 %v1200_v1, %v1152_v62  ;;  %v10697_v62 = vld [vmem:[#allocation34_spill] sm:$0xff]  ;;  %v1355_v1 = vmul.f32 %v8235_v52, %v1347_v7  ;;  %v1322_v13 = vsel %vm410_vm0, %v1320_v36, %v1321_v3  ;;  %v1369_v44 = vrot.slane %v1353_v27, 2 }
 0xdbf   : >> { %v1393_v40 = vsel %vm368_vm6, %v10698_v37, %v10697_v62  ;;  %v1363_v12 = vrot.slane %v1351_v51, 2  ;;  %v1364_v55 = vrot.slane %v1354_v16, 2  ;;  %v1439_v43 = vsel %vm368_vm6, %v10700_v4, %v10699_v0 }
 0xdc0   : >> { %v1260_v8 = vadd.f32 %v1254_v49, %v1206_v47  ;;  %v1398_v32 = vmul.f32 %v8224_v6, %v1393_v40  ;;  %v1401_v53 = vmul.f32 %v8235_v52, %v1393_v40  ;;  %v1370_v49 = vrot.slane %v1356_v34, 2 }
 0xdc1   : >> { %v1366_v39 = vrot.slane %v1352_v15, 2  ;;  %v1367_v57 = vrot.slane %v1355_v1, 2  ;;  %v1399_v47 = vmul.f32 %v6399_v58, %v10697_v62  ;;  %v1409_v23 = vrot.slane %v1397_v38, 3  ;;  %v10701_v38 = vld [vmem:[#allocation38_spill] sm:$0xff] }
 0xdc2   : >> { %v1285_v54 = vadd.f32 %v1282_v21, %v1260_v8  ;;  %v1402_v21 = vmul.f32 %v6400_v5, %v10697_v62  ;;  %v1410_v30 = vrot.slane %v1400_v56, 3  ;;  %v1443_v28 = vmul.f32 %v8245_v35, %v10700_v4  ;;  %v10702_v56 = vld [vmem:[#allocation39_spill] sm:$0xff] }
 0xdc3   : >> { %v1446_v22 = vmul.f32 %v8249_v11, %v10700_v4  ;;  %v1412_v8 = vrot.slane %v1398_v32, 3  ;;  %v1413_v9 = vrot.slane %v1401_v53, 3  ;;  %v1444_v42 = vmul.f32 %v8224_v6, %v1439_v43  ;;  %v8532_v32 = vld [vmem:[%s6674_s9 + $0x70] sm:$0xf] }
 0xdc4   : >> { %v1447_v33 = vmul.f32 %v8235_v52, %v1439_v43  ;;  %v1329_v50 = vadd.f32 %v1319_v10, %v1283_v2  ;;  %v1365_v63 = vsel %vm457_vm1, %v1363_v12, %v1364_v55  ;;  %v1445_v60 = vmul.f32 %v6399_v58, %v10699_v0  ;;  %v10704_v12 = vld [vmem:[#allocation41_spill] sm:$0xff]  ;;  %v6404_v43 = vld [vmem:[%s6674_s9 + $0x60] sm:$0xf] }
 0xdc5   : >> { %v1448_v24 = vmul.f32 %v6400_v5, %v10699_v0  ;;  %v1330_v14 = vadd.f32 %v1322_v13, %v1284_v19  ;;  %v1371_v7 = vsel %vm457_vm1, %v1369_v44, %v1370_v49  ;;  %v1368_v35 = vsel %vm457_vm1, %v1366_v39, %v1367_v57  ;;  %v6403_v0 = vld [vmem:[%s6674_s9 + $0x40] sm:$0xff] }
 0xdc6   : >> { %v1415_v36 = vrot.slane %v1399_v47, 3  ;;  %v1416_v11 = vrot.slane %v1402_v21, 3  ;;  %v1411_v3 = vsel %vm504_vm2, %v1409_v23, %v1410_v30  ;;  %v1455_v27 = vrot.slane %v1443_v28, 4  ;;  %v8548_v28 = vld [vmem:[%s6674_s9 + $0x48] sm:$0xff] }
 0xdc7   : >> { %v1456_v6 = vrot.slane %v1446_v22, 4  ;;  %v1375_v52 = vadd.f32 %v1365_v63, %v1329_v50  ;;  %v1414_v34 = vsel %vm504_vm2, %v1412_v8, %v1413_v9  ;;  %v1458_v51 = vrot.slane %v1444_v42, 4  ;;  %v8553_v50 = vld [vmem:[%s6674_s9 + $0x68] sm:$0xf] }
 0xdc8   : >> { %v1459_v58 = vrot.slane %v1447_v33, 4  ;;  %v1331_v16 = vadd.f32 %v1325_v26, %v1285_v54  ;;  %v1376_v5 = vadd.f32 %v1368_v35, %v1330_v14  ;;  %v1461_v62 = vrot.slane %v1445_v60, 4  ;;  %v8527_v54 = vld [vmem:[%s6674_s9 + $0x50] sm:$0xff]  ;;  %v10703_v26 = vld [vmem:[#allocation40_spill] sm:$0xff]  ;;  %v10705_v14 = vld [vmem:[#allocation42_spill] sm:$0xff] }
 0xdc9   : >> { %v1462_v37 = vrot.slane %v1448_v24, 4  ;;  %v1421_v40 = vadd.f32 %v1411_v3, %v1375_v52  ;;  %v1457_v19 = vsel %vm551_vm3, %v1455_v27, %v1456_v6  ;;  %v1417_v15 = vsel %vm504_vm2, %v1415_v36, %v1416_v11  ;;  %v10706_v35 = vld [vmem:[#allocation43_spill] sm:$0xff] }
 0xdca   : >> { %v1422_v2 = vadd.f32 %v1414_v34, %v1376_v5  ;;  %v1377_v1 = vadd.f32 %v1371_v7, %v1331_v16  ;;  %v1460_v10 = vsel %vm551_vm3, %v1458_v51, %v1459_v58  ;;  %v1495_v13 = vsel %vm368_vm6, %v10702_v56, %v10701_v38 }
 0xdcb   : >> { %v1526_v44 = vmul.f32 %v8527_v54, %v10703_v26  ;;  %v1529_v53 = vmul.f32 %v8532_v32, %v10703_v26  ;;  %v1463_v49 = vsel %vm551_vm3, %v1461_v62, %v1462_v37  ;;  %v1520_v55 = vsel %vm368_vm6, %v10704_v12, %v10703_v26 }
 0xdcc   : >> { %v1524_v4 = vmul.f32 %v6403_v0, %v10704_v12  ;;  %v1527_v39 = vmul.f32 %v6404_v43, %v10704_v12  ;;  %v1423_v57 = vadd.f32 %v1417_v15, %v1377_v1  ;;  %v1501_v47 = vmul.f32 %v8527_v54, %v10701_v38 }
 0xdcd   : >> { %v1467_v21 = vadd.f32 %v1457_v19, %v1421_v40  ;;  %v1468_v23 = vadd.f32 %v1460_v10, %v1422_v2  ;;  %v1499_v30 = vmul.f32 %v6403_v0, %v10702_v56  ;;  %v1500_v22 = vmul.f32 %v8548_v28, %v1495_v13  ;;  %v10707_v2 = vld [vmem:[#allocation44_spill] sm:$0xff]  ;;  %v10708_v19 = vld [vmem:[#allocation45_spill] sm:$0xff] }
 0xdce   : >> { %v1469_v8 = vadd.f32 %v1463_v49, %v1423_v57  ;;  %v1542_v9 = vrot.slane %v1526_v44, 1  ;;  %v1543_v42 = vrot.slane %v1529_v53, 1  ;;  %v1525_v33 = vmul.f32 %v8548_v28, %v1520_v55  ;;  %v10709_v53 = vld [vmem:[#allocation46_spill] sm:$0xff]  ;;  %v10710_v49 = vld [vmem:[#allocation47_spill] sm:$0xff] }
 0xdcf   : >> { %v1528_v63 = vmul.f32 %v8553_v50, %v1520_v55  ;;  %v1536_v60 = vrot.slane %v1524_v4, 1  ;;  %v1537_v24 = vrot.slane %v1527_v39, 1  ;;  %v1572_v7 = vmul.f32 %v8527_v54, %v10705_v14 }
 0xdd0   : >> { %v1566_v36 = vsel %vm368_vm6, %v10706_v35, %v10705_v14  ;;  %v1502_v11 = vadd.f32 %v1499_v30, %v1467_v21  ;;  %v1575_v3 = vmul.f32 %v8532_v32, %v10705_v14  ;;  %v1570_v27 = vmul.f32 %v6403_v0, %v10706_v35 }
 0xdd1   : >> { %v1573_v6 = vmul.f32 %v6404_v43, %v10706_v35  ;;  %v1504_v52 = vadd.f32 %v1501_v47, %v1469_v8  ;;  %v1503_v34 = vadd.f32 %v1500_v22, %v1468_v23  ;;  %v1544_v51 = vsel %vm410_vm0, %v1542_v9, %v1543_v42 }
 0xdd2   : >> { %v1539_v58 = vrot.slane %v1525_v33, 1  ;;  %v1538_v16 = vsel %vm410_vm0, %v1536_v60, %v1537_v24  ;;  %v1540_v5 = vrot.slane %v1528_v63, 1  ;;  %v1571_v62 = vmul.f32 %v8548_v28, %v1566_v36 }
 0xdd3   : >> { %v1574_v37 = vmul.f32 %v8553_v50, %v1566_v36  ;;  %v1588_v40 = vrot.slane %v1572_v7, 2  ;;  %v1612_v15 = vsel %vm368_vm6, %v10708_v19, %v10707_v2  ;;  %v1616_v1 = vmul.f32 %v6403_v0, %v10708_v19 }
 0xdd4   : >> { %v1619_v10 = vmul.f32 %v6404_v43, %v10708_v19  ;;  %v1589_v38 = vrot.slane %v1575_v3, 2  ;;  %v1582_v56 = vrot.slane %v1570_v27, 2  ;;  %v1583_v13 = vrot.slane %v1573_v6, 2 }
 0xdd5   : >> { %v1618_v26 = vmul.f32 %v8527_v54, %v10707_v2  ;;  %v1621_v44 = vmul.f32 %v8532_v32, %v10707_v2  ;;  %v1658_v12 = vsel %vm368_vm6, %v10710_v49, %v10709_v53  ;;  %v1662_v55 = vmul.f32 %v6403_v0, %v10710_v49 }
 0xdd6   : >> { %v1665_v4 = vmul.f32 %v6404_v43, %v10710_v49  ;;  %v1585_v39 = vrot.slane %v1571_v62, 2  ;;  %v1586_v57 = vrot.slane %v1574_v37, 2  ;;  %v1617_v47 = vmul.f32 %v8548_v28, %v1612_v15  ;;  %v10714_v49 = vld [vmem:[#allocation51_spill] sm:$0xff] }
 0xdd7   : >> { %v1620_v21 = vmul.f32 %v8553_v50, %v1612_v15  ;;  %v1628_v23 = vrot.slane %v1616_v1, 3  ;;  %v1629_v30 = vrot.slane %v1619_v10, 3  ;;  %v1664_v22 = vmul.f32 %v8527_v54, %v10709_v53 }
 0xdd8   : >> { %v1667_v8 = vmul.f32 %v8532_v32, %v10709_v53  ;;  %v1541_v9 = vsel %vm410_vm0, %v1539_v58, %v1540_v5  ;;  %v1584_v0 = vsel %vm457_vm1, %v1582_v56, %v1583_v13  ;;  %v1663_v43 = vmul.f32 %v8548_v28, %v1658_v12  ;;  %v10711_v13 = vld [vmem:[#allocation49_spill] sm:$0xff] }
 0xdd9   : >> { %v1666_v42 = vmul.f32 %v8553_v50, %v1658_v12  ;;  %v1634_v33 = vrot.slane %v1618_v26, 3  ;;  %v1635_v63 = vrot.slane %v1621_v44, 3  ;;  %v1674_v60 = vrot.slane %v1662_v55, 4  ;;  %v10712_v26 = vld [vmem:[#allocation48_spill] sm:$0xff] }
 0xdda   : >> { %v1675_v24 = vrot.slane %v1665_v4, 4  ;;  %v1548_v14 = vadd.f32 %v1538_v16, %v1502_v11  ;;  %v1587_v7 = vsel %vm457_vm1, %v1585_v39, %v1586_v57  ;;  %v1631_v35 = vrot.slane %v1617_v47, 3  ;;  %v10715_v39 = vld [vmem:[#allocation50_spill] sm:$0xff] }
 0xddb   : >> { %v1632_v36 = vrot.slane %v1620_v21, 3  ;;  %v1630_v3 = vsel %vm504_vm2, %v1628_v23, %v1629_v30  ;;  %v1680_v27 = vrot.slane %v1664_v22, 4  ;;  %v1681_v6 = vrot.slane %v1667_v8, 4  ;;  %v10716_v21 = vld [vmem:[#allocation55_spill] sm:$0xff]  ;;  %v10717_v23 = vld [vmem:[#allocation54_spill] sm:$0xff]  ;;  %v10718_v8 = vld [vmem:[#allocation52_spill] sm:$0xff] }
 0xddc   : >> { %v1590_v58 = vsel %vm457_vm1, %v1588_v40, %v1589_v38  ;;  %v1594_v5 = vadd.f32 %v1584_v0, %v1548_v14  ;;  %v1677_v62 = vrot.slane %v1663_v43, 4  ;;  %v1678_v37 = vrot.slane %v1666_v42, 4  ;;  %v10719_v42 = vld [vmem:[#allocation59_spill] sm:$0xff]  ;;  %v10721_v14 = vld [vmem:[#allocation56_spill] sm:$0xff] }
 0xddd   : >> { %v1550_v2 = vadd.f32 %v1544_v51, %v1504_v52  ;;  %v1549_v19 = vadd.f32 %v1541_v9, %v1503_v34  ;;  %v1676_v15 = vsel %vm551_vm3, %v1674_v60, %v1675_v24  ;;  %v1636_v1 = vsel %vm504_vm2, %v1634_v33, %v1635_v63  ;;  %v10713_v51 = vld [vmem:[#allocation53_spill] sm:$0xff] }
 0xdde   : >> { %v1633_v11 = vsel %vm504_vm2, %v1631_v35, %v1632_v36  ;;  %v1640_v16 = vadd.f32 %v1630_v3, %v1594_v5  ;;  %v1720_v44 = vsel %vm582_vm5, %v10712_v26, %v10711_v13  ;;  %v1682_v40 = vsel %vm551_vm3, %v1680_v27, %v1681_v6  ;;  %v10720_v33 = vld [vmem:[#allocation57_spill] sm:$0xff]  ;;  %v10723_v27 = vld [vmem:[#allocation60_spill] sm:$0xff]  ;;  %v10724_v5 = vld [vmem:[#allocation58_spill] sm:$0xff] }
 0xddf   : >> { %v1596_v10 = vadd.f32 %v1590_v58, %v1550_v2  ;;  %v1595_v56 = vadd.f32 %v1587_v7, %v1549_v19  ;;  %v1679_v38 = vsel %vm551_vm3, %v1677_v62, %v1678_v37  ;;  %v1774_v12 = vsel %vm582_vm5, %v10714_v49, %v10713_v51  ;;  %v10722_v3 = vld [vmem:[#allocation61_spill] sm:$0xff] }
 0xde0   : >> { %v1686_v53 = vadd.f32 %v1676_v15, %v1640_v16  ;;  %v1721_v57 = vsel %vm582_vm5, %v10711_v13, %v10715_v39  ;;  %v1828_v30 = vsel %vm582_vm5, %v10717_v23, %v10716_v21  ;;  %v1775_v9 = vsel %vm582_vm5, %v10713_v51, %v10718_v8  ;;  %v8656_v23 = vld [vmem:[%s10348_s1 + $0x95] ss:$8 sm:$0x3] }
 0xde1   : >> { %v1642_v52 = vadd.f32 %v1636_v1, %v1596_v10  ;;  %v1641_v34 = vadd.f32 %v1633_v11, %v1595_v56  ;;  %v1882_v63 = vsel %vm582_vm5, %v10720_v33, %v10719_v42  ;;  %v1829_v7 = vsel %vm582_vm5, %v10716_v21, %v10721_v14  ;;  %v10725_v1 = vld [vmem:[#allocation62_spill] sm:$0xff] }
 0xde2   : >> { %v1725_v55 = vadd.f32 %v1720_v44, %v1686_v53  ;;  %v1936_v6 = vsel %vm582_vm5, %v10723_v27, %v10722_v3  ;;  %v1883_v62 = vsel %vm582_vm5, %v10719_v42, %v10724_v5  ;;  %v1937_v11 = vsel %vm582_vm5, %v10722_v3, %v10725_v1 }
 0xde3   : >> { %v1688_v4 = vadd.f32 %v1682_v40, %v1642_v52  ;;  %v1687_v47 = vadd.f32 %v1679_v38, %v1641_v34  ;;  %v10726_v40 = vld [vmem:[#allocation64_spill] sm:$0xff]  ;;  %v10727_v38 = vld [vmem:[#allocation63_spill] sm:$0xff]  ;;  %v4415_v3 = vrot.slane %v8295_v61, %v6606_v18  ;;  %v4190_v27 = vrot.slane %v8656_v23, %v6604_v17 }
 0xde4   : >> { %v1779_v0 = vadd.f32 %v1774_v12, %v1725_v55  ;;  %v1965_v53 = vsel %vm368_vm6, %v10727_v38, %v10726_v40  ;;  %v10728_v52 = vld [vmem:[#allocation168_spill] sm:$0xff] }
 0xde5   : >> { %v1727_v22 = vadd.f32 %v10715_v39, %v1688_v4  ;;  %v1726_v43 = vadd.f32 %v1721_v57, %v1687_v47  ;;  %v8649_v39 = vpop.permute.xlu1 %4141  ;;  %v10735_v61 = vld [vmem:[#allocation72_spill] sm:$0xff] }
 0xde6   : >> { %v1833_v24 = vadd.f32 %v1828_v30, %v1779_v0 }
 0xde7   : >> { %v1781_v60 = vadd.f32 %v10718_v8, %v1727_v22  ;;  %v1780_v36 = vadd.f32 %v1775_v9, %v1726_v43  ;;  %v10729_v22 = vld [vmem:[#allocation66_spill] sm:$0xff]  ;;  %v10730_v8 = vld [vmem:[#allocation65_spill] sm:$0xff] }
 0xde8   : >> { %v1887_v37 = vadd.f32 %v1882_v63, %v1833_v24  ;;  %v2003_v9 = vsel %vm368_vm6, %v10730_v8, %v10729_v22 }
 0xde9   : >> { %v1835_v58 = vadd.f32 %v10721_v14, %v1781_v60  ;;  %v1834_v2 = vadd.f32 %v1829_v7, %v1780_v36  ;;  %v10731_v14 = vld [vmem:[#allocation68_spill] sm:$0xff]  ;;  %v10732_v7 = vld [vmem:[#allocation67_spill] sm:$0xff] }
 0xdea   : >> { %v1941_v15 = vadd.f32 %v1936_v6, %v1887_v37  ;;  %v2041_v36 = vsel %vm368_vm6, %v10732_v7, %v10731_v14  ;;  %v10734_v37 = vld [vmem:[#allocation69_spill] sm:$0xff] }
 0xdeb   : >> { %v1889_v19 = vadd.f32 %v10724_v5, %v1835_v58  ;;  %v1888_v10 = vadd.f32 %v1883_v62, %v1834_v2  ;;  %v10733_v62 = vld [vmem:[#allocation70_spill] sm:$0xff] }
 0xdec   : >> { %v1969_v4 = vadd.f32 %v10727_v38, %v1941_v15  ;;  %v2079_v2 = vsel %vm368_vm6, %v10734_v37, %v10733_v62  ;;  %v8699_v38 = vld [vmem:[%s10348_s1 + $0xd2] ss:$8 sm:$0x3] }
 0xded   : >> { %v1943_v44 = vadd.f32 %v10725_v1, %v1889_v19  ;;  %v1942_v49 = vadd.f32 %v1937_v11, %v1888_v10 }
 0xdee   : >> { %v2007_v42 = vadd.f32 %v10730_v8, %v1969_v4  ;;  %v10740_v4 = vld [vmem:[#allocation77_spill] sm:$0xff]  ;;  %v5098_v8 = vrot.slane %v8699_v38, %v6606_v18 }
 0xdef   : >> { %v1970_v30 = vadd.f32 %v1965_v53, %v1942_v49  ;;  %v10737_v53 = vld [vmem:[#allocation75_spill] sm:$0xff]  ;;  %v10739_v49 = vld [vmem:[#allocation74_spill] sm:$0xff] }
 0xdf1   : >> { %v2008_v6 = vadd.f32 %v2003_v9, %v1970_v30 }
 0xdf3   : >> { %v2046_v19 = vadd.f32 %v2041_v36, %v2008_v6 }
 0xe05   : >> { %v8624_v35 = vpop.permute.xlu0 %4062 }
 0xe09   : >> { %v4090_v16 = vpop.permute.xlu0 %4089 }
 0xe0a   : >> { %v4091_v56 = vsel %vm582_vm5, %v8270_v59, %v4090_v16  ;;  %v4097_v13 = vmul.f32 %v8156_v48, %v4090_v16  ;;  %v4100_v26 = vmul.f32 %v8179_v45, %v4090_v16  ;;  %v1971_v59 = vadd.f32 %v10726_v40, %v1943_v44  ;;  %v10736_v16 = vld [vmem:[#allocation71_spill] sm:$0xff] }
 0xe0b   : >> { %v4096_v34 = vmul.f32 %v10728_v52, %v4091_v56  ;;  %v4099_v51 = vmul.f32 %v8182_v41, %v4091_v56  ;;  %v2117_v10 = vsel %vm368_vm6, %v10736_v16, %v10735_v61  ;;  %v4376_v56 = vrot.slane %v8314_v20, %v6606_v18 }
 0xe0c   : >> { %v4113_v12 = vrot.slane %v4097_v13, 3  ;;  %v4114_v55 = vrot.slane %v4100_v26, 3  ;;  %v2009_v24 = vadd.f32 %v10729_v22, %v1971_v59  ;;  %v4197_v13 = vmul.f32 %v10728_v52, %v4190_v27  ;;  %v10741_v59 = vld [vmem:[#allocation76_spill] sm:$0xff]  ;;  %v10747_v27 = vld [vmem:[#allocation82_spill] sm:$0xff] }
 0xe0d   : >> { %v4110_v57 = vrot.slane %v4096_v34, 3  ;;  %v4111_v47 = vrot.slane %v4099_v51, 3  ;;  %v8651_v21 = vpop.permute.xlu0 %4143  ;;  %v2084_v26 = vadd.f32 %v2079_v2, %v2046_v19  ;;  %v10738_v34 = vld [vmem:[#allocation73_spill] sm:$0xff]  ;;  %v2158_v20 = vsel %vm1020_vm4, %v10737_v53, %v10739_v49 }
 0xe0e   : >> { %v4145_v0 = vsel %vm582_vm5, %v8649_v39, %v8651_v21  ;;  %v4115_v43 = vsel %vm504_vm2, %v4113_v12, %v4114_v55  ;;  %v2047_v15 = vadd.f32 %v10731_v14, %v2009_v24  ;;  %v2157_v51 = vsel %vm1020_vm4, %v10738_v34, %v10737_v53  ;;  %v10745_v24 = vld [vmem:[#allocation80_spill] sm:$0xff] }
 0xe0f   : >> { %v4150_v33 = vmul.f32 %v10728_v52, %v4145_v0  ;;  %v4153_v63 = vmul.f32 %v8182_v41, %v4145_v0  ;;  %4120 = vrot.lane.b32.xlu1 %v4115_v43, %s6481_s21  ;;  %v4112_v60 = vsel %vm504_vm2, %v4110_v57, %v4111_v47  ;;  %v2045_v41 = vadd.f32 %v10732_v7, %v2007_v42  ;;  %v10742_v47 = vld [vmem:[#allocation78_spill] sm:$0xff]  ;;  %v8725_v42 = vld [vmem:[%s10348_s1 + $0xc5] ss:$8 sm:$0x3] }
 0xe10   : >> { %4118 = vrot.lane.b32.xlu0 %v4112_v60, %s6481_s21  ;;  %v2085_v44 = vadd.f32 %v10733_v62, %v2047_v15  ;;  %v2122_v12 = vadd.f32 %v2117_v10, %v2084_v26  ;;  %v2211_v57 = vsel %vm1020_vm4, %v10741_v59, %v10740_v4  ;;  %v2212_v30 = vsel %vm1020_vm4, %v10740_v4, %v10742_v47  ;;  %v10749_v15 = vld [vmem:[#allocation172_spill] sm:$0xff]  ;;  %v10750_v10 = vld [vmem:[#allocation86_spill] sm:$0xff] }
 0xe11   : >> { %v4164_v58 = vrot.slane %v4150_v33, 4  ;;  %v4165_v5 = vrot.slane %v4153_v63, 4  ;;  %v2083_v1 = vadd.f32 %v10734_v37, %v2045_v41  ;;  %v4469_v22 = vrot.slane %v8340_v25, %v6606_v18  ;;  %v10743_v33 = vld [vmem:[#allocation81_spill] sm:$0xff]  ;;  %v10744_v63 = vld [vmem:[#allocation79_spill] sm:$0xff]  ;;  %v10748_v41 = vld [vmem:[#allocation84_spill] sm:$0xff] }
 0xe12   : >> { %v2123_v52 = vadd.f32 %v10735_v61, %v2085_v44  ;;  %v2163_v9 = vadd.f32 %v2157_v51, %v2122_v12  ;;  %v2265_v60 = vsel %vm1020_vm4, %v10744_v63, %v10743_v33  ;;  %v2266_v25 = vsel %vm1020_vm4, %v10743_v33, %v10745_v24  ;;  %v10752_v26 = vld [vmem:[#allocation88_spill] sm:$0xff]  ;;  %v8781_v4 = vld [vmem:[%s6674_s9 + $0x58] sm:$0xff] }
 0xe13   : >> { %v4166_v11 = vsel %vm551_vm3, %v4164_v58, %v4165_v5  ;;  %v2121_v40 = vadd.f32 %v10736_v16, %v2083_v1  ;;  %v4523_v5 = vrot.slane %v8361_v29, %v6606_v18  ;;  %v5059_v62 = vrot.slane %v8725_v42, %v6606_v18 }
 0xe14   : >> { %4418 = vrot.lane.b32.xlu0 %v4415_v3, %s6482_s25  ;;  %4172 = vrot.lane.b32.xlu1 %v4166_v11, %s6481_s21  ;;  %v2164_v0 = vadd.f32 %v2158_v20, %v2123_v52  ;;  %v2217_v14 = vadd.f32 %v2211_v57, %v2163_v9  ;;  %v10746_v3 = vld [vmem:[#allocation83_spill] sm:$0xff]  ;;  %v4149_v19 = vmul.f32 %v8145_v46, %v8649_v39  ;;  %v8753_v11 = vld [vmem:[%s10348_s1 + $0xd7] ss:$8 sm:$0x3] }
 0xe15   : >> { %v2162_v55 = vadd.f32 %v10738_v34, %v2121_v40  ;;  %v2319_v6 = vsel %vm1020_vm4, %v10747_v27, %v10746_v3  ;;  %v2320_v58 = vsel %vm1020_vm4, %v10746_v3, %v10748_v41  ;;  %v4152_v1 = vmul.f32 %v10749_v15, %v8649_v39  ;;  %v10753_v46 = vld [vmem:[#allocation89_spill] sm:$0xff]  ;;  %v10754_v39 = vld [vmem:[#allocation90_spill] sm:$0xff]  ;;  %v10755_v40 = vld [vmem:[#allocation91_spill] sm:$0xff] }
 0xe16   : >> { %v2218_v7 = vadd.f32 %v2212_v30, %v2164_v0  ;;  %v2271_v37 = vadd.f32 %v2265_v60, %v2217_v14  ;;  %v2396_v44 = vsel %vm368_vm6, %v10753_v46, %v10752_v26  ;;  %v2421_v53 = vsel %vm368_vm6, %v10755_v40, %v10754_v39  ;;  %v10757_v41 = vld [vmem:[#allocation92_spill] sm:$0xff] }
 0xe17   : >> { %v2216_v43 = vadd.f32 %v10741_v59, %v2162_v55  ;;  %v4577_v34 = vrot.slane %v8373_v31, %v6606_v18  ;;  %v5152_v51 = vrot.slane %v8753_v11, %v6606_v18  ;;  %v4161_v49 = vrot.slane %v4149_v19, 4  ;;  %v8778_v55 = vld [vmem:[%s10348_s1 + $0xe4] ss:$8 sm:$0x3]  ;;  %v8786_v59 = vld [vmem:[%s6674_s9 + $0x78] sm:$0xf] }
 0xe18   : >> { %4379 = vrot.lane.b32.xlu0 %v4376_v56, %s6482_s25  ;;  %4201 = vrot.lane.b32.xlu1 %v4197_v13, %s6480_s7  ;;  %v2272_v2 = vadd.f32 %v2266_v25, %v2218_v7  ;;  %v2325_v29 = vadd.f32 %v2319_v6, %v2271_v37  ;;  %v10751_v56 = vld [vmem:[#allocation87_spill] sm:$0xff]  ;;  %v4162_v20 = vrot.slane %v4152_v1, 4  ;;  %v4151_v12 = vmul.f32 %v8156_v48, %v8651_v21  ;;  %v8812_v25 = vld [vmem:[%s10348_s1 + $0xf1] ss:$8 sm:$0x3] }
 0xe19   : >> { %v2270_v36 = vadd.f32 %v10744_v63, %v2216_v43  ;;  %v2374_v13 = vsel %vm1020_vm4, %v10751_v56, %v10750_v10  ;;  %v4154_v52 = vmul.f32 %v8179_v45, %v8651_v21  ;;  %v2427_v31 = vmul.f32 %v8781_v4, %v10754_v39  ;;  %v10756_v21 = vld [vmem:[#allocation85_spill] sm:$0xff] }
 0xe1a   : >> { %v2326_v16 = vadd.f32 %v2320_v58, %v2272_v2  ;;  %v2430_v57 = vmul.f32 %v8786_v59, %v10754_v39  ;;  %v2425_v48 = vmul.f32 %v8548_v28, %v10755_v40  ;;  %v2428_v45 = vmul.f32 %v8553_v50, %v10755_v40  ;;  %v8827_v1 = vld [vmem:[%s10348_s1 + $0xd4] ss:$8 sm:$0x3] }
 0xe1b   : >> { %v2324_v61 = vadd.f32 %v10747_v27, %v2270_v36  ;;  %v2373_v47 = vsel %vm1020_vm4, %v10756_v21, %v10751_v56  ;;  %v2402_v9 = vmul.f32 %v8781_v4, %v10752_v26  ;;  %v2400_v0 = vmul.f32 %v8548_v28, %v10753_v46 }
 0xe1c   : >> { %4472 = vrot.lane.b32.xlu0 %v4469_v22, %s6482_s25  ;;  %5101 = vrot.lane.b32.xlu1 %v5098_v8, %s6481_s21  ;;  %v2380_v30 = vadd.f32 %v2374_v13, %v2326_v16  ;;  %v2426_v22 = vmul.f32 %v8527_v54, %v2421_v53  ;;  %v2429_v8 = vmul.f32 %v8532_v32, %v2421_v53  ;;  %v4167_v63 = vrot.slane %v4151_v12, 4  ;;  %v8836_v13 = vld [vmem:[%s10348_s1 + $0xa2] ss:$8 sm:$0x3] }
 0xe1d   : >> { %v5206_v43 = vrot.slane %v8778_v55, %v6606_v18  ;;  %v2401_v33 = vmul.f32 %v8527_v54, %v2396_v44  ;;  %v4168_v60 = vrot.slane %v4154_v52, 4  ;;  %v4163_v24 = vsel %vm551_vm3, %v4161_v49, %v4162_v20  ;;  %v8856_v12 = vld [vmem:[%s10348_s1 + $0xc7] ss:$8 sm:$0x3] }
 0xe1e   : >> { %v2443_v14 = vrot.slane %v2427_v31, 1  ;;  %v2444_v7 = vrot.slane %v2430_v57, 1  ;;  %v2437_v36 = vrot.slane %v2425_v48, 1  ;;  %v2438_v3 = vrot.slane %v2428_v45, 1  ;;  %v10759_v48 = vld [vmem:[#allocation94_spill] sm:$0xff] }
 0xe1f   : >> { %v2440_v27 = vrot.slane %v2426_v22, 1  ;;  %v2441_v6 = vrot.slane %v2429_v8, 1  ;;  %v2473_v58 = vmul.f32 %v8781_v4, %v10757_v41  ;;  %v2379_v37 = vadd.f32 %v2373_v47, %v2325_v29  ;;  %v10758_v29 = vld [vmem:[#allocation93_spill] sm:$0xff] }
 0xe20   : >> { %4526 = vrot.lane.b32.xlu0 %v4523_v5, %s6482_s25  ;;  %5062 = vrot.lane.b32.xlu1 %v5059_v62, %s6481_s21  ;;  %v2476_v5 = vmul.f32 %v8786_v59, %v10757_v41  ;;  %v2378_v62 = vadd.f32 %v10756_v21, %v2324_v61  ;;  %v5260_v2 = vrot.slane %v8812_v25, %v6606_v18 }
 0xe21   : >> { %v2405_v19 = vadd.f32 %v2402_v9, %v2380_v30  ;;  %v4169_v15 = vsel %vm551_vm3, %v4167_v63, %v4168_v60  ;;  %v2404_v10 = vadd.f32 %v2401_v33, %v2379_v37  ;;  %v2445_v61 = vsel %vm410_vm0, %v2443_v14, %v2444_v7  ;;  %v10760_v30 = vld [vmem:[#allocation95_spill] sm:$0xff]  ;;  %v8891_v14 = vld [vmem:[%s6674_s9 + $0xc8] sm:$0xff]  ;;  %v10761_v37 = vld [vmem:[#allocation97_spill] sm:$0xff] }
 0xe22   : >> { %v2403_v16 = vadd.f32 %v2400_v0, %v2378_v62  ;;  %v2467_v56 = vsel %vm368_vm6, %v10758_v29, %v10757_v41  ;;  %v2439_v26 = vsel %vm410_vm0, %v2437_v36, %v2438_v3  ;;  %v2442_v46 = vsel %vm410_vm0, %v2440_v27, %v2441_v6  ;;  %v8895_v36 = vld [vmem:[%s6674_s9 + $0xe8] sm:$0xf] }
 0xe23   : >> { %v2489_v44 = vrot.slane %v2473_v58, 2  ;;  %v2490_v39 = vrot.slane %v2476_v5, 2  ;;  %v2471_v40 = vmul.f32 %v8548_v28, %v10758_v29  ;;  %v5094_v53 = vrot.slane %v8699_v38, %v6604_v17  ;;  %v8904_v58 = vld [vmem:[%s10348_s1 + $0xa7] ss:$8 sm:$0x3] }
 0xe24   : >> { %4580 = vrot.lane.b32.xlu0 %v4577_v34, %s6482_s25  ;;  %5155 = vrot.lane.b32.xlu1 %v5152_v51, %s6481_s21  ;;  %v5535_v34 = vrot.slane %v8827_v1, %v6606_v18  ;;  %v8848_v51 = vadd.f32 %v2445_v61, %v2405_v19  ;;  %v2472_v49 = vmul.f32 %v8527_v54, %v2467_v56 }
 0xe25   : >> { %v2474_v20 = vmul.f32 %v8553_v50, %v10758_v29  ;;  %v4218_v52 = vrot.slane %v8836_v13, %v6604_v17  ;;  %v2449_v31 = vadd.f32 %v2439_v26, %v2403_v16  ;;  %v2450_v38 = vadd.f32 %v2442_v46, %v2404_v10  ;;  %v10762_v16 = vld [vmem:[#allocation96_spill] sm:$0xff] }
 0xe26   : >> { %v2475_v57 = vmul.f32 %v8532_v32, %v2467_v56  ;;  %v8863_v45 = vmul.f32 %v8781_v4, %v10759_v48  ;;  %v8866_v21 = vsel %vm457_vm1, %v2489_v44, %v2490_v39  ;;  %v8870_v47 = vmul.f32 %v8786_v59, %v10759_v48 }
 0xe27   : >> { %v2513_v22 = vsel %vm368_vm6, %v10760_v30, %v10759_v48  ;;  %v2517_v8 = vmul.f32 %v8548_v28, %v10760_v30  ;;  %v2483_v9 = vrot.slane %v2471_v40, 2  ;;  %v2520_v0 = vmul.f32 %v8553_v50, %v10760_v30 }
 0xe28   : >> { %4170 = vrot.lane.b32.xlu0 %v4163_v24, %s6481_s21  ;;  %5209 = vrot.lane.b32.xlu1 %v5206_v43, %s6481_s21  ;;  %v5055_v43 = vrot.slane %v8725_v42, %v6604_v17  ;;  %v5496_v33 = vrot.slane %v8856_v12, %v6606_v18  ;;  %v2484_v63 = vrot.slane %v2474_v20, 2  ;;  %v2486_v60 = vrot.slane %v2472_v49, 2  ;;  %v8888_v24 = vld [vmem:[%s10348_s1 + $0xe1] ss:$8 sm:$0x3] }
 0xe29   : >> { %v4225_v7 = vmul.f32 %v8891_v14, %v4218_v52  ;;  %v4227_v3 = vmul.f32 %v8895_v36, %v4218_v52  ;;  %v2487_v27 = vrot.slane %v2475_v57, 2  ;;  %v2535_v42 = vrot.slane %v8863_v45, 3 }
 0xe2a   : >> { %v2518_v6 = vmul.f32 %v8527_v54, %v2513_v22  ;;  %v2521_v41 = vmul.f32 %v8532_v32, %v2513_v22  ;;  %v2536_v5 = vrot.slane %v8870_v47, 3  ;;  %v2529_v62 = vrot.slane %v2517_v8, 3 }
 0xe2b   : >> { %v2566_v19 = vmul.f32 %v8553_v50, %v10761_v37  ;;  %v2559_v10 = vsel %vm368_vm6, %v10761_v37, %v10762_v16  ;;  %v5148_v61 = vrot.slane %v8753_v11, %v6604_v17  ;;  %v5585_v29 = vrot.slane %v8888_v24, %v6604_v17 }
 0xe2c   : >> { %4174 = vrot.lane.b32.xlu0 %v4169_v15, %s6481_s21  ;;  %5263 = vrot.lane.b32.xlu1 %v5260_v2, %s6481_s21  ;;  %v2563_v2 = vmul.f32 %v8548_v28, %v10761_v37  ;;  %v2530_v15 = vrot.slane %v2520_v0, 3  ;;  %v2485_v28 = vsel %vm457_vm1, %v2483_v9, %v2484_v63  ;;  %v4233_v56 = vrot.slane %v4225_v7, 1  ;;  %v10764_v63 = vld [vmem:[#allocation99_spill] sm:$0xff]  ;;  %v8968_v37 = vld [vmem:[%s6674_s9 + $0x90] sm:$0xff] }
 0xe2d   : >> { %v4234_v26 = vrot.slane %v4227_v3, 1  ;;  %v4256_v50 = vrot.slane %v8904_v58, %v6604_v17  ;;  %v2532_v46 = vrot.slane %v2518_v6, 3  ;;  %v2533_v44 = vrot.slane %v2521_v41, 3 }
 0xe2e   : >> { %v2565_v39 = vmul.f32 %v8781_v4, %v10762_v16  ;;  %v2568_v40 = vmul.f32 %v8786_v59, %v10762_v16  ;;  %v2488_v11 = vsel %vm457_vm1, %v2486_v60, %v2487_v27  ;;  %v2576_v49 = vrot.slane %v2566_v19, 4  ;;  %v8962_v27 = vpop.permute.xlu1 %4064  ;;  %v8978_v19 = vld [vmem:[%s6674_s9 + $0x80] sm:$0xff]  ;;  %v8983_v16 = vld [vmem:[%s6674_s9 + $0x88] sm:$0xff] }
 0xe2f   : >> { %v2531_v20 = vsel %vm504_vm2, %v2529_v62, %v2530_v15  ;;  %v2567_v52 = vmul.f32 %v8532_v32, %v2559_v10  ;;  %v5202_v4 = vrot.slane %v8778_v55, %v6604_v17  ;;  %v2495_v57 = vadd.f32 %v2485_v28, %v2449_v31  ;;  %v8947_v55 = vld [vmem:[%s10348_s1 + $0xb4] ss:$8 sm:$0x3] }
 0xe30   : >> { %5099 = vrot.lane.b32.xlu0 %v5094_v53, %s6481_s21  ;;  %5538 = vrot.lane.b32.xlu1 %v5535_v34, %s6482_s25  ;;  %v2564_v53 = vmul.f32 %v8527_v54, %v2559_v10  ;;  %v2575_v34 = vrot.slane %v2563_v2, 4  ;;  %v4235_v59 = vsel %vm410_vm0, %v4233_v56, %v4234_v26  ;;  %v8939_v54 = vld [vmem:[%s10348_s1 + $0xe6] ss:$8 sm:$0x3]  ;;  %v4263_v48 = vmul.f32 %v8891_v14, %v4256_v50  ;;  %v10766_v28 = vld [vmem:[#allocation101_spill] sm:$0xff] }
 0xe31   : >> { %v4265_v45 = vmul.f32 %v8895_v36, %v4256_v50  ;;  %v2496_v32 = vadd.f32 %v2488_v11, %v2450_v38  ;;  %v2534_v47 = vsel %vm504_vm2, %v2532_v46, %v2533_v44  ;;  %v2581_v30 = vrot.slane %v2565_v39, 4  ;;  %v8975_v2 = vld [vmem:[%s10348_s1 + $0xc1] ss:$8 sm:$0x3] }
 0xe32   : >> { %v2582_v22 = vrot.slane %v2568_v40, 4  ;;  %v2541_v31 = vadd.f32 %v2531_v20, %v2495_v57  ;;  %v2577_v8 = vsel %vm551_vm3, %v2575_v34, %v2576_v49  ;;  %v2578_v9 = vrot.slane %v2564_v53, 4  ;;  %v8998_v46 = vld [vmem:[%s10348_s1 + $0xf3] ss:$8 sm:$0x3]  ;;  %v9000_v44 = vpop.permute.xlu1 %4116 }
 0xe33   : >> { %v2537_v0 = vsel %vm504_vm2, %v2535_v42, %v2536_v5  ;;  %v5256_v60 = vrot.slane %v8812_v25, %v6604_v17  ;;  %v5639_v7 = vrot.slane %v8939_v54, %v6604_v17  ;;  %v2497_v3 = vadd.f32 %v8866_v21, %v8848_v51  ;;  %v9009_v34 = vld [vmem:[%s6674_s9 + $0xb0] sm:$0xf] }
 0xe34   : >> { %5060 = vrot.lane.b32.xlu0 %v5055_v43, %s6481_s21  ;;  %5499 = vrot.lane.b32.xlu1 %v5496_v33, %s6482_s25  ;;  %v2579_v43 = vrot.slane %v2567_v52, 4  ;;  %v10763_v33 = vld [vmem:[#allocation98_spill] sm:$0xff]  ;;  %v4271_v42 = vrot.slane %v4263_v48, 2  ;;  %v4272_v6 = vrot.slane %v4265_v45, 2  ;;  %v4294_v41 = vrot.slane %v8947_v55, %v6604_v17 }
 0xe35   : >> { %v2615_v38 = vsel %vm368_vm6, %v10764_v63, %v10763_v33  ;;  %v2542_v5 = vadd.f32 %v2534_v47, %v2496_v32  ;;  %v2583_v62 = vsel %vm551_vm3, %v2581_v30, %v2582_v22  ;;  %v2621_v25 = vmul.f32 %v8968_v37, %v10763_v33 }
 0xe36   : >> { %v2587_v51 = vadd.f32 %v2577_v8, %v2541_v31  ;;  %v2543_v21 = vadd.f32 %v2537_v0, %v2497_v3  ;;  %v2619_v15 = vmul.f32 %v8978_v19, %v10764_v63  ;;  %v2620_v10 = vmul.f32 %v8983_v16, %v2615_v38  ;;  %v10767_v3 = vld [vmem:[#allocation102_spill] sm:$0xff] }
 0xe37   : >> { %v5531_v26 = vrot.slane %v8827_v1, %v6604_v17  ;;  %v4273_v50 = vsel %vm457_vm1, %v4271_v42, %v4272_v6  ;;  %v4301_v39 = vmul.f32 %v8891_v14, %v4294_v41  ;;  %v4303_v40 = vmul.f32 %v8895_v36, %v4294_v41  ;;  %v10768_v42 = vld [vmem:[#allocation103_spill] sm:$0xff]  ;;  %v9047_v41 = vld [vmem:[%s6674_s9 + $0xd0] sm:$0xff] }
 0xe38   : >> { %5153 = vrot.lane.b32.xlu0 %v5148_v61, %s6481_s21  ;;  %5590 = vrot.lane.b32.xlu1 %v5585_v29, %s6482_s25  ;;  %v2580_v61 = vsel %vm551_vm3, %v2578_v9, %v2579_v43  ;;  %v10765_v29 = vld [vmem:[#allocation100_spill] sm:$0xff]  ;;  %v4332_v11 = vrot.slane %v8975_v2, %v6604_v17  ;;  %v2589_v53 = vadd.f32 %v2583_v62, %v2543_v21 }
 0xe39   : >> { %v2640_v56 = vsel %vm368_vm6, %v10766_v28, %v10765_v29  ;;  %v2646_v1 = vmul.f32 %v8968_v37, %v10765_v29  ;;  %v2649_v49 = vmul.f32 %v9009_v34, %v10765_v29  ;;  %v2644_v20 = vmul.f32 %v8978_v19, %v10766_v28 }
 0xe3a   : >> { %v2645_v52 = vmul.f32 %v8983_v16, %v2640_v56  ;;  %v5492_v45 = vrot.slane %v8856_v12, %v6604_v17  ;;  %v5693_v32 = vrot.slane %v8998_v46, %v6604_v17  ;;  %v4194_v47 = vrot.slane %v8656_v23, %v6606_v18 }
 0xe3b   : >> { %v4222_v30 = vrot.slane %v8836_v13, %v6606_v18  ;;  %v4309_v22 = vrot.slane %v4301_v39, 3  ;;  %v4310_v31 = vrot.slane %v4303_v40, 3  ;;  %v4339_v8 = vmul.f32 %v8891_v14, %v4332_v11 }
 0xe3c   : >> { %5207 = vrot.lane.b32.xlu0 %v5202_v4, %s6481_s21  ;;  %4239 = vrot.lane.b32.xlu1 %v4235_v59, %s6480_s7  ;;  %v9017_v4 = vld [vmem:[%s6674_s9 + $0xa0] sm:$0xf]  ;;  %v9022_v59 = vld [vmem:[%s6674_s9 + $0xa8] sm:$0xf]  ;;  %v4341_v12 = vmul.f32 %v8895_v36, %v4332_v11  ;;  %v2588_v9 = vadd.f32 %v2580_v61, %v2542_v5  ;;  %v2622_v0 = vadd.f32 %v2619_v15, %v2587_v51  ;;  %v2662_v43 = vrot.slane %v2646_v1, 1 }
 0xe3d   : >> { %v2647_v57 = vmul.f32 %v9017_v4, %v10766_v28  ;;  %v2648_v48 = vmul.f32 %v9022_v59, %v2640_v56  ;;  %v2663_v33 = vrot.slane %v2649_v49, 1  ;;  %v9037_v63 = vadd.f32 %v2621_v25, %v2589_v53  ;;  %v9053_v15 = vld [vmem:[%s6674_s9 + $0xf0] sm:$0xf] }
 0xe3e   : >> { %v2656_v38 = vrot.slane %v2644_v20, 1  ;;  %v2659_v23 = vrot.slane %v2645_v52, 1  ;;  %v2686_v6 = vsel %vm368_vm6, %v10768_v42, %v10767_v3  ;;  %v4198_v5 = vmul.f32 %v9047_v41, %v4194_v47 }
 0xe3f   : >> { %v2660_v13 = vrot.slane %v2648_v48, 1  ;;  %v4226_v62 = vmul.f32 %v9047_v41, %v4222_v30  ;;  %v4311_v25 = vsel %vm504_vm2, %v4309_v22, %v4310_v31  ;;  %v4347_v51 = vrot.slane %v4339_v8, 4  ;;  %v10769_v31 = vld [vmem:[#allocation104_spill] sm:$0xff]  ;;  %v10770_v8 = vld [vmem:[#allocation105_spill] sm:$0xff] }
 0xe40   : >> { %5261 = vrot.lane.b32.xlu0 %v5256_v60, %s6481_s21  ;;  %5644 = vrot.lane.b32.xlu1 %v5639_v7, %s6482_s25  ;;  %v2657_v60 = vrot.slane %v2647_v57, 1  ;;  %v9039_v7 = vpop.permute.xlu1 %4416  ;;  %v4348_v21 = vrot.slane %v4341_v12, 4  ;;  %v4228_v61 = vmul.f32 %v9053_v15, %v4222_v30  ;;  %v2623_v29 = vadd.f32 %v2620_v10, %v2588_v9 }
 0xe41   : >> { %v9058_v28 = vmul.f32 %v8968_v37, %v10767_v3  ;;  %v2690_v56 = vmul.f32 %v8978_v19, %v10768_v42  ;;  %v9070_v40 = vmul.f32 %v9009_v34, %v10767_v3  ;;  %v2691_v10 = vmul.f32 %v8983_v16, %v2686_v6 }
 0xe42   : >> { %v2658_v39 = vsel %vm410_vm0, %v2656_v38, %v2657_v60  ;;  %v2661_v11 = vsel %vm410_vm0, %v2659_v23, %v2660_v13  ;;  %v2694_v53 = vmul.f32 %v9022_v59, %v2686_v6  ;;  %v5589_v1 = vrot.slane %v8888_v24, %v6606_v18  ;;  %v10771_v38 = vld [vmem:[#allocation106_spill] sm:$0xff]  ;;  %v10772_v60 = vld [vmem:[#allocation107_spill] sm:$0xff] }
 0xe43   : >> { %v4349_v49 = vsel %vm551_vm3, %v4347_v51, %v4348_v21  ;;  %v4236_v52 = vrot.slane %v4226_v62, 1  ;;  %v4237_v57 = vrot.slane %v4228_v61, 1  ;;  %v4260_v48 = vrot.slane %v8904_v58, %v6606_v18 }
 0xe44   : >> { %5536 = vrot.lane.b32.xlu0 %v5531_v26, %s6482_s25  ;;  %4277 = vrot.lane.b32.xlu1 %v4273_v50, %s6480_s7  ;;  %v2693_v26 = vmul.f32 %v9017_v4, %v10768_v42  ;;  %v9065_v50 = vsel %vm410_vm0, %v2662_v43, %v2663_v33  ;;  %v9080_v20 = vpop.permute.xlu1 %4377  ;;  %v2702_v47 = vrot.slane %v2690_v56, 2  ;;  %v2669_v22 = vadd.f32 %v2661_v11, %v2623_v29 }
 0xe45   : >> { %v2732_v12 = vsel %vm368_vm6, %v10770_v8, %v10769_v31  ;;  %v2736_v24 = vmul.f32 %v8978_v19, %v10770_v8  ;;  %v2739_v9 = vmul.f32 %v9017_v4, %v10770_v8  ;;  %v2705_v43 = vrot.slane %v2691_v10, 2 }
 0xe46   : >> { %v2703_v30 = vrot.slane %v2693_v26, 2  ;;  %v2706_v33 = vrot.slane %v2694_v53, 2  ;;  %v2738_v58 = vmul.f32 %v8968_v37, %v10769_v31  ;;  %v2778_v23 = vsel %vm368_vm6, %v10772_v60, %v10771_v38 }
 0xe47   : >> { %v4238_v13 = vsel %vm410_vm0, %v4236_v52, %v4237_v57  ;;  %v4264_v3 = vmul.f32 %v9047_v41, %v4260_v48  ;;  %v4266_v42 = vmul.f32 %v9053_v15, %v4260_v48  ;;  %v2737_v62 = vmul.f32 %v8983_v16, %v2732_v12 }
 0xe48   : >> { %5497 = vrot.lane.b32.xlu0 %v5492_v45, %s6482_s25  ;;  %5698 = vrot.lane.b32.xlu1 %v5693_v32, %s6482_s25  ;;  %v2668_v45 = vadd.f32 %v2658_v39, %v2622_v0  ;;  %v2708_v32 = vrot.slane %v9058_v28, 2  ;;  %v4385_v0 = vmul.f32 %v8891_v14, %v9080_v20  ;;  %v2704_v6 = vsel %vm457_vm1, %v2702_v47, %v2703_v30 }
 0xe49   : >> { %v2748_v51 = vrot.slane %v2736_v24, 3  ;;  %v2749_v21 = vrot.slane %v2739_v9, 3  ;;  %v2782_v61 = vmul.f32 %v8978_v19, %v10772_v60  ;;  %v2785_v29 = vmul.f32 %v9017_v4, %v10772_v60 }
 0xe4a   : >> { %v2709_v28 = vrot.slane %v9070_v40, 2  ;;  %v2783_v56 = vmul.f32 %v8983_v16, %v2778_v23  ;;  %v2786_v26 = vmul.f32 %v9022_v59, %v2778_v23  ;;  %v5643_v39 = vrot.slane %v8939_v54, %v6606_v18 }
 0xe4b   : >> { %v2707_v10 = vsel %vm457_vm1, %v2705_v43, %v2706_v33  ;;  %v4274_v11 = vrot.slane %v4264_v3, 2  ;;  %v4275_v19 = vrot.slane %v4266_v42, 2  ;;  %v4298_v4 = vrot.slane %v8947_v55, %v6606_v18  ;;  %v10773_v3 = vld [vmem:[#allocation109_spill] sm:$0xff]  ;;  %v10774_v42 = vld [vmem:[#allocation108_spill] sm:$0xff] }
 0xe4c   : >> { %4203 = vrot.lane.b32.xlu0 %v4198_v5, %s6480_s7  ;;  %4315 = vrot.lane.b32.xlu1 %v4311_v25, %s6480_s7  ;;  %v2741_v5 = vmul.f32 %v9009_v34, %v10769_v31  ;;  %v2740_v25 = vmul.f32 %v9022_v59, %v2732_v12  ;;  %v2714_v53 = vadd.f32 %v2704_v6, %v2668_v45  ;;  %v2751_v40 = vrot.slane %v2737_v62, 3 }
 0xe4d   : >> { %v2750_v52 = vsel %vm504_vm2, %v2748_v51, %v2749_v21  ;;  %v2794_v48 = vrot.slane %v2782_v61, 4  ;;  %v2795_v54 = vrot.slane %v2785_v29, 4  ;;  %v2754_v47 = vrot.slane %v2738_v58, 3  ;;  %v10775_v61 = vld [vmem:[#allocation110_spill] sm:$0xff] }
 0xe4e   : >> { %v2752_v57 = vrot.slane %v2740_v25, 3  ;;  %v2755_v30 = vrot.slane %v2741_v5, 3  ;;  %v2797_v31 = vrot.slane %v2783_v56, 4  ;;  %v2798_v8 = vrot.slane %v2786_v26, 4  ;;  %v10777_v56 = vld [vmem:[#allocation111_spill] sm:$0xff] }
 0xe4f   : >> { %v4276_v55 = vsel %vm457_vm1, %v4274_v11, %v4275_v19  ;;  %v4302_v45 = vmul.f32 %v9047_v41, %v4298_v4  ;;  %v4304_v12 = vmul.f32 %v9053_v15, %v4298_v4  ;;  %v4336_v24 = vrot.slane %v8975_v2, %v6606_v18  ;;  %v10778_v11 = vld [vmem:[#allocation112_spill] sm:$0xff]  ;;  %v10779_v4 = vld [vmem:[#allocation115_spill] sm:$0xff] }
 0xe50   : >> { %5592 = vrot.lane.b32.xlu0 %v5589_v1, %s6482_s25  ;;  %4353 = vrot.lane.b32.xlu1 %v4349_v49, %s6480_s7  ;;  %v2784_v1 = vmul.f32 %v8968_v37, %v10771_v38  ;;  %v2787_v49 = vmul.f32 %v9009_v34, %v10771_v38  ;;  %v2715_v9 = vadd.f32 %v2707_v10, %v2669_v22 }
 0xe51   : >> { %v2760_v43 = vadd.f32 %v2750_v52, %v2714_v53  ;;  %v2753_v58 = vsel %vm504_vm2, %v2751_v40, %v2752_v57  ;;  %v2796_v38 = vsel %vm551_vm3, %v2794_v48, %v2795_v54  ;;  %v2670_v60 = vadd.f32 %v9065_v50, %v9037_v63  ;;  %v10780_v53 = vld [vmem:[#allocation114_spill] sm:$0xff] }
 0xe52   : >> { %v2800_v33 = vrot.slane %v2784_v1, 4  ;;  %v2710_v23 = vsel %vm457_vm1, %v2708_v32, %v2709_v28  ;;  %v2840_v6 = vsel %vm582_vm5, %v10774_v42, %v10773_v3  ;;  %v2756_v2 = vsel %vm504_vm2, %v2754_v47, %v2755_v30  ;;  %v10776_v28 = vld [vmem:[#allocation113_spill] sm:$0xff]  ;;  %v10781_v47 = vld [vmem:[#allocation116_spill] sm:$0xff] }
 0xe53   : >> { %v5697_v22 = vrot.slane %v8998_v46, %v6606_v18  ;;  %v4312_v5 = vrot.slane %v4302_v45, 3  ;;  %v4313_v62 = vrot.slane %v4304_v12, 3  ;;  %v4340_v25 = vmul.f32 %v9047_v41, %v4336_v24 }
 0xe54   : >> { %4241 = vrot.lane.b32.xlu0 %v4238_v13, %s6480_s7  ;;  %4391 = vrot.lane.b32.xlu1 %v4385_v0, %s6482_s25  ;;  %v2801_v0 = vrot.slane %v2787_v49, 4  ;;  %v2799_v13 = vsel %vm551_vm3, %v2797_v31, %v2798_v8  ;;  %v4342_v63 = vmul.f32 %v9053_v15, %v4336_v24  ;;  %v2761_v50 = vadd.f32 %v2753_v58, %v2715_v9  ;;  %v10782_v31 = vld [vmem:[#allocation119_spill] sm:$0xff]  ;;  %v10783_v8 = vld [vmem:[#allocation117_spill] sm:$0xff]  ;;  %v10784_v9 = vld [vmem:[#allocation118_spill] sm:$0xff] }
 0xe55   : >> { %v2806_v32 = vadd.f32 %v2796_v38, %v2760_v43  ;;  %v2716_v51 = vadd.f32 %v2710_v23, %v2670_v60  ;;  %v2841_v29 = vsel %vm582_vm5, %v10773_v3, %v10775_v61  ;;  %v2894_v26 = vsel %vm582_vm5, %v10777_v56, %v10776_v28  ;;  %v10787_v3 = vld [vmem:[#allocation122_spill] sm:$0xff]  ;;  %v10792_v56 = vld [vmem:[#allocation128_spill] sm:$0xff] }
 0xe56   : >> { %v2802_v21 = vsel %vm551_vm3, %v2800_v33, %v2801_v0  ;;  %v2807_v46 = vadd.f32 %v2799_v13, %v2761_v50  ;;  %v2895_v19 = vsel %vm582_vm5, %v10776_v28, %v10778_v11  ;;  %v2948_v40 = vsel %vm582_vm5, %v10780_v53, %v10779_v4  ;;  %v10785_v33 = vld [vmem:[#allocation121_spill] sm:$0xff]  ;;  %v10786_v0 = vld [vmem:[#allocation120_spill] sm:$0xff] }
 0xe57   : >> { %v2762_v10 = vadd.f32 %v2756_v2, %v2716_v51  ;;  %v4314_v1 = vsel %vm504_vm2, %v4312_v5, %v4313_v62  ;;  %v4350_v49 = vrot.slane %v4340_v25, 4  ;;  %v4351_v52 = vrot.slane %v4342_v63, 4  ;;  %v10788_v5 = vld [vmem:[#allocation124_spill] sm:$0xff]  ;;  %v10789_v62 = vld [vmem:[#allocation123_spill] sm:$0xff]  ;;  %v10791_v51 = vld [vmem:[#allocation125_spill] sm:$0xff] }
 0xe58   : >> { %5646 = vrot.lane.b32.xlu0 %v5643_v39, %s6482_s25  ;;  %v2845_v39 = vadd.f32 %v2840_v6, %v2806_v32  ;;  %v2846_v48 = vadd.f32 %v2841_v29, %v2807_v46  ;;  %v2949_v30 = vsel %vm582_vm5, %v10779_v4, %v10781_v47  ;;  %v3003_v43 = vsel %vm582_vm5, %v10782_v31, %v10784_v9  ;;  %v10790_v32 = vld [vmem:[#allocation126_spill] sm:$0xff]  ;;  %v10795_v4 = vld [vmem:[#allocation129_spill] sm:$0xff] }
 0xe59   : >> { %v2808_v57 = vadd.f32 %v2802_v21, %v2762_v10  ;;  %v3056_v58 = vsel %vm582_vm5, %v10786_v0, %v10785_v33  ;;  %v4352_v38 = vsel %vm551_vm3, %v4350_v49, %v4351_v52  ;;  %v3057_v42 = vsel %vm582_vm5, %v10785_v33, %v10787_v3  ;;  %v10801_v0 = vld [vmem:[#allocation137_spill] sm:$0xff] }
 0xe5a   : >> { %v2899_v54 = vadd.f32 %v2894_v26, %v2845_v39  ;;  %v2900_v12 = vadd.f32 %v2895_v19, %v2846_v48  ;;  %v3085_v25 = vsel %vm368_vm6, %v10789_v62, %v10788_v5  ;;  %v3123_v21 = vsel %vm368_vm6, %v10791_v51, %v10790_v32  ;;  %v10793_v26 = vld [vmem:[#allocation127_spill] sm:$0xff]  ;;  %v10794_v19 = vld [vmem:[#allocation130_spill] sm:$0xff] }
 0xe5b   : >> { %v2847_v45 = vadd.f32 %v10775_v61, %v2808_v57  ;;  %v3161_v46 = vsel %vm368_vm6, %v10793_v26, %v10792_v56  ;;  %v3199_v53 = vsel %vm368_vm6, %v10795_v4, %v10794_v19  ;;  %v10796_v57 = vld [vmem:[#allocation132_spill] sm:$0xff]  ;;  %v10797_v48 = vld [vmem:[#allocation131_spill] sm:$0xff] }
 0xe5c   : >> { %4279 = vrot.lane.b32.xlu0 %v4276_v55, %s6480_s7  ;;  %v3002_v55 = vsel %vm582_vm5, %v10783_v8, %v10782_v31  ;;  %v2953_v24 = vadd.f32 %v2948_v40, %v2899_v54  ;;  %v2954_v23 = vadd.f32 %v2949_v30, %v2900_v12  ;;  %v9202_v40 = vpop.permute.xlu1 %4470  ;;  %v3237_v54 = vsel %vm368_vm6, %v10797_v48, %v10796_v57  ;;  %v10798_v8 = vld [vmem:[#allocation135_spill] sm:$0xff] }
 0xe5d   : >> { %v2901_v60 = vadd.f32 %v10778_v11, %v2847_v45 }
 0xe5e   : >> { %v3007_v13 = vadd.f32 %v3002_v55, %v2953_v24  ;;  %v3008_v2 = vadd.f32 %v3003_v43, %v2954_v23  ;;  %v10799_v55 = vld [vmem:[#allocation133_spill] sm:$0xff]  ;;  %v10800_v43 = vld [vmem:[#allocation134_spill] sm:$0xff] }
 0xe5f   : >> { %v2955_v6 = vadd.f32 %v10781_v47, %v2901_v60  ;;  %v3277_v45 = vsel %vm1020_vm4, %v10799_v55, %v10798_v8  ;;  %v3278_v33 = vsel %vm1020_vm4, %v10798_v8, %v10800_v43  ;;  %v10814_v8 = vld [vmem:[#allocation148_spill] sm:$0xff]  ;;  %v9269_v43 = vpop.permute.xlu0 %4066 }
 0xe60   : >> { %5700 = vrot.lane.b32.xlu0 %v5697_v22, %s6482_s25  ;;  %v3061_v22 = vadd.f32 %v3056_v58, %v3007_v13  ;;  %v3062_v50 = vadd.f32 %v3057_v42, %v3008_v2  ;;  %v10802_v58 = vld [vmem:[#allocation136_spill] sm:$0xff]  ;;  %v9222_v60 = vpop.permute.xlu1 %4524  ;;  %v10803_v42 = vld [vmem:[#allocation138_spill] sm:$0xff]  ;;  %v10804_v2 = vld [vmem:[#allocation141_spill] sm:$0xff] }
 0xe61   : >> { %v3009_v63 = vadd.f32 %v10784_v9, %v2955_v6  ;;  %v3332_v6 = vsel %vm1020_vm4, %v10801_v0, %v10803_v42 }
 0xe62   : >> { %v3089_v29 = vadd.f32 %v10789_v62, %v3061_v22  ;;  %v3090_v28 = vadd.f32 %v3085_v25, %v3062_v50  ;;  %v10805_v22 = vld [vmem:[#allocation139_spill] sm:$0xff]  ;;  %v10806_v50 = vld [vmem:[#allocation140_spill] sm:$0xff] }
 0xe63   : >> { %v3063_v61 = vadd.f32 %v10787_v3, %v3009_v63 }
 0xe64   : >> { %4317 = vrot.lane.b32.xlu0 %v4314_v1, %s6480_s7  ;;  %v3127_v10 = vadd.f32 %v10791_v51, %v3089_v29  ;;  %v3128_v11 = vadd.f32 %v3123_v21, %v3090_v28  ;;  %v10807_v51 = vld [vmem:[#allocation143_spill] sm:$0xff]  ;;  %v10808_v21 = vld [vmem:[#allocation142_spill] sm:$0xff] }
 0xe65   : >> { %v3091_v39 = vadd.f32 %v10788_v5, %v3063_v61  ;;  %v3385_v5 = vsel %vm1020_vm4, %v10805_v22, %v10804_v2  ;;  %v3439_v61 = vsel %vm1020_vm4, %v10808_v21, %v10807_v51 }
 0xe66   : >> { %v3165_v49 = vadd.f32 %v10793_v26, %v3127_v10  ;;  %v3166_v52 = vadd.f32 %v3161_v46, %v3128_v11  ;;  %v10809_v26 = vld [vmem:[#allocation144_spill] sm:$0xff] }
 0xe67   : >> { %v3129_v1 = vadd.f32 %v10790_v32, %v3091_v39  ;;  %v3386_v32 = vsel %vm1020_vm4, %v10804_v2, %v10806_v50  ;;  %v3440_v46 = vsel %vm1020_vm4, %v10807_v51, %v10809_v26  ;;  %v9243_v39 = vpop.permute.xlu1 %4578  ;;  %v10820_v26 = vld [vmem:[#allocation157_spill] sm:$0xff] }
 0xe68   : >> { %4355 = vrot.lane.b32.xlu0 %v4352_v38, %s6480_s7  ;;  %v3203_v30 = vadd.f32 %v10795_v4, %v3165_v49  ;;  %v3204_v31 = vadd.f32 %v3199_v53, %v3166_v52  ;;  %v3331_v38 = vsel %vm1020_vm4, %v10802_v58, %v10801_v0  ;;  %v10810_v4 = vld [vmem:[#allocation147_spill] sm:$0xff]  ;;  %v10811_v53 = vld [vmem:[#allocation145_spill] sm:$0xff]  ;;  %v10812_v49 = vld [vmem:[#allocation146_spill] sm:$0xff] }
 0xe69   : >> { %v3167_v47 = vadd.f32 %v10792_v56, %v3129_v1  ;;  %v3493_v1 = vsel %vm1020_vm4, %v10811_v53, %v10810_v4  ;;  %v3494_v52 = vsel %vm1020_vm4, %v10810_v4, %v10812_v49  ;;  %v10817_v0 = vld [vmem:[#allocation153_spill] sm:$0xff] }
 0xe6a   : >> { %v3241_v24 = vadd.f32 %v10797_v48, %v3203_v30  ;;  %v3242_v9 = vadd.f32 %v3237_v54, %v3204_v31  ;;  %v10813_v48 = vld [vmem:[#allocation150_spill] sm:$0xff] }
 0xe6b   : >> { %v3205_v12 = vadd.f32 %v10794_v19, %v3167_v47  ;;  %v9258_v47 = vld [vmem:[%s6674_s9 + $0xb8] sm:$0xf] }
 0xe6c   : >> { %v3282_v13 = vadd.f32 %v10799_v55, %v3241_v24  ;;  %v3283_v3 = vadd.f32 %v3277_v45, %v3242_v9  ;;  %v3550_v30 = vmul.f32 %v9258_v47, %v10813_v48  ;;  %v10815_v55 = vld [vmem:[#allocation149_spill] sm:$0xff] }
 0xe6d   : >> { %v3243_v23 = vadd.f32 %v10796_v57, %v3205_v12  ;;  %v9253_v57 = vld [vmem:[%s6674_s9 + $0x98] sm:$0xff]  ;;  %v3516_v45 = vsel %vm368_vm6, %v10815_v55, %v10814_v8  ;;  %v10816_v12 = vld [vmem:[#allocation151_spill] sm:$0xff] }
 0xe6e   : >> { %v3336_v25 = vadd.f32 %v10802_v58, %v3282_v13  ;;  %v3337_v63 = vadd.f32 %v3331_v38, %v3283_v3  ;;  %v3547_v54 = vmul.f32 %v9253_v57, %v10813_v48  ;;  %v3545_v24 = vmul.f32 %v8983_v16, %v10816_v12 }
 0xe6f   : >> { %v3284_v62 = vadd.f32 %v3278_v33, %v3243_v23  ;;  %v3548_v9 = vmul.f32 %v9022_v59, %v10816_v12  ;;  %v3541_v33 = vsel %vm368_vm6, %v10816_v12, %v10813_v48  ;;  %v3591_v58 = vmul.f32 %v8983_v16, %v10817_v0 }
 0xe70   : >> { %v3390_v28 = vadd.f32 %v10805_v22, %v3336_v25  ;;  %v3391_v56 = vadd.f32 %v3385_v5, %v3337_v63  ;;  %v3594_v38 = vmul.f32 %v9022_v59, %v10817_v0  ;;  %v3522_v42 = vmul.f32 %v9253_v57, %v10814_v8 }
 0xe71   : >> { %v3338_v29 = vadd.f32 %v3332_v6, %v3284_v62  ;;  %v3520_v6 = vmul.f32 %v8983_v16, %v10815_v55  ;;  %v3521_v2 = vmul.f32 %v8968_v37, %v3516_v45  ;;  %v3563_v22 = vrot.slane %v3547_v54, 1 }
 0xe72   : >> { %v3444_v11 = vadd.f32 %v10808_v21, %v3390_v28  ;;  %v3445_v19 = vadd.f32 %v3439_v61, %v3391_v56  ;;  %v3564_v5 = vrot.slane %v3550_v30, 1  ;;  %v9287_v25 = vmul.f32 %v8968_v37, %v3541_v33 }
 0xe73   : >> { %v3392_v10 = vadd.f32 %v3386_v32, %v3338_v29  ;;  %v9290_v63 = vmul.f32 %v9009_v34, %v3541_v33  ;;  %v3557_v50 = vrot.slane %v3545_v24, 1  ;;  %v3558_v32 = vrot.slane %v3548_v9, 1  ;;  %v10819_v29 = vld [vmem:[#allocation155_spill] sm:$0xff]  ;;  %v10821_v9 = vld [vmem:[#allocation152_spill] sm:$0xff] }
 0xe74   : >> { %v3498_v23 = vadd.f32 %v10811_v53, %v3444_v11  ;;  %v3499_v13 = vadd.f32 %v3493_v1, %v3445_v19  ;;  %v3603_v21 = vrot.slane %v3591_v58, 2  ;;  %v3604_v61 = vrot.slane %v3594_v38, 2 }
 0xe75   : >> { %v3446_v31 = vadd.f32 %v3440_v46, %v3392_v10  ;;  %v3637_v28 = vmul.f32 %v8983_v16, %v10819_v29  ;;  %v3640_v56 = vmul.f32 %v9022_v59, %v10819_v29  ;;  %v3683_v46 = vmul.f32 %v8983_v16, %v10820_v26 }
 0xe76   : >> { %v3686_v10 = vmul.f32 %v9022_v59, %v10820_v26  ;;  %v3523_v19 = vadd.f32 %v3520_v6, %v3498_v23  ;;  %v9302_v4 = vadd.f32 %v3521_v2, %v3499_v13  ;;  %v3565_v53 = vsel %vm410_vm0, %v3563_v22, %v3564_v5  ;;  %v9334_v6 = vld [vmem:[%s6674_s9 + $0xd8] sm:$0xff] }
 0xe77   : >> { %v3500_v3 = vadd.f32 %v3494_v52, %v3446_v31  ;;  %v3559_v1 = vsel %vm410_vm0, %v3557_v50, %v3558_v32  ;;  %v3605_v16 = vsel %vm457_vm1, %v3603_v21, %v3604_v61  ;;  %v3649_v30 = vrot.slane %v3637_v28, 3  ;;  %v9337_v2 = vld [vmem:[%s6674_s9 + $0xf8] sm:$0xf] }
 0xe78   : >> { %v3650_v59 = vrot.slane %v3640_v56, 3  ;;  %v3695_v8 = vrot.slane %v3683_v46, 4  ;;  %v3696_v55 = vrot.slane %v3686_v10, 4  ;;  %v3569_v24 = vadd.f32 %v3559_v1, %v3523_v19 }
 0xe79   : >> { %v3525_v11 = vadd.f32 %v3522_v42, %v3500_v3  ;;  %v9317_v33 = vmul.f32 %v9253_v57, %v10821_v9  ;;  %v4424_v58 = vmul.f32 %v8891_v14, %v9039_v7  ;;  %v4427_v38 = vmul.f32 %v8895_v36, %v9039_v7 }
 0xe7a   : >> { %v9327_v13 = vmul.f32 %v9258_v47, %v10821_v9  ;;  %v4478_v3 = vmul.f32 %v8891_v14, %v9202_v40  ;;  %v4481_v42 = vmul.f32 %v8895_v36, %v9202_v40  ;;  %v3615_v50 = vadd.f32 %v3605_v16, %v3569_v24  ;;  %v6421_v16 = vld [vmem:[%s6674_s9 + $0xc0] sm:$0xff] }
 0xe7b   : >> { %v9323_v23 = vadd.f32 %v3565_v53, %v3525_v11  ;;  %v3697_v61 = vsel %vm551_vm3, %v3695_v8, %v3696_v55  ;;  %v4436_v10 = vrot.slane %v4424_v58, 1  ;;  %v4437_v11 = vrot.slane %v4427_v38, 1  ;;  %v10824_v38 = vld [vmem:[#allocation163_spill] sm:$0xff] }
 0xe81   : >> { %v9284_v62 = vpop.permute.xlu1 %4120 }
 0xe82   : >> { %10818 = vst [vmem:[#allocation7_spill] sm:$0xff] %v9284_v62  ;;  %v9292_v51 = vpop.permute.xlu0 %4118 }
 0xe86   : >> { %v4419_v48 = vpop.permute.xlu0 %4418  ;;  %v9308_v54 = vpop.permute.xlu1 %4172 }
 0xe87   : >> { %v4420_v31 = vsel %vm1020_vm4, %v9039_v7, %v4419_v48  ;;  %v3651_v7 = vsel %vm504_vm2, %v3649_v30, %v3650_v59  ;;  %v4426_v19 = vmul.f32 %v9334_v6, %v4419_v48  ;;  %v4429_v53 = vmul.f32 %v9337_v2, %v4419_v48 }
 0xe88   : >> { %v4425_v45 = vmul.f32 %v9047_v41, %v4420_v31  ;;  %v4428_v12 = vmul.f32 %v9053_v15, %v4420_v31  ;;  %v3661_v1 = vadd.f32 %v3651_v7, %v3615_v50  ;;  %v4490_v59 = vrot.slane %v4478_v3, 2 }
 0xe89   : >> { %v4491_v31 = vrot.slane %v4481_v42, 2 }
 0xe8a   : >> { %v4380_v22 = vpop.permute.xlu0 %4379  ;;  %v9339_v5 = vpop.permute.xlu1 %4201  ;;  %v4439_v28 = vrot.slane %v4425_v45, 1  ;;  %v4440_v56 = vrot.slane %v4428_v12, 1  ;;  %v6422_v45 = vld [vmem:[%s6674_s9 + $0xe0] sm:$0xf] }
 0xe8b   : >> { %v4381_v32 = vsel %vm1020_vm4, %v9080_v20, %v4380_v22  ;;  %v4387_v21 = vmul.f32 %v9334_v6, %v4380_v22  ;;  %v10822_v20 = vld [vmem:[#allocation161_spill] sm:$0xff]  ;;  %v3810_v22 = vmul.f32 %v6421_v16, %v10824_v38  ;;  %v3813_v50 = vmul.f32 %v6422_v45, %v10824_v38 }
 0xe8c   : >> { %v4386_v46 = vmul.f32 %v9047_v41, %v4381_v32  ;;  %v9352_v30 = vmul.f32 %v6421_v16, %v10822_v20  ;;  %v9359_v12 = vmul.f32 %v6422_v45, %v10822_v20  ;;  %v4441_v7 = vsel %vm410_vm0, %v4439_v28, %v4440_v56 }
 0xe8d   : >> { %4395 = vrot.lane.b32.xlu1 %v4387_v21, %s6482_s25  ;;  %v4442_v32 = vrot.slane %v4426_v19, 1  ;;  %v4443_v21 = vrot.slane %v4429_v53, 1  ;;  %v4492_v28 = vsel %vm457_vm1, %v4490_v59, %v4491_v31  ;;  %v4535_v56 = vmul.f32 %v8895_v36, %v9222_v60 }
 0xe8e   : >> { %v4473_v8 = vpop.permute.xlu0 %4472  ;;  %4393 = vrot.lane.b32.xlu0 %v4386_v46, %s6482_s25  ;;  %v9355_v55 = vpop.permute.xlu1 %5101  ;;  %v4532_v46 = vmul.f32 %v8891_v14, %v9222_v60  ;;  %v3776_v59 = vrot.slane %v9352_v30, 1  ;;  %v3777_v31 = vrot.slane %v9359_v12, 1  ;;  %v10828_v12 = vrot.slane %v9290_v63, 1 }
 0xe8f   : >> { %10823 = vst [vmem:[#allocation8_spill] sm:$0xff] %v9355_v55  ;;  %v4474_v48 = vsel %vm1020_vm4, %v9202_v40, %v4473_v8  ;;  %v4480_v24 = vmul.f32 %v9334_v6, %v4473_v8  ;;  %v4483_v58 = vmul.f32 %v9337_v2, %v4473_v8  ;;  %v4438_v40 = vsel %vm410_vm0, %v4436_v10, %v4437_v11 }
 0xe90   : >> { %v4479_v3 = vmul.f32 %v9047_v41, %v4474_v48  ;;  %v4482_v42 = vmul.f32 %v9053_v15, %v4474_v48  ;;  %v3587_v11 = vsel %vm368_vm6, %v10817_v0, %v10821_v9  ;;  %v10826_v48 = vld [vmem:[#allocation159_spill] sm:$0xff]  ;;  %v4586_v63 = vmul.f32 %v8891_v14, %v9243_v39 }
 0xe91   : >> { %4447 = vrot.lane.b32.xlu1 %v4441_v7, %s6482_s25  ;;  %v4496_v8 = vrot.slane %v4480_v24, 2  ;;  %v4497_v49 = vrot.slane %v4483_v58, 2  ;;  %v3739_v24 = vmul.f32 %v6421_v16, %v10826_v48 }
 0xe92   : >> { %v4527_v52 = vpop.permute.xlu0 %4526  ;;  %4445 = vrot.lane.b32.xlu0 %v4438_v40, %s6482_s25  ;;  %v9375_v55 = vpop.permute.xlu1 %5062  ;;  %v4493_v19 = vrot.slane %v4479_v3, 2  ;;  %v4494_v53 = vrot.slane %v4482_v42, 2  ;;  %v3707_v40 = vadd.f32 %v3697_v61, %v3661_v1  ;;  %v4444_v3 = vsel %vm410_vm0, %v4442_v32, %v4443_v21  ;;  %v10830_v32 = vld [vmem:[#allocation165_spill] sm:$0xff] }
 0xe93   : >> { %10825 = vst [vmem:[#allocation9_spill] sm:$0xff] %v9375_v55  ;;  %v4528_v10 = vsel %vm1020_vm4, %v9222_v60, %v4527_v52  ;;  %v3822_v60 = vrot.slane %v3810_v22, 2  ;;  %v4498_v9 = vsel %vm457_vm1, %v4496_v8, %v4497_v49  ;;  %v4544_v61 = vrot.slane %v4532_v46, 3 }
 0xe94   : >> { %v4533_v58 = vmul.f32 %v9047_v41, %v4528_v10  ;;  %v4536_v7 = vmul.f32 %v9053_v15, %v4528_v10  ;;  %v3823_v10 = vrot.slane %v3813_v50, 2  ;;  %v4545_v1 = vrot.slane %v4535_v56, 3 }
 0xe95   : >> { %4499 = vrot.lane.b32.xlu1 %v4492_v28, %s6482_s25  ;;  %v4495_v30 = vsel %vm457_vm1, %v4493_v19, %v4494_v53  ;;  %v10829_v28 = vrot.slane %v9287_v25, 1  ;;  %v3856_v21 = vmul.f32 %v6421_v16, %v10830_v32  ;;  %v4534_v46 = vmul.f32 %v9334_v6, %v4527_v52 }
 0xe96   : >> { %v4547_v42 = vrot.slane %v4533_v58, 3  ;;  %v4548_v55 = vrot.slane %v4536_v7, 3  ;;  %v4581_v62 = vpop.permute.xlu0 %4580  ;;  %4449 = vrot.lane.b32.xlu0 %v4444_v3, %s6482_s25  ;;  %v9393_v0 = vpop.permute.xlu1 %5155  ;;  %v3859_v58 = vmul.f32 %v6422_v45, %v10830_v32  ;;  %v10831_v7 = vld [vmem:[#allocation167_spill] sm:$0xff]  ;;  %v4537_v8 = vmul.f32 %v9337_v2, %v4527_v52 }
 0xe97   : >> { %10827 = vst [vmem:[#allocation10_spill] sm:$0xff] %v9393_v0  ;;  %v9402_v22 = vsel %vm410_vm0, %v10829_v28, %v10828_v12  ;;  %v3902_v3 = vmul.f32 %v6421_v16, %v10831_v7  ;;  %v3905_v50 = vmul.f32 %v6422_v45, %v10831_v7  ;;  %v9413_v25 = vmul.f32 %v8968_v37, %v3587_v11  ;;  %v6297_v52 = vld [vmem:[%s10348_s1 + $0xa4] ss:$8 sm:$0x3] }
 0xe98   : >> { %v4589_v56 = vmul.f32 %v8895_v36, %v9243_v39  ;;  %v4549_v19 = vsel %vm504_vm2, %v4547_v42, %v4548_v55  ;;  %v3742_v53 = vadd.f32 %v3739_v24, %v3707_v40  ;;  %v3824_v14 = vsel %vm457_vm1, %v3822_v60, %v3823_v10 }
 0xe99   : >> { %4503 = vrot.lane.b32.xlu1 %v4498_v9, %s6482_s25  ;;  %v3778_v9 = vsel %vm410_vm0, %v3776_v59, %v3777_v31  ;;  %v4546_v12 = vsel %vm504_vm2, %v4544_v61, %v4545_v1  ;;  %v3868_v36 = vrot.slane %v3856_v21, 3  ;;  %v3869_v28 = vrot.slane %v3859_v58, 3 }
 0xe9a   : >> { %v9419_v16 = vpop.permute.xlu0 %4170  ;;  %4501 = vrot.lane.b32.xlu0 %v4495_v30, %s6482_s25  ;;  %v9422_v45 = vpop.permute.xlu1 %5209  ;;  %v3914_v49 = vrot.slane %v3902_v3, 4  ;;  %v4582_v30 = vsel %vm1020_vm4, %v9243_v39, %v4581_v62  ;;  %v4550_v0 = vrot.slane %v4534_v46, 3  ;;  %v4551_v55 = vrot.slane %v4537_v8, 3  ;;  %v10833_v3 = vld [vmem:[#allocation154_spill] sm:$0xff] }
 0xe9b   : >> { %10832 = vst [vmem:[#allocation11_spill] sm:$0xff] %v9422_v45  ;;  %v3915_v45 = vrot.slane %v3905_v50, 4  ;;  %v4652_v42 = vrot.slane %v6297_v52, %v6604_v17  ;;  %v4598_v24 = vrot.slane %v4586_v63, 4  ;;  %v4599_v40 = vrot.slane %v4589_v56, 4 }
 0xe9c   : >> { %v4588_v59 = vmul.f32 %v9334_v6, %v4581_v62  ;;  %v4591_v31 = vmul.f32 %v9337_v2, %v4581_v62  ;;  %v3595_v39 = vmul.f32 %v9009_v34, %v3587_v11  ;;  %v3788_v61 = vadd.f32 %v3778_v9, %v3742_v53 }
 0xe9d   : >> { %4555 = vrot.lane.b32.xlu1 %v4549_v19, %s6482_s25  ;;  %v4587_v1 = vmul.f32 %v9047_v41, %v4582_v30  ;;  %v4590_v21 = vmul.f32 %v9053_v15, %v4582_v30  ;;  %v3606_v58 = vrot.slane %v9413_v25, 2  ;;  %v9448_v6 = vmul.f32 %v9253_v57, %v10833_v3  ;;  %v10835_v30 = vld [vmem:[#allocation170_spill] sm:$0xff] }
 0xe9e   : >> { %v9437_v60 = vpop.permute.xlu0 %4174  ;;  %4553 = vrot.lane.b32.xlu0 %v4546_v12, %s6482_s25  ;;  %v9440_v10 = vpop.permute.xlu1 %5263  ;;  %v9452_v62 = vmul.f32 %v9258_v47, %v10833_v3  ;;  %v3870_v2 = vsel %vm504_vm2, %v3868_v36, %v3869_v28  ;;  %v3633_v11 = vsel %vm368_vm6, %v10819_v29, %v10833_v3  ;;  %v3916_v50 = vsel %vm551_vm3, %v3914_v49, %v3915_v45  ;;  %v10834_v29 = vld [vmem:[#allocation156_spill] sm:$0xff] }
 0xe9f   : >> { %v3834_v46 = vadd.f32 %v3824_v14, %v3788_v61  ;;  %v4552_v8 = vsel %vm504_vm2, %v4550_v0, %v4551_v55  ;;  %v4604_v25 = vrot.slane %v4588_v59, 4  ;;  %v4605_v63 = vrot.slane %v4591_v31, 4  ;;  %v10836_v55 = vld [vmem:[#allocation169_spill] sm:$0xff] }
 0xea0   : >> { %v4600_v53 = vsel %vm551_vm3, %v4598_v24, %v4599_v40  ;;  %v4656_v9 = vrot.slane %v6297_v52, %v6606_v18  ;;  %v3679_v49 = vsel %vm368_vm6, %v10820_v26, %v10834_v29  ;;  %v4601_v14 = vrot.slane %v4587_v1, 4  ;;  %v10838_v61 = vld [vmem:[#allocation173_spill] sm:$0xff] }
 0xea1   : >> { %4657 = vrot.lane.b32.xlu1 %v4652_v42, %s6480_s7  ;;  %v3880_v45 = vadd.f32 %v3870_v2, %v3834_v46  ;;  %v4602_v12 = vrot.slane %v4590_v21, 4  ;;  %v3607_v0 = vrot.slane %v3595_v39, 2  ;;  %v3638_v36 = vmul.f32 %v8968_v37, %v3633_v11  ;;  %v10837_v39 = vld [vmem:[#allocation175_spill] sm:$0xff] }
 0xea2   : >> { %v9461_v56 = vpop.permute.xlu0 %5099  ;;  %4557 = vrot.lane.b32.xlu0 %v4552_v8, %s6482_s25  ;;  %v9464_v19 = vpop.permute.xlu1 %5538  ;;  %v3641_v28 = vmul.f32 %v9009_v34, %v3633_v11  ;;  %v3960_v42 = vsel %vm582_vm5, %v10836_v55, %v10835_v30  ;;  %v3610_v24 = vrot.slane %v9327_v13, 2  ;;  %v3655_v52 = vrot.slane %v9448_v6, 3  ;;  %v6296_v6 = vld [vmem:[%s10348_s1 + $0x97] ss:$8 sm:$0x3] }
 0xea3   : >> { %v3656_v40 = vrot.slane %v9452_v62, 3  ;;  %v3926_v59 = vadd.f32 %v3916_v50, %v3880_v45  ;;  %v3684_v26 = vmul.f32 %v8968_v37, %v3679_v49  ;;  %v3687_v31 = vmul.f32 %v9009_v34, %v3679_v49  ;;  %v10840_v55 = vld [vmem:[#allocation158_spill] sm:$0xff] }
 0xea4   : >> { %v4014_v1 = vsel %vm582_vm5, %v10838_v61, %v10837_v39  ;;  %v4606_v3 = vsel %vm551_vm3, %v4604_v25, %v4605_v63  ;;  %v3685_v37 = vmul.f32 %v9253_v57, %v10834_v29  ;;  %v3688_v34 = vmul.f32 %v9258_v47, %v10834_v29  ;;  %v6299_v61 = vld [vmem:[%s10348_s1 + $0xb6] ss:$8 sm:$0x3] }
 0xea5   : >> { %4607 = vrot.lane.b32.xlu1 %v4600_v53, %s6482_s25  ;;  %v3965_v62 = vadd.f32 %v3960_v42, %v3926_v59  ;;  %v4603_v2 = vsel %vm551_vm3, %v4601_v14, %v4602_v12  ;;  %v3608_v11 = vsel %vm457_vm1, %v3606_v58, %v3607_v0  ;;  %v3652_v50 = vrot.slane %v3638_v36, 3 }
 0xea6   : >> { %v9485_v21 = vpop.permute.xlu0 %5060  ;;  %4659 = vrot.lane.b32.xlu0 %v4656_v9, %s6480_s7  ;;  %v9488_v13 = vpop.permute.xlu1 %5499  ;;  %v3653_v46 = vrot.slane %v3641_v28, 3  ;;  %v4068_v8 = vsel %vm582_vm5, %v8624_v35, %v8962_v27  ;;  %v3570_v25 = vadd.f32 %v9402_v22, %v9302_v4  ;;  %v10839_v63 = vrot.slane %v9317_v33, 2  ;;  %v6298_v33 = vld [vmem:[%s10348_s1 + $0xb1] ss:$8 sm:$0x3] }
 0xea7   : >> { %v4019_v53 = vadd.f32 %v4014_v1, %v3965_v62  ;;  %v4631_v47 = vrot.slane %v6296_v6, %v6606_v18  ;;  %v3698_v9 = vrot.slane %v3684_v26, 4  ;;  %v3699_v58 = vrot.slane %v3687_v31, 4 }
 0xea8   : >> { %v3611_v57 = vsel %vm457_vm1, %v10839_v63, %v3610_v24  ;;  %v4122_v29 = vsel %vm582_vm5, %v9000_v44, %v9292_v51  ;;  %v4627_v4 = vrot.slane %v6296_v6, %v6604_v17  ;;  %v3616_v22 = vadd.f32 %v3608_v11, %v3570_v25  ;;  %v10841_v24 = vld [vmem:[#allocation160_spill] sm:$0xff] }
 0xea9   : >> { %4611 = vrot.lane.b32.xlu1 %v4606_v3, %s6482_s25  ;;  %v3701_v45 = vrot.slane %v3685_v37, 4  ;;  %v3702_v14 = vrot.slane %v3688_v34, 4  ;;  %v4073_v12 = vadd.f32 %v4068_v8, %v4019_v53  ;;  %v3654_v0 = vsel %vm504_vm2, %v3652_v50, %v3653_v46  ;;  %v9552_v34 = vld [vmem:[%s6674_s9 + $0xc8] sm:$0xff]  ;;  %v10842_v50 = vld [vmem:[#allocation162_spill] sm:$0xff] }
 0xeaa   : >> { %v9513_v49 = vpop.permute.xlu0 %5153  ;;  %4609 = vrot.lane.b32.xlu0 %v4603_v2, %s6482_s25  ;;  %v9516_v35 = vpop.permute.xlu1 %5590  ;;  %v3657_v44 = vsel %vm504_vm2, %v3655_v52, %v3656_v40  ;;  %v3617_v36 = vadd.f32 %v3611_v57, %v9323_v23  ;;  %v4176_v28 = vsel %vm582_vm5, %v9419_v16, %v9308_v54  ;;  %v3735_v42 = vsel %vm368_vm6, %v10826_v48, %v10840_v55  ;;  %v9556_v2 = vld [vmem:[%s6674_s9 + $0xe8] sm:$0xf] }
 0xeab   : >> { %v3760_v59 = vsel %vm368_vm6, %v10822_v20, %v10841_v24  ;;  %v4127_v26 = vadd.f32 %v4122_v29, %v4073_v12  ;;  %v4702_v52 = vrot.slane %v6298_v33, %v6606_v18  ;;  %v3700_v23 = vsel %vm551_vm3, %v3698_v9, %v3699_v58 }
 0xeac   : >> { %v3766_v16 = vmul.f32 %v9047_v41, %v10841_v24  ;;  %v3769_v40 = vmul.f32 %v9053_v15, %v10841_v24  ;;  %v4698_v31 = vrot.slane %v6298_v33, %v6604_v17  ;;  %v3662_v1 = vadd.f32 %v3654_v0, %v3616_v22  ;;  %v6300_v33 = vld [vmem:[%s10348_s1 + $0xc3] ss:$8 sm:$0x3]  ;;  %v10844_v24 = vld [vmem:[#allocation166_spill] sm:$0xff] }
 0xead   : >> { %4634 = vrot.lane.b32.xlu1 %v4631_v47, %s6480_s7  ;;  %v3703_v3 = vsel %vm551_vm3, %v3701_v45, %v3702_v14  ;;  %v3663_v6 = vadd.f32 %v3657_v44, %v3617_v36  ;;  %v4181_v37 = vadd.f32 %v4176_v28, %v4127_v26  ;;  %v3765_v62 = vmul.f32 %v9552_v34, %v3760_v59  ;;  %v10843_v14 = vld [vmem:[#allocation164_spill] sm:$0xff] }
 0xeae   : >> { %v9541_v48 = vpop.permute.xlu0 %5207  ;;  %4632 = vrot.lane.b32.xlu0 %v4627_v4, %s6480_s7  ;;  %v9544_v20 = vpop.permute.xlu1 %4239  ;;  %v3768_v11 = vmul.f32 %v9556_v2, %v3760_v59  ;;  %v9561_v46 = vmul.f32 %v9047_v41, %v10842_v50  ;;  %v3806_v8 = vsel %vm368_vm6, %v10824_v38, %v10842_v50  ;;  %v3708_v25 = vadd.f32 %v3700_v23, %v3662_v1 }
 0xeaf   : >> { %v3741_v63 = vmul.f32 %v9047_v41, %v10840_v55  ;;  %v3740_v57 = vmul.f32 %v9552_v34, %v3735_v42  ;;  %v4748_v53 = vrot.slane %v6299_v61, %v6606_v18  ;;  %v3709_v47 = vadd.f32 %v3703_v3, %v3663_v6 }
 0xeb0   : >> { %v3782_v9 = vrot.slane %v3766_v16, 1  ;;  %v3783_v58 = vrot.slane %v3769_v40, 1  ;;  %v4744_v38 = vrot.slane %v6299_v61, %v6604_v17  ;;  %v3811_v22 = vmul.f32 %v9552_v34, %v3806_v8  ;;  %v6309_v61 = vld [vmem:[%s10348_s1 + $0xd1] ss:$8 sm:$0x3] }
 0xeb1   : >> { %4705 = vrot.lane.b32.xlu1 %v4702_v52, %s6480_s7  ;;  %v3814_v45 = vmul.f32 %v9556_v2, %v3806_v8  ;;  %v3852_v12 = vsel %vm368_vm6, %v10830_v32, %v10843_v14  ;;  %v4209_v0 = vadd.f32 %v9339_v5, %v4181_v37  ;;  %v3779_v44 = vrot.slane %v3765_v62, 1 }
 0xeb2   : >> { %v9571_v29 = vpop.permute.xlu0 %5261  ;;  %4703 = vrot.lane.b32.xlu0 %v4698_v31, %s6480_s7  ;;  %v9574_v4 = vpop.permute.xlu1 %5644  ;;  %v3780_v36 = vrot.slane %v3768_v11, 1  ;;  %v3815_v28 = vmul.f32 %v9053_v15, %v10842_v50  ;;  %v3828_v55 = vrot.slane %v9561_v46, 2  ;;  %v3858_v42 = vmul.f32 %v9047_v41, %v10843_v14 }
 0xeb3   : >> { %v3898_v59 = vsel %vm368_vm6, %v10831_v7, %v10844_v24  ;;  %v4247_v26 = vadd.f32 %v9544_v20, %v4209_v0  ;;  %v4794_v32 = vrot.slane %v6300_v33, %v6606_v18  ;;  %v3861_v52 = vmul.f32 %v9053_v15, %v10843_v14 }
 0xeb4   : >> { %v3857_v23 = vmul.f32 %v9552_v34, %v3852_v12  ;;  %v3860_v16 = vmul.f32 %v9556_v2, %v3852_v12  ;;  %v4790_v7 = vrot.slane %v6300_v33, %v6604_v17  ;;  %v3825_v1 = vrot.slane %v3811_v22, 2 }
 0xeb5   : >> { %4751 = vrot.lane.b32.xlu1 %v4748_v53, %s6480_s7  ;;  %v3826_v3 = vrot.slane %v3814_v45, 2  ;;  %v3904_v6 = vmul.f32 %v9047_v41, %v10844_v24  ;;  %v3829_v62 = vrot.slane %v3815_v28, 2  ;;  %v3907_v11 = vmul.f32 %v9053_v15, %v10844_v24 }
 0xeb6   : >> { %v9601_v40 = vpop.permute.xlu0 %5536  ;;  %4749 = vrot.lane.b32.xlu0 %v4744_v38, %s6480_s7  ;;  %v9604_v31 = vpop.permute.xlu1 %4277  ;;  %v3903_v50 = vmul.f32 %v9552_v34, %v3898_v59  ;;  %v3906_v46 = vmul.f32 %v9556_v2, %v3898_v59  ;;  %v3784_v8 = vsel %vm410_vm0, %v3782_v9, %v3783_v58  ;;  %v3781_v53 = vsel %vm410_vm0, %v3779_v44, %v3780_v36  ;;  %v6308_v9 = vld [vmem:[%s10348_s1 + $0xc4] ss:$8 sm:$0x3] }
 0xeb7   : >> { %v4285_v37 = vadd.f32 %v9604_v31, %v4247_v26  ;;  %v3874_v38 = vrot.slane %v3858_v42, 3  ;;  %v4875_v33 = vrot.slane %v6309_v61, %v6606_v18  ;;  %v3875_v41 = vrot.slane %v3861_v52, 3 }
 0xeb8   : >> { %v3871_v22 = vrot.slane %v3857_v23, 3  ;;  %v3872_v45 = vrot.slane %v3860_v16, 3  ;;  %v4871_v12 = vrot.slane %v6309_v61, %v6604_v17  ;;  %v3744_v58 = vadd.f32 %v3741_v63, %v3709_v47  ;;  %v6310_v47 = vld [vmem:[%s10348_s1 + $0xd6] ss:$8 sm:$0x3] }
 0xeb9   : >> { %4797 = vrot.lane.b32.xlu1 %v4794_v32, %s6480_s7  ;;  %v3743_v0 = vadd.f32 %v3740_v57, %v3708_v25  ;;  %v3827_v44 = vsel %vm457_vm1, %v3825_v1, %v3826_v3  ;;  %v3920_v36 = vrot.slane %v3904_v6, 4  ;;  %v3921_v28 = vrot.slane %v3907_v11, 4 }
 0xeba   : >> { %v9621_v14 = vpop.permute.xlu0 %5497  ;;  %4795 = vrot.lane.b32.xlu0 %v4790_v7, %s6480_s7  ;;  %v9624_v15 = vpop.permute.xlu1 %5698  ;;  %v3917_v42 = vrot.slane %v3903_v50, 4  ;;  %v3918_v24 = vrot.slane %v3906_v46, 4  ;;  %v3830_v59 = vsel %vm457_vm1, %v3828_v55, %v3829_v62  ;;  %v3790_v32 = vadd.f32 %v3784_v8, %v3744_v58  ;;  %v10845_v50 = vld [vmem:[#allocation171_spill] sm:$0xff] }
 0xebb   : >> { %v3789_v26 = vadd.f32 %v3781_v53, %v3743_v0  ;;  %v4850_v52 = vrot.slane %v6308_v9, %v6606_v18  ;;  %v3873_v23 = vsel %vm504_vm2, %v3871_v22, %v3872_v45  ;;  %v3876_v16 = vsel %vm504_vm2, %v3874_v38, %v3875_v41  ;;  %v6311_v38 = vld [vmem:[%s10348_s1 + $0xe3] ss:$8 sm:$0x3]  ;;  %v10846_v45 = vld [vmem:[#allocation174_spill] sm:$0xff] }
 0xebc   : >> { %v4846_v57 = vrot.slane %v6308_v9, %v6604_v17  ;;  %v3836_v7 = vadd.f32 %v3830_v59, %v3790_v32  ;;  %v3919_v1 = vsel %vm551_vm3, %v3917_v42, %v3918_v24  ;;  %v3922_v3 = vsel %vm551_vm3, %v3920_v36, %v3921_v28  ;;  %v6312_v28 = vld [vmem:[%s10348_s1 + $0xf0] ss:$8 sm:$0x3] }
 0xebd   : >> { %4878 = vrot.lane.b32.xlu1 %v4875_v33, %s6480_s7  ;;  %v3835_v55 = vadd.f32 %v3827_v44, %v3789_v26  ;;  %v4921_v11 = vrot.slane %v6310_v47, %v6606_v18  ;;  %v3961_v46 = vsel %vm582_vm5, %v10835_v30, %v10845_v50  ;;  %v4015_v30 = vsel %vm582_vm5, %v10837_v39, %v10846_v45 }
 0xebe   : >> { %v9636_v63 = vpop.permute.xlu0 %4203  ;;  %4876 = vrot.lane.b32.xlu0 %v4871_v12, %s6480_s7  ;;  %v9639_v25 = vpop.permute.xlu1 %4315  ;;  %v3882_v62 = vadd.f32 %v3876_v16, %v3836_v7  ;;  %v4967_v58 = vrot.slane %v6311_v38, %v6606_v18  ;;  %v4069_v0 = vsel %vm582_vm5, %v8962_v27, %v9269_v43  ;;  %v4963_v39 = vrot.slane %v6311_v38, %v6604_v17  ;;  %v10847_v27 = vld [vmem:[#allocation7_spill] sm:$0xff] }
 0xebf   : >> { %v4323_v61 = vadd.f32 %v9639_v25, %v4285_v37  ;;  %v3881_v6 = vadd.f32 %v3873_v23, %v3835_v55  ;;  %v4917_v37 = vrot.slane %v6310_v47, %v6604_v17  ;;  %v4123_v26 = vsel %vm582_vm5, %v9292_v51, %v10847_v27  ;;  %v9688_v23 = vld [vmem:[%s6674_s9 + $0x100] sm:$0xff] }
 0xec0   : >> { %v3928_v41 = vadd.f32 %v3922_v3, %v3882_v62  ;;  %v9691_v16 = vld [vmem:[%s6674_s9 + $0x120] sm:$0xf]  ;;  %v5009_v55 = vrot.slane %v6312_v28, %v6604_v17  ;;  %v9710_v3 = vld [vmem:[%s6674_s9 + $0x108] sm:$0xff] }
 0xec1   : >> { %4853 = vrot.lane.b32.xlu1 %v4850_v52, %s6480_s7  ;;  %v3927_v33 = vadd.f32 %v3919_v1, %v3881_v6  ;;  %v4177_v1 = vsel %vm582_vm5, %v9308_v54, %v9437_v60  ;;  %v10848_v6 = vld [vmem:[#allocation8_spill] sm:$0xff] }
 0xec2   : >> { %v9653_v8 = vpop.permute.xlu0 %5592  ;;  %4851 = vrot.lane.b32.xlu0 %v4846_v57, %s6480_s7  ;;  %v9656_v53 = vpop.permute.xlu1 %4353  ;;  %v3967_v9 = vadd.f32 %v10845_v50, %v3928_v41  ;;  %v5013_v57 = vrot.slane %v6312_v28, %v6606_v18  ;;  %v5103_v62 = vsel %vm582_vm5, %v9461_v56, %v10848_v6  ;;  %v5110_v50 = vmul.f32 %v9691_v16, %v9461_v56 }
 0xec3   : >> { %v4361_v22 = vadd.f32 %v9656_v53, %v4323_v61  ;;  %v3966_v12 = vadd.f32 %v3961_v46, %v3927_v33  ;;  %v9701_v61 = vld [vmem:[%s6674_s9 + $0x110] sm:$0xff] }
 0xec4   : >> { %v4021_v42 = vadd.f32 %v10846_v45, %v3967_v9  ;;  %v10849_v46 = vld [vmem:[#allocation9_spill] sm:$0xff]  ;;  %v5109_v54 = vmul.f32 %v9701_v61, %v10848_v6 }
 0xec5   : >> { %4924 = vrot.lane.b32.xlu1 %v4921_v11, %s6480_s7  ;;  %v4020_v24 = vadd.f32 %v4015_v30, %v3966_v12  ;;  %v5107_v11 = vmul.f32 %v9688_v23, %v9461_v56  ;;  %v5108_v56 = vmul.f32 %v9710_v3, %v5103_v62  ;;  %v4205_v12 = vsel %vm368_vm6, %v9339_v5, %v9636_v63 }
 0xec6   : >> { %v4242_v44 = vpop.permute.xlu0 %4241  ;;  %4922 = vrot.lane.b32.xlu0 %v4917_v37, %s6480_s7  ;;  %v9673_v36 = vpop.permute.xlu1 %4391  ;;  %v4075_v52 = vadd.f32 %v9269_v43, %v4021_v42  ;;  %v9704_v43 = vld [vmem:[%s6674_s9 + $0x130] sm:$0xf]  ;;  %v5064_v37 = vsel %vm582_vm5, %v9485_v21, %v10849_v46  ;;  %v5125_v5 = vrot.slane %v5109_v54, 1 }
 0xec7   : >> { %v9681_v59 = vadd.f32 %v9673_v36, %v4361_v22  ;;  %v4074_v32 = vadd.f32 %v4069_v0, %v4020_v24  ;;  %v5112_v38 = vmul.f32 %v9704_v43, %v10848_v6  ;;  %v9729_v22 = vld [vmem:[%s6674_s9 + $0x128] sm:$0xf]  ;;  %v5069_v30 = vmul.f32 %v9710_v3, %v5064_v37 }
 0xec8   : >> { %v4129_v51 = vadd.f32 %v10847_v27, %v4075_v52  ;;  %v5120_v0 = vrot.slane %v5110_v50, 1  ;;  %v5111_v42 = vmul.f32 %v9729_v22, %v5103_v62  ;;  %v4243_v27 = vsel %vm368_vm6, %v9544_v20, %v4242_v44 }
 0xec9   : >> { %4970 = vrot.lane.b32.xlu1 %v4967_v58, %s6480_s7  ;;  %v4128_v7 = vadd.f32 %v4123_v26, %v4074_v32  ;;  %v5119_v58 = vrot.slane %v5107_v11, 1  ;;  %v5070_v32 = vmul.f32 %v9701_v61, %v10849_v46  ;;  %v5164_v6 = vmul.f32 %v9691_v16, %v9513_v49 }
 0xeca   : >> { %v9695_v47 = vpop.permute.xlu0 %5646  ;;  %4968 = vrot.lane.b32.xlu0 %v4963_v39, %s6480_s7  ;;  %v4183_v41 = vadd.f32 %v9437_v60, %v4129_v51  ;;  %v5068_v60 = vmul.f32 %v9688_v23, %v9485_v21  ;;  %v10850_v39 = vld [vmem:[#allocation10_spill] sm:$0xff]  ;;  %v5126_v21 = vrot.slane %v5112_v38, 1 }
 0xecb   : >> { %v4182_v33 = vadd.f32 %v4177_v1, %v4128_v7  ;;  %v5157_v28 = vsel %vm582_vm5, %v9513_v49, %v10850_v39  ;;  %v5121_v20 = vsel %vm410_vm0, %v5119_v58, %v5120_v0  ;;  %v5123_v7 = vrot.slane %v5111_v42, 1 }
 0xecc   : >> { %v4211_v24 = vadd.f32 %v9636_v63, %v4183_v41  ;;  %v5162_v52 = vmul.f32 %v9710_v3, %v5157_v28  ;;  %v5165_v63 = vmul.f32 %v9729_v22, %v5157_v28  ;;  %v5161_v1 = vmul.f32 %v9688_v23, %v9513_v49 }
 0xecd   : >> { %5016 = vrot.lane.b32.xlu1 %v5013_v57, %s6480_s7  ;;  %v5163_v11 = vmul.f32 %v9701_v61, %v10850_v39  ;;  %v5127_v49 = vsel %vm410_vm0, %v5125_v5, %v5126_v21  ;;  %v5215_v41 = vmul.f32 %v9688_v23, %v9541_v48 }
 0xece   : >> { %v4280_v45 = vpop.permute.xlu0 %4279  ;;  %5014 = vrot.lane.b32.xlu0 %v5009_v55, %s6480_s7  ;;  %v4249_v57 = vadd.f32 %v4242_v44, %v4211_v24  ;;  %v5122_v55 = vrot.slane %v5108_v56, 1  ;;  %v5166_v44 = vmul.f32 %v9704_v43, %v10850_v39  ;;  %v5176_v37 = vrot.slane %v5162_v52, 2 }
 0xecf   : >> { %v4281_v9 = vsel %vm368_vm6, %v9604_v31, %v4280_v45  ;;  %v4210_v31 = vadd.f32 %v4205_v12, %v4182_v33  ;;  %v5177_v33 = vrot.slane %v5165_v63, 2  ;;  %v5174_v12 = vrot.slane %v5164_v6, 2 }
 0xed0   : >> { %v4287_v62 = vadd.f32 %v4280_v45, %v4249_v57  ;;  %v5218_v45 = vmul.f32 %v9691_v16, %v9541_v48  ;;  %v5179_v58 = vrot.slane %v5163_v11, 2  ;;  %v5180_v0 = vrot.slane %v5166_v44, 2  ;;  %v6320_v11 = vld [vmem:[%s10348_s1 + $0xe0] ss:$8 sm:$0x3] }
 0xed1   : >> { %5076 = vrot.lane.b32.xlu1 %v5069_v30, %s6481_s21  ;;  %v4248_v51 = vadd.f32 %v4243_v27, %v4210_v31  ;;  %v5173_v30 = vrot.slane %v5161_v1, 2  ;;  %v5227_v5 = vrot.slane %v5215_v41, 3  ;;  %v5265_v57 = vsel %vm582_vm5, %v9571_v29, %v9440_v10 }
 0xed2   : >> { %v9749_v26 = vpop.permute.xlu0 %5700  ;;  %5074 = vrot.lane.b32.xlu0 %v5068_v60, %s6481_s21  ;;  %v5228_v31 = vrot.slane %v5218_v45, 3  ;;  %v5270_v1 = vmul.f32 %v9710_v3, %v5265_v57  ;;  %v5273_v6 = vmul.f32 %v9729_v22, %v5265_v57 }
 0xed3   : >> { %v4286_v50 = vadd.f32 %v4281_v9, %v4248_v51  ;;  %v5124_v9 = vsel %vm410_vm0, %v5122_v55, %v5123_v7  ;;  %v6318_v55 = vld [vmem:[%s10348_s1 + $0xc6] ss:$8 sm:$0x3]  ;;  %v5181_v51 = vsel %vm457_vm1, %v5179_v58, %v5180_v0 }
 0xed4   : >> { %v5284_v41 = vrot.slane %v5270_v1, 4  ;;  %v5285_v45 = vrot.slane %v5273_v6, 4 }
 0xed5   : >> { %5128 = vrot.lane.b32.xlu1 %v5121_v20, %s6481_s21  ;;  %v6319_v20 = vld [vmem:[%s10348_s1 + $0xd3] ss:$8 sm:$0x3] }
 0xed6   : >> { %v4318_v46 = vpop.permute.xlu0 %4317  ;;  %5078 = vrot.lane.b32.xlu0 %v5070_v32, %s6481_s21 }
 0xed7   : >> { %v4319_v54 = vsel %vm368_vm6, %v9639_v25, %v4318_v46  ;;  %v4325_v38 = vadd.f32 %v4318_v46, %v4287_v62  ;;  %v10851_v25 = vld [vmem:[#allocation11_spill] sm:$0xff]  ;;  %v5229_v62 = vsel %vm504_vm2, %v5227_v5, %v5228_v31  ;;  %v5269_v46 = vmul.f32 %v9688_v23, %v9571_v29 }
 0xed8   : >> { %v4324_v56 = vadd.f32 %v4319_v54, %v4286_v50  ;;  %v5211_v60 = vsel %vm582_vm5, %v9541_v48, %v10851_v25  ;;  %v5217_v28 = vmul.f32 %v9701_v61, %v10851_v25  ;;  %v5220_v42 = vmul.f32 %v9704_v43, %v10851_v25  ;;  %v6321_v25 = vld [vmem:[%s10348_s1 + $0xe5] ss:$8 sm:$0x3] }
 0xed9   : >> { %5132 = vrot.lane.b32.xlu1 %v5127_v49, %s6481_s21  ;;  %v5178_v48 = vsel %vm457_vm1, %v5176_v37, %v5177_v33  ;;  %v5216_v32 = vmul.f32 %v9710_v3, %v5211_v60  ;;  %v5219_v52 = vmul.f32 %v9729_v22, %v5211_v60  ;;  %v5272_v37 = vmul.f32 %v9691_v16, %v9571_v29 }
 0xeda   : >> { %v4356_v39 = vpop.permute.xlu0 %4355  ;;  %5130 = vrot.lane.b32.xlu0 %v5124_v9, %s6481_s21  ;;  %v5233_v63 = vrot.slane %v5217_v28, 3  ;;  %v5234_v7 = vrot.slane %v5220_v42, 3  ;;  %v5338_v54 = vrot.slane %v6319_v20, %v6604_v17  ;;  %v5376_v49 = vrot.slane %v6320_v11, %v6604_v17 }
 0xedb   : >> { %v4357_v24 = vsel %vm368_vm6, %v9656_v53, %v4356_v39  ;;  %v9786_v27 = vadd.f32 %v4356_v39, %v4325_v38  ;;  %v5175_v53 = vsel %vm457_vm1, %v5173_v30, %v5174_v12  ;;  %v5230_v44 = vrot.slane %v5216_v32, 3 }
 0xedc   : >> { %v9788_v21 = vadd.f32 %v4357_v24, %v4324_v56  ;;  %v5231_v50 = vrot.slane %v5219_v52, 3  ;;  %v5310_v38 = vrot.slane %v6318_v55, %v6604_v17  ;;  %v5271_v33 = vmul.f32 %v9701_v61, %v9440_v10 }
 0xedd   : >> { %5184 = vrot.lane.b32.xlu1 %v5178_v48, %s6481_s21  ;;  %v5235_v56 = vsel %vm504_vm2, %v5233_v63, %v5234_v7  ;;  %v5274_v29 = vmul.f32 %v9704_v43, %v9440_v10  ;;  %v5281_v30 = vrot.slane %v5269_v46, 4  ;;  %v5282_v12 = vrot.slane %v5272_v37, 4 }
 0xede   : >> { %5182 = vrot.lane.b32.xlu0 %v5175_v53, %s6481_s21  ;;  %v5232_v9 = vsel %vm504_vm2, %v5230_v44, %v5231_v50  ;;  %v5345_v58 = vmul.f32 %v9710_v3, %v5338_v54  ;;  %v5347_v0 = vmul.f32 %v9729_v22, %v5338_v54  ;;  %v5317_v60 = vmul.f32 %v9710_v3, %v5310_v38 }
 0xedf   : >> { %v5342_v10 = vrot.slane %v6319_v20, %v6606_v18  ;;  %v5286_v39 = vsel %vm551_vm3, %v5284_v41, %v5285_v45  ;;  %v5314_v28 = vrot.slane %v6318_v55, %v6606_v18  ;;  %v5383_v42 = vmul.f32 %v9710_v3, %v5376_v49 }
 0xee0   : >> { %v5385_v24 = vmul.f32 %v9729_v22, %v5376_v49  ;;  %v5287_v5 = vrot.slane %v5271_v33, 4  ;;  %v5288_v31 = vrot.slane %v5274_v29, 4  ;;  %v5283_v48 = vsel %vm551_vm3, %v5281_v30, %v5282_v12 }
 0xee1   : >> { %5236 = vrot.lane.b32.xlu1 %v5229_v62, %s6481_s21  ;;  %v5414_v32 = vrot.slane %v6321_v25, %v6604_v17  ;;  %v5353_v52 = vrot.slane %v5345_v58, 1  ;;  %v5354_v57 = vrot.slane %v5347_v0, 1  ;;  %v5380_v53 = vrot.slane %v6320_v11, %v6606_v18 }
 0xee2   : >> { %5186 = vrot.lane.b32.xlu0 %v5181_v51, %s6481_s21  ;;  %v5346_v55 = vmul.f32 %v9701_v61, %v5342_v10  ;;  %v5348_v63 = vmul.f32 %v9704_v43, %v5342_v10  ;;  %v6322_v51 = vld [vmem:[%s10348_s1 + $0xf2] ss:$8 sm:$0x3]  ;;  %v5318_v20 = vmul.f32 %v9701_v61, %v5314_v28  ;;  %v5391_v7 = vrot.slane %v5383_v42, 2 }
 0xee3   : >> { %v5289_v1 = vsel %vm551_vm3, %v5287_v5, %v5288_v31  ;;  %v5392_v6 = vrot.slane %v5385_v24, 2  ;;  %v5421_v62 = vmul.f32 %v9710_v3, %v5414_v32  ;;  %v5423_v11 = vmul.f32 %v9729_v22, %v5414_v32 }
 0xee4   : >> { %v5355_v44 = vsel %vm410_vm0, %v5353_v52, %v5354_v57  ;;  %v5384_v50 = vmul.f32 %v9701_v61, %v5380_v53  ;;  %v5386_v46 = vmul.f32 %v9704_v43, %v5380_v53  ;;  %v5452_v37 = vrot.slane %v6322_v51, %v6604_v17 }
 0xee5   : >> { %5240 = vrot.lane.b32.xlu1 %v5235_v56, %s6481_s21  ;;  %v5356_v54 = vrot.slane %v5346_v55, 1  ;;  %v5357_v38 = vrot.slane %v5348_v63, 1  ;;  %v5418_v49 = vrot.slane %v6321_v25, %v6606_v18  ;;  %v5393_v33 = vsel %vm457_vm1, %v5391_v7, %v5392_v6  ;;  %v9892_v7 = vld [vmem:[%s6674_s9 + $0x138] sm:$0xf] }
 0xee6   : >> { %5238 = vrot.lane.b32.xlu0 %v5232_v9, %s6481_s21  ;;  %v5429_v41 = vrot.slane %v5421_v62, 3  ;;  %v5430_v45 = vrot.slane %v5423_v11, 3  ;;  %v5394_v56 = vrot.slane %v5384_v50, 2  ;;  %v5395_v29 = vrot.slane %v5386_v46, 2 }
 0xee7   : >> { %v5459_v30 = vmul.f32 %v9710_v3, %v5452_v37  ;;  %v5461_v12 = vmul.f32 %v9729_v22, %v5452_v37  ;;  %v5358_v9 = vsel %vm410_vm0, %v5356_v54, %v5357_v38  ;;  %v5422_v58 = vmul.f32 %v9701_v61, %v5418_v49 }
 0xee8   : >> { %v5424_v0 = vmul.f32 %v9704_v43, %v5418_v49  ;;  %v5456_v25 = vrot.slane %v6322_v51, %v6606_v18  ;;  %v5396_v10 = vsel %vm457_vm1, %v5394_v56, %v5395_v29  ;;  %v5540_v53 = vsel %vm1020_vm4, %v9601_v40, %v9464_v19 }
 0xee9   : >> { %5292 = vrot.lane.b32.xlu1 %v5286_v39, %s6481_s21  ;;  %v5467_v39 = vrot.slane %v5459_v30, 4  ;;  %v5468_v28 = vrot.slane %v5461_v12, 4  ;;  %v5432_v42 = vrot.slane %v5422_v58, 3  ;;  %v5505_v55 = vmul.f32 %v9710_v3, %v9621_v14 }
 0xeea   : >> { %5290 = vrot.lane.b32.xlu0 %v5283_v48, %s6481_s21  ;;  %v5433_v24 = vrot.slane %v5424_v0, 3  ;;  %v5460_v5 = vmul.f32 %v9701_v61, %v5456_v25  ;;  %v5462_v31 = vmul.f32 %v9704_v43, %v5456_v25  ;;  %v5545_v6 = vmul.f32 %v9701_v61, %v5540_v53 }
 0xeeb   : >> { %v5469_v48 = vsel %vm551_vm3, %v5467_v39, %v5468_v28  ;;  %v5548_v62 = vmul.f32 %v9704_v43, %v5540_v53  ;;  %v5501_v50 = vsel %vm1020_vm4, %v9621_v14, %v9488_v13  ;;  %v5598_v54 = vmul.f32 %v9710_v3, %v9516_v35 }
 0xeec   : >> { %v5434_v32 = vsel %vm504_vm2, %v5432_v42, %v5433_v24  ;;  %v5470_v52 = vrot.slane %v5460_v5, 4  ;;  %v5471_v57 = vrot.slane %v5462_v31, 4  ;;  %v5601_v38 = vmul.f32 %v9729_v22, %v9516_v35 }
 0xeed   : >> { %5321 = vrot.lane.b32.xlu1 %v5317_v60, %s6480_s7  ;;  %v5431_v60 = vsel %vm504_vm2, %v5429_v41, %v5430_v45  ;;  %v5559_v56 = vrot.slane %v5545_v6, 1  ;;  %v5560_v29 = vrot.slane %v5548_v62, 1  ;;  %v5506_v30 = vmul.f32 %v9701_v61, %v5501_v50 }
 0xeee   : >> { %5294 = vrot.lane.b32.xlu0 %v5289_v1, %s6481_s21  ;;  %v5472_v51 = vsel %vm551_vm3, %v5470_v52, %v5471_v57  ;;  %v5544_v1 = vmul.f32 %v9710_v3, %v9601_v40  ;;  %v5648_v31 = vsel %vm1020_vm4, %v9574_v4, %v9695_v47  ;;  %v5652_v57 = vmul.f32 %v9710_v3, %v9574_v4 }
 0xeef   : >> { %v5561_v24 = vsel %vm410_vm0, %v5559_v56, %v5560_v29  ;;  %v5655_v53 = vmul.f32 %v9729_v22, %v9574_v4  ;;  %v5653_v62 = vmul.f32 %v9701_v61, %v5648_v31  ;;  %v5657_v29 = vmul.f32 %v9892_v7, %v9695_v47 }
 0xef0   : >> { %v5556_v45 = vrot.slane %v5544_v1, 1 }
 0xef1   : >> { %5359 = vrot.lane.b32.xlu1 %v5355_v44, %s6480_s7  ;;  %v5547_v44 = vmul.f32 %v9729_v22, %v9601_v40 }
 0xef2   : >> { %5323 = vrot.lane.b32.xlu0 %v5318_v20, %s6480_s7  ;;  %v9889_v20 = vld [vmem:[%s6674_s9 + $0x118] sm:$0xff] }
 0xef3   : >> { %v5546_v14 = vmul.f32 %v9889_v20, %v9464_v19  ;;  %v5557_v12 = vrot.slane %v5547_v44, 1  ;;  %v5654_v56 = vmul.f32 %v9889_v20, %v9695_v47 }
 0xef5   : >> { %5397 = vrot.lane.b32.xlu1 %v5393_v33, %s6480_s7  ;;  %v5507_v33 = vmul.f32 %v9889_v20, %v9488_v13  ;;  %v5611_v13 = vrot.slane %v5601_v38, 2  ;;  %v5562_v25 = vrot.slane %v5546_v14, 1  ;;  %v5664_v38 = vrot.slane %v5652_v57, 3 }
 0xef6   : >> { %5361 = vrot.lane.b32.xlu0 %v5358_v9, %s6480_s7  ;;  %v5667_v14 = vrot.slane %v5653_v62, 3  ;;  %v10007_v62 = vld [vmem:[%s6674_s9 + $0xd0] sm:$0xff] }
 0xef9   : >> { %5435 = vrot.lane.b32.xlu1 %v5431_v60, %s6480_s7  ;;  %v5600_v60 = vmul.f32 %v9889_v20, %v9653_v8 }
 0xefa   : >> { %5399 = vrot.lane.b32.xlu0 %v5396_v10, %s6480_s7  ;;  %v5603_v10 = vmul.f32 %v9892_v7, %v9653_v8 }
 0xefd   : >> { %5473 = vrot.lane.b32.xlu1 %v5469_v48, %s6480_s7 }
 0xefe   : >> { %5437 = vrot.lane.b32.xlu0 %v5434_v32, %s6480_s7 }
 0xeff   : >> { %v4396_v63 = vpop.permute.xlu1 %4395 }
 0xf00   : >> { %v4394_v11 = vpop.permute.xlu0 %4393 }
 0xf01   : >> { %v4397_v46 = vsel %vm1020_vm4, %v9673_v36, %v4394_v11  ;;  %v4398_v37 = vsel %vm1020_vm4, %v4394_v11, %v4396_v63  ;;  %5511 = vrot.lane.b32.xlu1 %v5505_v55, %s6482_s25  ;;  %v5549_v36 = vmul.f32 %v9892_v7, %v9464_v19  ;;  %v5610_v19 = vrot.slane %v5598_v54, 2 }
 0xf02   : >> { %v4403_v49 = vadd.f32 %v4397_v46, %v9788_v21  ;;  %v4404_v40 = vadd.f32 %v4398_v37, %v9786_v27  ;;  %5475 = vrot.lane.b32.xlu0 %v5472_v51, %s6480_s7  ;;  %v5594_v27 = vsel %vm1020_vm4, %v9516_v35, %v9653_v8  ;;  %v5558_v8 = vsel %vm410_vm0, %v5556_v45, %v5557_v12  ;;  %v6331_v12 = vld [vmem:[%s10348_s1 + $0xd5] ss:$8 sm:$0x3] }
 0xf03   : >> { %v4448_v41 = vpop.permute.xlu1 %4447  ;;  %v5599_v35 = vmul.f32 %v9701_v61, %v5594_v27  ;;  %v5602_v28 = vmul.f32 %v9704_v43, %v5594_v27  ;;  %v5563_v5 = vrot.slane %v5549_v36, 1  ;;  %v5612_v52 = vsel %vm457_vm1, %v5610_v19, %v5611_v13 }
 0xf04   : >> { %v4446_v21 = vpop.permute.xlu0 %4445  ;;  %v5616_v55 = vrot.slane %v5600_v60, 2  ;;  %v5617_v63 = vrot.slane %v5603_v10, 2  ;;  %v5656_v11 = vmul.f32 %v9704_v43, %v5648_v31  ;;  %v5709_v19 = vmul.f32 %v9729_v22, %v9624_v15 }
 0xf05   : >> { %v4451_v9 = vsel %vm1020_vm4, %v4446_v21, %v4448_v41  ;;  %v4456_v58 = vadd.f32 %v4446_v21, %v9681_v59  ;;  %5515 = vrot.lane.b32.xlu1 %v5507_v33, %s6482_s25  ;;  %v5613_v1 = vrot.slane %v5599_v35, 2  ;;  %v5614_v6 = vrot.slane %v5602_v28, 2 }
 0xf06   : >> { %v4457_v0 = vadd.f32 %v4451_v9, %v4403_v49  ;;  %5513 = vrot.lane.b32.xlu0 %v5506_v30, %s6482_s25  ;;  %v5564_v37 = vsel %vm410_vm0, %v5562_v25, %v5563_v5  ;;  %v5665_v49 = vrot.slane %v5655_v53, 3  ;;  %v5668_v36 = vrot.slane %v5656_v11, 3  ;;  %v9983_v5 = vld [vmem:[%s10348_s1 + $0xd0] ss:$8 sm:$0x3] }
 0xf07   : >> { %v4500_v39 = vpop.permute.xlu1 %4499  ;;  %v5615_v45 = vsel %vm457_vm1, %v5613_v1, %v5614_v6  ;;  %v5706_v9 = vmul.f32 %v9710_v3, %v9624_v15  ;;  %v5670_v25 = vrot.slane %v5654_v56, 3  ;;  %v5671_v60 = vrot.slane %v5657_v29, 3 }
 0xf08   : >> { %v4510_v59 = vadd.f32 %v4500_v39, %v4456_v58  ;;  %v4450_v42 = vpop.permute.xlu0 %4449  ;;  %v5669_v13 = vsel %vm504_vm2, %v5667_v14, %v5668_v36  ;;  %v5702_v35 = vsel %vm1020_vm4, %v9624_v15, %v9749_v26  ;;  %v5719_v31 = vrot.slane %v5709_v19, 4  ;;  %v10037_v19 = vld [vmem:[%s10348_s1 + $0xf4] ss:$8 sm:$0x3] }
 0xf09   : >> { %v4452_v48 = vsel %vm1020_vm4, %v4448_v41, %v4450_v42  ;;  %5567 = vrot.lane.b32.xlu1 %v5561_v24, %s6482_s25  ;;  %v5618_v41 = vsel %vm457_vm1, %v5616_v55, %v5617_v63  ;;  %v5776_v24 = vrot.slane %v6331_v12, %v6606_v18  ;;  %v5711_v15 = vmul.f32 %v9892_v7, %v9749_v26  ;;  %v9997_v63 = vld [vmem:[%s10348_s1 + $0xe2] ss:$8 sm:$0x3] }
 0xf0a   : >> { %v4458_v32 = vadd.f32 %v4452_v48, %v4404_v40  ;;  %5565 = vrot.lane.b32.xlu0 %v5558_v8, %s6482_s25  ;;  %v5708_v48 = vmul.f32 %v9889_v20, %v9749_v26  ;;  %v5710_v57 = vmul.f32 %v9704_v43, %v5702_v35  ;;  %v5672_v55 = vsel %vm504_vm2, %v5670_v25, %v5671_v60 }
 0xf0b   : >> { %v4504_v51 = vpop.permute.xlu1 %4503  ;;  %v5751_v1 = vrot.slane %v9983_v5, %v6606_v18  ;;  %v5747_v6 = vrot.slane %v9983_v5, %v6604_v17 }
 0xf0c   : >> { %v4502_v44 = vpop.permute.xlu0 %4501 }
 0xf0d   : >> { %v4505_v50 = vsel %vm1020_vm4, %v4500_v39, %v4502_v44  ;;  %v4506_v46 = vsel %vm1020_vm4, %v4502_v44, %v4504_v51  ;;  %5619 = vrot.lane.b32.xlu1 %v5612_v52, %s6482_s25  ;;  %v5666_v39 = vsel %vm504_vm2, %v5664_v38, %v5665_v49  ;;  %v5707_v52 = vmul.f32 %v9701_v61, %v5702_v35  ;;  %v10011_v44 = vld [vmem:[%s6674_s9 + $0xd8] sm:$0xff] }
 0xf0e   : >> { %v4511_v54 = vadd.f32 %v4505_v50, %v4457_v0  ;;  %v4512_v4 = vadd.f32 %v4506_v46, %v4458_v32  ;;  %5569 = vrot.lane.b32.xlu0 %v5564_v37, %s6482_s25  ;;  %v5772_v0 = vrot.slane %v6331_v12, %v6604_v17  ;;  %v10015_v46 = vld [vmem:[%s6674_s9 + $0xf0] sm:$0xf]  ;;  %v5724_v49 = vrot.slane %v5708_v48, 4 }
 0xf0f   : >> { %v4556_v40 = vpop.permute.xlu1 %4555 }
 0xf10   : >> { %v4554_v33 = vpop.permute.xlu0 %4553 }
 0xf11   : >> { %v4559_v30 = vsel %vm1020_vm4, %v4554_v33, %v4556_v40  ;;  %v4564_v21 = vadd.f32 %v4554_v33, %v4510_v59  ;;  %5623 = vrot.lane.b32.xlu1 %v5618_v41, %s6482_s25  ;;  %v5718_v59 = vrot.slane %v5706_v9, 4  ;;  %v5822_v33 = vrot.slane %v9997_v63, %v6606_v18 }
 0xf12   : >> { %v4565_v27 = vadd.f32 %v4559_v30, %v4511_v54  ;;  %5621 = vrot.lane.b32.xlu0 %v5615_v45, %s6482_s25  ;;  %v10019_v54 = vld [vmem:[%s6674_s9 + $0xf8] sm:$0xf]  ;;  %v5721_v41 = vrot.slane %v5707_v52, 4  ;;  %v5722_v45 = vrot.slane %v5710_v57, 4  ;;  %v5910_v52 = vrot.slane %v10037_v19, %v6604_v17 }
 0xf13   : >> { %v4658_v58 = vpop.permute.xlu1 %4657  ;;  %v5720_v36 = vsel %vm551_vm3, %v5718_v59, %v5719_v31  ;;  %v10031_v30 = vld [vmem:[%s10348_s1 + $0xe7] ss:$8 sm:$0x3] }
 0xf14   : >> { %v4558_v47 = vpop.permute.xlu0 %4557  ;;  %v4665_v26 = vmul.f32 %v9552_v34, %v4658_v58  ;;  %v4668_v51 = vmul.f32 %v9556_v2, %v4658_v58  ;;  %v5864_v31 = vrot.slane %v10031_v30, %v6604_v17 }
 0xf15   : >> { %v4560_v10 = vsel %vm1020_vm4, %v4556_v40, %v4558_v47  ;;  %5675 = vrot.lane.b32.xlu1 %v5669_v13, %s6482_s25  ;;  %v5725_v40 = vrot.slane %v5711_v15, 4 }
 0xf16   : >> { %v4566_v28 = vadd.f32 %v4560_v10, %v4512_v4  ;;  %5673 = vrot.lane.b32.xlu0 %v5666_v39, %s6482_s25  ;;  %v4678_v12 = vrot.slane %v4668_v51, 1 }
 0xf17   : >> { %v4608_v42 = vpop.permute.xlu1 %4607  ;;  %v5726_v35 = vsel %vm551_vm3, %v5724_v49, %v5725_v40  ;;  %v10065_v49 = vld [vmem:[%s10349_s2] sm:$0x3] }
 0xf18   : >> { %v4618_v8 = vadd.f32 %v4608_v42, %v4564_v21  ;;  %v4660_v32 = vpop.permute.xlu0 %4659  ;;  %v4677_v21 = vrot.slane %v4665_v26, 1 }
 0xf19   : >> { %v4661_v53 = vsel %vm368_vm6, %v4658_v58, %v4660_v32  ;;  %5777 = vrot.lane.b32.xlu1 %v5772_v0, %s6480_s7  ;;  %v4667_v50 = vmul.f32 %v10011_v44, %v4660_v32  ;;  %v4670_v4 = vmul.f32 %v10019_v54, %v4660_v32  ;;  %v5914_v32 = vrot.slane %v10037_v19, %v6606_v18 }
 0xf1a   : >> { %5677 = vrot.lane.b32.xlu0 %v5672_v55, %s6482_s25  ;;  %v4666_v11 = vmul.f32 %v10007_v62, %v4661_v53  ;;  %v4669_v37 = vmul.f32 %v10015_v46, %v4661_v53  ;;  %v4679_v55 = vsel %vm410_vm0, %v4677_v21, %v4678_v12 }
 0xf1b   : >> { %v4612_v38 = vpop.permute.xlu1 %4611  ;;  %v4683_v0 = vrot.slane %v4667_v50, 1  ;;  %v4684_v25 = vrot.slane %v4670_v4, 1 }
 0xf1c   : >> { %v4610_v14 = vpop.permute.xlu0 %4609  ;;  %v4680_v47 = vrot.slane %v4666_v11, 1  ;;  %v4681_v13 = vrot.slane %v4669_v37, 1 }
 0xf1d   : >> { %v4613_v56 = vsel %vm1020_vm4, %v4608_v42, %v4610_v14  ;;  %v4614_v29 = vsel %vm1020_vm4, %v4610_v14, %v4612_v38  ;;  %5727 = vrot.lane.b32.xlu1 %v5720_v36, %s6482_s25  ;;  %v4685_v57 = vsel %vm410_vm0, %v4683_v0, %v4684_v25 }
 0xf1e   : >> { %v4619_v9 = vadd.f32 %v4613_v56, %v4565_v27  ;;  %v4620_v58 = vadd.f32 %v4614_v29, %v4566_v28  ;;  %5779 = vrot.lane.b32.xlu0 %v5776_v24, %s6480_s7  ;;  %v5818_v27 = vrot.slane %v9997_v63, %v6604_v17  ;;  %v5868_v28 = vrot.slane %v10031_v30, %v6606_v18 }
 0xf1f   : >> { %v4635_v60 = vpop.permute.xlu1 %4634  ;;  %v5723_v24 = vsel %vm551_vm3, %v5721_v41, %v5722_v45  ;;  %v4682_v26 = vsel %vm410_vm0, %v4680_v47, %v4681_v13  ;;  %v5959_v47 = vrot.slane %v10065_v49, %v6606_v18 }
 0xf20   : >> { %v4642_v10 = vmul.f32 %v10011_v44, %v4635_v60  ;;  %v4633_v39 = vpop.permute.xlu0 %4632 }
 0xf21   : >> { %v4636_v59 = vsel %vm368_vm6, %v4633_v39, %v4635_v60  ;;  %v4640_v42 = vmul.f32 %v9552_v34, %v4633_v39  ;;  %5731 = vrot.lane.b32.xlu1 %v5726_v35, %s6482_s25 }
 0xf22   : >> { %v4645_v48 = vadd.f32 %v4642_v10, %v4620_v58  ;;  %v4641_v15 = vmul.f32 %v10007_v62, %v4636_v59  ;;  %5729 = vrot.lane.b32.xlu0 %v5723_v24, %s6482_s25 }
 0xf23   : >> { %v4643_v53 = vadd.f32 %v4640_v42, %v4618_v8  ;;  %v4706_v51 = vpop.permute.xlu1 %4705 }
 0xf24   : >> { %v4691_v11 = vadd.f32 %v4685_v57, %v4645_v48  ;;  %v4644_v50 = vadd.f32 %v4641_v15, %v4619_v9  ;;  %v4713_v37 = vmul.f32 %v10011_v44, %v4706_v51  ;;  %v4716_v4 = vmul.f32 %v10019_v54, %v4706_v51  ;;  %v4704_v38 = vpop.permute.xlu0 %4703 }
 0xf25   : >> { %v4689_v40 = vadd.f32 %v4679_v55, %v4643_v53  ;;  %v4707_v8 = vsel %vm368_vm6, %v4704_v38, %v4706_v51  ;;  %v4711_v14 = vmul.f32 %v9552_v34, %v4704_v38  ;;  %v4714_v36 = vmul.f32 %v9556_v2, %v4704_v38  ;;  %5754 = vrot.lane.b32.xlu1 %v5751_v1, %s6480_s7  ;;  %v6429_v38 = vld [vmem:[%s6674_s9 + $0xc8] sm:$0xff] }
 0xf26   : >> { %v4690_v41 = vadd.f32 %v4682_v26, %v4644_v50  ;;  %v4729_v45 = vrot.slane %v4713_v37, 2  ;;  %v4730_v56 = vrot.slane %v4716_v4, 2  ;;  %v4712_v29 = vmul.f32 %v10007_v62, %v4707_v8  ;;  %5752 = vrot.lane.b32.xlu0 %v5747_v6, %s6480_s7 }
 0xf27   : >> { %v4715_v21 = vmul.f32 %v10015_v46, %v4707_v8  ;;  %v4723_v12 = vrot.slane %v4711_v14, 2  ;;  %v4724_v9 = vrot.slane %v4714_v36, 2  ;;  %v4752_v58 = vpop.permute.xlu1 %4751 }
 0xf28   : >> { %v4731_v1 = vsel %vm457_vm1, %v4729_v45, %v4730_v56  ;;  %v4726_v13 = vrot.slane %v4712_v29, 2  ;;  %v4759_v0 = vmul.f32 %v10011_v44, %v4752_v58  ;;  %v4762_v25 = vmul.f32 %v10019_v54, %v4752_v58  ;;  %v4750_v60 = vpop.permute.xlu0 %4749 }
 0xf29   : >> { %v4737_v10 = vadd.f32 %v4731_v1, %v4691_v11  ;;  %v4725_v5 = vsel %vm457_vm1, %v4723_v12, %v4724_v9  ;;  %v4727_v6 = vrot.slane %v4715_v21, 2  ;;  %v4753_v39 = vsel %vm368_vm6, %v4750_v60, %v4752_v58  ;;  %5825 = vrot.lane.b32.xlu1 %v5822_v33, %s6480_s7 }
 0xf2a   : >> { %v10091_v35 = vadd.f32 %v4725_v5, %v4689_v40  ;;  %v4775_v59 = vrot.slane %v4759_v0, 3  ;;  %v4776_v42 = vrot.slane %v4762_v25, 3  ;;  %v4757_v24 = vmul.f32 %v9552_v34, %v4750_v60  ;;  %5823 = vrot.lane.b32.xlu0 %v5818_v27, %s6480_s7  ;;  %v6430_v40 = vld [vmem:[%s6674_s9 + $0xe8] sm:$0xf] }
 0xf2b   : >> { %v4728_v48 = vsel %vm457_vm1, %v4726_v13, %v4727_v6  ;;  %v4758_v15 = vmul.f32 %v10007_v62, %v4753_v39  ;;  %v4760_v57 = vmul.f32 %v9556_v2, %v4750_v60  ;;  %v4761_v53 = vmul.f32 %v10015_v46, %v4753_v39  ;;  %v4798_v63 = vpop.permute.xlu1 %4797 }
 0xf2c   : >> { %v4736_v33 = vadd.f32 %v4728_v48, %v4690_v41  ;;  %v4769_v55 = vrot.slane %v4757_v24, 3  ;;  %v4805_v26 = vmul.f32 %v10011_v44, %v4798_v63  ;;  %v4796_v51 = vpop.permute.xlu0 %4795  ;;  %v5955_v34 = vrot.slane %v10065_v49, %v6604_v17 }
 0xf2d   : >> { %v4777_v27 = vsel %vm504_vm2, %v4775_v59, %v4776_v42  ;;  %v4770_v11 = vrot.slane %v4760_v57, 3  ;;  %v4772_v50 = vrot.slane %v4758_v15, 3  ;;  %v4808_v37 = vmul.f32 %v10019_v54, %v4798_v63  ;;  %5871 = vrot.lane.b32.xlu1 %v5868_v28, %s6480_s7 }
 0xf2e   : >> { %v4773_v2 = vrot.slane %v4761_v53, 3  ;;  %v4799_v4 = vsel %vm368_vm6, %v4796_v51, %v4798_v63  ;;  %v4803_v44 = vmul.f32 %v6429_v38, %v4796_v51  ;;  %v4806_v8 = vmul.f32 %v6430_v40, %v4796_v51  ;;  %5869 = vrot.lane.b32.xlu0 %v5864_v31, %s6480_s7 }
 0xf2f   : >> { %v4771_v14 = vsel %vm504_vm2, %v4769_v55, %v4770_v11  ;;  %v4821_v54 = vrot.slane %v4805_v26, 4  ;;  %v4822_v36 = vrot.slane %v4808_v37, 4  ;;  %v4804_v41 = vmul.f32 %v10007_v62, %v4799_v4  ;;  %v4879_v45 = vpop.permute.xlu1 %4878 }
 0xf30   : >> { %v4807_v28 = vmul.f32 %v10015_v46, %v4799_v4  ;;  %v4815_v56 = vrot.slane %v4803_v44, 4  ;;  %v4816_v29 = vrot.slane %v4806_v8, 4  ;;  %v4886_v21 = vmul.f32 %v9701_v61, %v4879_v45  ;;  %v4877_v12 = vpop.permute.xlu0 %4876 }
 0xf31   : >> { %v4818_v9 = vrot.slane %v4804_v41, 4  ;;  %v4889_v58 = vmul.f32 %v9704_v43, %v4879_v45  ;;  %v4880_v30 = vsel %vm368_vm6, %v4877_v12, %v4879_v45  ;;  %v4884_v31 = vmul.f32 %v9688_v23, %v4877_v12  ;;  %5917 = vrot.lane.b32.xlu1 %v5914_v32, %s6480_s7 }
 0xf32   : >> { %v4819_v62 = vrot.slane %v4807_v28, 4  ;;  %v4902_v1 = vrot.slane %v4886_v21, 1  ;;  %v4885_v46 = vmul.f32 %v9710_v3, %v4880_v30  ;;  %v4887_v13 = vmul.f32 %v9691_v16, %v4877_v12  ;;  %5915 = vrot.lane.b32.xlu0 %v5910_v52, %s6480_s7 }
 0xf33   : >> { %v4774_v0 = vsel %vm504_vm2, %v4772_v50, %v4773_v2  ;;  %v4903_v25 = vrot.slane %v4889_v58, 1  ;;  %v4888_v60 = vmul.f32 %v9729_v22, %v4880_v30  ;;  %v4783_v5 = vadd.f32 %v4777_v27, %v4737_v10  ;;  %v4854_v6 = vpop.permute.xlu1 %4853 }
 0xf34   : >> { %v4896_v39 = vrot.slane %v4884_v31, 1  ;;  %v4823_v32 = vsel %vm551_vm3, %v4821_v54, %v4822_v36  ;;  %v4861_v59 = vmul.f32 %v9701_v61, %v4854_v6  ;;  %v4852_v42 = vpop.permute.xlu0 %4851  ;;  %v4897_v24 = vrot.slane %v4887_v13, 1 }
 0xf35   : >> { %v4899_v48 = vrot.slane %v4885_v46, 1  ;;  %v4829_v15 = vadd.f32 %v4823_v32, %v4783_v5  ;;  %v4817_v57 = vsel %vm551_vm3, %v4815_v56, %v4816_v29  ;;  %5962 = vrot.lane.b32.xlu1 %v5959_v47, %s6480_s7  ;;  %v4904_v17 = vsel %vm410_vm0, %v4902_v1, %v4903_v25 }
 0xf36   : >> { %v4781_v19 = vadd.f32 %v4771_v14, %v10091_v35  ;;  %v4782_v52 = vadd.f32 %v4774_v0, %v4736_v33  ;;  %v4820_v10 = vsel %vm551_vm3, %v4818_v9, %v4819_v62  ;;  %5960 = vrot.lane.b32.xlu0 %v5955_v34, %s6480_s7  ;;  %v4900_v53 = vrot.slane %v4888_v60, 1 }
 0xf37   : >> { %v4864_v63 = vadd.f32 %v4861_v59, %v4829_v15  ;;  %v4855_v55 = vsel %vm368_vm6, %v4852_v42, %v4854_v6  ;;  %v4859_v26 = vmul.f32 %v9688_v23, %v4852_v42  ;;  %v4925_v51 = vpop.permute.xlu1 %4924  ;;  %v4898_v38 = vsel %vm410_vm0, %v4896_v39, %v4897_v24 }
 0xf38   : >> { %v4827_v27 = vadd.f32 %v4817_v57, %v4781_v19  ;;  %v4828_v11 = vadd.f32 %v4820_v10, %v4782_v52  ;;  %v4860_v18 = vmul.f32 %v9710_v3, %v4855_v55  ;;  %v4923_v49 = vpop.permute.xlu0 %4922  ;;  %v4932_v35 = vmul.f32 %v9701_v61, %v4925_v51 }
 0xf39   : >> { %v4910_v47 = vadd.f32 %v4904_v17, %v4864_v63  ;;  %v4926_v33 = vsel %vm368_vm6, %v4923_v49, %v4925_v51  ;;  %v4930_v50 = vmul.f32 %v9688_v23, %v4923_v49  ;;  %v4935_v2 = vmul.f32 %v9704_v43, %v4925_v51 }
 0xf3a   : >> { %v4862_v34 = vadd.f32 %v4859_v26, %v4827_v27  ;;  %v4863_v37 = vadd.f32 %v4860_v18, %v4828_v11  ;;  %v4931_v4 = vmul.f32 %v9710_v3, %v4926_v33  ;;  %v4901_v44 = vsel %vm410_vm0, %v4899_v48, %v4900_v53 }
 0xf3b   : >> { %v4933_v40 = vmul.f32 %v9691_v16, %v4923_v49  ;;  %v4934_v8 = vmul.f32 %v9729_v22, %v4926_v33  ;;  %v4971_v14 = vpop.permute.xlu1 %4970  ;;  %v4942_v45 = vrot.slane %v4930_v50, 2  ;;  %v4948_v29 = vrot.slane %v4932_v35, 2  ;;  %v6431_v49 = vld [vmem:[%s6674_s9 + $0x100] sm:$0xff] }
 0xf3c   : >> { %v4908_v54 = vadd.f32 %v4898_v38, %v4862_v34  ;;  %v4909_v36 = vadd.f32 %v4901_v44, %v4863_v37  ;;  %v4969_v41 = vpop.permute.xlu0 %4968  ;;  %v4945_v28 = vrot.slane %v4931_v4, 2  ;;  %v4949_v21 = vrot.slane %v4935_v2, 2  ;;  %v6432_v35 = vld [vmem:[%s6674_s9 + $0x120] sm:$0xf] }
 0xf3d   : >> { %v4943_v23 = vrot.slane %v4933_v40, 2  ;;  %v4946_v56 = vrot.slane %v4934_v8, 2  ;;  %v4978_v3 = vmul.f32 %v9701_v61, %v4971_v14  ;;  %v4981_v12 = vmul.f32 %v9704_v43, %v4971_v14  ;;  %v10197_v8 = vld [vmem:[%s6674_s9 + $0x108] sm:$0xff] }
 0xf3e   : >> { %v4950_v1 = vsel %vm457_vm1, %v4948_v29, %v4949_v21  ;;  %v4979_v33 = vmul.f32 %v6432_v35, %v4969_v41  ;;  %v4972_v50 = vsel %vm368_vm6, %v4969_v41, %v4971_v14 }
 0xf3f   : >> { %v5017_v9 = vpop.permute.xlu1 %5016  ;;  %v4944_v30 = vsel %vm457_vm1, %v4942_v45, %v4943_v23  ;;  %v4947_v31 = vsel %vm457_vm1, %v4945_v28, %v4946_v56  ;;  %v4994_v46 = vrot.slane %v4978_v3, 3  ;;  %v4995_v13 = vrot.slane %v4981_v12, 3 }
 0xf40   : >> { %v5024_v58 = vmul.f32 %v9701_v61, %v5017_v9  ;;  %v5015_v16 = vpop.permute.xlu0 %5014  ;;  %v5027_v62 = vmul.f32 %v9704_v43, %v5017_v9  ;;  %v4954_v6 = vadd.f32 %v4944_v30, %v4908_v54  ;;  %v4955_v39 = vadd.f32 %v4947_v31, %v4909_v36 }
 0xf41   : >> { %v4956_v32 = vadd.f32 %v4950_v1, %v4910_v47  ;;  %v4996_v61 = vsel %vm504_vm2, %v4994_v46, %v4995_v13  ;;  %v4976_v47 = vmul.f32 %v6431_v49, %v4969_v41  ;;  %v5022_v34 = vmul.f32 %v6431_v49, %v5015_v16  ;;  %v10205_v41 = vld [vmem:[%s6674_s9 + $0x128] sm:$0xf] }
 0xf42   : >> { %v5040_v0 = vrot.slane %v5024_v58, 4  ;;  %v5041_v25 = vrot.slane %v5027_v62, 4  ;;  %v5025_v37 = vmul.f32 %v6432_v35, %v5015_v16  ;;  %v4989_v44 = vrot.slane %v4979_v33, 3 }
 0xf43   : >> { %v10164_v60 = vpop.permute.xlu1 %5076  ;;  %v5002_v42 = vadd.f32 %v4996_v61, %v4956_v32  ;;  %v4988_v38 = vrot.slane %v4976_v47, 3  ;;  %v5018_v40 = vsel %vm368_vm6, %v5015_v16, %v5017_v9  ;;  %v4977_v54 = vmul.f32 %v10197_v8, %v4972_v50 }
 0xf44   : >> { %v5075_v5 = vpop.permute.xlu0 %5074  ;;  %v5042_v24 = vsel %vm551_vm3, %v5040_v0, %v5041_v25  ;;  %v4980_v36 = vmul.f32 %v9729_v22, %v4972_v50  ;;  %v5034_v45 = vrot.slane %v5022_v34, 4  ;;  %v5035_v23 = vrot.slane %v5025_v37, 4 }
 0xf45   : >> { %v5048_v43 = vadd.f32 %v5042_v24, %v5002_v42  ;;  %v5023_v14 = vmul.f32 %v10197_v8, %v5018_v40  ;;  %v5026_v56 = vmul.f32 %v10205_v41, %v5018_v40  ;;  %v4990_v21 = vsel %vm504_vm2, %v4988_v38, %v4989_v44 }
 0xf46   : >> { %v4991_v3 = vrot.slane %v4977_v54, 3  ;;  %v4992_v12 = vrot.slane %v4980_v36, 3  ;;  %v5036_v9 = vsel %vm551_vm3, %v5034_v45, %v5035_v23  ;;  %v5000_v30 = vadd.f32 %v4990_v21, %v4954_v6 }
 0xf47   : >> { %v5129_v59 = vpop.permute.xlu1 %5128  ;;  %v5037_v22 = vrot.slane %v5023_v14, 4  ;;  %v5038_v16 = vrot.slane %v5026_v56, 4  ;;  %v5080_v25 = vsel %vm582_vm5, %v5075_v5, %v10164_v60 }
 0xf48   : >> { %v5079_v48 = vpop.permute.xlu0 %5078  ;;  %v5046_v62 = vadd.f32 %v5036_v9, %v5000_v30  ;;  %v4993_v1 = vsel %vm504_vm2, %v4991_v3, %v4992_v12 }
 0xf49   : >> { %v5039_v13 = vsel %vm551_vm3, %v5037_v22, %v5038_v16  ;;  %v5001_v32 = vadd.f32 %v4993_v1, %v4955_v39  ;;  %v5081_v47 = vsel %vm582_vm5, %v10164_v60, %v5079_v48  ;;  %v5087_v35 = vadd.f32 %v5079_v48, %v5048_v43 }
 0xf4a   : >> { %v5085_v42 = vadd.f32 %v5080_v25, %v5046_v62 }
 0xf4b   : >> { %v10168_v15 = vpop.permute.xlu1 %5132  ;;  %v5047_v24 = vadd.f32 %v5039_v13, %v5001_v32 }
 0xf4c   : >> { %v5131_v57 = vpop.permute.xlu0 %5130 }
 0xf4d   : >> { %v5134_v61 = vsel %vm582_vm5, %v5129_v59, %v5131_v57  ;;  %v5135_v5 = vsel %vm582_vm5, %v5131_v57, %v10168_v15  ;;  %v5086_v59 = vadd.f32 %v5081_v47, %v5047_v24 }
 0xf4e   : >> { %v5139_v33 = vadd.f32 %v5134_v61, %v5085_v42 }
 0xf4f   : >> { %v10170_v17 = vpop.permute.xlu1 %5184  ;;  %v5140_v44 = vadd.f32 %v5135_v5, %v5086_v59 }
 0xf50   : >> { %v5183_v19 = vpop.permute.xlu0 %5182 }
 0xf51   : >> { %v5188_v6 = vsel %vm582_vm5, %v5183_v19, %v10170_v17  ;;  %v5141_v19 = vadd.f32 %v10168_v15, %v5087_v35 }
 0xf52   : >> { %v5193_v39 = vadd.f32 %v5188_v6, %v5139_v33 }
 0xf53   : >> { %v5237_v52 = vpop.permute.xlu1 %5236 }
 0xf54   : >> { %v10172_v10 = vpop.permute.xlu0 %5186 }
 0xf55   : >> { %v5189_v60 = vsel %vm582_vm5, %v10170_v17, %v10172_v10 }
 0xf56   : >> { %v5194_v54 = vadd.f32 %v5189_v60, %v5140_v44 }
 0xf57   : >> { %v10174_v53 = vpop.permute.xlu1 %5240 }
 0xf58   : >> { %v10176_v63 = vpop.permute.xlu0 %5238 }
 0xf59   : >> { %v5242_v34 = vsel %vm582_vm5, %v5237_v52, %v10176_v63  ;;  %v5195_v52 = vadd.f32 %v10172_v10, %v5141_v19  ;;  %v5243_v57 = vsel %vm582_vm5, %v10176_v63, %v10174_v53 }
 0xf5a   : >> { %v5247_v48 = vadd.f32 %v5242_v34, %v5193_v39  ;;  %v5248_v45 = vadd.f32 %v5243_v57, %v5194_v54 }
 0xf5b   : >> { %v10178_v55 = vpop.permute.xlu1 %5292  ;;  %v5249_v17 = vadd.f32 %v10174_v53, %v5195_v52 }
 0xf5c   : >> { %v5291_v26 = vpop.permute.xlu0 %5290 }
 0xf5d   : >> { %v5296_v37 = vsel %vm582_vm5, %v5291_v26, %v10178_v55 }
 0xf5e   : >> { %v5301_v40 = vadd.f32 %v5296_v37, %v5247_v48 }
 0xf5f   : >> { %v10180_v51 = vpop.permute.xlu1 %5321 }
 0xf60   : >> { %v10182_v27 = vpop.permute.xlu0 %5294  ;;  %v5329_v23 = vadd.f32 %v10180_v51, %v5301_v40  ;;  %v10281_v40 = vld [vmem:[%s6674_s9 + $0x110] sm:$0xff] }
 0xf61   : >> { %v5297_v15 = vsel %vm582_vm5, %v10178_v55, %v10182_v27  ;;  %v5303_v63 = vadd.f32 %v10182_v27, %v5249_v17 }
 0xf62   : >> { %v5302_v14 = vadd.f32 %v5297_v15, %v5248_v45 }
 0xf63   : >> { %v10184_v11 = vpop.permute.xlu1 %5359 }
 0xf64   : >> { %v10186_v18 = vpop.permute.xlu0 %5323  ;;  %v5367_v21 = vadd.f32 %v10184_v11, %v5329_v23 }
 0xf65   : >> { %v5325_v10 = vsel %vm368_vm6, %v10180_v51, %v10186_v18  ;;  %v5331_v53 = vadd.f32 %v10186_v18, %v5303_v63 }
 0xf66   : >> { %v5330_v12 = vadd.f32 %v5325_v10, %v5302_v14 }
 0xf67   : >> { %v10191_v2 = vpop.permute.xlu1 %5397 }
 0xf68   : >> { %v10193_v4 = vpop.permute.xlu0 %5361  ;;  %v5405_v9 = vadd.f32 %v10191_v2, %v5367_v21 }
 0xf69   : >> { %v5363_v55 = vsel %vm368_vm6, %v10184_v11, %v10193_v4  ;;  %v5369_v27 = vadd.f32 %v10193_v4, %v5331_v53 }
 0xf6a   : >> { %v5368_v22 = vadd.f32 %v5363_v55, %v5330_v12 }
 0xf6b   : >> { %v10201_v28 = vpop.permute.xlu1 %5435 }
 0xf6c   : >> { %v10208_v29 = vpop.permute.xlu0 %5399  ;;  %v5443_v30 = vadd.f32 %v10201_v28, %v5405_v9 }
 0xf6d   : >> { %v5401_v51 = vsel %vm368_vm6, %v10191_v2, %v10208_v29  ;;  %v5407_v13 = vadd.f32 %v10208_v29, %v5369_v27 }
 0xf6e   : >> { %v5406_v1 = vadd.f32 %v5401_v51, %v5368_v22 }
 0xf6f   : >> { %v10212_v58 = vpop.permute.xlu1 %5473 }
 0xf70   : >> { %v5438_v31 = vpop.permute.xlu0 %5437  ;;  %v5481_v18 = vadd.f32 %v10212_v58, %v5443_v30 }
 0xf71   : >> { %v5439_v62 = vsel %vm368_vm6, %v10201_v28, %v5438_v31  ;;  %v5445_v61 = vadd.f32 %v5438_v31, %v5407_v13 }
 0xf72   : >> { %v5444_v2 = vadd.f32 %v5439_v62, %v5406_v1 }
 0xf73   : >> { %v5512_v46 = vpop.permute.xlu1 %5511 }
 0xf74   : >> { %v10216_v0 = vpop.permute.xlu0 %5475  ;;  %v5522_v42 = vadd.f32 %v5512_v46, %v5481_v18 }
 0xf75   : >> { %v5477_v25 = vsel %vm368_vm6, %v10212_v58, %v10216_v0  ;;  %v5483_v47 = vadd.f32 %v10216_v0, %v5445_v61 }
 0xf76   : >> { %v5482_v6 = vadd.f32 %v5477_v25, %v5444_v2 }
 0xf77   : >> { %v5516_v49 = vpop.permute.xlu1 %5515 }
 0xf78   : >> { %v5514_v50 = vpop.permute.xlu0 %5513 }
 0xf79   : >> { %v5517_v4 = vsel %vm1020_vm4, %v5512_v46, %v5514_v50  ;;  %v5518_v28 = vsel %vm1020_vm4, %v5514_v50, %v5516_v49 }
 0xf7a   : >> { %v5523_v33 = vadd.f32 %v5517_v4, %v5482_v6  ;;  %v5524_v58 = vadd.f32 %v5518_v28, %v5483_v47 }
 0xf7b   : >> { %v5568_v38 = vpop.permute.xlu1 %5567 }
 0xf7c   : >> { %v5566_v43 = vpop.permute.xlu0 %5565 }
 0xf7d   : >> { %v5571_v29 = vsel %vm1020_vm4, %v5566_v43, %v5568_v38  ;;  %v5576_v35 = vadd.f32 %v5566_v43, %v5522_v42 }
 0xf7e   : >> { %v5577_v31 = vadd.f32 %v5571_v29, %v5523_v33 }
 0xf7f   : >> { %v5620_v36 = vpop.permute.xlu1 %5619 }
 0xf80   : >> { %v5570_v26 = vpop.permute.xlu0 %5569  ;;  %v5630_v50 = vadd.f32 %v5620_v36, %v5576_v35 }
 0xf81   : >> { %v5572_v34 = vsel %vm1020_vm4, %v5568_v38, %v5570_v26 }
 0xf82   : >> { %v5578_v0 = vadd.f32 %v5572_v34, %v5524_v58 }
 0xf83   : >> { %v5624_v56 = vpop.permute.xlu1 %5623 }
 0xf84   : >> { %v5622_v3 = vpop.permute.xlu0 %5621 }
 0xf85   : >> { %v5625_v59 = vsel %vm1020_vm4, %v5620_v36, %v5622_v3  ;;  %v5626_v46 = vsel %vm1020_vm4, %v5622_v3, %v5624_v56  ;;  %v10285_v36 = vld [vmem:[%s6674_s9 + $0x130] sm:$0xf]  ;;  %s6344_s9 = sshll.u32 %s6477_s29, 4  ;;  %s344_s29 = sadd.s32 1, %s6477_s29  }
 0xf86   : >> { %v5631_v52 = vadd.f32 %v5625_v59, %v5577_v31  ;;  %v5632_v57 = vadd.f32 %v5626_v46, %v5578_v0  ;;  %s6001_s26 = scalar_lea.vmem %s6527_s23, %s6344_s9  ;;  %p341_p6 = scmp.ge.s32.totalorder %s344_s29, 4  }
 0xf87   : >> { %v5676_v16 = vpop.permute.xlu1 %5675 }
 0xf88   : >> { %v5674_v11 = vpop.permute.xlu0 %5673 }
 0xf89   : >> { %v5679_v37 = vsel %vm1020_vm4, %v5674_v11, %v5676_v16  ;;  %v5684_v17 = vadd.f32 %v5674_v11, %v5630_v50 }
 0xf8a   : >> { %v5685_v23 = vadd.f32 %v5679_v37, %v5631_v52 }
 0xf8b   : >> { %v5778_v32 = vpop.permute.xlu1 %5777 }
 0xf8c   : >> { %v5678_v24 = vpop.permute.xlu0 %5677  ;;  %v5785_v19 = vmul.f32 %v10197_v8, %v5778_v32  ;;  %v5788_v38 = vmul.f32 %v10205_v41, %v5778_v32 }
 0xf8d   : >> { %v5680_v60 = vsel %vm1020_vm4, %v5676_v16, %v5678_v24 }
 0xf8e   : >> { %v5797_v10 = vrot.slane %v5785_v19, 1  ;;  %v5686_v14 = vadd.f32 %v5680_v60, %v5632_v57  ;;  %v5798_v56 = vrot.slane %v5788_v38, 1 }
 0xf8f   : >> { %v5728_v5 = vpop.permute.xlu1 %5727 }
 0xf90   : >> { %v5780_v39 = vpop.permute.xlu0 %5779  ;;  %v5738_v16 = vadd.f32 %v5728_v5, %v5684_v17  ;;  %v5799_v25 = vsel %vm410_vm0, %v5797_v10, %v5798_v56 }
 0xf91   : >> { %v5781_v49 = vsel %vm368_vm6, %v5778_v32, %v5780_v39  ;;  %v5787_v48 = vmul.f32 %v9889_v20, %v5780_v39  ;;  %v5790_v43 = vmul.f32 %v9892_v7, %v5780_v39 }
 0xf92   : >> { %v5786_v54 = vmul.f32 %v10281_v40, %v5781_v49  ;;  %v5789_v15 = vmul.f32 %v10285_v36, %v5781_v49 }
 0xf93   : >> { %v5732_v44 = vpop.permute.xlu1 %5731  ;;  %v5803_v63 = vrot.slane %v5787_v48, 1  ;;  %v5804_v21 = vrot.slane %v5790_v43, 1 }
 0xf94   : >> { %v5730_v26 = vpop.permute.xlu0 %5729  ;;  %v5800_v12 = vrot.slane %v5786_v54, 1  ;;  %v5801_v53 = vrot.slane %v5789_v15, 1 }
 0xf95   : >> { %v5734_v45 = vsel %vm1020_vm4, %v5730_v26, %v5732_v44  ;;  %v5733_v55 = vsel %vm1020_vm4, %v5728_v5, %v5730_v26  ;;  %v5805_v13 = vsel %vm410_vm0, %v5803_v63, %v5804_v21 }
 0xf96   : >> { %v5740_v9 = vadd.f32 %v5734_v45, %v5686_v14  ;;  %v5739_v62 = vadd.f32 %v5733_v55, %v5685_v23  ;;  %v5802_v61 = vsel %vm410_vm0, %v5800_v12, %v5801_v53 }
 0xf97   : >> { %v5755_v3 = vpop.permute.xlu1 %5754 }
 0xf98   : >> { %v5762_v51 = vmul.f32 %v9889_v20, %v5755_v3  ;;  %v5753_v22 = vpop.permute.xlu0 %5752 }
 0xf99   : >> { %v5756_v27 = vsel %vm368_vm6, %v5753_v22, %v5755_v3  ;;  %v5760_v30 = vmul.f32 %v10197_v8, %v5753_v22 }
 0xf9a   : >> { %v5765_v11 = vadd.f32 %v5762_v51, %v5740_v9  ;;  %v5761_v1 = vmul.f32 %v10281_v40, %v5756_v27 }
 0xf9b   : >> { %v5763_v18 = vadd.f32 %v5760_v30, %v5738_v16  ;;  %v5826_v2 = vpop.permute.xlu1 %5825 }
 0xf9c   : >> { %v5764_v32 = vadd.f32 %v5761_v1, %v5739_v62  ;;  %v5833_v42 = vmul.f32 %v9889_v20, %v5826_v2  ;;  %v5836_v4 = vmul.f32 %v9892_v7, %v5826_v2  ;;  %v5824_v24 = vpop.permute.xlu0 %5823  ;;  %v5811_v6 = vadd.f32 %v5805_v13, %v5765_v11 }
 0xf9d   : >> { %v5827_v28 = vsel %vm368_vm6, %v5824_v24, %v5826_v2  ;;  %v5831_v47 = vmul.f32 %v10197_v8, %v5824_v24  ;;  %v5834_v29 = vmul.f32 %v10205_v41, %v5824_v24  ;;  %v5809_v35 = vadd.f32 %v5799_v25, %v5763_v18 }
 0xf9e   : >> { %v5849_v33 = vrot.slane %v5833_v42, 2  ;;  %v5850_v34 = vrot.slane %v5836_v4, 2  ;;  %v5832_v5 = vmul.f32 %v10281_v40, %v5827_v28  ;;  %v5810_v58 = vadd.f32 %v5802_v61, %v5764_v32 }
 0xf9f   : >> { %v5835_v39 = vmul.f32 %v10285_v36, %v5827_v28  ;;  %v5843_v31 = vrot.slane %v5831_v47, 2  ;;  %v5844_v59 = vrot.slane %v5834_v29, 2  ;;  %v5872_v46 = vpop.permute.xlu1 %5871 }
 0xfa0   : >> { %v5851_v49 = vsel %vm457_vm1, %v5849_v33, %v5850_v34  ;;  %v5846_v50 = vrot.slane %v5832_v5, 2  ;;  %v5879_v0 = vmul.f32 %v9889_v20, %v5872_v46  ;;  %v5882_v37 = vmul.f32 %v9892_v7, %v5872_v46  ;;  %v5870_v19 = vpop.permute.xlu0 %5869 }
 0xfa1   : >> { %v5845_v38 = vsel %vm457_vm1, %v5843_v31, %v5844_v59  ;;  %v5847_v60 = vrot.slane %v5835_v39, 2  ;;  %v5873_v48 = vsel %vm368_vm6, %v5870_v19, %v5872_v46  ;;  %v5877_v43 = vmul.f32 %v10197_v8, %v5870_v19 }
 0xfa2   : >> { %v5895_v44 = vrot.slane %v5879_v0, 3  ;;  %v5896_v52 = vrot.slane %v5882_v37, 3  ;;  %v5878_v57 = vmul.f32 %v10281_v40, %v5873_v48  ;;  %v5880_v54 = vmul.f32 %v10205_v41, %v5870_v19 }
 0xfa3   : >> { %v5848_v15 = vsel %vm457_vm1, %v5846_v50, %v5847_v60  ;;  %v5881_v26 = vmul.f32 %v10285_v36, %v5873_v48  ;;  %v5889_v45 = vrot.slane %v5877_v43, 3  ;;  %v5918_v17 = vpop.permute.xlu1 %5917  ;;  %v5857_v23 = vadd.f32 %v5851_v49, %v5811_v6 }
 0xfa4   : >> { %v5890_v10 = vrot.slane %v5880_v54, 3  ;;  %v5892_v14 = vrot.slane %v5878_v57, 3  ;;  %v5925_v56 = vmul.f32 %v9889_v20, %v5918_v17  ;;  %v5928_v63 = vmul.f32 %v9892_v7, %v5918_v17  ;;  %v5916_v21 = vpop.permute.xlu0 %5915 }
 0xfa5   : >> { %v5893_v55 = vrot.slane %v5881_v26, 3  ;;  %v5919_v3 = vsel %vm368_vm6, %v5916_v21, %v5918_v17  ;;  %v5923_v12 = vmul.f32 %v10197_v8, %v5916_v21  ;;  %v5926_v53 = vmul.f32 %v10205_v41, %v5916_v21 }
 0xfa6   : >> { %v5941_v9 = vrot.slane %v5925_v56, 4  ;;  %v5942_v51 = vrot.slane %v5928_v63, 4  ;;  %v5924_v22 = vmul.f32 %v10281_v40, %v5919_v3  ;;  %v5927_v16 = vmul.f32 %v10285_v36, %v5919_v3 }
 0xfa7   : >> { %v5935_v27 = vrot.slane %v5923_v12, 4  ;;  %v5936_v30 = vrot.slane %v5926_v53, 4  ;;  %v5897_v20 = vsel %vm504_vm2, %v5895_v44, %v5896_v52  ;;  %v5891_v7 = vsel %vm504_vm2, %v5889_v45, %v5890_v10  ;;  %v5963_v8 = vpop.permute.xlu1 %5962 }
 0xfa8   : >> { %v5938_v62 = vrot.slane %v5924_v22, 4  ;;  %v5939_v11 = vrot.slane %v5927_v16, 4  ;;  %v5903_v1 = vadd.f32 %v5897_v20, %v5857_v23  ;;  %v5943_v13 = vsel %vm551_vm3, %v5941_v9, %v5942_v51  ;;  %v5961_v18 = vpop.permute.xlu0 %5960 }
 0xfa9   : >> { %v5855_v41 = vadd.f32 %v5845_v38, %v5809_v35  ;;  %v5856_v25 = vadd.f32 %v5848_v15, %v5810_v58  ;;  %v5894_v2 = vsel %vm504_vm2, %v5892_v14, %v5893_v55  ;;  %v5937_v36 = vsel %vm551_vm3, %v5935_v27, %v5936_v30 }
 0xfaa   : >> { %v5949_v40 = vadd.f32 %v5943_v13, %v5903_v1  ;;  %v5940_v32 = vsel %vm551_vm3, %v5938_v62, %v5939_v11  ;;  %v5964_v24 = vsel %vm368_vm6, %v5961_v18, %v5963_v8 }
 0xfab   : >> { %v5901_v61 = vadd.f32 %v5891_v7, %v5855_v41  ;;  %v5902_v42 = vadd.f32 %v5894_v2, %v5856_v25 }
 0xfac   : >> { %v5970_v4 = vadd.f32 %v5963_v8, %v5949_v40 }
 0xfad   : >> { %v5947_v6 = vadd.f32 %v5937_v36, %v5901_v61  ;;  %v5948_v28 = vadd.f32 %v5940_v32, %v5902_v42 }
 0xfae   : >> { %v5976_v47 = vmul.f32 0.70710677, %v5970_v4  ;;  %v5973_v19 = vmul.f32 0.5, %v5970_v4 }
 0xfaf   : >> { %v5968_v29 = vadd.f32 %v5961_v18, %v5947_v6  ;;  %v5969_v33 = vadd.f32 %v5964_v24, %v5948_v28 }
 0xfb0   : >> { %6389 = verf.f32 %v5976_v47 }
 0xfb1   : >> { %v5974_v34 = vmul.f32 0.70710677, %v5968_v29  ;;  %v5975_v35 = vmul.f32 0.70710677, %v5969_v33  ;;  %v5971_v31 = vmul.f32 0.5, %v5968_v29  ;;  %v5972_v46 = vmul.f32 0.5, %v5969_v33 }
 0xfb3   : >> { %6391 = verf.f32 %v5974_v34 }
 0xfb4   : >> { %6393 = verf.f32 %v5975_v35 }
 0xfba   : >> { %v6390_v5 = vpop.eup %6389 }
 0xfbb   : >> { %v5982_v50 = vadd.f32 1.0, %v6390_v5 }
 0xfbd   : >> { %v6392_v58 = vpop.eup %6391  ;;  %v5985_v38 = vmul.f32 %v5982_v50, %v5973_v19 }
 0xfbe   : >> { %v6394_v39 = vpop.eup %6393  ;;  %v5980_v59 = vadd.f32 1.0, %v6392_v58 }
 0xfbf   : >> { %v5981_v49 = vadd.f32 1.0, %v6394_v39 }
 0xfc0   : >> { %v5983_v0 = vmul.f32 %v5980_v59, %v5971_v31 }
 0xfc1   : >> { %v5984_v37 = vmul.f32 %v5981_v49, %v5972_v46 }
 0xfc2   : >> { %5989 = vrot.lane.b32.xlu0 %v5983_v0, %s6480_s7 }
 0xfc3   : >> { %5991 = vrot.lane.b32.xlu1 %v5984_v37, %s6480_s7 }
 0xfc6   : >> { %5993 = vrot.lane.b32.xlu0 %v5985_v38, %s6480_s7 }
0x1034   : >> { %v5990_v60 = vpop.permute.xlu0 %5989  ;;  %343 = sbr.rel (!%p341_p6) target bundleno = 64 (0x40), region = 261 }
0x1035   : >> { %v5992_v48 = vpop.permute.xlu1 %5991 }
0x1036   : >> { %v5995_v43 = vsel %vm368_vm6, %v5990_v60, %v5992_v48 }
0x1037   : >> { %6002 = vst [vmem:[%s6001_s26] sm:$0xff] %v5995_v43 }
0x1038   : >> { %v5994_v44 = vpop.permute.xlu0 %5993 }
0x1039   : >> { %v5996_v52 = vsel %vm368_vm6, %v5992_v48, %v5994_v44 }
0x103a   : >> { %6003 = vst [vmem:[%s6001_s26 + $0x8] sm:$0xff] %v5996_v52 }
0x103b PF: > { %s13_s14 = sadd.s32 1, %s6469_s14   ;;  %s10852_s12 = smov %s6465_s13 }
0x103c   : > { %p10_p7 = scmp.ge.s32.totalorder %s13_s14, 4   ;;  %s10853_s13 = smov %s10855_s15 }
0x103e   :  { %12 = sbr.rel (!%p10_p7) target bundleno = 2 (0x2), region = 272 }
0x1045   :  { %6033 = vsyncmov [#allocation4] }
0x1048   :  { %s6034_s7 = vpop.sfrf %6033 }
0x1049   :  { %p6339_p8 = scmp.ne.s32.totalorder %s6034_s7, 0 }
0x104b   :  { %6038 = shalt.err (%p6339_p8)  }

</bundles_post_ra>
